<compile_context>
chip_gen: v6e
topology: v6e:2x2x1
jax: 0.10.0
libtpu: 0.0.40
codegen_flags: <defaults>
</compile_context>

<pallas_src>
import math
from functools import partial

import jax
import jax.numpy as jnp
from jax.experimental import pallas as pl
from jax.experimental.pallas import tpu as pltpu

# ------------------------------ tiny BERT config ------------------------------
VOCAB = 64
VOCAB_PAD = 128        # lane-dense logits store (padded, sliced off outside)
HIDDEN = 32
N_HEADS = 4
HEAD_DIM = HIDDEN // N_HEADS
INTER = 64
N_LAYERS = 4           # hidden_states[3] needs >= 3 layers; decoder runs all 4
MAX_POS = 32
LN_EPS = 1e-12
NEG_INF = -1e9

BATCH = 2
SEQ = 8


# ------------------------------ fused Pallas kernel ----------------------------
def _bert_ae_kernel(
    enc_emb_ref,        # (B*S, H)   word_emb[ids] + pos + type (pre-LN sum)
    pos_type_ref,       # (B*S, H)   pos + type embeddings (for decoder embeds)
    enc_bias_ref,       # (B, 1, S)  additive attention mask bias (encoder only)
    emb_ln_g_ref, emb_ln_b_ref,          # (1, H)
    wqkv_ref, bqkv_ref,                  # (L, H, 3H), (L, 1, 3H)
    wo_ref, bo_ref,                      # (L, H, H),  (L, 1, H)
    ln1_g_ref, ln1_b_ref,                # (L, 1, H)
    wi_ref, bi_ref,                      # (L, H, I),  (L, 1, I)
    wf_ref, bf_ref,                      # (L, I, H),  (L, 1, H)
    ln2_g_ref, ln2_b_ref,                # (L, 1, H)
    mlm_w_ref, mlm_b_ref,                # (H, H), (1, H)
    mlm_ln_g_ref, mlm_ln_b_ref,          # (1, H)
    dec_w_ref, dec_b_ref,                # (H, VOCAB_PAD), (1, VOCAB_PAD)
    logits_ref,                          # out: (B*S, VOCAB_PAD)
    *, batch, seq, n_heads, head_dim, enc_layers, dec_layers,
):
    hidden = n_heads * head_dim
    scale = 1.0 / math.sqrt(head_dim)

    def layer_norm(x, g, b):
        mu = jnp.mean(x, axis=-1, keepdims=True)
        var = jnp.mean(jnp.square(x - mu), axis=-1, keepdims=True)
        return (x - mu) * jax.lax.rsqrt(var + LN_EPS) * g + b

    def gelu(x):
        # TODO(synk): HF BERT uses exact erf-GELU; tanh-approx GELU used here.
        return jax.nn.gelu(x, approximate=True)

    enc_bias = enc_bias_ref[...]                      # (B, 1, S)

    def attention(qkv, use_bias):
        # qkv: (B*S, 3H); all batch*head slices handled in one kernel step.
        rows = []
        for b in range(batch):
            r0 = b * seq
            heads = []
            for h in range(n_heads):
                c0 = h * head_dim
                q = qkv[r0:r0 + seq, c0:c0 + head_dim]                       # (S, DH)
                k = qkv[r0:r0 + seq, hidden + c0:hidden + c0 + head_dim]
                v = qkv[r0:r0 + seq, 2 * hidden + c0:2 * hidden + c0 + head_dim]
                # q @ k^T without an explicit transpose.
                s = jax.lax.dot_general(
                    q, k, (((1,), (1,)), ((), ())),
                    preferred_element_type=jnp.float32) * scale              # (S, S)
                if use_bias:
                    s = s + enc_bias[b]                                      # (1, S) bcast
                m = jnp.max(s, axis=-1, keepdims=True)
                p = jnp.exp(s - m)
                denom = jnp.sum(p, axis=-1, keepdims=True)
                p = p * pl.reciprocal(denom, approx=True)
                heads.append(jnp.dot(p, v, preferred_element_type=jnp.float32))
            rows.append(jnp.concatenate(heads, axis=1))                      # (S, H)
        return jnp.concatenate(rows, axis=0)                                 # (B*S, H)

    def bert_layer(x, li, use_bias):
        # fused QKV projection: one (H, 3H) matmul instead of three.
        qkv = jnp.dot(x, wqkv_ref[li], preferred_element_type=jnp.float32) + bqkv_ref[li]
        ctx = attention(qkv, use_bias)
        attn_out = jnp.dot(ctx, wo_ref[li], preferred_element_type=jnp.float32) + bo_ref[li]
        h1 = layer_norm(attn_out + x, ln1_g_ref[li], ln1_b_ref[li])
        inter = gelu(jnp.dot(h1, wi_ref[li], preferred_element_type=jnp.float32) + bi_ref[li])
        ffn = jnp.dot(inter, wf_ref[li], preferred_element_type=jnp.float32) + bf_ref[li]
        return layer_norm(ffn + h1, ln2_g_ref[li], ln2_b_ref[li])

    # ---- encoder: embeddings LN + first `enc_layers` layers -> hidden_states[k]
    # TODO(synk): HF applies dropout here (model is in .train() mode); omitted.
    x = layer_norm(enc_emb_ref[...], emb_ln_g_ref[...], emb_ln_b_ref[...])
    for li in range(enc_layers):
        x = bert_layer(x, li, use_bias=True)

    # ---- decoder: BertEmbeddings(inputs_embeds = encoder output), all layers,
    #      attention_mask=None -> all-ones mask -> zero bias.
    x = layer_norm(x + pos_type_ref[...], emb_ln_g_ref[...], emb_ln_b_ref[...])
    for li in range(dec_layers):
        x = bert_layer(x, li, use_bias=False)

    # ---- MLM head: transform + LN + tied decoder (vocab padded to 128 lanes)
    t = gelu(jnp.dot(x, mlm_w_ref[...], preferred_element_type=jnp.float32) + mlm_b_ref[...])
    t = layer_norm(t, mlm_ln_g_ref[...], mlm_ln_b_ref[...])
    logits_ref[...] = (
        jnp.dot(t, dec_w_ref[...], preferred_element_type=jnp.float32) + dec_b_ref[...]
    )


def _full_spec(a):
    n = a.ndim
    return pl.BlockSpec(a.shape, lambda i, _n=n: (0,) * _n)


# ------------------------------ parameters ------------------------------------
def init_params(key):
    keys = iter(jax.random.split(key, 64))

    def nrm(shape):
        return 0.02 * jax.random.normal(next(keys), shape, jnp.float32)

    def stack(fn):
        return jnp.stack([fn() for _ in range(N_LAYERS)])

    return {
        "word_emb": nrm((VOCAB, HIDDEN)),
        "pos_emb": nrm((MAX_POS, HIDDEN)),
        "type_emb": nrm((2, HIDDEN)),
        "emb_ln_g": jnp.ones((1, HIDDEN), jnp.float32),
        "emb_ln_b": jnp.zeros((1, HIDDEN), jnp.float32),
        # per-layer weights stacked along a leading layer axis; QKV fused to (H, 3H)
        "wqkv": stack(lambda: nrm((HIDDEN, 3 * HIDDEN))),
        "bqkv": jnp.zeros((N_LAYERS, 1, 3 * HIDDEN), jnp.float32),
        "wo": stack(lambda: nrm((HIDDEN, HIDDEN))),
        "bo": jnp.zeros((N_LAYERS, 1, HIDDEN), jnp.float32),
        "ln1_g": jnp.ones((N_LAYERS, 1, HIDDEN), jnp.float32),
        "ln1_b": jnp.zeros((N_LAYERS, 1, HIDDEN), jnp.float32),
        "wi": stack(lambda: nrm((HIDDEN, INTER))),
        "bi": jnp.zeros((N_LAYERS, 1, INTER), jnp.float32),
        "wf": stack(lambda: nrm((INTER, HIDDEN))),
        "bf": jnp.zeros((N_LAYERS, 1, HIDDEN), jnp.float32),
        "ln2_g": jnp.ones((N_LAYERS, 1, HIDDEN), jnp.float32),
        "ln2_b": jnp.zeros((N_LAYERS, 1, HIDDEN), jnp.float32),
        "mlm_dense_w": nrm((HIDDEN, HIDDEN)),
        "mlm_dense_b": jnp.zeros((1, HIDDEN), jnp.float32),
        "mlm_ln_g": jnp.ones((1, HIDDEN), jnp.float32),
        "mlm_ln_b": jnp.zeros((1, HIDDEN), jnp.float32),
        "mlm_bias": jnp.zeros((VOCAB,), jnp.float32),
    }


# ------------------------------ forward wrapper --------------------------------
def bert_ae_forward(params, input_ids, attention_mask, return_hidden_layer=3):
    """HuggingFaceBERT_AE.forward: encoder -> hidden_states[k] -> decoder logits."""
    B, S = input_ids.shape
    H = HIDDEN

    # JAX glue: tiny one-time embedding gather + constant additions.
    pos_type = params["pos_emb"][:S] + params["type_emb"][0][None, :]          # (S, H)
    pos_type_flat = jnp.tile(pos_type, (B, 1))                                  # (B*S, H)
    enc_emb = params["word_emb"][input_ids].reshape(B * S, H) + pos_type_flat   # (B*S, H)
    enc_bias = ((1.0 - attention_mask.astype(jnp.float32)) * NEG_INF)[:, None, :]  # (B,1,S)

    # tied MLM decoder weight/bias, zero-padded to 128 lanes for a dense store.
    dec_w = jnp.zeros((H, VOCAB_PAD), jnp.float32).at[:, :VOCAB].set(params["word_emb"].T)
    dec_b = jnp.zeros((1, VOCAB_PAD), jnp.float32).at[0, :VOCAB].set(params["mlm_bias"])

    inputs = (
        enc_emb, pos_type_flat, enc_bias,
        params["emb_ln_g"], params["emb_ln_b"],
        params["wqkv"], params["bqkv"], params["wo"], params["bo"],
        params["ln1_g"], params["ln1_b"],
        params["wi"], params["bi"], params["wf"], params["bf"],
        params["ln2_g"], params["ln2_b"],
        params["mlm_dense_w"], params["mlm_dense_b"],
        params["mlm_ln_g"], params["mlm_ln_b"],
        dec_w, dec_b,
    )

    kernel = partial(
        _bert_ae_kernel,
        batch=B, seq=S, n_heads=N_HEADS, head_dim=HEAD_DIM,
        enc_layers=return_hidden_layer, dec_layers=N_LAYERS,
    )

    logits_pad = pl.pallas_call(
        kernel,
        out_shape=jax.ShapeDtypeStruct((B * S, VOCAB_PAD), jnp.float32),
        grid=(1,),
        in_specs=[_full_spec(a) for a in inputs],
        out_specs=pl.BlockSpec((B * S, VOCAB_PAD), lambda i: (0, 0)),
        compiler_params=pltpu.CompilerParams(dimension_semantics=("arbitrary",)),
    )(*inputs)

    return logits_pad[:, :VOCAB].reshape(B, S, VOCAB)


# ---------------------------------- main ---------------------------------------
if __name__ == "__main__":
    key = jax.random.PRNGKey(0)
    k_param, k_ids = jax.random.split(key)

    params = init_params(k_param)
    input_ids = jax.random.randint(k_ids, (BATCH, SEQ), 0, VOCAB, dtype=jnp.int32)
    # attention mask: pad out the last two positions of batch element 1
    attention_mask = jnp.ones((BATCH, SEQ), jnp.float32).at[1, -2:].set(0.0)

    fwd = jax.jit(partial(bert_ae_forward, return_hidden_layer=3))
    logits = fwd(params, input_ids, attention_mask)
    jax.block_until_ready(logits)

    assert logits.shape == (BATCH, SEQ, VOCAB)
    assert logits.dtype == jnp.float32
    assert bool(jnp.all(jnp.isfinite(logits)))
    print("KERNEL_OK")
</pallas_src>

<mosaic_0001>
module attributes {stable_mosaic.version = 11 : i64} {
  func.func @_bert_ae_kernel(%arg0: i32, %arg1: memref<16x32xf32, #tpu.memory_space<vmem>>, %arg2: memref<16x32xf32, #tpu.memory_space<vmem>>, %arg3: memref<2x1x8xf32, #tpu.memory_space<vmem>>, %arg4: memref<1x32xf32, #tpu.memory_space<vmem>>, %arg5: memref<1x32xf32, #tpu.memory_space<vmem>>, %arg6: memref<4x32x96xf32, #tpu.memory_space<vmem>>, %arg7: memref<4x1x96xf32, #tpu.memory_space<vmem>>, %arg8: memref<4x32x32xf32, #tpu.memory_space<vmem>>, %arg9: memref<4x1x32xf32, #tpu.memory_space<vmem>>, %arg10: memref<4x1x32xf32, #tpu.memory_space<vmem>>, %arg11: memref<4x1x32xf32, #tpu.memory_space<vmem>>, %arg12: memref<4x32x64xf32, #tpu.memory_space<vmem>>, %arg13: memref<4x1x64xf32, #tpu.memory_space<vmem>>, %arg14: memref<4x64x32xf32, #tpu.memory_space<vmem>>, %arg15: memref<4x1x32xf32, #tpu.memory_space<vmem>>, %arg16: memref<4x1x32xf32, #tpu.memory_space<vmem>>, %arg17: memref<4x1x32xf32, #tpu.memory_space<vmem>>, %arg18: memref<32x32xf32, #tpu.memory_space<vmem>>, %arg19: memref<1x32xf32, #tpu.memory_space<vmem>>, %arg20: memref<1x32xf32, #tpu.memory_space<vmem>>, %arg21: memref<1x32xf32, #tpu.memory_space<vmem>>, %arg22: memref<32x128xf32, #tpu.memory_space<vmem>>, %arg23: memref<1x128xf32, #tpu.memory_space<vmem>>, %arg24: memref<16x128xf32, #tpu.memory_space<vmem>>) attributes {dimension_semantics = [#tpu.dimension_semantics<arbitrary>], iteration_bounds = array<i64: 1>, scalar_prefetch = 0 : i64, scratch_operands = 0 : i64, tpu.core_type = #tpu.core_type<tc>, window_params = [{pipeline_mode = #tpu.pipeline_mode<synchronous>, transform_indices = @transform_0, window_bounds = array<i64: 16, 32>}, {pipeline_mode = #tpu.pipeline_mode<synchronous>, transform_indices = @transform_1, window_bounds = array<i64: 16, 32>}, {pipeline_mode = #tpu.pipeline_mode<synchronous>, transform_indices = @transform_2, window_bounds = array<i64: 2, 1, 8>}, {pipeline_mode = #tpu.pipeline_mode<synchronous>, transform_indices = @transform_3, window_bounds = array<i64: 1, 32>}, {pipeline_mode = #tpu.pipeline_mode<synchronous>, transform_indices = @transform_4, window_bounds = array<i64: 1, 32>}, {pipeline_mode = #tpu.pipeline_mode<synchronous>, transform_indices = @transform_5, window_bounds = array<i64: 4, 32, 96>}, {pipeline_mode = #tpu.pipeline_mode<synchronous>, transform_indices = @transform_6, window_bounds = array<i64: 4, 1, 96>}, {pipeline_mode = #tpu.pipeline_mode<synchronous>, transform_indices = @transform_7, window_bounds = array<i64: 4, 32, 32>}, {pipeline_mode = #tpu.pipeline_mode<synchronous>, transform_indices = @transform_8, window_bounds = array<i64: 4, 1, 32>}, {pipeline_mode = #tpu.pipeline_mode<synchronous>, transform_indices = @transform_9, window_bounds = array<i64: 4, 1, 32>}, {pipeline_mode = #tpu.pipeline_mode<synchronous>, transform_indices = @transform_10, window_bounds = array<i64: 4, 1, 32>}, {pipeline_mode = #tpu.pipeline_mode<synchronous>, transform_indices = @transform_11, window_bounds = array<i64: 4, 32, 64>}, {pipeline_mode = #tpu.pipeline_mode<synchronous>, transform_indices = @transform_12, window_bounds = array<i64: 4, 1, 64>}, {pipeline_mode = #tpu.pipeline_mode<synchronous>, transform_indices = @transform_13, window_bounds = array<i64: 4, 64, 32>}, {pipeline_mode = #tpu.pipeline_mode<synchronous>, transform_indices = @transform_14, window_bounds = array<i64: 4, 1, 32>}, {pipeline_mode = #tpu.pipeline_mode<synchronous>, transform_indices = @transform_15, window_bounds = array<i64: 4, 1, 32>}, {pipeline_mode = #tpu.pipeline_mode<synchronous>, transform_indices = @transform_16, window_bounds = array<i64: 4, 1, 32>}, {pipeline_mode = #tpu.pipeline_mode<synchronous>, transform_indices = @transform_17, window_bounds = array<i64: 32, 32>}, {pipeline_mode = #tpu.pipeline_mode<synchronous>, transform_indices = @transform_18, window_bounds = array<i64: 1, 32>}, {pipeline_mode = #tpu.pipeline_mode<synchronous>, transform_indices = @transform_19, window_bounds = array<i64: 1, 32>}, {pipeline_mode = #tpu.pipeline_mode<synchronous>, transform_indices = @transform_20, window_bounds = array<i64: 1, 32>}, {pipeline_mode = #tpu.pipeline_mode<synchronous>, transform_indices = @transform_21, window_bounds = array<i64: 32, 128>}, {pipeline_mode = #tpu.pipeline_mode<synchronous>, transform_indices = @transform_22, window_bounds = array<i64: 1, 128>}, {pipeline_mode = #tpu.pipeline_mode<synchronous>, transform_indices = @transform_23, window_bounds = array<i64: 16, 128>}]} {
    %c0 = arith.constant 0 : index
    %c0_0 = arith.constant 0 : index
    %c0_1 = arith.constant 0 : index
    %0 = vector.load %arg3[%c0, %c0_0, %c0_1] : memref<2x1x8xf32, #tpu.memory_space<vmem>>, vector<2x1x8xf32>
    %c0_2 = arith.constant 0 : index
    %c0_3 = arith.constant 0 : index
    %1 = vector.load %arg1[%c0_2, %c0_3] : memref<16x32xf32, #tpu.memory_space<vmem>>, vector<16x32xf32>
    %c0_4 = arith.constant 0 : index
    %c0_5 = arith.constant 0 : index
    %2 = vector.load %arg4[%c0_4, %c0_5] : memref<1x32xf32, #tpu.memory_space<vmem>>, vector<1x32xf32>
    %c0_6 = arith.constant 0 : index
    %c0_7 = arith.constant 0 : index
    %3 = vector.load %arg5[%c0_6, %c0_7] : memref<1x32xf32, #tpu.memory_space<vmem>>, vector<1x32xf32>
    %cst = arith.constant dense<0.000000e+00> : vector<16xf32>
    %4 = vector.multi_reduction <add>, %1, %cst [1] : vector<16x32xf32> to vector<16xf32>
    %5 = vector.shape_cast %4 : vector<16xf32> to vector<16x1xf32>
    %cst_8 = arith.constant 3.200000e+01 : f32
    %6 = vector.broadcast %cst_8 : f32 to vector<16x1xf32>
    %7 = arith.divf %5, %6 : vector<16x1xf32>
    %8 = vector.broadcast %7 : vector<16x1xf32> to vector<16x32xf32>
    %9 = arith.subf %1, %8 : vector<16x32xf32>
    %10 = arith.mulf %9, %9 : vector<16x32xf32>
    %cst_9 = arith.constant dense<0.000000e+00> : vector<16xf32>
    %11 = vector.multi_reduction <add>, %10, %cst_9 [1] : vector<16x32xf32> to vector<16xf32>
    %12 = vector.shape_cast %11 : vector<16xf32> to vector<16x1xf32>
    %cst_10 = arith.constant 3.200000e+01 : f32
    %13 = vector.broadcast %cst_10 : f32 to vector<16x1xf32>
    %14 = arith.divf %12, %13 : vector<16x1xf32>
    %15 = vector.broadcast %7 : vector<16x1xf32> to vector<16x32xf32>
    %16 = arith.subf %1, %15 : vector<16x32xf32>
    %cst_11 = arith.constant 9.99999996E-13 : f32
    %17 = vector.broadcast %cst_11 : f32 to vector<16x1xf32>
    %18 = arith.addf %14, %17 : vector<16x1xf32>
    %19 = math.rsqrt %18 : vector<16x1xf32>
    %20 = vector.broadcast %19 : vector<16x1xf32> to vector<16x32xf32>
    %21 = arith.mulf %16, %20 : vector<16x32xf32>
    %22 = vector.broadcast %2 : vector<1x32xf32> to vector<16x32xf32>
    %23 = arith.mulf %21, %22 : vector<16x32xf32>
    %24 = vector.broadcast %3 : vector<1x32xf32> to vector<16x32xf32>
    %25 = arith.addf %23, %24 : vector<16x32xf32>
    %c0_12 = arith.constant 0 : index
    %c0_13 = arith.constant 0 : index
    %c0_14 = arith.constant 0 : index
    %26 = vector.load %arg6[%c0_12, %c0_13, %c0_14] : memref<4x32x96xf32, #tpu.memory_space<vmem>>, vector<1x32x96xf32>
    %27 = vector.shape_cast %26 : vector<1x32x96xf32> to vector<32x96xf32>
    %cst_15 = arith.constant dense<0.000000e+00> : vector<16x96xf32>
    %28 = tpu.matmul %25, %27, %cst_15 {dimension_numbers = #tpu.dot_dimension_numbers<[1], [0], [0], [1], [0, 0, 1, 1], [], []>} : vector<16x32xf32>, vector<32x96xf32>, vector<16x96xf32> -> vector<16x96xf32>
    %c0_16 = arith.constant 0 : index
    %c0_17 = arith.constant 0 : index
    %c0_18 = arith.constant 0 : index
    %29 = vector.load %arg7[%c0_16, %c0_17, %c0_18] : memref<4x1x96xf32, #tpu.memory_space<vmem>>, vector<1x1x96xf32>
    %30 = vector.shape_cast %29 : vector<1x1x96xf32> to vector<1x96xf32>
    %31 = vector.broadcast %30 : vector<1x96xf32> to vector<16x96xf32>
    %32 = arith.addf %28, %31 : vector<16x96xf32>
    %33 = vector.extract_strided_slice %32 {offsets = [0, 0], sizes = [8, 8], strides = [1, 1]} : vector<16x96xf32> to vector<8x8xf32>
    %34 = vector.extract_strided_slice %32 {offsets = [0, 32], sizes = [8, 8], strides = [1, 1]} : vector<16x96xf32> to vector<8x8xf32>
    %35 = vector.extract_strided_slice %32 {offsets = [0, 64], sizes = [8, 8], strides = [1, 1]} : vector<16x96xf32> to vector<8x8xf32>
    %cst_19 = arith.constant dense<0.000000e+00> : vector<8x8xf32>
    %36 = tpu.matmul %33, %34, %cst_19 {dimension_numbers = #tpu.dot_dimension_numbers<[1], [1], [0], [0], [0, 0, 1, 0], [], []>} : vector<8x8xf32>, vector<8x8xf32>, vector<8x8xf32> -> vector<8x8xf32>
    %cst_20 = arith.constant 0.353553385 : f32
    %37 = vector.broadcast %cst_20 : f32 to vector<8x8xf32>
    %38 = arith.mulf %36, %37 : vector<8x8xf32>
    %39 = vector.extract_strided_slice %0 {offsets = [0, 0, 0], sizes = [1, 1, 8], strides = [1, 1, 1]} : vector<2x1x8xf32> to vector<1x1x8xf32>
    %40 = vector.shape_cast %39 : vector<1x1x8xf32> to vector<1x8xf32>
    %41 = vector.broadcast %40 : vector<1x8xf32> to vector<8x8xf32>
    %42 = arith.addf %38, %41 : vector<8x8xf32>
    %cst_21 = arith.constant dense<0xFF800000> : vector<8xf32>
    %43 = vector.multi_reduction <maximumf>, %42, %cst_21 [1] : vector<8x8xf32> to vector<8xf32>
    %44 = vector.shape_cast %43 : vector<8xf32> to vector<8x1xf32>
    %45 = vector.broadcast %44 : vector<8x1xf32> to vector<8x8xf32>
    %46 = arith.subf %42, %45 : vector<8x8xf32>
    %47 = math.exp %46 : vector<8x8xf32>
    %cst_22 = arith.constant dense<0.000000e+00> : vector<8xf32>
    %48 = vector.multi_reduction <add>, %47, %cst_22 [1] : vector<8x8xf32> to vector<8xf32>
    %49 = vector.shape_cast %48 : vector<8xf32> to vector<8x1xf32>
    %50 = tpu.reciprocal %49 {approx = true} : vector<8x1xf32> -> vector<8x1xf32>
    %51 = vector.broadcast %50 : vector<8x1xf32> to vector<8x8xf32>
    %52 = arith.mulf %47, %51 : vector<8x8xf32>
    %cst_23 = arith.constant dense<0.000000e+00> : vector<8x8xf32>
    %53 = tpu.matmul %52, %35, %cst_23 {dimension_numbers = #tpu.dot_dimension_numbers<[1], [0], [0], [1], [0, 0, 1, 1], [], []>} : vector<8x8xf32>, vector<8x8xf32>, vector<8x8xf32> -> vector<8x8xf32>
    %54 = vector.extract_strided_slice %32 {offsets = [0, 8], sizes = [8, 8], strides = [1, 1]} : vector<16x96xf32> to vector<8x8xf32>
    %55 = vector.extract_strided_slice %32 {offsets = [0, 40], sizes = [8, 8], strides = [1, 1]} : vector<16x96xf32> to vector<8x8xf32>
    %56 = vector.extract_strided_slice %32 {offsets = [0, 72], sizes = [8, 8], strides = [1, 1]} : vector<16x96xf32> to vector<8x8xf32>
    %cst_24 = arith.constant dense<0.000000e+00> : vector<8x8xf32>
    %57 = tpu.matmul %54, %55, %cst_24 {dimension_numbers = #tpu.dot_dimension_numbers<[1], [1], [0], [0], [0, 0, 1, 0], [], []>} : vector<8x8xf32>, vector<8x8xf32>, vector<8x8xf32> -> vector<8x8xf32>
    %cst_25 = arith.constant 0.353553385 : f32
    %58 = vector.broadcast %cst_25 : f32 to vector<8x8xf32>
    %59 = arith.mulf %57, %58 : vector<8x8xf32>
    %60 = vector.extract_strided_slice %0 {offsets = [0, 0, 0], sizes = [1, 1, 8], strides = [1, 1, 1]} : vector<2x1x8xf32> to vector<1x1x8xf32>
    %61 = vector.shape_cast %60 : vector<1x1x8xf32> to vector<1x8xf32>
    %62 = vector.broadcast %61 : vector<1x8xf32> to vector<8x8xf32>
    %63 = arith.addf %59, %62 : vector<8x8xf32>
    %cst_26 = arith.constant dense<0xFF800000> : vector<8xf32>
    %64 = vector.multi_reduction <maximumf>, %63, %cst_26 [1] : vector<8x8xf32> to vector<8xf32>
    %65 = vector.shape_cast %64 : vector<8xf32> to vector<8x1xf32>
    %66 = vector.broadcast %65 : vector<8x1xf32> to vector<8x8xf32>
    %67 = arith.subf %63, %66 : vector<8x8xf32>
    %68 = math.exp %67 : vector<8x8xf32>
    %cst_27 = arith.constant dense<0.000000e+00> : vector<8xf32>
    %69 = vector.multi_reduction <add>, %68, %cst_27 [1] : vector<8x8xf32> to vector<8xf32>
    %70 = vector.shape_cast %69 : vector<8xf32> to vector<8x1xf32>
    %71 = tpu.reciprocal %70 {approx = true} : vector<8x1xf32> -> vector<8x1xf32>
    %72 = vector.broadcast %71 : vector<8x1xf32> to vector<8x8xf32>
    %73 = arith.mulf %68, %72 : vector<8x8xf32>
    %cst_28 = arith.constant dense<0.000000e+00> : vector<8x8xf32>
    %74 = tpu.matmul %73, %56, %cst_28 {dimension_numbers = #tpu.dot_dimension_numbers<[1], [0], [0], [1], [0, 0, 1, 1], [], []>} : vector<8x8xf32>, vector<8x8xf32>, vector<8x8xf32> -> vector<8x8xf32>
    %75 = vector.extract_strided_slice %32 {offsets = [0, 16], sizes = [8, 8], strides = [1, 1]} : vector<16x96xf32> to vector<8x8xf32>
    %76 = vector.extract_strided_slice %32 {offsets = [0, 48], sizes = [8, 8], strides = [1, 1]} : vector<16x96xf32> to vector<8x8xf32>
    %77 = vector.extract_strided_slice %32 {offsets = [0, 80], sizes = [8, 8], strides = [1, 1]} : vector<16x96xf32> to vector<8x8xf32>
    %cst_29 = arith.constant dense<0.000000e+00> : vector<8x8xf32>
    %78 = tpu.matmul %75, %76, %cst_29 {dimension_numbers = #tpu.dot_dimension_numbers<[1], [1], [0], [0], [0, 0, 1, 0], [], []>} : vector<8x8xf32>, vector<8x8xf32>, vector<8x8xf32> -> vector<8x8xf32>
    %cst_30 = arith.constant 0.353553385 : f32
    %79 = vector.broadcast %cst_30 : f32 to vector<8x8xf32>
    %80 = arith.mulf %78, %79 : vector<8x8xf32>
    %81 = vector.extract_strided_slice %0 {offsets = [0, 0, 0], sizes = [1, 1, 8], strides = [1, 1, 1]} : vector<2x1x8xf32> to vector<1x1x8xf32>
    %82 = vector.shape_cast %81 : vector<1x1x8xf32> to vector<1x8xf32>
    %83 = vector.broadcast %82 : vector<1x8xf32> to vector<8x8xf32>
    %84 = arith.addf %80, %83 : vector<8x8xf32>
    %cst_31 = arith.constant dense<0xFF800000> : vector<8xf32>
    %85 = vector.multi_reduction <maximumf>, %84, %cst_31 [1] : vector<8x8xf32> to vector<8xf32>
    %86 = vector.shape_cast %85 : vector<8xf32> to vector<8x1xf32>
    %87 = vector.broadcast %86 : vector<8x1xf32> to vector<8x8xf32>
    %88 = arith.subf %84, %87 : vector<8x8xf32>
    %89 = math.exp %88 : vector<8x8xf32>
    %cst_32 = arith.constant dense<0.000000e+00> : vector<8xf32>
    %90 = vector.multi_reduction <add>, %89, %cst_32 [1] : vector<8x8xf32> to vector<8xf32>
    %91 = vector.shape_cast %90 : vector<8xf32> to vector<8x1xf32>
    %92 = tpu.reciprocal %91 {approx = true} : vector<8x1xf32> -> vector<8x1xf32>
    %93 = vector.broadcast %92 : vector<8x1xf32> to vector<8x8xf32>
    %94 = arith.mulf %89, %93 : vector<8x8xf32>
    %cst_33 = arith.constant dense<0.000000e+00> : vector<8x8xf32>
    %95 = tpu.matmul %94, %77, %cst_33 {dimension_numbers = #tpu.dot_dimension_numbers<[1], [0], [0], [1], [0, 0, 1, 1], [], []>} : vector<8x8xf32>, vector<8x8xf32>, vector<8x8xf32> -> vector<8x8xf32>
    %96 = vector.extract_strided_slice %32 {offsets = [0, 24], sizes = [8, 8], strides = [1, 1]} : vector<16x96xf32> to vector<8x8xf32>
    %97 = vector.extract_strided_slice %32 {offsets = [0, 56], sizes = [8, 8], strides = [1, 1]} : vector<16x96xf32> to vector<8x8xf32>
    %98 = vector.extract_strided_slice %32 {offsets = [0, 88], sizes = [8, 8], strides = [1, 1]} : vector<16x96xf32> to vector<8x8xf32>
    %cst_34 = arith.constant dense<0.000000e+00> : vector<8x8xf32>
    %99 = tpu.matmul %96, %97, %cst_34 {dimension_numbers = #tpu.dot_dimension_numbers<[1], [1], [0], [0], [0, 0, 1, 0], [], []>} : vector<8x8xf32>, vector<8x8xf32>, vector<8x8xf32> -> vector<8x8xf32>
    %cst_35 = arith.constant 0.353553385 : f32
    %100 = vector.broadcast %cst_35 : f32 to vector<8x8xf32>
    %101 = arith.mulf %99, %100 : vector<8x8xf32>
    %102 = vector.extract_strided_slice %0 {offsets = [0, 0, 0], sizes = [1, 1, 8], strides = [1, 1, 1]} : vector<2x1x8xf32> to vector<1x1x8xf32>
    %103 = vector.shape_cast %102 : vector<1x1x8xf32> to vector<1x8xf32>
    %104 = vector.broadcast %103 : vector<1x8xf32> to vector<8x8xf32>
    %105 = arith.addf %101, %104 : vector<8x8xf32>
    %cst_36 = arith.constant dense<0xFF800000> : vector<8xf32>
    %106 = vector.multi_reduction <maximumf>, %105, %cst_36 [1] : vector<8x8xf32> to vector<8xf32>
    %107 = vector.shape_cast %106 : vector<8xf32> to vector<8x1xf32>
    %108 = vector.broadcast %107 : vector<8x1xf32> to vector<8x8xf32>
    %109 = arith.subf %105, %108 : vector<8x8xf32>
    %110 = math.exp %109 : vector<8x8xf32>
    %cst_37 = arith.constant dense<0.000000e+00> : vector<8xf32>
    %111 = vector.multi_reduction <add>, %110, %cst_37 [1] : vector<8x8xf32> to vector<8xf32>
    %112 = vector.shape_cast %111 : vector<8xf32> to vector<8x1xf32>
    %113 = tpu.reciprocal %112 {approx = true} : vector<8x1xf32> -> vector<8x1xf32>
    %114 = vector.broadcast %113 : vector<8x1xf32> to vector<8x8xf32>
    %115 = arith.mulf %110, %114 : vector<8x8xf32>
    %cst_38 = arith.constant dense<0.000000e+00> : vector<8x8xf32>
    %116 = tpu.matmul %115, %98, %cst_38 {dimension_numbers = #tpu.dot_dimension_numbers<[1], [0], [0], [1], [0, 0, 1, 1], [], []>} : vector<8x8xf32>, vector<8x8xf32>, vector<8x8xf32> -> vector<8x8xf32>
    %117 = tpu.concatenate %53, %74, %95, %116 in 1 : vector<8x8xf32>, vector<8x8xf32>, vector<8x8xf32>, vector<8x8xf32> -> vector<8x32xf32>
    %118 = vector.extract_strided_slice %32 {offsets = [8, 0], sizes = [8, 8], strides = [1, 1]} : vector<16x96xf32> to vector<8x8xf32>
    %119 = vector.extract_strided_slice %32 {offsets = [8, 32], sizes = [8, 8], strides = [1, 1]} : vector<16x96xf32> to vector<8x8xf32>
    %120 = vector.extract_strided_slice %32 {offsets = [8, 64], sizes = [8, 8], strides = [1, 1]} : vector<16x96xf32> to vector<8x8xf32>
    %cst_39 = arith.constant dense<0.000000e+00> : vector<8x8xf32>
    %121 = tpu.matmul %118, %119, %cst_39 {dimension_numbers = #tpu.dot_dimension_numbers<[1], [1], [0], [0], [0, 0, 1, 0], [], []>} : vector<8x8xf32>, vector<8x8xf32>, vector<8x8xf32> -> vector<8x8xf32>
    %cst_40 = arith.constant 0.353553385 : f32
    %122 = vector.broadcast %cst_40 : f32 to vector<8x8xf32>
    %123 = arith.mulf %121, %122 : vector<8x8xf32>
    %124 = vector.extract_strided_slice %0 {offsets = [1, 0, 0], sizes = [1, 1, 8], strides = [1, 1, 1]} : vector<2x1x8xf32> to vector<1x1x8xf32>
    %125 = vector.shape_cast %124 : vector<1x1x8xf32> to vector<1x8xf32>
    %126 = vector.broadcast %125 : vector<1x8xf32> to vector<8x8xf32>
    %127 = arith.addf %123, %126 : vector<8x8xf32>
    %cst_41 = arith.constant dense<0xFF800000> : vector<8xf32>
    %128 = vector.multi_reduction <maximumf>, %127, %cst_41 [1] : vector<8x8xf32> to vector<8xf32>
    %129 = vector.shape_cast %128 : vector<8xf32> to vector<8x1xf32>
    %130 = vector.broadcast %129 : vector<8x1xf32> to vector<8x8xf32>
    %131 = arith.subf %127, %130 : vector<8x8xf32>
    %132 = math.exp %131 : vector<8x8xf32>
    %cst_42 = arith.constant dense<0.000000e+00> : vector<8xf32>
    %133 = vector.multi_reduction <add>, %132, %cst_42 [1] : vector<8x8xf32> to vector<8xf32>
    %134 = vector.shape_cast %133 : vector<8xf32> to vector<8x1xf32>
    %135 = tpu.reciprocal %134 {approx = true} : vector<8x1xf32> -> vector<8x1xf32>
    %136 = vector.broadcast %135 : vector<8x1xf32> to vector<8x8xf32>
    %137 = arith.mulf %132, %136 : vector<8x8xf32>
    %cst_43 = arith.constant dense<0.000000e+00> : vector<8x8xf32>
    %138 = tpu.matmul %137, %120, %cst_43 {dimension_numbers = #tpu.dot_dimension_numbers<[1], [0], [0], [1], [0, 0, 1, 1], [], []>} : vector<8x8xf32>, vector<8x8xf32>, vector<8x8xf32> -> vector<8x8xf32>
    %139 = vector.extract_strided_slice %32 {offsets = [8, 8], sizes = [8, 8], strides = [1, 1]} : vector<16x96xf32> to vector<8x8xf32>
    %140 = vector.extract_strided_slice %32 {offsets = [8, 40], sizes = [8, 8], strides = [1, 1]} : vector<16x96xf32> to vector<8x8xf32>
    %141 = vector.extract_strided_slice %32 {offsets = [8, 72], sizes = [8, 8], strides = [1, 1]} : vector<16x96xf32> to vector<8x8xf32>
    %cst_44 = arith.constant dense<0.000000e+00> : vector<8x8xf32>
    %142 = tpu.matmul %139, %140, %cst_44 {dimension_numbers = #tpu.dot_dimension_numbers<[1], [1], [0], [0], [0, 0, 1, 0], [], []>} : vector<8x8xf32>, vector<8x8xf32>, vector<8x8xf32> -> vector<8x8xf32>
    %cst_45 = arith.constant 0.353553385 : f32
    %143 = vector.broadcast %cst_45 : f32 to vector<8x8xf32>
    %144 = arith.mulf %142, %143 : vector<8x8xf32>
    %145 = vector.extract_strided_slice %0 {offsets = [1, 0, 0], sizes = [1, 1, 8], strides = [1, 1, 1]} : vector<2x1x8xf32> to vector<1x1x8xf32>
    %146 = vector.shape_cast %145 : vector<1x1x8xf32> to vector<1x8xf32>
    %147 = vector.broadcast %146 : vector<1x8xf32> to vector<8x8xf32>
    %148 = arith.addf %144, %147 : vector<8x8xf32>
    %cst_46 = arith.constant dense<0xFF800000> : vector<8xf32>
    %149 = vector.multi_reduction <maximumf>, %148, %cst_46 [1] : vector<8x8xf32> to vector<8xf32>
    %150 = vector.shape_cast %149 : vector<8xf32> to vector<8x1xf32>
    %151 = vector.broadcast %150 : vector<8x1xf32> to vector<8x8xf32>
    %152 = arith.subf %148, %151 : vector<8x8xf32>
    %153 = math.exp %152 : vector<8x8xf32>
    %cst_47 = arith.constant dense<0.000000e+00> : vector<8xf32>
    %154 = vector.multi_reduction <add>, %153, %cst_47 [1] : vector<8x8xf32> to vector<8xf32>
    %155 = vector.shape_cast %154 : vector<8xf32> to vector<8x1xf32>
    %156 = tpu.reciprocal %155 {approx = true} : vector<8x1xf32> -> vector<8x1xf32>
    %157 = vector.broadcast %156 : vector<8x1xf32> to vector<8x8xf32>
    %158 = arith.mulf %153, %157 : vector<8x8xf32>
    %cst_48 = arith.constant dense<0.000000e+00> : vector<8x8xf32>
    %159 = tpu.matmul %158, %141, %cst_48 {dimension_numbers = #tpu.dot_dimension_numbers<[1], [0], [0], [1], [0, 0, 1, 1], [], []>} : vector<8x8xf32>, vector<8x8xf32>, vector<8x8xf32> -> vector<8x8xf32>
    %160 = vector.extract_strided_slice %32 {offsets = [8, 16], sizes = [8, 8], strides = [1, 1]} : vector<16x96xf32> to vector<8x8xf32>
    %161 = vector.extract_strided_slice %32 {offsets = [8, 48], sizes = [8, 8], strides = [1, 1]} : vector<16x96xf32> to vector<8x8xf32>
    %162 = vector.extract_strided_slice %32 {offsets = [8, 80], sizes = [8, 8], strides = [1, 1]} : vector<16x96xf32> to vector<8x8xf32>
    %cst_49 = arith.constant dense<0.000000e+00> : vector<8x8xf32>
    %163 = tpu.matmul %160, %161, %cst_49 {dimension_numbers = #tpu.dot_dimension_numbers<[1], [1], [0], [0], [0, 0, 1, 0], [], []>} : vector<8x8xf32>, vector<8x8xf32>, vector<8x8xf32> -> vector<8x8xf32>
    %cst_50 = arith.constant 0.353553385 : f32
    %164 = vector.broadcast %cst_50 : f32 to vector<8x8xf32>
    %165 = arith.mulf %163, %164 : vector<8x8xf32>
    %166 = vector.extract_strided_slice %0 {offsets = [1, 0, 0], sizes = [1, 1, 8], strides = [1, 1, 1]} : vector<2x1x8xf32> to vector<1x1x8xf32>
    %167 = vector.shape_cast %166 : vector<1x1x8xf32> to vector<1x8xf32>
    %168 = vector.broadcast %167 : vector<1x8xf32> to vector<8x8xf32>
    %169 = arith.addf %165, %168 : vector<8x8xf32>
    %cst_51 = arith.constant dense<0xFF800000> : vector<8xf32>
    %170 = vector.multi_reduction <maximumf>, %169, %cst_51 [1] : vector<8x8xf32> to vector<8xf32>
    %171 = vector.shape_cast %170 : vector<8xf32> to vector<8x1xf32>
    %172 = vector.broadcast %171 : vector<8x1xf32> to vector<8x8xf32>
    %173 = arith.subf %169, %172 : vector<8x8xf32>
    %174 = math.exp %173 : vector<8x8xf32>
    %cst_52 = arith.constant dense<0.000000e+00> : vector<8xf32>
    %175 = vector.multi_reduction <add>, %174, %cst_52 [1] : vector<8x8xf32> to vector<8xf32>
    %176 = vector.shape_cast %175 : vector<8xf32> to vector<8x1xf32>
    %177 = tpu.reciprocal %176 {approx = true} : vector<8x1xf32> -> vector<8x1xf32>
    %178 = vector.broadcast %177 : vector<8x1xf32> to vector<8x8xf32>
    %179 = arith.mulf %174, %178 : vector<8x8xf32>
    %cst_53 = arith.constant dense<0.000000e+00> : vector<8x8xf32>
    %180 = tpu.matmul %179, %162, %cst_53 {dimension_numbers = #tpu.dot_dimension_numbers<[1], [0], [0], [1], [0, 0, 1, 1], [], []>} : vector<8x8xf32>, vector<8x8xf32>, vector<8x8xf32> -> vector<8x8xf32>
    %181 = vector.extract_strided_slice %32 {offsets = [8, 24], sizes = [8, 8], strides = [1, 1]} : vector<16x96xf32> to vector<8x8xf32>
    %182 = vector.extract_strided_slice %32 {offsets = [8, 56], sizes = [8, 8], strides = [1, 1]} : vector<16x96xf32> to vector<8x8xf32>
    %183 = vector.extract_strided_slice %32 {offsets = [8, 88], sizes = [8, 8], strides = [1, 1]} : vector<16x96xf32> to vector<8x8xf32>
    %cst_54 = arith.constant dense<0.000000e+00> : vector<8x8xf32>
    %184 = tpu.matmul %181, %182, %cst_54 {dimension_numbers = #tpu.dot_dimension_numbers<[1], [1], [0], [0], [0, 0, 1, 0], [], []>} : vector<8x8xf32>, vector<8x8xf32>, vector<8x8xf32> -> vector<8x8xf32>
    %cst_55 = arith.constant 0.353553385 : f32
    %185 = vector.broadcast %cst_55 : f32 to vector<8x8xf32>
    %186 = arith.mulf %184, %185 : vector<8x8xf32>
    %187 = vector.extract_strided_slice %0 {offsets = [1, 0, 0], sizes = [1, 1, 8], strides = [1, 1, 1]} : vector<2x1x8xf32> to vector<1x1x8xf32>
    %188 = vector.shape_cast %187 : vector<1x1x8xf32> to vector<1x8xf32>
    %189 = vector.broadcast %188 : vector<1x8xf32> to vector<8x8xf32>
    %190 = arith.addf %186, %189 : vector<8x8xf32>
    %cst_56 = arith.constant dense<0xFF800000> : vector<8xf32>
    %191 = vector.multi_reduction <maximumf>, %190, %cst_56 [1] : vector<8x8xf32> to vector<8xf32>
    %192 = vector.shape_cast %191 : vector<8xf32> to vector<8x1xf32>
    %193 = vector.broadcast %192 : vector<8x1xf32> to vector<8x8xf32>
    %194 = arith.subf %190, %193 : vector<8x8xf32>
    %195 = math.exp %194 : vector<8x8xf32>
    %cst_57 = arith.constant dense<0.000000e+00> : vector<8xf32>
    %196 = vector.multi_reduction <add>, %195, %cst_57 [1] : vector<8x8xf32> to vector<8xf32>
    %197 = vector.shape_cast %196 : vector<8xf32> to vector<8x1xf32>
    %198 = tpu.reciprocal %197 {approx = true} : vector<8x1xf32> -> vector<8x1xf32>
    %199 = vector.broadcast %198 : vector<8x1xf32> to vector<8x8xf32>
    %200 = arith.mulf %195, %199 : vector<8x8xf32>
    %cst_58 = arith.constant dense<0.000000e+00> : vector<8x8xf32>
    %201 = tpu.matmul %200, %183, %cst_58 {dimension_numbers = #tpu.dot_dimension_numbers<[1], [0], [0], [1], [0, 0, 1, 1], [], []>} : vector<8x8xf32>, vector<8x8xf32>, vector<8x8xf32> -> vector<8x8xf32>
    %202 = tpu.concatenate %138, %159, %180, %201 in 1 : vector<8x8xf32>, vector<8x8xf32>, vector<8x8xf32>, vector<8x8xf32> -> vector<8x32xf32>
    %203 = tpu.concatenate %117, %202 in 0 : vector<8x32xf32>, vector<8x32xf32> -> vector<16x32xf32>
    %c0_59 = arith.constant 0 : index
    %c0_60 = arith.constant 0 : index
    %c0_61 = arith.constant 0 : index
    %204 = vector.load %arg8[%c0_59, %c0_60, %c0_61] : memref<4x32x32xf32, #tpu.memory_space<vmem>>, vector<1x32x32xf32>
    %205 = vector.shape_cast %204 : vector<1x32x32xf32> to vector<32x32xf32>
    %cst_62 = arith.constant dense<0.000000e+00> : vector<16x32xf32>
    %206 = tpu.matmul %203, %205, %cst_62 {dimension_numbers = #tpu.dot_dimension_numbers<[1], [0], [0], [1], [0, 0, 1, 1], [], []>} : vector<16x32xf32>, vector<32x32xf32>, vector<16x32xf32> -> vector<16x32xf32>
    %c0_63 = arith.constant 0 : index
    %c0_64 = arith.constant 0 : index
    %c0_65 = arith.constant 0 : index
    %207 = vector.load %arg9[%c0_63, %c0_64, %c0_65] : memref<4x1x32xf32, #tpu.memory_space<vmem>>, vector<1x1x32xf32>
    %208 = vector.shape_cast %207 : vector<1x1x32xf32> to vector<1x32xf32>
    %209 = vector.broadcast %208 : vector<1x32xf32> to vector<16x32xf32>
    %210 = arith.addf %206, %209 : vector<16x32xf32>
    %211 = arith.addf %210, %25 : vector<16x32xf32>
    %c0_66 = arith.constant 0 : index
    %c0_67 = arith.constant 0 : index
    %c0_68 = arith.constant 0 : index
    %212 = vector.load %arg10[%c0_66, %c0_67, %c0_68] : memref<4x1x32xf32, #tpu.memory_space<vmem>>, vector<1x1x32xf32>
    %213 = vector.shape_cast %212 : vector<1x1x32xf32> to vector<1x32xf32>
    %c0_69 = arith.constant 0 : index
    %c0_70 = arith.constant 0 : index
    %c0_71 = arith.constant 0 : index
    %214 = vector.load %arg11[%c0_69, %c0_70, %c0_71] : memref<4x1x32xf32, #tpu.memory_space<vmem>>, vector<1x1x32xf32>
    %215 = vector.shape_cast %214 : vector<1x1x32xf32> to vector<1x32xf32>
    %cst_72 = arith.constant dense<0.000000e+00> : vector<16xf32>
    %216 = vector.multi_reduction <add>, %211, %cst_72 [1] : vector<16x32xf32> to vector<16xf32>
    %217 = vector.shape_cast %216 : vector<16xf32> to vector<16x1xf32>
    %cst_73 = arith.constant 3.200000e+01 : f32
    %218 = vector.broadcast %cst_73 : f32 to vector<16x1xf32>
    %219 = arith.divf %217, %218 : vector<16x1xf32>
    %220 = vector.broadcast %219 : vector<16x1xf32> to vector<16x32xf32>
    %221 = arith.subf %211, %220 : vector<16x32xf32>
    %222 = arith.mulf %221, %221 : vector<16x32xf32>
    %cst_74 = arith.constant dense<0.000000e+00> : vector<16xf32>
    %223 = vector.multi_reduction <add>, %222, %cst_74 [1] : vector<16x32xf32> to vector<16xf32>
    %224 = vector.shape_cast %223 : vector<16xf32> to vector<16x1xf32>
    %cst_75 = arith.constant 3.200000e+01 : f32
    %225 = vector.broadcast %cst_75 : f32 to vector<16x1xf32>
    %226 = arith.divf %224, %225 : vector<16x1xf32>
    %227 = vector.broadcast %219 : vector<16x1xf32> to vector<16x32xf32>
    %228 = arith.subf %211, %227 : vector<16x32xf32>
    %cst_76 = arith.constant 9.99999996E-13 : f32
    %229 = vector.broadcast %cst_76 : f32 to vector<16x1xf32>
    %230 = arith.addf %226, %229 : vector<16x1xf32>
    %231 = math.rsqrt %230 : vector<16x1xf32>
    %232 = vector.broadcast %231 : vector<16x1xf32> to vector<16x32xf32>
    %233 = arith.mulf %228, %232 : vector<16x32xf32>
    %234 = vector.broadcast %213 : vector<1x32xf32> to vector<16x32xf32>
    %235 = arith.mulf %233, %234 : vector<16x32xf32>
    %236 = vector.broadcast %215 : vector<1x32xf32> to vector<16x32xf32>
    %237 = arith.addf %235, %236 : vector<16x32xf32>
    %c0_77 = arith.constant 0 : index
    %c0_78 = arith.constant 0 : index
    %c0_79 = arith.constant 0 : index
    %238 = vector.load %arg12[%c0_77, %c0_78, %c0_79] : memref<4x32x64xf32, #tpu.memory_space<vmem>>, vector<1x32x64xf32>
    %239 = vector.shape_cast %238 : vector<1x32x64xf32> to vector<32x64xf32>
    %cst_80 = arith.constant dense<0.000000e+00> : vector<16x64xf32>
    %240 = tpu.matmul %237, %239, %cst_80 {dimension_numbers = #tpu.dot_dimension_numbers<[1], [0], [0], [1], [0, 0, 1, 1], [], []>} : vector<16x32xf32>, vector<32x64xf32>, vector<16x64xf32> -> vector<16x64xf32>
    %c0_81 = arith.constant 0 : index
    %c0_82 = arith.constant 0 : index
    %c0_83 = arith.constant 0 : index
    %241 = vector.load %arg13[%c0_81, %c0_82, %c0_83] : memref<4x1x64xf32, #tpu.memory_space<vmem>>, vector<1x1x64xf32>
    %242 = vector.shape_cast %241 : vector<1x1x64xf32> to vector<1x64xf32>
    %243 = vector.broadcast %242 : vector<1x64xf32> to vector<16x64xf32>
    %244 = arith.addf %240, %243 : vector<16x64xf32>
    %245 = arith.mulf %244, %244 : vector<16x64xf32>
    %246 = arith.mulf %244, %245 : vector<16x64xf32>
    %cst_84 = arith.constant 4.471500e-02 : f32
    %247 = vector.broadcast %cst_84 : f32 to vector<16x64xf32>
    %248 = arith.mulf %247, %246 : vector<16x64xf32>
    %249 = arith.addf %244, %248 : vector<16x64xf32>
    %cst_85 = arith.constant 0.797884583 : f32
    %250 = vector.broadcast %cst_85 : f32 to vector<16x64xf32>
    %251 = arith.mulf %250, %249 : vector<16x64xf32>
    %252 = math.tanh %251 : vector<16x64xf32>
    %cst_86 = arith.constant 1.000000e+00 : f32
    %253 = vector.broadcast %cst_86 : f32 to vector<16x64xf32>
    %254 = arith.addf %253, %252 : vector<16x64xf32>
    %cst_87 = arith.constant 5.000000e-01 : f32
    %255 = vector.broadcast %cst_87 : f32 to vector<16x64xf32>
    %256 = arith.mulf %255, %254 : vector<16x64xf32>
    %257 = arith.mulf %244, %256 : vector<16x64xf32>
    %c0_88 = arith.constant 0 : index
    %c0_89 = arith.constant 0 : index
    %c0_90 = arith.constant 0 : index
    %258 = vector.load %arg14[%c0_88, %c0_89, %c0_90] : memref<4x64x32xf32, #tpu.memory_space<vmem>>, vector<1x64x32xf32>
    %259 = vector.shape_cast %258 : vector<1x64x32xf32> to vector<64x32xf32>
    %cst_91 = arith.constant dense<0.000000e+00> : vector<16x32xf32>
    %260 = tpu.matmul %257, %259, %cst_91 {dimension_numbers = #tpu.dot_dimension_numbers<[1], [0], [0], [1], [0, 0, 1, 1], [], []>} : vector<16x64xf32>, vector<64x32xf32>, vector<16x32xf32> -> vector<16x32xf32>
    %c0_92 = arith.constant 0 : index
    %c0_93 = arith.constant 0 : index
    %c0_94 = arith.constant 0 : index
    %261 = vector.load %arg15[%c0_92, %c0_93, %c0_94] : memref<4x1x32xf32, #tpu.memory_space<vmem>>, vector<1x1x32xf32>
    %262 = vector.shape_cast %261 : vector<1x1x32xf32> to vector<1x32xf32>
    %263 = vector.broadcast %262 : vector<1x32xf32> to vector<16x32xf32>
    %264 = arith.addf %260, %263 : vector<16x32xf32>
    %265 = arith.addf %264, %237 : vector<16x32xf32>
    %c0_95 = arith.constant 0 : index
    %c0_96 = arith.constant 0 : index
    %c0_97 = arith.constant 0 : index
    %266 = vector.load %arg16[%c0_95, %c0_96, %c0_97] : memref<4x1x32xf32, #tpu.memory_space<vmem>>, vector<1x1x32xf32>
    %267 = vector.shape_cast %266 : vector<1x1x32xf32> to vector<1x32xf32>
    %c0_98 = arith.constant 0 : index
    %c0_99 = arith.constant 0 : index
    %c0_100 = arith.constant 0 : index
    %268 = vector.load %arg17[%c0_98, %c0_99, %c0_100] : memref<4x1x32xf32, #tpu.memory_space<vmem>>, vector<1x1x32xf32>
    %269 = vector.shape_cast %268 : vector<1x1x32xf32> to vector<1x32xf32>
    %cst_101 = arith.constant dense<0.000000e+00> : vector<16xf32>
    %270 = vector.multi_reduction <add>, %265, %cst_101 [1] : vector<16x32xf32> to vector<16xf32>
    %271 = vector.shape_cast %270 : vector<16xf32> to vector<16x1xf32>
    %cst_102 = arith.constant 3.200000e+01 : f32
    %272 = vector.broadcast %cst_102 : f32 to vector<16x1xf32>
    %273 = arith.divf %271, %272 : vector<16x1xf32>
    %274 = vector.broadcast %273 : vector<16x1xf32> to vector<16x32xf32>
    %275 = arith.subf %265, %274 : vector<16x32xf32>
    %276 = arith.mulf %275, %275 : vector<16x32xf32>
    %cst_103 = arith.constant dense<0.000000e+00> : vector<16xf32>
    %277 = vector.multi_reduction <add>, %276, %cst_103 [1] : vector<16x32xf32> to vector<16xf32>
    %278 = vector.shape_cast %277 : vector<16xf32> to vector<16x1xf32>
    %cst_104 = arith.constant 3.200000e+01 : f32
    %279 = vector.broadcast %cst_104 : f32 to vector<16x1xf32>
    %280 = arith.divf %278, %279 : vector<16x1xf32>
    %281 = vector.broadcast %273 : vector<16x1xf32> to vector<16x32xf32>
    %282 = arith.subf %265, %281 : vector<16x32xf32>
    %cst_105 = arith.constant 9.99999996E-13 : f32
    %283 = vector.broadcast %cst_105 : f32 to vector<16x1xf32>
    %284 = arith.addf %280, %283 : vector<16x1xf32>
    %285 = math.rsqrt %284 : vector<16x1xf32>
    %286 = vector.broadcast %285 : vector<16x1xf32> to vector<16x32xf32>
    %287 = arith.mulf %282, %286 : vector<16x32xf32>
    %288 = vector.broadcast %267 : vector<1x32xf32> to vector<16x32xf32>
    %289 = arith.mulf %287, %288 : vector<16x32xf32>
    %290 = vector.broadcast %269 : vector<1x32xf32> to vector<16x32xf32>
    %291 = arith.addf %289, %290 : vector<16x32xf32>
    %c1 = arith.constant 1 : index
    %c0_106 = arith.constant 0 : index
    %c0_107 = arith.constant 0 : index
    %292 = vector.load %arg6[%c1, %c0_106, %c0_107] : memref<4x32x96xf32, #tpu.memory_space<vmem>>, vector<1x32x96xf32>
    %293 = vector.shape_cast %292 : vector<1x32x96xf32> to vector<32x96xf32>
    %cst_108 = arith.constant dense<0.000000e+00> : vector<16x96xf32>
    %294 = tpu.matmul %291, %293, %cst_108 {dimension_numbers = #tpu.dot_dimension_numbers<[1], [0], [0], [1], [0, 0, 1, 1], [], []>} : vector<16x32xf32>, vector<32x96xf32>, vector<16x96xf32> -> vector<16x96xf32>
    %c1_109 = arith.constant 1 : index
    %c0_110 = arith.constant 0 : index
    %c0_111 = arith.constant 0 : index
    %295 = vector.load %arg7[%c1_109, %c0_110, %c0_111] : memref<4x1x96xf32, #tpu.memory_space<vmem>>, vector<1x1x96xf32>
    %296 = vector.shape_cast %295 : vector<1x1x96xf32> to vector<1x96xf32>
    %297 = vector.broadcast %296 : vector<1x96xf32> to vector<16x96xf32>
    %298 = arith.addf %294, %297 : vector<16x96xf32>
    %299 = vector.extract_strided_slice %298 {offsets = [0, 0], sizes = [8, 8], strides = [1, 1]} : vector<16x96xf32> to vector<8x8xf32>
    %300 = vector.extract_strided_slice %298 {offsets = [0, 32], sizes = [8, 8], strides = [1, 1]} : vector<16x96xf32> to vector<8x8xf32>
    %301 = vector.extract_strided_slice %298 {offsets = [0, 64], sizes = [8, 8], strides = [1, 1]} : vector<16x96xf32> to vector<8x8xf32>
    %cst_112 = arith.constant dense<0.000000e+00> : vector<8x8xf32>
    %302 = tpu.matmul %299, %300, %cst_112 {dimension_numbers = #tpu.dot_dimension_numbers<[1], [1], [0], [0], [0, 0, 1, 0], [], []>} : vector<8x8xf32>, vector<8x8xf32>, vector<8x8xf32> -> vector<8x8xf32>
    %cst_113 = arith.constant 0.353553385 : f32
    %303 = vector.broadcast %cst_113 : f32 to vector<8x8xf32>
    %304 = arith.mulf %302, %303 : vector<8x8xf32>
    %305 = vector.extract_strided_slice %0 {offsets = [0, 0, 0], sizes = [1, 1, 8], strides = [1, 1, 1]} : vector<2x1x8xf32> to vector<1x1x8xf32>
    %306 = vector.shape_cast %305 : vector<1x1x8xf32> to vector<1x8xf32>
    %307 = vector.broadcast %306 : vector<1x8xf32> to vector<8x8xf32>
    %308 = arith.addf %304, %307 : vector<8x8xf32>
    %cst_114 = arith.constant dense<0xFF800000> : vector<8xf32>
    %309 = vector.multi_reduction <maximumf>, %308, %cst_114 [1] : vector<8x8xf32> to vector<8xf32>
    %310 = vector.shape_cast %309 : vector<8xf32> to vector<8x1xf32>
    %311 = vector.broadcast %310 : vector<8x1xf32> to vector<8x8xf32>
    %312 = arith.subf %308, %311 : vector<8x8xf32>
    %313 = math.exp %312 : vector<8x8xf32>
    %cst_115 = arith.constant dense<0.000000e+00> : vector<8xf32>
    %314 = vector.multi_reduction <add>, %313, %cst_115 [1] : vector<8x8xf32> to vector<8xf32>
    %315 = vector.shape_cast %314 : vector<8xf32> to vector<8x1xf32>
    %316 = tpu.reciprocal %315 {approx = true} : vector<8x1xf32> -> vector<8x1xf32>
    %317 = vector.broadcast %316 : vector<8x1xf32> to vector<8x8xf32>
    %318 = arith.mulf %313, %317 : vector<8x8xf32>
    %cst_116 = arith.constant dense<0.000000e+00> : vector<8x8xf32>
    %319 = tpu.matmul %318, %301, %cst_116 {dimension_numbers = #tpu.dot_dimension_numbers<[1], [0], [0], [1], [0, 0, 1, 1], [], []>} : vector<8x8xf32>, vector<8x8xf32>, vector<8x8xf32> -> vector<8x8xf32>
    %320 = vector.extract_strided_slice %298 {offsets = [0, 8], sizes = [8, 8], strides = [1, 1]} : vector<16x96xf32> to vector<8x8xf32>
    %321 = vector.extract_strided_slice %298 {offsets = [0, 40], sizes = [8, 8], strides = [1, 1]} : vector<16x96xf32> to vector<8x8xf32>
    %322 = vector.extract_strided_slice %298 {offsets = [0, 72], sizes = [8, 8], strides = [1, 1]} : vector<16x96xf32> to vector<8x8xf32>
    %cst_117 = arith.constant dense<0.000000e+00> : vector<8x8xf32>
    %323 = tpu.matmul %320, %321, %cst_117 {dimension_numbers = #tpu.dot_dimension_numbers<[1], [1], [0], [0], [0, 0, 1, 0], [], []>} : vector<8x8xf32>, vector<8x8xf32>, vector<8x8xf32> -> vector<8x8xf32>
    %cst_118 = arith.constant 0.353553385 : f32
    %324 = vector.broadcast %cst_118 : f32 to vector<8x8xf32>
    %325 = arith.mulf %323, %324 : vector<8x8xf32>
    %326 = vector.extract_strided_slice %0 {offsets = [0, 0, 0], sizes = [1, 1, 8], strides = [1, 1, 1]} : vector<2x1x8xf32> to vector<1x1x8xf32>
    %327 = vector.shape_cast %326 : vector<1x1x8xf32> to vector<1x8xf32>
    %328 = vector.broadcast %327 : vector<1x8xf32> to vector<8x8xf32>
    %329 = arith.addf %325, %328 : vector<8x8xf32>
    %cst_119 = arith.constant dense<0xFF800000> : vector<8xf32>
    %330 = vector.multi_reduction <maximumf>, %329, %cst_119 [1] : vector<8x8xf32> to vector<8xf32>
    %331 = vector.shape_cast %330 : vector<8xf32> to vector<8x1xf32>
    %332 = vector.broadcast %331 : vector<8x1xf32> to vector<8x8xf32>
    %333 = arith.subf %329, %332 : vector<8x8xf32>
    %334 = math.exp %333 : vector<8x8xf32>
    %cst_120 = arith.constant dense<0.000000e+00> : vector<8xf32>
    %335 = vector.multi_reduction <add>, %334, %cst_120 [1] : vector<8x8xf32> to vector<8xf32>
    %336 = vector.shape_cast %335 : vector<8xf32> to vector<8x1xf32>
    %337 = tpu.reciprocal %336 {approx = true} : vector<8x1xf32> -> vector<8x1xf32>
    %338 = vector.broadcast %337 : vector<8x1xf32> to vector<8x8xf32>
    %339 = arith.mulf %334, %338 : vector<8x8xf32>
    %cst_121 = arith.constant dense<0.000000e+00> : vector<8x8xf32>
    %340 = tpu.matmul %339, %322, %cst_121 {dimension_numbers = #tpu.dot_dimension_numbers<[1], [0], [0], [1], [0, 0, 1, 1], [], []>} : vector<8x8xf32>, vector<8x8xf32>, vector<8x8xf32> -> vector<8x8xf32>
    %341 = vector.extract_strided_slice %298 {offsets = [0, 16], sizes = [8, 8], strides = [1, 1]} : vector<16x96xf32> to vector<8x8xf32>
    %342 = vector.extract_strided_slice %298 {offsets = [0, 48], sizes = [8, 8], strides = [1, 1]} : vector<16x96xf32> to vector<8x8xf32>
    %343 = vector.extract_strided_slice %298 {offsets = [0, 80], sizes = [8, 8], strides = [1, 1]} : vector<16x96xf32> to vector<8x8xf32>
    %cst_122 = arith.constant dense<0.000000e+00> : vector<8x8xf32>
    %344 = tpu.matmul %341, %342, %cst_122 {dimension_numbers = #tpu.dot_dimension_numbers<[1], [1], [0], [0], [0, 0, 1, 0], [], []>} : vector<8x8xf32>, vector<8x8xf32>, vector<8x8xf32> -> vector<8x8xf32>
    %cst_123 = arith.constant 0.353553385 : f32
    %345 = vector.broadcast %cst_123 : f32 to vector<8x8xf32>
    %346 = arith.mulf %344, %345 : vector<8x8xf32>
    %347 = vector.extract_strided_slice %0 {offsets = [0, 0, 0], sizes = [1, 1, 8], strides = [1, 1, 1]} : vector<2x1x8xf32> to vector<1x1x8xf32>
    %348 = vector.shape_cast %347 : vector<1x1x8xf32> to vector<1x8xf32>
    %349 = vector.broadcast %348 : vector<1x8xf32> to vector<8x8xf32>
    %350 = arith.addf %346, %349 : vector<8x8xf32>
    %cst_124 = arith.constant dense<0xFF800000> : vector<8xf32>
    %351 = vector.multi_reduction <maximumf>, %350, %cst_124 [1] : vector<8x8xf32> to vector<8xf32>
    %352 = vector.shape_cast %351 : vector<8xf32> to vector<8x1xf32>
    %353 = vector.broadcast %352 : vector<8x1xf32> to vector<8x8xf32>
    %354 = arith.subf %350, %353 : vector<8x8xf32>
    %355 = math.exp %354 : vector<8x8xf32>
    %cst_125 = arith.constant dense<0.000000e+00> : vector<8xf32>
    %356 = vector.multi_reduction <add>, %355, %cst_125 [1] : vector<8x8xf32> to vector<8xf32>
    %357 = vector.shape_cast %356 : vector<8xf32> to vector<8x1xf32>
    %358 = tpu.reciprocal %357 {approx = true} : vector<8x1xf32> -> vector<8x1xf32>
    %359 = vector.broadcast %358 : vector<8x1xf32> to vector<8x8xf32>
    %360 = arith.mulf %355, %359 : vector<8x8xf32>
    %cst_126 = arith.constant dense<0.000000e+00> : vector<8x8xf32>
    %361 = tpu.matmul %360, %343, %cst_126 {dimension_numbers = #tpu.dot_dimension_numbers<[1], [0], [0], [1], [0, 0, 1, 1], [], []>} : vector<8x8xf32>, vector<8x8xf32>, vector<8x8xf32> -> vector<8x8xf32>
    %362 = vector.extract_strided_slice %298 {offsets = [0, 24], sizes = [8, 8], strides = [1, 1]} : vector<16x96xf32> to vector<8x8xf32>
    %363 = vector.extract_strided_slice %298 {offsets = [0, 56], sizes = [8, 8], strides = [1, 1]} : vector<16x96xf32> to vector<8x8xf32>
    %364 = vector.extract_strided_slice %298 {offsets = [0, 88], sizes = [8, 8], strides = [1, 1]} : vector<16x96xf32> to vector<8x8xf32>
    %cst_127 = arith.constant dense<0.000000e+00> : vector<8x8xf32>
    %365 = tpu.matmul %362, %363, %cst_127 {dimension_numbers = #tpu.dot_dimension_numbers<[1], [1], [0], [0], [0, 0, 1, 0], [], []>} : vector<8x8xf32>, vector<8x8xf32>, vector<8x8xf32> -> vector<8x8xf32>
    %cst_128 = arith.constant 0.353553385 : f32
    %366 = vector.broadcast %cst_128 : f32 to vector<8x8xf32>
    %367 = arith.mulf %365, %366 : vector<8x8xf32>
    %368 = vector.extract_strided_slice %0 {offsets = [0, 0, 0], sizes = [1, 1, 8], strides = [1, 1, 1]} : vector<2x1x8xf32> to vector<1x1x8xf32>
    %369 = vector.shape_cast %368 : vector<1x1x8xf32> to vector<1x8xf32>
    %370 = vector.broadcast %369 : vector<1x8xf32> to vector<8x8xf32>
    %371 = arith.addf %367, %370 : vector<8x8xf32>
    %cst_129 = arith.constant dense<0xFF800000> : vector<8xf32>
    %372 = vector.multi_reduction <maximumf>, %371, %cst_129 [1] : vector<8x8xf32> to vector<8xf32>
    %373 = vector.shape_cast %372 : vector<8xf32> to vector<8x1xf32>
    %374 = vector.broadcast %373 : vector<8x1xf32> to vector<8x8xf32>
    %375 = arith.subf %371, %374 : vector<8x8xf32>
    %376 = math.exp %375 : vector<8x8xf32>
    %cst_130 = arith.constant dense<0.000000e+00> : vector<8xf32>
    %377 = vector.multi_reduction <add>, %376, %cst_130 [1] : vector<8x8xf32> to vector<8xf32>
    %378 = vector.shape_cast %377 : vector<8xf32> to vector<8x1xf32>
    %379 = tpu.reciprocal %378 {approx = true} : vector<8x1xf32> -> vector<8x1xf32>
    %380 = vector.broadcast %379 : vector<8x1xf32> to vector<8x8xf32>
    %381 = arith.mulf %376, %380 : vector<8x8xf32>
    %cst_131 = arith.constant dense<0.000000e+00> : vector<8x8xf32>
    %382 = tpu.matmul %381, %364, %cst_131 {dimension_numbers = #tpu.dot_dimension_numbers<[1], [0], [0], [1], [0, 0, 1, 1], [], []>} : vector<8x8xf32>, vector<8x8xf32>, vector<8x8xf32> -> vector<8x8xf32>
    %383 = tpu.concatenate %319, %340, %361, %382 in 1 : vector<8x8xf32>, vector<8x8xf32>, vector<8x8xf32>, vector<8x8xf32> -> vector<8x32xf32>
    %384 = vector.extract_strided_slice %298 {offsets = [8, 0], sizes = [8, 8], strides = [1, 1]} : vector<16x96xf32> to vector<8x8xf32>
    %385 = vector.extract_strided_slice %298 {offsets = [8, 32], sizes = [8, 8], strides = [1, 1]} : vector<16x96xf32> to vector<8x8xf32>
    %386 = vector.extract_strided_slice %298 {offsets = [8, 64], sizes = [8, 8], strides = [1, 1]} : vector<16x96xf32> to vector<8x8xf32>
    %cst_132 = arith.constant dense<0.000000e+00> : vector<8x8xf32>
    %387 = tpu.matmul %384, %385, %cst_132 {dimension_numbers = #tpu.dot_dimension_numbers<[1], [1], [0], [0], [0, 0, 1, 0], [], []>} : vector<8x8xf32>, vector<8x8xf32>, vector<8x8xf32> -> vector<8x8xf32>
    %cst_133 = arith.constant 0.353553385 : f32
    %388 = vector.broadcast %cst_133 : f32 to vector<8x8xf32>
    %389 = arith.mulf %387, %388 : vector<8x8xf32>
    %390 = vector.extract_strided_slice %0 {offsets = [1, 0, 0], sizes = [1, 1, 8], strides = [1, 1, 1]} : vector<2x1x8xf32> to vector<1x1x8xf32>
    %391 = vector.shape_cast %390 : vector<1x1x8xf32> to vector<1x8xf32>
    %392 = vector.broadcast %391 : vector<1x8xf32> to vector<8x8xf32>
    %393 = arith.addf %389, %392 : vector<8x8xf32>
    %cst_134 = arith.constant dense<0xFF800000> : vector<8xf32>
    %394 = vector.multi_reduction <maximumf>, %393, %cst_134 [1] : vector<8x8xf32> to vector<8xf32>
    %395 = vector.shape_cast %394 : vector<8xf32> to vector<8x1xf32>
    %396 = vector.broadcast %395 : vector<8x1xf32> to vector<8x8xf32>
    %397 = arith.subf %393, %396 : vector<8x8xf32>
    %398 = math.exp %397 : vector<8x8xf32>
    %cst_135 = arith.constant dense<0.000000e+00> : vector<8xf32>
    %399 = vector.multi_reduction <add>, %398, %cst_135 [1] : vector<8x8xf32> to vector<8xf32>
    %400 = vector.shape_cast %399 : vector<8xf32> to vector<8x1xf32>
    %401 = tpu.reciprocal %400 {approx = true} : vector<8x1xf32> -> vector<8x1xf32>
    %402 = vector.broadcast %401 : vector<8x1xf32> to vector<8x8xf32>
    %403 = arith.mulf %398, %402 : vector<8x8xf32>
    %cst_136 = arith.constant dense<0.000000e+00> : vector<8x8xf32>
    %404 = tpu.matmul %403, %386, %cst_136 {dimension_numbers = #tpu.dot_dimension_numbers<[1], [0], [0], [1], [0, 0, 1, 1], [], []>} : vector<8x8xf32>, vector<8x8xf32>, vector<8x8xf32> -> vector<8x8xf32>
    %405 = vector.extract_strided_slice %298 {offsets = [8, 8], sizes = [8, 8], strides = [1, 1]} : vector<16x96xf32> to vector<8x8xf32>
    %406 = vector.extract_strided_slice %298 {offsets = [8, 40], sizes = [8, 8], strides = [1, 1]} : vector<16x96xf32> to vector<8x8xf32>
    %407 = vector.extract_strided_slice %298 {offsets = [8, 72], sizes = [8, 8], strides = [1, 1]} : vector<16x96xf32> to vector<8x8xf32>
    %cst_137 = arith.constant dense<0.000000e+00> : vector<8x8xf32>
    %408 = tpu.matmul %405, %406, %cst_137 {dimension_numbers = #tpu.dot_dimension_numbers<[1], [1], [0], [0], [0, 0, 1, 0], [], []>} : vector<8x8xf32>, vector<8x8xf32>, vector<8x8xf32> -> vector<8x8xf32>
    %cst_138 = arith.constant 0.353553385 : f32
    %409 = vector.broadcast %cst_138 : f32 to vector<8x8xf32>
    %410 = arith.mulf %408, %409 : vector<8x8xf32>
    %411 = vector.extract_strided_slice %0 {offsets = [1, 0, 0], sizes = [1, 1, 8], strides = [1, 1, 1]} : vector<2x1x8xf32> to vector<1x1x8xf32>
    %412 = vector.shape_cast %411 : vector<1x1x8xf32> to vector<1x8xf32>
    %413 = vector.broadcast %412 : vector<1x8xf32> to vector<8x8xf32>
    %414 = arith.addf %410, %413 : vector<8x8xf32>
    %cst_139 = arith.constant dense<0xFF800000> : vector<8xf32>
    %415 = vector.multi_reduction <maximumf>, %414, %cst_139 [1] : vector<8x8xf32> to vector<8xf32>
    %416 = vector.shape_cast %415 : vector<8xf32> to vector<8x1xf32>
    %417 = vector.broadcast %416 : vector<8x1xf32> to vector<8x8xf32>
    %418 = arith.subf %414, %417 : vector<8x8xf32>
    %419 = math.exp %418 : vector<8x8xf32>
    %cst_140 = arith.constant dense<0.000000e+00> : vector<8xf32>
    %420 = vector.multi_reduction <add>, %419, %cst_140 [1] : vector<8x8xf32> to vector<8xf32>
    %421 = vector.shape_cast %420 : vector<8xf32> to vector<8x1xf32>
    %422 = tpu.reciprocal %421 {approx = true} : vector<8x1xf32> -> vector<8x1xf32>
    %423 = vector.broadcast %422 : vector<8x1xf32> to vector<8x8xf32>
    %424 = arith.mulf %419, %423 : vector<8x8xf32>
    %cst_141 = arith.constant dense<0.000000e+00> : vector<8x8xf32>
    %425 = tpu.matmul %424, %407, %cst_141 {dimension_numbers = #tpu.dot_dimension_numbers<[1], [0], [0], [1], [0, 0, 1, 1], [], []>} : vector<8x8xf32>, vector<8x8xf32>, vector<8x8xf32> -> vector<8x8xf32>
    %426 = vector.extract_strided_slice %298 {offsets = [8, 16], sizes = [8, 8], strides = [1, 1]} : vector<16x96xf32> to vector<8x8xf32>
    %427 = vector.extract_strided_slice %298 {offsets = [8, 48], sizes = [8, 8], strides = [1, 1]} : vector<16x96xf32> to vector<8x8xf32>
    %428 = vector.extract_strided_slice %298 {offsets = [8, 80], sizes = [8, 8], strides = [1, 1]} : vector<16x96xf32> to vector<8x8xf32>
    %cst_142 = arith.constant dense<0.000000e+00> : vector<8x8xf32>
    %429 = tpu.matmul %426, %427, %cst_142 {dimension_numbers = #tpu.dot_dimension_numbers<[1], [1], [0], [0], [0, 0, 1, 0], [], []>} : vector<8x8xf32>, vector<8x8xf32>, vector<8x8xf32> -> vector<8x8xf32>
    %cst_143 = arith.constant 0.353553385 : f32
    %430 = vector.broadcast %cst_143 : f32 to vector<8x8xf32>
    %431 = arith.mulf %429, %430 : vector<8x8xf32>
    %432 = vector.extract_strided_slice %0 {offsets = [1, 0, 0], sizes = [1, 1, 8], strides = [1, 1, 1]} : vector<2x1x8xf32> to vector<1x1x8xf32>
    %433 = vector.shape_cast %432 : vector<1x1x8xf32> to vector<1x8xf32>
    %434 = vector.broadcast %433 : vector<1x8xf32> to vector<8x8xf32>
    %435 = arith.addf %431, %434 : vector<8x8xf32>
    %cst_144 = arith.constant dense<0xFF800000> : vector<8xf32>
    %436 = vector.multi_reduction <maximumf>, %435, %cst_144 [1] : vector<8x8xf32> to vector<8xf32>
    %437 = vector.shape_cast %436 : vector<8xf32> to vector<8x1xf32>
    %438 = vector.broadcast %437 : vector<8x1xf32> to vector<8x8xf32>
    %439 = arith.subf %435, %438 : vector<8x8xf32>
    %440 = math.exp %439 : vector<8x8xf32>
    %cst_145 = arith.constant dense<0.000000e+00> : vector<8xf32>
    %441 = vector.multi_reduction <add>, %440, %cst_145 [1] : vector<8x8xf32> to vector<8xf32>
    %442 = vector.shape_cast %441 : vector<8xf32> to vector<8x1xf32>
    %443 = tpu.reciprocal %442 {approx = true} : vector<8x1xf32> -> vector<8x1xf32>
    %444 = vector.broadcast %443 : vector<8x1xf32> to vector<8x8xf32>
    %445 = arith.mulf %440, %444 : vector<8x8xf32>
    %cst_146 = arith.constant dense<0.000000e+00> : vector<8x8xf32>
    %446 = tpu.matmul %445, %428, %cst_146 {dimension_numbers = #tpu.dot_dimension_numbers<[1], [0], [0], [1], [0, 0, 1, 1], [], []>} : vector<8x8xf32>, vector<8x8xf32>, vector<8x8xf32> -> vector<8x8xf32>
    %447 = vector.extract_strided_slice %298 {offsets = [8, 24], sizes = [8, 8], strides = [1, 1]} : vector<16x96xf32> to vector<8x8xf32>
    %448 = vector.extract_strided_slice %298 {offsets = [8, 56], sizes = [8, 8], strides = [1, 1]} : vector<16x96xf32> to vector<8x8xf32>
    %449 = vector.extract_strided_slice %298 {offsets = [8, 88], sizes = [8, 8], strides = [1, 1]} : vector<16x96xf32> to vector<8x8xf32>
    %cst_147 = arith.constant dense<0.000000e+00> : vector<8x8xf32>
    %450 = tpu.matmul %447, %448, %cst_147 {dimension_numbers = #tpu.dot_dimension_numbers<[1], [1], [0], [0], [0, 0, 1, 0], [], []>} : vector<8x8xf32>, vector<8x8xf32>, vector<8x8xf32> -> vector<8x8xf32>
    %cst_148 = arith.constant 0.353553385 : f32
    %451 = vector.broadcast %cst_148 : f32 to vector<8x8xf32>
    %452 = arith.mulf %450, %451 : vector<8x8xf32>
    %453 = vector.extract_strided_slice %0 {offsets = [1, 0, 0], sizes = [1, 1, 8], strides = [1, 1, 1]} : vector<2x1x8xf32> to vector<1x1x8xf32>
    %454 = vector.shape_cast %453 : vector<1x1x8xf32> to vector<1x8xf32>
    %455 = vector.broadcast %454 : vector<1x8xf32> to vector<8x8xf32>
    %456 = arith.addf %452, %455 : vector<8x8xf32>
    %cst_149 = arith.constant dense<0xFF800000> : vector<8xf32>
    %457 = vector.multi_reduction <maximumf>, %456, %cst_149 [1] : vector<8x8xf32> to vector<8xf32>
    %458 = vector.shape_cast %457 : vector<8xf32> to vector<8x1xf32>
    %459 = vector.broadcast %458 : vector<8x1xf32> to vector<8x8xf32>
    %460 = arith.subf %456, %459 : vector<8x8xf32>
    %461 = math.exp %460 : vector<8x8xf32>
    %cst_150 = arith.constant dense<0.000000e+00> : vector<8xf32>
    %462 = vector.multi_reduction <add>, %461, %cst_150 [1] : vector<8x8xf32> to vector<8xf32>
    %463 = vector.shape_cast %462 : vector<8xf32> to vector<8x1xf32>
    %464 = tpu.reciprocal %463 {approx = true} : vector<8x1xf32> -> vector<8x1xf32>
    %465 = vector.broadcast %464 : vector<8x1xf32> to vector<8x8xf32>
    %466 = arith.mulf %461, %465 : vector<8x8xf32>
    %cst_151 = arith.constant dense<0.000000e+00> : vector<8x8xf32>
    %467 = tpu.matmul %466, %449, %cst_151 {dimension_numbers = #tpu.dot_dimension_numbers<[1], [0], [0], [1], [0, 0, 1, 1], [], []>} : vector<8x8xf32>, vector<8x8xf32>, vector<8x8xf32> -> vector<8x8xf32>
    %468 = tpu.concatenate %404, %425, %446, %467 in 1 : vector<8x8xf32>, vector<8x8xf32>, vector<8x8xf32>, vector<8x8xf32> -> vector<8x32xf32>
    %469 = tpu.concatenate %383, %468 in 0 : vector<8x32xf32>, vector<8x32xf32> -> vector<16x32xf32>
    %c1_152 = arith.constant 1 : index
    %c0_153 = arith.constant 0 : index
    %c0_154 = arith.constant 0 : index
    %470 = vector.load %arg8[%c1_152, %c0_153, %c0_154] : memref<4x32x32xf32, #tpu.memory_space<vmem>>, vector<1x32x32xf32>
    %471 = vector.shape_cast %470 : vector<1x32x32xf32> to vector<32x32xf32>
    %cst_155 = arith.constant dense<0.000000e+00> : vector<16x32xf32>
    %472 = tpu.matmul %469, %471, %cst_155 {dimension_numbers = #tpu.dot_dimension_numbers<[1], [0], [0], [1], [0, 0, 1, 1], [], []>} : vector<16x32xf32>, vector<32x32xf32>, vector<16x32xf32> -> vector<16x32xf32>
    %c1_156 = arith.constant 1 : index
    %c0_157 = arith.constant 0 : index
    %c0_158 = arith.constant 0 : index
    %473 = vector.load %arg9[%c1_156, %c0_157, %c0_158] : memref<4x1x32xf32, #tpu.memory_space<vmem>>, vector<1x1x32xf32>
    %474 = vector.shape_cast %473 : vector<1x1x32xf32> to vector<1x32xf32>
    %475 = vector.broadcast %474 : vector<1x32xf32> to vector<16x32xf32>
    %476 = arith.addf %472, %475 : vector<16x32xf32>
    %477 = arith.addf %476, %291 : vector<16x32xf32>
    %c1_159 = arith.constant 1 : index
    %c0_160 = arith.constant 0 : index
    %c0_161 = arith.constant 0 : index
    %478 = vector.load %arg10[%c1_159, %c0_160, %c0_161] : memref<4x1x32xf32, #tpu.memory_space<vmem>>, vector<1x1x32xf32>
    %479 = vector.shape_cast %478 : vector<1x1x32xf32> to vector<1x32xf32>
    %c1_162 = arith.constant 1 : index
    %c0_163 = arith.constant 0 : index
    %c0_164 = arith.constant 0 : index
    %480 = vector.load %arg11[%c1_162, %c0_163, %c0_164] : memref<4x1x32xf32, #tpu.memory_space<vmem>>, vector<1x1x32xf32>
    %481 = vector.shape_cast %480 : vector<1x1x32xf32> to vector<1x32xf32>
    %cst_165 = arith.constant dense<0.000000e+00> : vector<16xf32>
    %482 = vector.multi_reduction <add>, %477, %cst_165 [1] : vector<16x32xf32> to vector<16xf32>
    %483 = vector.shape_cast %482 : vector<16xf32> to vector<16x1xf32>
    %cst_166 = arith.constant 3.200000e+01 : f32
    %484 = vector.broadcast %cst_166 : f32 to vector<16x1xf32>
    %485 = arith.divf %483, %484 : vector<16x1xf32>
    %486 = vector.broadcast %485 : vector<16x1xf32> to vector<16x32xf32>
    %487 = arith.subf %477, %486 : vector<16x32xf32>
    %488 = arith.mulf %487, %487 : vector<16x32xf32>
    %cst_167 = arith.constant dense<0.000000e+00> : vector<16xf32>
    %489 = vector.multi_reduction <add>, %488, %cst_167 [1] : vector<16x32xf32> to vector<16xf32>
    %490 = vector.shape_cast %489 : vector<16xf32> to vector<16x1xf32>
    %cst_168 = arith.constant 3.200000e+01 : f32
    %491 = vector.broadcast %cst_168 : f32 to vector<16x1xf32>
    %492 = arith.divf %490, %491 : vector<16x1xf32>
    %493 = vector.broadcast %485 : vector<16x1xf32> to vector<16x32xf32>
    %494 = arith.subf %477, %493 : vector<16x32xf32>
    %cst_169 = arith.constant 9.99999996E-13 : f32
    %495 = vector.broadcast %cst_169 : f32 to vector<16x1xf32>
    %496 = arith.addf %492, %495 : vector<16x1xf32>
    %497 = math.rsqrt %496 : vector<16x1xf32>
    %498 = vector.broadcast %497 : vector<16x1xf32> to vector<16x32xf32>
    %499 = arith.mulf %494, %498 : vector<16x32xf32>
    %500 = vector.broadcast %479 : vector<1x32xf32> to vector<16x32xf32>
    %501 = arith.mulf %499, %500 : vector<16x32xf32>
    %502 = vector.broadcast %481 : vector<1x32xf32> to vector<16x32xf32>
    %503 = arith.addf %501, %502 : vector<16x32xf32>
    %c1_170 = arith.constant 1 : index
    %c0_171 = arith.constant 0 : index
    %c0_172 = arith.constant 0 : index
    %504 = vector.load %arg12[%c1_170, %c0_171, %c0_172] : memref<4x32x64xf32, #tpu.memory_space<vmem>>, vector<1x32x64xf32>
    %505 = vector.shape_cast %504 : vector<1x32x64xf32> to vector<32x64xf32>
    %cst_173 = arith.constant dense<0.000000e+00> : vector<16x64xf32>
    %506 = tpu.matmul %503, %505, %cst_173 {dimension_numbers = #tpu.dot_dimension_numbers<[1], [0], [0], [1], [0, 0, 1, 1], [], []>} : vector<16x32xf32>, vector<32x64xf32>, vector<16x64xf32> -> vector<16x64xf32>
    %c1_174 = arith.constant 1 : index
    %c0_175 = arith.constant 0 : index
    %c0_176 = arith.constant 0 : index
    %507 = vector.load %arg13[%c1_174, %c0_175, %c0_176] : memref<4x1x64xf32, #tpu.memory_space<vmem>>, vector<1x1x64xf32>
    %508 = vector.shape_cast %507 : vector<1x1x64xf32> to vector<1x64xf32>
    %509 = vector.broadcast %508 : vector<1x64xf32> to vector<16x64xf32>
    %510 = arith.addf %506, %509 : vector<16x64xf32>
    %511 = arith.mulf %510, %510 : vector<16x64xf32>
    %512 = arith.mulf %510, %511 : vector<16x64xf32>
    %cst_177 = arith.constant 4.471500e-02 : f32
    %513 = vector.broadcast %cst_177 : f32 to vector<16x64xf32>
    %514 = arith.mulf %513, %512 : vector<16x64xf32>
    %515 = arith.addf %510, %514 : vector<16x64xf32>
    %cst_178 = arith.constant 0.797884583 : f32
    %516 = vector.broadcast %cst_178 : f32 to vector<16x64xf32>
    %517 = arith.mulf %516, %515 : vector<16x64xf32>
    %518 = math.tanh %517 : vector<16x64xf32>
    %cst_179 = arith.constant 1.000000e+00 : f32
    %519 = vector.broadcast %cst_179 : f32 to vector<16x64xf32>
    %520 = arith.addf %519, %518 : vector<16x64xf32>
    %cst_180 = arith.constant 5.000000e-01 : f32
    %521 = vector.broadcast %cst_180 : f32 to vector<16x64xf32>
    %522 = arith.mulf %521, %520 : vector<16x64xf32>
    %523 = arith.mulf %510, %522 : vector<16x64xf32>
    %c1_181 = arith.constant 1 : index
    %c0_182 = arith.constant 0 : index
    %c0_183 = arith.constant 0 : index
    %524 = vector.load %arg14[%c1_181, %c0_182, %c0_183] : memref<4x64x32xf32, #tpu.memory_space<vmem>>, vector<1x64x32xf32>
    %525 = vector.shape_cast %524 : vector<1x64x32xf32> to vector<64x32xf32>
    %cst_184 = arith.constant dense<0.000000e+00> : vector<16x32xf32>
    %526 = tpu.matmul %523, %525, %cst_184 {dimension_numbers = #tpu.dot_dimension_numbers<[1], [0], [0], [1], [0, 0, 1, 1], [], []>} : vector<16x64xf32>, vector<64x32xf32>, vector<16x32xf32> -> vector<16x32xf32>
    %c1_185 = arith.constant 1 : index
    %c0_186 = arith.constant 0 : index
    %c0_187 = arith.constant 0 : index
    %527 = vector.load %arg15[%c1_185, %c0_186, %c0_187] : memref<4x1x32xf32, #tpu.memory_space<vmem>>, vector<1x1x32xf32>
    %528 = vector.shape_cast %527 : vector<1x1x32xf32> to vector<1x32xf32>
    %529 = vector.broadcast %528 : vector<1x32xf32> to vector<16x32xf32>
    %530 = arith.addf %526, %529 : vector<16x32xf32>
    %531 = arith.addf %530, %503 : vector<16x32xf32>
    %c1_188 = arith.constant 1 : index
    %c0_189 = arith.constant 0 : index
    %c0_190 = arith.constant 0 : index
    %532 = vector.load %arg16[%c1_188, %c0_189, %c0_190] : memref<4x1x32xf32, #tpu.memory_space<vmem>>, vector<1x1x32xf32>
    %533 = vector.shape_cast %532 : vector<1x1x32xf32> to vector<1x32xf32>
    %c1_191 = arith.constant 1 : index
    %c0_192 = arith.constant 0 : index
    %c0_193 = arith.constant 0 : index
    %534 = vector.load %arg17[%c1_191, %c0_192, %c0_193] : memref<4x1x32xf32, #tpu.memory_space<vmem>>, vector<1x1x32xf32>
    %535 = vector.shape_cast %534 : vector<1x1x32xf32> to vector<1x32xf32>
    %cst_194 = arith.constant dense<0.000000e+00> : vector<16xf32>
    %536 = vector.multi_reduction <add>, %531, %cst_194 [1] : vector<16x32xf32> to vector<16xf32>
    %537 = vector.shape_cast %536 : vector<16xf32> to vector<16x1xf32>
    %cst_195 = arith.constant 3.200000e+01 : f32
    %538 = vector.broadcast %cst_195 : f32 to vector<16x1xf32>
    %539 = arith.divf %537, %538 : vector<16x1xf32>
    %540 = vector.broadcast %539 : vector<16x1xf32> to vector<16x32xf32>
    %541 = arith.subf %531, %540 : vector<16x32xf32>
    %542 = arith.mulf %541, %541 : vector<16x32xf32>
    %cst_196 = arith.constant dense<0.000000e+00> : vector<16xf32>
    %543 = vector.multi_reduction <add>, %542, %cst_196 [1] : vector<16x32xf32> to vector<16xf32>
    %544 = vector.shape_cast %543 : vector<16xf32> to vector<16x1xf32>
    %cst_197 = arith.constant 3.200000e+01 : f32
    %545 = vector.broadcast %cst_197 : f32 to vector<16x1xf32>
    %546 = arith.divf %544, %545 : vector<16x1xf32>
    %547 = vector.broadcast %539 : vector<16x1xf32> to vector<16x32xf32>
    %548 = arith.subf %531, %547 : vector<16x32xf32>
    %cst_198 = arith.constant 9.99999996E-13 : f32
    %549 = vector.broadcast %cst_198 : f32 to vector<16x1xf32>
    %550 = arith.addf %546, %549 : vector<16x1xf32>
    %551 = math.rsqrt %550 : vector<16x1xf32>
    %552 = vector.broadcast %551 : vector<16x1xf32> to vector<16x32xf32>
    %553 = arith.mulf %548, %552 : vector<16x32xf32>
    %554 = vector.broadcast %533 : vector<1x32xf32> to vector<16x32xf32>
    %555 = arith.mulf %553, %554 : vector<16x32xf32>
    %556 = vector.broadcast %535 : vector<1x32xf32> to vector<16x32xf32>
    %557 = arith.addf %555, %556 : vector<16x32xf32>
    %c2 = arith.constant 2 : index
    %c0_199 = arith.constant 0 : index
    %c0_200 = arith.constant 0 : index
    %558 = vector.load %arg6[%c2, %c0_199, %c0_200] : memref<4x32x96xf32, #tpu.memory_space<vmem>>, vector<1x32x96xf32>
    %559 = vector.shape_cast %558 : vector<1x32x96xf32> to vector<32x96xf32>
    %cst_201 = arith.constant dense<0.000000e+00> : vector<16x96xf32>
    %560 = tpu.matmul %557, %559, %cst_201 {dimension_numbers = #tpu.dot_dimension_numbers<[1], [0], [0], [1], [0, 0, 1, 1], [], []>} : vector<16x32xf32>, vector<32x96xf32>, vector<16x96xf32> -> vector<16x96xf32>
    %c2_202 = arith.constant 2 : index
    %c0_203 = arith.constant 0 : index
    %c0_204 = arith.constant 0 : index
    %561 = vector.load %arg7[%c2_202, %c0_203, %c0_204] : memref<4x1x96xf32, #tpu.memory_space<vmem>>, vector<1x1x96xf32>
    %562 = vector.shape_cast %561 : vector<1x1x96xf32> to vector<1x96xf32>
    %563 = vector.broadcast %562 : vector<1x96xf32> to vector<16x96xf32>
    %564 = arith.addf %560, %563 : vector<16x96xf32>
    %565 = vector.extract_strided_slice %564 {offsets = [0, 0], sizes = [8, 8], strides = [1, 1]} : vector<16x96xf32> to vector<8x8xf32>
    %566 = vector.extract_strided_slice %564 {offsets = [0, 32], sizes = [8, 8], strides = [1, 1]} : vector<16x96xf32> to vector<8x8xf32>
    %567 = vector.extract_strided_slice %564 {offsets = [0, 64], sizes = [8, 8], strides = [1, 1]} : vector<16x96xf32> to vector<8x8xf32>
    %cst_205 = arith.constant dense<0.000000e+00> : vector<8x8xf32>
    %568 = tpu.matmul %565, %566, %cst_205 {dimension_numbers = #tpu.dot_dimension_numbers<[1], [1], [0], [0], [0, 0, 1, 0], [], []>} : vector<8x8xf32>, vector<8x8xf32>, vector<8x8xf32> -> vector<8x8xf32>
    %cst_206 = arith.constant 0.353553385 : f32
    %569 = vector.broadcast %cst_206 : f32 to vector<8x8xf32>
    %570 = arith.mulf %568, %569 : vector<8x8xf32>
    %571 = vector.extract_strided_slice %0 {offsets = [0, 0, 0], sizes = [1, 1, 8], strides = [1, 1, 1]} : vector<2x1x8xf32> to vector<1x1x8xf32>
    %572 = vector.shape_cast %571 : vector<1x1x8xf32> to vector<1x8xf32>
    %573 = vector.broadcast %572 : vector<1x8xf32> to vector<8x8xf32>
    %574 = arith.addf %570, %573 : vector<8x8xf32>
    %cst_207 = arith.constant dense<0xFF800000> : vector<8xf32>
    %575 = vector.multi_reduction <maximumf>, %574, %cst_207 [1] : vector<8x8xf32> to vector<8xf32>
    %576 = vector.shape_cast %575 : vector<8xf32> to vector<8x1xf32>
    %577 = vector.broadcast %576 : vector<8x1xf32> to vector<8x8xf32>
    %578 = arith.subf %574, %577 : vector<8x8xf32>
    %579 = math.exp %578 : vector<8x8xf32>
    %cst_208 = arith.constant dense<0.000000e+00> : vector<8xf32>
    %580 = vector.multi_reduction <add>, %579, %cst_208 [1] : vector<8x8xf32> to vector<8xf32>
    %581 = vector.shape_cast %580 : vector<8xf32> to vector<8x1xf32>
    %582 = tpu.reciprocal %581 {approx = true} : vector<8x1xf32> -> vector<8x1xf32>
    %583 = vector.broadcast %582 : vector<8x1xf32> to vector<8x8xf32>
    %584 = arith.mulf %579, %583 : vector<8x8xf32>
    %cst_209 = arith.constant dense<0.000000e+00> : vector<8x8xf32>
    %585 = tpu.matmul %584, %567, %cst_209 {dimension_numbers = #tpu.dot_dimension_numbers<[1], [0], [0], [1], [0, 0, 1, 1], [], []>} : vector<8x8xf32>, vector<8x8xf32>, vector<8x8xf32> -> vector<8x8xf32>
    %586 = vector.extract_strided_slice %564 {offsets = [0, 8], sizes = [8, 8], strides = [1, 1]} : vector<16x96xf32> to vector<8x8xf32>
    %587 = vector.extract_strided_slice %564 {offsets = [0, 40], sizes = [8, 8], strides = [1, 1]} : vector<16x96xf32> to vector<8x8xf32>
    %588 = vector.extract_strided_slice %564 {offsets = [0, 72], sizes = [8, 8], strides = [1, 1]} : vector<16x96xf32> to vector<8x8xf32>
    %cst_210 = arith.constant dense<0.000000e+00> : vector<8x8xf32>
    %589 = tpu.matmul %586, %587, %cst_210 {dimension_numbers = #tpu.dot_dimension_numbers<[1], [1], [0], [0], [0, 0, 1, 0], [], []>} : vector<8x8xf32>, vector<8x8xf32>, vector<8x8xf32> -> vector<8x8xf32>
    %cst_211 = arith.constant 0.353553385 : f32
    %590 = vector.broadcast %cst_211 : f32 to vector<8x8xf32>
    %591 = arith.mulf %589, %590 : vector<8x8xf32>
    %592 = vector.extract_strided_slice %0 {offsets = [0, 0, 0], sizes = [1, 1, 8], strides = [1, 1, 1]} : vector<2x1x8xf32> to vector<1x1x8xf32>
    %593 = vector.shape_cast %592 : vector<1x1x8xf32> to vector<1x8xf32>
    %594 = vector.broadcast %593 : vector<1x8xf32> to vector<8x8xf32>
    %595 = arith.addf %591, %594 : vector<8x8xf32>
    %cst_212 = arith.constant dense<0xFF800000> : vector<8xf32>
    %596 = vector.multi_reduction <maximumf>, %595, %cst_212 [1] : vector<8x8xf32> to vector<8xf32>
    %597 = vector.shape_cast %596 : vector<8xf32> to vector<8x1xf32>
    %598 = vector.broadcast %597 : vector<8x1xf32> to vector<8x8xf32>
    %599 = arith.subf %595, %598 : vector<8x8xf32>
    %600 = math.exp %599 : vector<8x8xf32>
    %cst_213 = arith.constant dense<0.000000e+00> : vector<8xf32>
    %601 = vector.multi_reduction <add>, %600, %cst_213 [1] : vector<8x8xf32> to vector<8xf32>
    %602 = vector.shape_cast %601 : vector<8xf32> to vector<8x1xf32>
    %603 = tpu.reciprocal %602 {approx = true} : vector<8x1xf32> -> vector<8x1xf32>
    %604 = vector.broadcast %603 : vector<8x1xf32> to vector<8x8xf32>
    %605 = arith.mulf %600, %604 : vector<8x8xf32>
    %cst_214 = arith.constant dense<0.000000e+00> : vector<8x8xf32>
    %606 = tpu.matmul %605, %588, %cst_214 {dimension_numbers = #tpu.dot_dimension_numbers<[1], [0], [0], [1], [0, 0, 1, 1], [], []>} : vector<8x8xf32>, vector<8x8xf32>, vector<8x8xf32> -> vector<8x8xf32>
    %607 = vector.extract_strided_slice %564 {offsets = [0, 16], sizes = [8, 8], strides = [1, 1]} : vector<16x96xf32> to vector<8x8xf32>
    %608 = vector.extract_strided_slice %564 {offsets = [0, 48], sizes = [8, 8], strides = [1, 1]} : vector<16x96xf32> to vector<8x8xf32>
    %609 = vector.extract_strided_slice %564 {offsets = [0, 80], sizes = [8, 8], strides = [1, 1]} : vector<16x96xf32> to vector<8x8xf32>
    %cst_215 = arith.constant dense<0.000000e+00> : vector<8x8xf32>
    %610 = tpu.matmul %607, %608, %cst_215 {dimension_numbers = #tpu.dot_dimension_numbers<[1], [1], [0], [0], [0, 0, 1, 0], [], []>} : vector<8x8xf32>, vector<8x8xf32>, vector<8x8xf32> -> vector<8x8xf32>
    %cst_216 = arith.constant 0.353553385 : f32
    %611 = vector.broadcast %cst_216 : f32 to vector<8x8xf32>
    %612 = arith.mulf %610, %611 : vector<8x8xf32>
    %613 = vector.extract_strided_slice %0 {offsets = [0, 0, 0], sizes = [1, 1, 8], strides = [1, 1, 1]} : vector<2x1x8xf32> to vector<1x1x8xf32>
    %614 = vector.shape_cast %613 : vector<1x1x8xf32> to vector<1x8xf32>
    %615 = vector.broadcast %614 : vector<1x8xf32> to vector<8x8xf32>
    %616 = arith.addf %612, %615 : vector<8x8xf32>
    %cst_217 = arith.constant dense<0xFF800000> : vector<8xf32>
    %617 = vector.multi_reduction <maximumf>, %616, %cst_217 [1] : vector<8x8xf32> to vector<8xf32>
    %618 = vector.shape_cast %617 : vector<8xf32> to vector<8x1xf32>
    %619 = vector.broadcast %618 : vector<8x1xf32> to vector<8x8xf32>
    %620 = arith.subf %616, %619 : vector<8x8xf32>
    %621 = math.exp %620 : vector<8x8xf32>
    %cst_218 = arith.constant dense<0.000000e+00> : vector<8xf32>
    %622 = vector.multi_reduction <add>, %621, %cst_218 [1] : vector<8x8xf32> to vector<8xf32>
    %623 = vector.shape_cast %622 : vector<8xf32> to vector<8x1xf32>
    %624 = tpu.reciprocal %623 {approx = true} : vector<8x1xf32> -> vector<8x1xf32>
    %625 = vector.broadcast %624 : vector<8x1xf32> to vector<8x8xf32>
    %626 = arith.mulf %621, %625 : vector<8x8xf32>
    %cst_219 = arith.constant dense<0.000000e+00> : vector<8x8xf32>
    %627 = tpu.matmul %626, %609, %cst_219 {dimension_numbers = #tpu.dot_dimension_numbers<[1], [0], [0], [1], [0, 0, 1, 1], [], []>} : vector<8x8xf32>, vector<8x8xf32>, vector<8x8xf32> -> vector<8x8xf32>
    %628 = vector.extract_strided_slice %564 {offsets = [0, 24], sizes = [8, 8], strides = [1, 1]} : vector<16x96xf32> to vector<8x8xf32>
    %629 = vector.extract_strided_slice %564 {offsets = [0, 56], sizes = [8, 8], strides = [1, 1]} : vector<16x96xf32> to vector<8x8xf32>
    %630 = vector.extract_strided_slice %564 {offsets = [0, 88], sizes = [8, 8], strides = [1, 1]} : vector<16x96xf32> to vector<8x8xf32>
    %cst_220 = arith.constant dense<0.000000e+00> : vector<8x8xf32>
    %631 = tpu.matmul %628, %629, %cst_220 {dimension_numbers = #tpu.dot_dimension_numbers<[1], [1], [0], [0], [0, 0, 1, 0], [], []>} : vector<8x8xf32>, vector<8x8xf32>, vector<8x8xf32> -> vector<8x8xf32>
    %cst_221 = arith.constant 0.353553385 : f32
    %632 = vector.broadcast %cst_221 : f32 to vector<8x8xf32>
    %633 = arith.mulf %631, %632 : vector<8x8xf32>
    %634 = vector.extract_strided_slice %0 {offsets = [0, 0, 0], sizes = [1, 1, 8], strides = [1, 1, 1]} : vector<2x1x8xf32> to vector<1x1x8xf32>
    %635 = vector.shape_cast %634 : vector<1x1x8xf32> to vector<1x8xf32>
    %636 = vector.broadcast %635 : vector<1x8xf32> to vector<8x8xf32>
    %637 = arith.addf %633, %636 : vector<8x8xf32>
    %cst_222 = arith.constant dense<0xFF800000> : vector<8xf32>
    %638 = vector.multi_reduction <maximumf>, %637, %cst_222 [1] : vector<8x8xf32> to vector<8xf32>
    %639 = vector.shape_cast %638 : vector<8xf32> to vector<8x1xf32>
    %640 = vector.broadcast %639 : vector<8x1xf32> to vector<8x8xf32>
    %641 = arith.subf %637, %640 : vector<8x8xf32>
    %642 = math.exp %641 : vector<8x8xf32>
    %cst_223 = arith.constant dense<0.000000e+00> : vector<8xf32>
    %643 = vector.multi_reduction <add>, %642, %cst_223 [1] : vector<8x8xf32> to vector<8xf32>
    %644 = vector.shape_cast %643 : vector<8xf32> to vector<8x1xf32>
    %645 = tpu.reciprocal %644 {approx = true} : vector<8x1xf32> -> vector<8x1xf32>
    %646 = vector.broadcast %645 : vector<8x1xf32> to vector<8x8xf32>
    %647 = arith.mulf %642, %646 : vector<8x8xf32>
    %cst_224 = arith.constant dense<0.000000e+00> : vector<8x8xf32>
    %648 = tpu.matmul %647, %630, %cst_224 {dimension_numbers = #tpu.dot_dimension_numbers<[1], [0], [0], [1], [0, 0, 1, 1], [], []>} : vector<8x8xf32>, vector<8x8xf32>, vector<8x8xf32> -> vector<8x8xf32>
    %649 = tpu.concatenate %585, %606, %627, %648 in 1 : vector<8x8xf32>, vector<8x8xf32>, vector<8x8xf32>, vector<8x8xf32> -> vector<8x32xf32>
    %650 = vector.extract_strided_slice %564 {offsets = [8, 0], sizes = [8, 8], strides = [1, 1]} : vector<16x96xf32> to vector<8x8xf32>
    %651 = vector.extract_strided_slice %564 {offsets = [8, 32], sizes = [8, 8], strides = [1, 1]} : vector<16x96xf32> to vector<8x8xf32>
    %652 = vector.extract_strided_slice %564 {offsets = [8, 64], sizes = [8, 8], strides = [1, 1]} : vector<16x96xf32> to vector<8x8xf32>
    %cst_225 = arith.constant dense<0.000000e+00> : vector<8x8xf32>
    %653 = tpu.matmul %650, %651, %cst_225 {dimension_numbers = #tpu.dot_dimension_numbers<[1], [1], [0], [0], [0, 0, 1, 0], [], []>} : vector<8x8xf32>, vector<8x8xf32>, vector<8x8xf32> -> vector<8x8xf32>
    %cst_226 = arith.constant 0.353553385 : f32
    %654 = vector.broadcast %cst_226 : f32 to vector<8x8xf32>
    %655 = arith.mulf %653, %654 : vector<8x8xf32>
    %656 = vector.extract_strided_slice %0 {offsets = [1, 0, 0], sizes = [1, 1, 8], strides = [1, 1, 1]} : vector<2x1x8xf32> to vector<1x1x8xf32>
    %657 = vector.shape_cast %656 : vector<1x1x8xf32> to vector<1x8xf32>
    %658 = vector.broadcast %657 : vector<1x8xf32> to vector<8x8xf32>
    %659 = arith.addf %655, %658 : vector<8x8xf32>
    %cst_227 = arith.constant dense<0xFF800000> : vector<8xf32>
    %660 = vector.multi_reduction <maximumf>, %659, %cst_227 [1] : vector<8x8xf32> to vector<8xf32>
    %661 = vector.shape_cast %660 : vector<8xf32> to vector<8x1xf32>
    %662 = vector.broadcast %661 : vector<8x1xf32> to vector<8x8xf32>
    %663 = arith.subf %659, %662 : vector<8x8xf32>
    %664 = math.exp %663 : vector<8x8xf32>
    %cst_228 = arith.constant dense<0.000000e+00> : vector<8xf32>
    %665 = vector.multi_reduction <add>, %664, %cst_228 [1] : vector<8x8xf32> to vector<8xf32>
    %666 = vector.shape_cast %665 : vector<8xf32> to vector<8x1xf32>
    %667 = tpu.reciprocal %666 {approx = true} : vector<8x1xf32> -> vector<8x1xf32>
    %668 = vector.broadcast %667 : vector<8x1xf32> to vector<8x8xf32>
    %669 = arith.mulf %664, %668 : vector<8x8xf32>
    %cst_229 = arith.constant dense<0.000000e+00> : vector<8x8xf32>
    %670 = tpu.matmul %669, %652, %cst_229 {dimension_numbers = #tpu.dot_dimension_numbers<[1], [0], [0], [1], [0, 0, 1, 1], [], []>} : vector<8x8xf32>, vector<8x8xf32>, vector<8x8xf32> -> vector<8x8xf32>
    %671 = vector.extract_strided_slice %564 {offsets = [8, 8], sizes = [8, 8], strides = [1, 1]} : vector<16x96xf32> to vector<8x8xf32>
    %672 = vector.extract_strided_slice %564 {offsets = [8, 40], sizes = [8, 8], strides = [1, 1]} : vector<16x96xf32> to vector<8x8xf32>
    %673 = vector.extract_strided_slice %564 {offsets = [8, 72], sizes = [8, 8], strides = [1, 1]} : vector<16x96xf32> to vector<8x8xf32>
    %cst_230 = arith.constant dense<0.000000e+00> : vector<8x8xf32>
    %674 = tpu.matmul %671, %672, %cst_230 {dimension_numbers = #tpu.dot_dimension_numbers<[1], [1], [0], [0], [0, 0, 1, 0], [], []>} : vector<8x8xf32>, vector<8x8xf32>, vector<8x8xf32> -> vector<8x8xf32>
    %cst_231 = arith.constant 0.353553385 : f32
    %675 = vector.broadcast %cst_231 : f32 to vector<8x8xf32>
    %676 = arith.mulf %674, %675 : vector<8x8xf32>
    %677 = vector.extract_strided_slice %0 {offsets = [1, 0, 0], sizes = [1, 1, 8], strides = [1, 1, 1]} : vector<2x1x8xf32> to vector<1x1x8xf32>
    %678 = vector.shape_cast %677 : vector<1x1x8xf32> to vector<1x8xf32>
    %679 = vector.broadcast %678 : vector<1x8xf32> to vector<8x8xf32>
    %680 = arith.addf %676, %679 : vector<8x8xf32>
    %cst_232 = arith.constant dense<0xFF800000> : vector<8xf32>
    %681 = vector.multi_reduction <maximumf>, %680, %cst_232 [1] : vector<8x8xf32> to vector<8xf32>
    %682 = vector.shape_cast %681 : vector<8xf32> to vector<8x1xf32>
    %683 = vector.broadcast %682 : vector<8x1xf32> to vector<8x8xf32>
    %684 = arith.subf %680, %683 : vector<8x8xf32>
    %685 = math.exp %684 : vector<8x8xf32>
    %cst_233 = arith.constant dense<0.000000e+00> : vector<8xf32>
    %686 = vector.multi_reduction <add>, %685, %cst_233 [1] : vector<8x8xf32> to vector<8xf32>
    %687 = vector.shape_cast %686 : vector<8xf32> to vector<8x1xf32>
    %688 = tpu.reciprocal %687 {approx = true} : vector<8x1xf32> -> vector<8x1xf32>
    %689 = vector.broadcast %688 : vector<8x1xf32> to vector<8x8xf32>
    %690 = arith.mulf %685, %689 : vector<8x8xf32>
    %cst_234 = arith.constant dense<0.000000e+00> : vector<8x8xf32>
    %691 = tpu.matmul %690, %673, %cst_234 {dimension_numbers = #tpu.dot_dimension_numbers<[1], [0], [0], [1], [0, 0, 1, 1], [], []>} : vector<8x8xf32>, vector<8x8xf32>, vector<8x8xf32> -> vector<8x8xf32>
    %692 = vector.extract_strided_slice %564 {offsets = [8, 16], sizes = [8, 8], strides = [1, 1]} : vector<16x96xf32> to vector<8x8xf32>
    %693 = vector.extract_strided_slice %564 {offsets = [8, 48], sizes = [8, 8], strides = [1, 1]} : vector<16x96xf32> to vector<8x8xf32>
    %694 = vector.extract_strided_slice %564 {offsets = [8, 80], sizes = [8, 8], strides = [1, 1]} : vector<16x96xf32> to vector<8x8xf32>
    %cst_235 = arith.constant dense<0.000000e+00> : vector<8x8xf32>
    %695 = tpu.matmul %692, %693, %cst_235 {dimension_numbers = #tpu.dot_dimension_numbers<[1], [1], [0], [0], [0, 0, 1, 0], [], []>} : vector<8x8xf32>, vector<8x8xf32>, vector<8x8xf32> -> vector<8x8xf32>
    %cst_236 = arith.constant 0.353553385 : f32
    %696 = vector.broadcast %cst_236 : f32 to vector<8x8xf32>
    %697 = arith.mulf %695, %696 : vector<8x8xf32>
    %698 = vector.extract_strided_slice %0 {offsets = [1, 0, 0], sizes = [1, 1, 8], strides = [1, 1, 1]} : vector<2x1x8xf32> to vector<1x1x8xf32>
    %699 = vector.shape_cast %698 : vector<1x1x8xf32> to vector<1x8xf32>
    %700 = vector.broadcast %699 : vector<1x8xf32> to vector<8x8xf32>
    %701 = arith.addf %697, %700 : vector<8x8xf32>
    %cst_237 = arith.constant dense<0xFF800000> : vector<8xf32>
    %702 = vector.multi_reduction <maximumf>, %701, %cst_237 [1] : vector<8x8xf32> to vector<8xf32>
    %703 = vector.shape_cast %702 : vector<8xf32> to vector<8x1xf32>
    %704 = vector.broadcast %703 : vector<8x1xf32> to vector<8x8xf32>
    %705 = arith.subf %701, %704 : vector<8x8xf32>
    %706 = math.exp %705 : vector<8x8xf32>
    %cst_238 = arith.constant dense<0.000000e+00> : vector<8xf32>
    %707 = vector.multi_reduction <add>, %706, %cst_238 [1] : vector<8x8xf32> to vector<8xf32>
    %708 = vector.shape_cast %707 : vector<8xf32> to vector<8x1xf32>
    %709 = tpu.reciprocal %708 {approx = true} : vector<8x1xf32> -> vector<8x1xf32>
    %710 = vector.broadcast %709 : vector<8x1xf32> to vector<8x8xf32>
    %711 = arith.mulf %706, %710 : vector<8x8xf32>
    %cst_239 = arith.constant dense<0.000000e+00> : vector<8x8xf32>
    %712 = tpu.matmul %711, %694, %cst_239 {dimension_numbers = #tpu.dot_dimension_numbers<[1], [0], [0], [1], [0, 0, 1, 1], [], []>} : vector<8x8xf32>, vector<8x8xf32>, vector<8x8xf32> -> vector<8x8xf32>
    %713 = vector.extract_strided_slice %564 {offsets = [8, 24], sizes = [8, 8], strides = [1, 1]} : vector<16x96xf32> to vector<8x8xf32>
    %714 = vector.extract_strided_slice %564 {offsets = [8, 56], sizes = [8, 8], strides = [1, 1]} : vector<16x96xf32> to vector<8x8xf32>
    %715 = vector.extract_strided_slice %564 {offsets = [8, 88], sizes = [8, 8], strides = [1, 1]} : vector<16x96xf32> to vector<8x8xf32>
    %cst_240 = arith.constant dense<0.000000e+00> : vector<8x8xf32>
    %716 = tpu.matmul %713, %714, %cst_240 {dimension_numbers = #tpu.dot_dimension_numbers<[1], [1], [0], [0], [0, 0, 1, 0], [], []>} : vector<8x8xf32>, vector<8x8xf32>, vector<8x8xf32> -> vector<8x8xf32>
    %cst_241 = arith.constant 0.353553385 : f32
    %717 = vector.broadcast %cst_241 : f32 to vector<8x8xf32>
    %718 = arith.mulf %716, %717 : vector<8x8xf32>
    %719 = vector.extract_strided_slice %0 {offsets = [1, 0, 0], sizes = [1, 1, 8], strides = [1, 1, 1]} : vector<2x1x8xf32> to vector<1x1x8xf32>
    %720 = vector.shape_cast %719 : vector<1x1x8xf32> to vector<1x8xf32>
    %721 = vector.broadcast %720 : vector<1x8xf32> to vector<8x8xf32>
    %722 = arith.addf %718, %721 : vector<8x8xf32>
    %cst_242 = arith.constant dense<0xFF800000> : vector<8xf32>
    %723 = vector.multi_reduction <maximumf>, %722, %cst_242 [1] : vector<8x8xf32> to vector<8xf32>
    %724 = vector.shape_cast %723 : vector<8xf32> to vector<8x1xf32>
    %725 = vector.broadcast %724 : vector<8x1xf32> to vector<8x8xf32>
    %726 = arith.subf %722, %725 : vector<8x8xf32>
    %727 = math.exp %726 : vector<8x8xf32>
    %cst_243 = arith.constant dense<0.000000e+00> : vector<8xf32>
    %728 = vector.multi_reduction <add>, %727, %cst_243 [1] : vector<8x8xf32> to vector<8xf32>
    %729 = vector.shape_cast %728 : vector<8xf32> to vector<8x1xf32>
    %730 = tpu.reciprocal %729 {approx = true} : vector<8x1xf32> -> vector<8x1xf32>
    %731 = vector.broadcast %730 : vector<8x1xf32> to vector<8x8xf32>
    %732 = arith.mulf %727, %731 : vector<8x8xf32>
    %cst_244 = arith.constant dense<0.000000e+00> : vector<8x8xf32>
    %733 = tpu.matmul %732, %715, %cst_244 {dimension_numbers = #tpu.dot_dimension_numbers<[1], [0], [0], [1], [0, 0, 1, 1], [], []>} : vector<8x8xf32>, vector<8x8xf32>, vector<8x8xf32> -> vector<8x8xf32>
    %734 = tpu.concatenate %670, %691, %712, %733 in 1 : vector<8x8xf32>, vector<8x8xf32>, vector<8x8xf32>, vector<8x8xf32> -> vector<8x32xf32>
    %735 = tpu.concatenate %649, %734 in 0 : vector<8x32xf32>, vector<8x32xf32> -> vector<16x32xf32>
    %c2_245 = arith.constant 2 : index
    %c0_246 = arith.constant 0 : index
    %c0_247 = arith.constant 0 : index
    %736 = vector.load %arg8[%c2_245, %c0_246, %c0_247] : memref<4x32x32xf32, #tpu.memory_space<vmem>>, vector<1x32x32xf32>
    %737 = vector.shape_cast %736 : vector<1x32x32xf32> to vector<32x32xf32>
    %cst_248 = arith.constant dense<0.000000e+00> : vector<16x32xf32>
    %738 = tpu.matmul %735, %737, %cst_248 {dimension_numbers = #tpu.dot_dimension_numbers<[1], [0], [0], [1], [0, 0, 1, 1], [], []>} : vector<16x32xf32>, vector<32x32xf32>, vector<16x32xf32> -> vector<16x32xf32>
    %c2_249 = arith.constant 2 : index
    %c0_250 = arith.constant 0 : index
    %c0_251 = arith.constant 0 : index
    %739 = vector.load %arg9[%c2_249, %c0_250, %c0_251] : memref<4x1x32xf32, #tpu.memory_space<vmem>>, vector<1x1x32xf32>
    %740 = vector.shape_cast %739 : vector<1x1x32xf32> to vector<1x32xf32>
    %741 = vector.broadcast %740 : vector<1x32xf32> to vector<16x32xf32>
    %742 = arith.addf %738, %741 : vector<16x32xf32>
    %743 = arith.addf %742, %557 : vector<16x32xf32>
    %c2_252 = arith.constant 2 : index
    %c0_253 = arith.constant 0 : index
    %c0_254 = arith.constant 0 : index
    %744 = vector.load %arg10[%c2_252, %c0_253, %c0_254] : memref<4x1x32xf32, #tpu.memory_space<vmem>>, vector<1x1x32xf32>
    %745 = vector.shape_cast %744 : vector<1x1x32xf32> to vector<1x32xf32>
    %c2_255 = arith.constant 2 : index
    %c0_256 = arith.constant 0 : index
    %c0_257 = arith.constant 0 : index
    %746 = vector.load %arg11[%c2_255, %c0_256, %c0_257] : memref<4x1x32xf32, #tpu.memory_space<vmem>>, vector<1x1x32xf32>
    %747 = vector.shape_cast %746 : vector<1x1x32xf32> to vector<1x32xf32>
    %cst_258 = arith.constant dense<0.000000e+00> : vector<16xf32>
    %748 = vector.multi_reduction <add>, %743, %cst_258 [1] : vector<16x32xf32> to vector<16xf32>
    %749 = vector.shape_cast %748 : vector<16xf32> to vector<16x1xf32>
    %cst_259 = arith.constant 3.200000e+01 : f32
    %750 = vector.broadcast %cst_259 : f32 to vector<16x1xf32>
    %751 = arith.divf %749, %750 : vector<16x1xf32>
    %752 = vector.broadcast %751 : vector<16x1xf32> to vector<16x32xf32>
    %753 = arith.subf %743, %752 : vector<16x32xf32>
    %754 = arith.mulf %753, %753 : vector<16x32xf32>
    %cst_260 = arith.constant dense<0.000000e+00> : vector<16xf32>
    %755 = vector.multi_reduction <add>, %754, %cst_260 [1] : vector<16x32xf32> to vector<16xf32>
    %756 = vector.shape_cast %755 : vector<16xf32> to vector<16x1xf32>
    %cst_261 = arith.constant 3.200000e+01 : f32
    %757 = vector.broadcast %cst_261 : f32 to vector<16x1xf32>
    %758 = arith.divf %756, %757 : vector<16x1xf32>
    %759 = vector.broadcast %751 : vector<16x1xf32> to vector<16x32xf32>
    %760 = arith.subf %743, %759 : vector<16x32xf32>
    %cst_262 = arith.constant 9.99999996E-13 : f32
    %761 = vector.broadcast %cst_262 : f32 to vector<16x1xf32>
    %762 = arith.addf %758, %761 : vector<16x1xf32>
    %763 = math.rsqrt %762 : vector<16x1xf32>
    %764 = vector.broadcast %763 : vector<16x1xf32> to vector<16x32xf32>
    %765 = arith.mulf %760, %764 : vector<16x32xf32>
    %766 = vector.broadcast %745 : vector<1x32xf32> to vector<16x32xf32>
    %767 = arith.mulf %765, %766 : vector<16x32xf32>
    %768 = vector.broadcast %747 : vector<1x32xf32> to vector<16x32xf32>
    %769 = arith.addf %767, %768 : vector<16x32xf32>
    %c2_263 = arith.constant 2 : index
    %c0_264 = arith.constant 0 : index
    %c0_265 = arith.constant 0 : index
    %770 = vector.load %arg12[%c2_263, %c0_264, %c0_265] : memref<4x32x64xf32, #tpu.memory_space<vmem>>, vector<1x32x64xf32>
    %771 = vector.shape_cast %770 : vector<1x32x64xf32> to vector<32x64xf32>
    %cst_266 = arith.constant dense<0.000000e+00> : vector<16x64xf32>
    %772 = tpu.matmul %769, %771, %cst_266 {dimension_numbers = #tpu.dot_dimension_numbers<[1], [0], [0], [1], [0, 0, 1, 1], [], []>} : vector<16x32xf32>, vector<32x64xf32>, vector<16x64xf32> -> vector<16x64xf32>
    %c2_267 = arith.constant 2 : index
    %c0_268 = arith.constant 0 : index
    %c0_269 = arith.constant 0 : index
    %773 = vector.load %arg13[%c2_267, %c0_268, %c0_269] : memref<4x1x64xf32, #tpu.memory_space<vmem>>, vector<1x1x64xf32>
    %774 = vector.shape_cast %773 : vector<1x1x64xf32> to vector<1x64xf32>
    %775 = vector.broadcast %774 : vector<1x64xf32> to vector<16x64xf32>
    %776 = arith.addf %772, %775 : vector<16x64xf32>
    %777 = arith.mulf %776, %776 : vector<16x64xf32>
    %778 = arith.mulf %776, %777 : vector<16x64xf32>
    %cst_270 = arith.constant 4.471500e-02 : f32
    %779 = vector.broadcast %cst_270 : f32 to vector<16x64xf32>
    %780 = arith.mulf %779, %778 : vector<16x64xf32>
    %781 = arith.addf %776, %780 : vector<16x64xf32>
    %cst_271 = arith.constant 0.797884583 : f32
    %782 = vector.broadcast %cst_271 : f32 to vector<16x64xf32>
    %783 = arith.mulf %782, %781 : vector<16x64xf32>
    %784 = math.tanh %783 : vector<16x64xf32>
    %cst_272 = arith.constant 1.000000e+00 : f32
    %785 = vector.broadcast %cst_272 : f32 to vector<16x64xf32>
    %786 = arith.addf %785, %784 : vector<16x64xf32>
    %cst_273 = arith.constant 5.000000e-01 : f32
    %787 = vector.broadcast %cst_273 : f32 to vector<16x64xf32>
    %788 = arith.mulf %787, %786 : vector<16x64xf32>
    %789 = arith.mulf %776, %788 : vector<16x64xf32>
    %c2_274 = arith.constant 2 : index
    %c0_275 = arith.constant 0 : index
    %c0_276 = arith.constant 0 : index
    %790 = vector.load %arg14[%c2_274, %c0_275, %c0_276] : memref<4x64x32xf32, #tpu.memory_space<vmem>>, vector<1x64x32xf32>
    %791 = vector.shape_cast %790 : vector<1x64x32xf32> to vector<64x32xf32>
    %cst_277 = arith.constant dense<0.000000e+00> : vector<16x32xf32>
    %792 = tpu.matmul %789, %791, %cst_277 {dimension_numbers = #tpu.dot_dimension_numbers<[1], [0], [0], [1], [0, 0, 1, 1], [], []>} : vector<16x64xf32>, vector<64x32xf32>, vector<16x32xf32> -> vector<16x32xf32>
    %c2_278 = arith.constant 2 : index
    %c0_279 = arith.constant 0 : index
    %c0_280 = arith.constant 0 : index
    %793 = vector.load %arg15[%c2_278, %c0_279, %c0_280] : memref<4x1x32xf32, #tpu.memory_space<vmem>>, vector<1x1x32xf32>
    %794 = vector.shape_cast %793 : vector<1x1x32xf32> to vector<1x32xf32>
    %795 = vector.broadcast %794 : vector<1x32xf32> to vector<16x32xf32>
    %796 = arith.addf %792, %795 : vector<16x32xf32>
    %797 = arith.addf %796, %769 : vector<16x32xf32>
    %c2_281 = arith.constant 2 : index
    %c0_282 = arith.constant 0 : index
    %c0_283 = arith.constant 0 : index
    %798 = vector.load %arg16[%c2_281, %c0_282, %c0_283] : memref<4x1x32xf32, #tpu.memory_space<vmem>>, vector<1x1x32xf32>
    %799 = vector.shape_cast %798 : vector<1x1x32xf32> to vector<1x32xf32>
    %c2_284 = arith.constant 2 : index
    %c0_285 = arith.constant 0 : index
    %c0_286 = arith.constant 0 : index
    %800 = vector.load %arg17[%c2_284, %c0_285, %c0_286] : memref<4x1x32xf32, #tpu.memory_space<vmem>>, vector<1x1x32xf32>
    %801 = vector.shape_cast %800 : vector<1x1x32xf32> to vector<1x32xf32>
    %cst_287 = arith.constant dense<0.000000e+00> : vector<16xf32>
    %802 = vector.multi_reduction <add>, %797, %cst_287 [1] : vector<16x32xf32> to vector<16xf32>
    %803 = vector.shape_cast %802 : vector<16xf32> to vector<16x1xf32>
    %cst_288 = arith.constant 3.200000e+01 : f32
    %804 = vector.broadcast %cst_288 : f32 to vector<16x1xf32>
    %805 = arith.divf %803, %804 : vector<16x1xf32>
    %806 = vector.broadcast %805 : vector<16x1xf32> to vector<16x32xf32>
    %807 = arith.subf %797, %806 : vector<16x32xf32>
    %808 = arith.mulf %807, %807 : vector<16x32xf32>
    %cst_289 = arith.constant dense<0.000000e+00> : vector<16xf32>
    %809 = vector.multi_reduction <add>, %808, %cst_289 [1] : vector<16x32xf32> to vector<16xf32>
    %810 = vector.shape_cast %809 : vector<16xf32> to vector<16x1xf32>
    %cst_290 = arith.constant 3.200000e+01 : f32
    %811 = vector.broadcast %cst_290 : f32 to vector<16x1xf32>
    %812 = arith.divf %810, %811 : vector<16x1xf32>
    %813 = vector.broadcast %805 : vector<16x1xf32> to vector<16x32xf32>
    %814 = arith.subf %797, %813 : vector<16x32xf32>
    %cst_291 = arith.constant 9.99999996E-13 : f32
    %815 = vector.broadcast %cst_291 : f32 to vector<16x1xf32>
    %816 = arith.addf %812, %815 : vector<16x1xf32>
    %817 = math.rsqrt %816 : vector<16x1xf32>
    %818 = vector.broadcast %817 : vector<16x1xf32> to vector<16x32xf32>
    %819 = arith.mulf %814, %818 : vector<16x32xf32>
    %820 = vector.broadcast %799 : vector<1x32xf32> to vector<16x32xf32>
    %821 = arith.mulf %819, %820 : vector<16x32xf32>
    %822 = vector.broadcast %801 : vector<1x32xf32> to vector<16x32xf32>
    %823 = arith.addf %821, %822 : vector<16x32xf32>
    %c0_292 = arith.constant 0 : index
    %c0_293 = arith.constant 0 : index
    %824 = vector.load %arg2[%c0_292, %c0_293] : memref<16x32xf32, #tpu.memory_space<vmem>>, vector<16x32xf32>
    %825 = arith.addf %823, %824 : vector<16x32xf32>
    %c0_294 = arith.constant 0 : index
    %c0_295 = arith.constant 0 : index
    %826 = vector.load %arg4[%c0_294, %c0_295] : memref<1x32xf32, #tpu.memory_space<vmem>>, vector<1x32xf32>
    %c0_296 = arith.constant 0 : index
    %c0_297 = arith.constant 0 : index
    %827 = vector.load %arg5[%c0_296, %c0_297] : memref<1x32xf32, #tpu.memory_space<vmem>>, vector<1x32xf32>
    %cst_298 = arith.constant dense<0.000000e+00> : vector<16xf32>
    %828 = vector.multi_reduction <add>, %825, %cst_298 [1] : vector<16x32xf32> to vector<16xf32>
    %829 = vector.shape_cast %828 : vector<16xf32> to vector<16x1xf32>
    %cst_299 = arith.constant 3.200000e+01 : f32
    %830 = vector.broadcast %cst_299 : f32 to vector<16x1xf32>
    %831 = arith.divf %829, %830 : vector<16x1xf32>
    %832 = vector.broadcast %831 : vector<16x1xf32> to vector<16x32xf32>
    %833 = arith.subf %825, %832 : vector<16x32xf32>
    %834 = arith.mulf %833, %833 : vector<16x32xf32>
    %cst_300 = arith.constant dense<0.000000e+00> : vector<16xf32>
    %835 = vector.multi_reduction <add>, %834, %cst_300 [1] : vector<16x32xf32> to vector<16xf32>
    %836 = vector.shape_cast %835 : vector<16xf32> to vector<16x1xf32>
    %cst_301 = arith.constant 3.200000e+01 : f32
    %837 = vector.broadcast %cst_301 : f32 to vector<16x1xf32>
    %838 = arith.divf %836, %837 : vector<16x1xf32>
    %839 = vector.broadcast %831 : vector<16x1xf32> to vector<16x32xf32>
    %840 = arith.subf %825, %839 : vector<16x32xf32>
    %cst_302 = arith.constant 9.99999996E-13 : f32
    %841 = vector.broadcast %cst_302 : f32 to vector<16x1xf32>
    %842 = arith.addf %838, %841 : vector<16x1xf32>
    %843 = math.rsqrt %842 : vector<16x1xf32>
    %844 = vector.broadcast %843 : vector<16x1xf32> to vector<16x32xf32>
    %845 = arith.mulf %840, %844 : vector<16x32xf32>
    %846 = vector.broadcast %826 : vector<1x32xf32> to vector<16x32xf32>
    %847 = arith.mulf %845, %846 : vector<16x32xf32>
    %848 = vector.broadcast %827 : vector<1x32xf32> to vector<16x32xf32>
    %849 = arith.addf %847, %848 : vector<16x32xf32>
    %c0_303 = arith.constant 0 : index
    %c0_304 = arith.constant 0 : index
    %c0_305 = arith.constant 0 : index
    %850 = vector.load %arg6[%c0_303, %c0_304, %c0_305] : memref<4x32x96xf32, #tpu.memory_space<vmem>>, vector<1x32x96xf32>
    %851 = vector.shape_cast %850 : vector<1x32x96xf32> to vector<32x96xf32>
    %cst_306 = arith.constant dense<0.000000e+00> : vector<16x96xf32>
    %852 = tpu.matmul %849, %851, %cst_306 {dimension_numbers = #tpu.dot_dimension_numbers<[1], [0], [0], [1], [0, 0, 1, 1], [], []>} : vector<16x32xf32>, vector<32x96xf32>, vector<16x96xf32> -> vector<16x96xf32>
    %c0_307 = arith.constant 0 : index
    %c0_308 = arith.constant 0 : index
    %c0_309 = arith.constant 0 : index
    %853 = vector.load %arg7[%c0_307, %c0_308, %c0_309] : memref<4x1x96xf32, #tpu.memory_space<vmem>>, vector<1x1x96xf32>
    %854 = vector.shape_cast %853 : vector<1x1x96xf32> to vector<1x96xf32>
    %855 = vector.broadcast %854 : vector<1x96xf32> to vector<16x96xf32>
    %856 = arith.addf %852, %855 : vector<16x96xf32>
    %857 = vector.extract_strided_slice %856 {offsets = [0, 0], sizes = [8, 8], strides = [1, 1]} : vector<16x96xf32> to vector<8x8xf32>
    %858 = vector.extract_strided_slice %856 {offsets = [0, 32], sizes = [8, 8], strides = [1, 1]} : vector<16x96xf32> to vector<8x8xf32>
    %859 = vector.extract_strided_slice %856 {offsets = [0, 64], sizes = [8, 8], strides = [1, 1]} : vector<16x96xf32> to vector<8x8xf32>
    %cst_310 = arith.constant dense<0.000000e+00> : vector<8x8xf32>
    %860 = tpu.matmul %857, %858, %cst_310 {dimension_numbers = #tpu.dot_dimension_numbers<[1], [1], [0], [0], [0, 0, 1, 0], [], []>} : vector<8x8xf32>, vector<8x8xf32>, vector<8x8xf32> -> vector<8x8xf32>
    %cst_311 = arith.constant 0.353553385 : f32
    %861 = vector.broadcast %cst_311 : f32 to vector<8x8xf32>
    %862 = arith.mulf %860, %861 : vector<8x8xf32>
    %cst_312 = arith.constant dense<0xFF800000> : vector<8xf32>
    %863 = vector.multi_reduction <maximumf>, %862, %cst_312 [1] : vector<8x8xf32> to vector<8xf32>
    %864 = vector.shape_cast %863 : vector<8xf32> to vector<8x1xf32>
    %865 = vector.broadcast %864 : vector<8x1xf32> to vector<8x8xf32>
    %866 = arith.subf %862, %865 : vector<8x8xf32>
    %867 = math.exp %866 : vector<8x8xf32>
    %cst_313 = arith.constant dense<0.000000e+00> : vector<8xf32>
    %868 = vector.multi_reduction <add>, %867, %cst_313 [1] : vector<8x8xf32> to vector<8xf32>
    %869 = vector.shape_cast %868 : vector<8xf32> to vector<8x1xf32>
    %870 = tpu.reciprocal %869 {approx = true} : vector<8x1xf32> -> vector<8x1xf32>
    %871 = vector.broadcast %870 : vector<8x1xf32> to vector<8x8xf32>
    %872 = arith.mulf %867, %871 : vector<8x8xf32>
    %cst_314 = arith.constant dense<0.000000e+00> : vector<8x8xf32>
    %873 = tpu.matmul %872, %859, %cst_314 {dimension_numbers = #tpu.dot_dimension_numbers<[1], [0], [0], [1], [0, 0, 1, 1], [], []>} : vector<8x8xf32>, vector<8x8xf32>, vector<8x8xf32> -> vector<8x8xf32>
    %874 = vector.extract_strided_slice %856 {offsets = [0, 8], sizes = [8, 8], strides = [1, 1]} : vector<16x96xf32> to vector<8x8xf32>
    %875 = vector.extract_strided_slice %856 {offsets = [0, 40], sizes = [8, 8], strides = [1, 1]} : vector<16x96xf32> to vector<8x8xf32>
    %876 = vector.extract_strided_slice %856 {offsets = [0, 72], sizes = [8, 8], strides = [1, 1]} : vector<16x96xf32> to vector<8x8xf32>
    %cst_315 = arith.constant dense<0.000000e+00> : vector<8x8xf32>
    %877 = tpu.matmul %874, %875, %cst_315 {dimension_numbers = #tpu.dot_dimension_numbers<[1], [1], [0], [0], [0, 0, 1, 0], [], []>} : vector<8x8xf32>, vector<8x8xf32>, vector<8x8xf32> -> vector<8x8xf32>
    %cst_316 = arith.constant 0.353553385 : f32
    %878 = vector.broadcast %cst_316 : f32 to vector<8x8xf32>
    %879 = arith.mulf %877, %878 : vector<8x8xf32>
    %cst_317 = arith.constant dense<0xFF800000> : vector<8xf32>
    %880 = vector.multi_reduction <maximumf>, %879, %cst_317 [1] : vector<8x8xf32> to vector<8xf32>
    %881 = vector.shape_cast %880 : vector<8xf32> to vector<8x1xf32>
    %882 = vector.broadcast %881 : vector<8x1xf32> to vector<8x8xf32>
    %883 = arith.subf %879, %882 : vector<8x8xf32>
    %884 = math.exp %883 : vector<8x8xf32>
    %cst_318 = arith.constant dense<0.000000e+00> : vector<8xf32>
    %885 = vector.multi_reduction <add>, %884, %cst_318 [1] : vector<8x8xf32> to vector<8xf32>
    %886 = vector.shape_cast %885 : vector<8xf32> to vector<8x1xf32>
    %887 = tpu.reciprocal %886 {approx = true} : vector<8x1xf32> -> vector<8x1xf32>
    %888 = vector.broadcast %887 : vector<8x1xf32> to vector<8x8xf32>
    %889 = arith.mulf %884, %888 : vector<8x8xf32>
    %cst_319 = arith.constant dense<0.000000e+00> : vector<8x8xf32>
    %890 = tpu.matmul %889, %876, %cst_319 {dimension_numbers = #tpu.dot_dimension_numbers<[1], [0], [0], [1], [0, 0, 1, 1], [], []>} : vector<8x8xf32>, vector<8x8xf32>, vector<8x8xf32> -> vector<8x8xf32>
    %891 = vector.extract_strided_slice %856 {offsets = [0, 16], sizes = [8, 8], strides = [1, 1]} : vector<16x96xf32> to vector<8x8xf32>
    %892 = vector.extract_strided_slice %856 {offsets = [0, 48], sizes = [8, 8], strides = [1, 1]} : vector<16x96xf32> to vector<8x8xf32>
    %893 = vector.extract_strided_slice %856 {offsets = [0, 80], sizes = [8, 8], strides = [1, 1]} : vector<16x96xf32> to vector<8x8xf32>
    %cst_320 = arith.constant dense<0.000000e+00> : vector<8x8xf32>
    %894 = tpu.matmul %891, %892, %cst_320 {dimension_numbers = #tpu.dot_dimension_numbers<[1], [1], [0], [0], [0, 0, 1, 0], [], []>} : vector<8x8xf32>, vector<8x8xf32>, vector<8x8xf32> -> vector<8x8xf32>
    %cst_321 = arith.constant 0.353553385 : f32
    %895 = vector.broadcast %cst_321 : f32 to vector<8x8xf32>
    %896 = arith.mulf %894, %895 : vector<8x8xf32>
    %cst_322 = arith.constant dense<0xFF800000> : vector<8xf32>
    %897 = vector.multi_reduction <maximumf>, %896, %cst_322 [1] : vector<8x8xf32> to vector<8xf32>
    %898 = vector.shape_cast %897 : vector<8xf32> to vector<8x1xf32>
    %899 = vector.broadcast %898 : vector<8x1xf32> to vector<8x8xf32>
    %900 = arith.subf %896, %899 : vector<8x8xf32>
    %901 = math.exp %900 : vector<8x8xf32>
    %cst_323 = arith.constant dense<0.000000e+00> : vector<8xf32>
    %902 = vector.multi_reduction <add>, %901, %cst_323 [1] : vector<8x8xf32> to vector<8xf32>
    %903 = vector.shape_cast %902 : vector<8xf32> to vector<8x1xf32>
    %904 = tpu.reciprocal %903 {approx = true} : vector<8x1xf32> -> vector<8x1xf32>
    %905 = vector.broadcast %904 : vector<8x1xf32> to vector<8x8xf32>
    %906 = arith.mulf %901, %905 : vector<8x8xf32>
    %cst_324 = arith.constant dense<0.000000e+00> : vector<8x8xf32>
    %907 = tpu.matmul %906, %893, %cst_324 {dimension_numbers = #tpu.dot_dimension_numbers<[1], [0], [0], [1], [0, 0, 1, 1], [], []>} : vector<8x8xf32>, vector<8x8xf32>, vector<8x8xf32> -> vector<8x8xf32>
    %908 = vector.extract_strided_slice %856 {offsets = [0, 24], sizes = [8, 8], strides = [1, 1]} : vector<16x96xf32> to vector<8x8xf32>
    %909 = vector.extract_strided_slice %856 {offsets = [0, 56], sizes = [8, 8], strides = [1, 1]} : vector<16x96xf32> to vector<8x8xf32>
    %910 = vector.extract_strided_slice %856 {offsets = [0, 88], sizes = [8, 8], strides = [1, 1]} : vector<16x96xf32> to vector<8x8xf32>
    %cst_325 = arith.constant dense<0.000000e+00> : vector<8x8xf32>
    %911 = tpu.matmul %908, %909, %cst_325 {dimension_numbers = #tpu.dot_dimension_numbers<[1], [1], [0], [0], [0, 0, 1, 0], [], []>} : vector<8x8xf32>, vector<8x8xf32>, vector<8x8xf32> -> vector<8x8xf32>
    %cst_326 = arith.constant 0.353553385 : f32
    %912 = vector.broadcast %cst_326 : f32 to vector<8x8xf32>
    %913 = arith.mulf %911, %912 : vector<8x8xf32>
    %cst_327 = arith.constant dense<0xFF800000> : vector<8xf32>
    %914 = vector.multi_reduction <maximumf>, %913, %cst_327 [1] : vector<8x8xf32> to vector<8xf32>
    %915 = vector.shape_cast %914 : vector<8xf32> to vector<8x1xf32>
    %916 = vector.broadcast %915 : vector<8x1xf32> to vector<8x8xf32>
    %917 = arith.subf %913, %916 : vector<8x8xf32>
    %918 = math.exp %917 : vector<8x8xf32>
    %cst_328 = arith.constant dense<0.000000e+00> : vector<8xf32>
    %919 = vector.multi_reduction <add>, %918, %cst_328 [1] : vector<8x8xf32> to vector<8xf32>
    %920 = vector.shape_cast %919 : vector<8xf32> to vector<8x1xf32>
    %921 = tpu.reciprocal %920 {approx = true} : vector<8x1xf32> -> vector<8x1xf32>
    %922 = vector.broadcast %921 : vector<8x1xf32> to vector<8x8xf32>
    %923 = arith.mulf %918, %922 : vector<8x8xf32>
    %cst_329 = arith.constant dense<0.000000e+00> : vector<8x8xf32>
    %924 = tpu.matmul %923, %910, %cst_329 {dimension_numbers = #tpu.dot_dimension_numbers<[1], [0], [0], [1], [0, 0, 1, 1], [], []>} : vector<8x8xf32>, vector<8x8xf32>, vector<8x8xf32> -> vector<8x8xf32>
    %925 = tpu.concatenate %873, %890, %907, %924 in 1 : vector<8x8xf32>, vector<8x8xf32>, vector<8x8xf32>, vector<8x8xf32> -> vector<8x32xf32>
    %926 = vector.extract_strided_slice %856 {offsets = [8, 0], sizes = [8, 8], strides = [1, 1]} : vector<16x96xf32> to vector<8x8xf32>
    %927 = vector.extract_strided_slice %856 {offsets = [8, 32], sizes = [8, 8], strides = [1, 1]} : vector<16x96xf32> to vector<8x8xf32>
    %928 = vector.extract_strided_slice %856 {offsets = [8, 64], sizes = [8, 8], strides = [1, 1]} : vector<16x96xf32> to vector<8x8xf32>
    %cst_330 = arith.constant dense<0.000000e+00> : vector<8x8xf32>
    %929 = tpu.matmul %926, %927, %cst_330 {dimension_numbers = #tpu.dot_dimension_numbers<[1], [1], [0], [0], [0, 0, 1, 0], [], []>} : vector<8x8xf32>, vector<8x8xf32>, vector<8x8xf32> -> vector<8x8xf32>
    %cst_331 = arith.constant 0.353553385 : f32
    %930 = vector.broadcast %cst_331 : f32 to vector<8x8xf32>
    %931 = arith.mulf %929, %930 : vector<8x8xf32>
    %cst_332 = arith.constant dense<0xFF800000> : vector<8xf32>
    %932 = vector.multi_reduction <maximumf>, %931, %cst_332 [1] : vector<8x8xf32> to vector<8xf32>
    %933 = vector.shape_cast %932 : vector<8xf32> to vector<8x1xf32>
    %934 = vector.broadcast %933 : vector<8x1xf32> to vector<8x8xf32>
    %935 = arith.subf %931, %934 : vector<8x8xf32>
    %936 = math.exp %935 : vector<8x8xf32>
    %cst_333 = arith.constant dense<0.000000e+00> : vector<8xf32>
    %937 = vector.multi_reduction <add>, %936, %cst_333 [1] : vector<8x8xf32> to vector<8xf32>
    %938 = vector.shape_cast %937 : vector<8xf32> to vector<8x1xf32>
    %939 = tpu.reciprocal %938 {approx = true} : vector<8x1xf32> -> vector<8x1xf32>
    %940 = vector.broadcast %939 : vector<8x1xf32> to vector<8x8xf32>
    %941 = arith.mulf %936, %940 : vector<8x8xf32>
    %cst_334 = arith.constant dense<0.000000e+00> : vector<8x8xf32>
    %942 = tpu.matmul %941, %928, %cst_334 {dimension_numbers = #tpu.dot_dimension_numbers<[1], [0], [0], [1], [0, 0, 1, 1], [], []>} : vector<8x8xf32>, vector<8x8xf32>, vector<8x8xf32> -> vector<8x8xf32>
    %943 = vector.extract_strided_slice %856 {offsets = [8, 8], sizes = [8, 8], strides = [1, 1]} : vector<16x96xf32> to vector<8x8xf32>
    %944 = vector.extract_strided_slice %856 {offsets = [8, 40], sizes = [8, 8], strides = [1, 1]} : vector<16x96xf32> to vector<8x8xf32>
    %945 = vector.extract_strided_slice %856 {offsets = [8, 72], sizes = [8, 8], strides = [1, 1]} : vector<16x96xf32> to vector<8x8xf32>
    %cst_335 = arith.constant dense<0.000000e+00> : vector<8x8xf32>
    %946 = tpu.matmul %943, %944, %cst_335 {dimension_numbers = #tpu.dot_dimension_numbers<[1], [1], [0], [0], [0, 0, 1, 0], [], []>} : vector<8x8xf32>, vector<8x8xf32>, vector<8x8xf32> -> vector<8x8xf32>
    %cst_336 = arith.constant 0.353553385 : f32
    %947 = vector.broadcast %cst_336 : f32 to vector<8x8xf32>
    %948 = arith.mulf %946, %947 : vector<8x8xf32>
    %cst_337 = arith.constant dense<0xFF800000> : vector<8xf32>
    %949 = vector.multi_reduction <maximumf>, %948, %cst_337 [1] : vector<8x8xf32> to vector<8xf32>
    %950 = vector.shape_cast %949 : vector<8xf32> to vector<8x1xf32>
    %951 = vector.broadcast %950 : vector<8x1xf32> to vector<8x8xf32>
    %952 = arith.subf %948, %951 : vector<8x8xf32>
    %953 = math.exp %952 : vector<8x8xf32>
    %cst_338 = arith.constant dense<0.000000e+00> : vector<8xf32>
    %954 = vector.multi_reduction <add>, %953, %cst_338 [1] : vector<8x8xf32> to vector<8xf32>
    %955 = vector.shape_cast %954 : vector<8xf32> to vector<8x1xf32>
    %956 = tpu.reciprocal %955 {approx = true} : vector<8x1xf32> -> vector<8x1xf32>
    %957 = vector.broadcast %956 : vector<8x1xf32> to vector<8x8xf32>
    %958 = arith.mulf %953, %957 : vector<8x8xf32>
    %cst_339 = arith.constant dense<0.000000e+00> : vector<8x8xf32>
    %959 = tpu.matmul %958, %945, %cst_339 {dimension_numbers = #tpu.dot_dimension_numbers<[1], [0], [0], [1], [0, 0, 1, 1], [], []>} : vector<8x8xf32>, vector<8x8xf32>, vector<8x8xf32> -> vector<8x8xf32>
    %960 = vector.extract_strided_slice %856 {offsets = [8, 16], sizes = [8, 8], strides = [1, 1]} : vector<16x96xf32> to vector<8x8xf32>
    %961 = vector.extract_strided_slice %856 {offsets = [8, 48], sizes = [8, 8], strides = [1, 1]} : vector<16x96xf32> to vector<8x8xf32>
    %962 = vector.extract_strided_slice %856 {offsets = [8, 80], sizes = [8, 8], strides = [1, 1]} : vector<16x96xf32> to vector<8x8xf32>
    %cst_340 = arith.constant dense<0.000000e+00> : vector<8x8xf32>
    %963 = tpu.matmul %960, %961, %cst_340 {dimension_numbers = #tpu.dot_dimension_numbers<[1], [1], [0], [0], [0, 0, 1, 0], [], []>} : vector<8x8xf32>, vector<8x8xf32>, vector<8x8xf32> -> vector<8x8xf32>
    %cst_341 = arith.constant 0.353553385 : f32
    %964 = vector.broadcast %cst_341 : f32 to vector<8x8xf32>
    %965 = arith.mulf %963, %964 : vector<8x8xf32>
    %cst_342 = arith.constant dense<0xFF800000> : vector<8xf32>
    %966 = vector.multi_reduction <maximumf>, %965, %cst_342 [1] : vector<8x8xf32> to vector<8xf32>
    %967 = vector.shape_cast %966 : vector<8xf32> to vector<8x1xf32>
    %968 = vector.broadcast %967 : vector<8x1xf32> to vector<8x8xf32>
    %969 = arith.subf %965, %968 : vector<8x8xf32>
    %970 = math.exp %969 : vector<8x8xf32>
    %cst_343 = arith.constant dense<0.000000e+00> : vector<8xf32>
    %971 = vector.multi_reduction <add>, %970, %cst_343 [1] : vector<8x8xf32> to vector<8xf32>
    %972 = vector.shape_cast %971 : vector<8xf32> to vector<8x1xf32>
    %973 = tpu.reciprocal %972 {approx = true} : vector<8x1xf32> -> vector<8x1xf32>
    %974 = vector.broadcast %973 : vector<8x1xf32> to vector<8x8xf32>
    %975 = arith.mulf %970, %974 : vector<8x8xf32>
    %cst_344 = arith.constant dense<0.000000e+00> : vector<8x8xf32>
    %976 = tpu.matmul %975, %962, %cst_344 {dimension_numbers = #tpu.dot_dimension_numbers<[1], [0], [0], [1], [0, 0, 1, 1], [], []>} : vector<8x8xf32>, vector<8x8xf32>, vector<8x8xf32> -> vector<8x8xf32>
    %977 = vector.extract_strided_slice %856 {offsets = [8, 24], sizes = [8, 8], strides = [1, 1]} : vector<16x96xf32> to vector<8x8xf32>
    %978 = vector.extract_strided_slice %856 {offsets = [8, 56], sizes = [8, 8], strides = [1, 1]} : vector<16x96xf32> to vector<8x8xf32>
    %979 = vector.extract_strided_slice %856 {offsets = [8, 88], sizes = [8, 8], strides = [1, 1]} : vector<16x96xf32> to vector<8x8xf32>
    %cst_345 = arith.constant dense<0.000000e+00> : vector<8x8xf32>
    %980 = tpu.matmul %977, %978, %cst_345 {dimension_numbers = #tpu.dot_dimension_numbers<[1], [1], [0], [0], [0, 0, 1, 0], [], []>} : vector<8x8xf32>, vector<8x8xf32>, vector<8x8xf32> -> vector<8x8xf32>
    %cst_346 = arith.constant 0.353553385 : f32
    %981 = vector.broadcast %cst_346 : f32 to vector<8x8xf32>
    %982 = arith.mulf %980, %981 : vector<8x8xf32>
    %cst_347 = arith.constant dense<0xFF800000> : vector<8xf32>
    %983 = vector.multi_reduction <maximumf>, %982, %cst_347 [1] : vector<8x8xf32> to vector<8xf32>
    %984 = vector.shape_cast %983 : vector<8xf32> to vector<8x1xf32>
    %985 = vector.broadcast %984 : vector<8x1xf32> to vector<8x8xf32>
    %986 = arith.subf %982, %985 : vector<8x8xf32>
    %987 = math.exp %986 : vector<8x8xf32>
    %cst_348 = arith.constant dense<0.000000e+00> : vector<8xf32>
    %988 = vector.multi_reduction <add>, %987, %cst_348 [1] : vector<8x8xf32> to vector<8xf32>
    %989 = vector.shape_cast %988 : vector<8xf32> to vector<8x1xf32>
    %990 = tpu.reciprocal %989 {approx = true} : vector<8x1xf32> -> vector<8x1xf32>
    %991 = vector.broadcast %990 : vector<8x1xf32> to vector<8x8xf32>
    %992 = arith.mulf %987, %991 : vector<8x8xf32>
    %cst_349 = arith.constant dense<0.000000e+00> : vector<8x8xf32>
    %993 = tpu.matmul %992, %979, %cst_349 {dimension_numbers = #tpu.dot_dimension_numbers<[1], [0], [0], [1], [0, 0, 1, 1], [], []>} : vector<8x8xf32>, vector<8x8xf32>, vector<8x8xf32> -> vector<8x8xf32>
    %994 = tpu.concatenate %942, %959, %976, %993 in 1 : vector<8x8xf32>, vector<8x8xf32>, vector<8x8xf32>, vector<8x8xf32> -> vector<8x32xf32>
    %995 = tpu.concatenate %925, %994 in 0 : vector<8x32xf32>, vector<8x32xf32> -> vector<16x32xf32>
    %c0_350 = arith.constant 0 : index
    %c0_351 = arith.constant 0 : index
    %c0_352 = arith.constant 0 : index
    %996 = vector.load %arg8[%c0_350, %c0_351, %c0_352] : memref<4x32x32xf32, #tpu.memory_space<vmem>>, vector<1x32x32xf32>
    %997 = vector.shape_cast %996 : vector<1x32x32xf32> to vector<32x32xf32>
    %cst_353 = arith.constant dense<0.000000e+00> : vector<16x32xf32>
    %998 = tpu.matmul %995, %997, %cst_353 {dimension_numbers = #tpu.dot_dimension_numbers<[1], [0], [0], [1], [0, 0, 1, 1], [], []>} : vector<16x32xf32>, vector<32x32xf32>, vector<16x32xf32> -> vector<16x32xf32>
    %c0_354 = arith.constant 0 : index
    %c0_355 = arith.constant 0 : index
    %c0_356 = arith.constant 0 : index
    %999 = vector.load %arg9[%c0_354, %c0_355, %c0_356] : memref<4x1x32xf32, #tpu.memory_space<vmem>>, vector<1x1x32xf32>
    %1000 = vector.shape_cast %999 : vector<1x1x32xf32> to vector<1x32xf32>
    %1001 = vector.broadcast %1000 : vector<1x32xf32> to vector<16x32xf32>
    %1002 = arith.addf %998, %1001 : vector<16x32xf32>
    %1003 = arith.addf %1002, %849 : vector<16x32xf32>
    %c0_357 = arith.constant 0 : index
    %c0_358 = arith.constant 0 : index
    %c0_359 = arith.constant 0 : index
    %1004 = vector.load %arg10[%c0_357, %c0_358, %c0_359] : memref<4x1x32xf32, #tpu.memory_space<vmem>>, vector<1x1x32xf32>
    %1005 = vector.shape_cast %1004 : vector<1x1x32xf32> to vector<1x32xf32>
    %c0_360 = arith.constant 0 : index
    %c0_361 = arith.constant 0 : index
    %c0_362 = arith.constant 0 : index
    %1006 = vector.load %arg11[%c0_360, %c0_361, %c0_362] : memref<4x1x32xf32, #tpu.memory_space<vmem>>, vector<1x1x32xf32>
    %1007 = vector.shape_cast %1006 : vector<1x1x32xf32> to vector<1x32xf32>
    %cst_363 = arith.constant dense<0.000000e+00> : vector<16xf32>
    %1008 = vector.multi_reduction <add>, %1003, %cst_363 [1] : vector<16x32xf32> to vector<16xf32>
    %1009 = vector.shape_cast %1008 : vector<16xf32> to vector<16x1xf32>
    %cst_364 = arith.constant 3.200000e+01 : f32
    %1010 = vector.broadcast %cst_364 : f32 to vector<16x1xf32>
    %1011 = arith.divf %1009, %1010 : vector<16x1xf32>
    %1012 = vector.broadcast %1011 : vector<16x1xf32> to vector<16x32xf32>
    %1013 = arith.subf %1003, %1012 : vector<16x32xf32>
    %1014 = arith.mulf %1013, %1013 : vector<16x32xf32>
    %cst_365 = arith.constant dense<0.000000e+00> : vector<16xf32>
    %1015 = vector.multi_reduction <add>, %1014, %cst_365 [1] : vector<16x32xf32> to vector<16xf32>
    %1016 = vector.shape_cast %1015 : vector<16xf32> to vector<16x1xf32>
    %cst_366 = arith.constant 3.200000e+01 : f32
    %1017 = vector.broadcast %cst_366 : f32 to vector<16x1xf32>
    %1018 = arith.divf %1016, %1017 : vector<16x1xf32>
    %1019 = vector.broadcast %1011 : vector<16x1xf32> to vector<16x32xf32>
    %1020 = arith.subf %1003, %1019 : vector<16x32xf32>
    %cst_367 = arith.constant 9.99999996E-13 : f32
    %1021 = vector.broadcast %cst_367 : f32 to vector<16x1xf32>
    %1022 = arith.addf %1018, %1021 : vector<16x1xf32>
    %1023 = math.rsqrt %1022 : vector<16x1xf32>
    %1024 = vector.broadcast %1023 : vector<16x1xf32> to vector<16x32xf32>
    %1025 = arith.mulf %1020, %1024 : vector<16x32xf32>
    %1026 = vector.broadcast %1005 : vector<1x32xf32> to vector<16x32xf32>
    %1027 = arith.mulf %1025, %1026 : vector<16x32xf32>
    %1028 = vector.broadcast %1007 : vector<1x32xf32> to vector<16x32xf32>
    %1029 = arith.addf %1027, %1028 : vector<16x32xf32>
    %c0_368 = arith.constant 0 : index
    %c0_369 = arith.constant 0 : index
    %c0_370 = arith.constant 0 : index
    %1030 = vector.load %arg12[%c0_368, %c0_369, %c0_370] : memref<4x32x64xf32, #tpu.memory_space<vmem>>, vector<1x32x64xf32>
    %1031 = vector.shape_cast %1030 : vector<1x32x64xf32> to vector<32x64xf32>
    %cst_371 = arith.constant dense<0.000000e+00> : vector<16x64xf32>
    %1032 = tpu.matmul %1029, %1031, %cst_371 {dimension_numbers = #tpu.dot_dimension_numbers<[1], [0], [0], [1], [0, 0, 1, 1], [], []>} : vector<16x32xf32>, vector<32x64xf32>, vector<16x64xf32> -> vector<16x64xf32>
    %c0_372 = arith.constant 0 : index
    %c0_373 = arith.constant 0 : index
    %c0_374 = arith.constant 0 : index
    %1033 = vector.load %arg13[%c0_372, %c0_373, %c0_374] : memref<4x1x64xf32, #tpu.memory_space<vmem>>, vector<1x1x64xf32>
    %1034 = vector.shape_cast %1033 : vector<1x1x64xf32> to vector<1x64xf32>
    %1035 = vector.broadcast %1034 : vector<1x64xf32> to vector<16x64xf32>
    %1036 = arith.addf %1032, %1035 : vector<16x64xf32>
    %1037 = arith.mulf %1036, %1036 : vector<16x64xf32>
    %1038 = arith.mulf %1036, %1037 : vector<16x64xf32>
    %cst_375 = arith.constant 4.471500e-02 : f32
    %1039 = vector.broadcast %cst_375 : f32 to vector<16x64xf32>
    %1040 = arith.mulf %1039, %1038 : vector<16x64xf32>
    %1041 = arith.addf %1036, %1040 : vector<16x64xf32>
    %cst_376 = arith.constant 0.797884583 : f32
    %1042 = vector.broadcast %cst_376 : f32 to vector<16x64xf32>
    %1043 = arith.mulf %1042, %1041 : vector<16x64xf32>
    %1044 = math.tanh %1043 : vector<16x64xf32>
    %cst_377 = arith.constant 1.000000e+00 : f32
    %1045 = vector.broadcast %cst_377 : f32 to vector<16x64xf32>
    %1046 = arith.addf %1045, %1044 : vector<16x64xf32>
    %cst_378 = arith.constant 5.000000e-01 : f32
    %1047 = vector.broadcast %cst_378 : f32 to vector<16x64xf32>
    %1048 = arith.mulf %1047, %1046 : vector<16x64xf32>
    %1049 = arith.mulf %1036, %1048 : vector<16x64xf32>
    %c0_379 = arith.constant 0 : index
    %c0_380 = arith.constant 0 : index
    %c0_381 = arith.constant 0 : index
    %1050 = vector.load %arg14[%c0_379, %c0_380, %c0_381] : memref<4x64x32xf32, #tpu.memory_space<vmem>>, vector<1x64x32xf32>
    %1051 = vector.shape_cast %1050 : vector<1x64x32xf32> to vector<64x32xf32>
    %cst_382 = arith.constant dense<0.000000e+00> : vector<16x32xf32>
    %1052 = tpu.matmul %1049, %1051, %cst_382 {dimension_numbers = #tpu.dot_dimension_numbers<[1], [0], [0], [1], [0, 0, 1, 1], [], []>} : vector<16x64xf32>, vector<64x32xf32>, vector<16x32xf32> -> vector<16x32xf32>
    %c0_383 = arith.constant 0 : index
    %c0_384 = arith.constant 0 : index
    %c0_385 = arith.constant 0 : index
    %1053 = vector.load %arg15[%c0_383, %c0_384, %c0_385] : memref<4x1x32xf32, #tpu.memory_space<vmem>>, vector<1x1x32xf32>
    %1054 = vector.shape_cast %1053 : vector<1x1x32xf32> to vector<1x32xf32>
    %1055 = vector.broadcast %1054 : vector<1x32xf32> to vector<16x32xf32>
    %1056 = arith.addf %1052, %1055 : vector<16x32xf32>
    %1057 = arith.addf %1056, %1029 : vector<16x32xf32>
    %c0_386 = arith.constant 0 : index
    %c0_387 = arith.constant 0 : index
    %c0_388 = arith.constant 0 : index
    %1058 = vector.load %arg16[%c0_386, %c0_387, %c0_388] : memref<4x1x32xf32, #tpu.memory_space<vmem>>, vector<1x1x32xf32>
    %1059 = vector.shape_cast %1058 : vector<1x1x32xf32> to vector<1x32xf32>
    %c0_389 = arith.constant 0 : index
    %c0_390 = arith.constant 0 : index
    %c0_391 = arith.constant 0 : index
    %1060 = vector.load %arg17[%c0_389, %c0_390, %c0_391] : memref<4x1x32xf32, #tpu.memory_space<vmem>>, vector<1x1x32xf32>
    %1061 = vector.shape_cast %1060 : vector<1x1x32xf32> to vector<1x32xf32>
    %cst_392 = arith.constant dense<0.000000e+00> : vector<16xf32>
    %1062 = vector.multi_reduction <add>, %1057, %cst_392 [1] : vector<16x32xf32> to vector<16xf32>
    %1063 = vector.shape_cast %1062 : vector<16xf32> to vector<16x1xf32>
    %cst_393 = arith.constant 3.200000e+01 : f32
    %1064 = vector.broadcast %cst_393 : f32 to vector<16x1xf32>
    %1065 = arith.divf %1063, %1064 : vector<16x1xf32>
    %1066 = vector.broadcast %1065 : vector<16x1xf32> to vector<16x32xf32>
    %1067 = arith.subf %1057, %1066 : vector<16x32xf32>
    %1068 = arith.mulf %1067, %1067 : vector<16x32xf32>
    %cst_394 = arith.constant dense<0.000000e+00> : vector<16xf32>
    %1069 = vector.multi_reduction <add>, %1068, %cst_394 [1] : vector<16x32xf32> to vector<16xf32>
    %1070 = vector.shape_cast %1069 : vector<16xf32> to vector<16x1xf32>
    %cst_395 = arith.constant 3.200000e+01 : f32
    %1071 = vector.broadcast %cst_395 : f32 to vector<16x1xf32>
    %1072 = arith.divf %1070, %1071 : vector<16x1xf32>
    %1073 = vector.broadcast %1065 : vector<16x1xf32> to vector<16x32xf32>
    %1074 = arith.subf %1057, %1073 : vector<16x32xf32>
    %cst_396 = arith.constant 9.99999996E-13 : f32
    %1075 = vector.broadcast %cst_396 : f32 to vector<16x1xf32>
    %1076 = arith.addf %1072, %1075 : vector<16x1xf32>
    %1077 = math.rsqrt %1076 : vector<16x1xf32>
    %1078 = vector.broadcast %1077 : vector<16x1xf32> to vector<16x32xf32>
    %1079 = arith.mulf %1074, %1078 : vector<16x32xf32>
    %1080 = vector.broadcast %1059 : vector<1x32xf32> to vector<16x32xf32>
    %1081 = arith.mulf %1079, %1080 : vector<16x32xf32>
    %1082 = vector.broadcast %1061 : vector<1x32xf32> to vector<16x32xf32>
    %1083 = arith.addf %1081, %1082 : vector<16x32xf32>
    %c1_397 = arith.constant 1 : index
    %c0_398 = arith.constant 0 : index
    %c0_399 = arith.constant 0 : index
    %1084 = vector.load %arg6[%c1_397, %c0_398, %c0_399] : memref<4x32x96xf32, #tpu.memory_space<vmem>>, vector<1x32x96xf32>
    %1085 = vector.shape_cast %1084 : vector<1x32x96xf32> to vector<32x96xf32>
    %cst_400 = arith.constant dense<0.000000e+00> : vector<16x96xf32>
    %1086 = tpu.matmul %1083, %1085, %cst_400 {dimension_numbers = #tpu.dot_dimension_numbers<[1], [0], [0], [1], [0, 0, 1, 1], [], []>} : vector<16x32xf32>, vector<32x96xf32>, vector<16x96xf32> -> vector<16x96xf32>
    %c1_401 = arith.constant 1 : index
    %c0_402 = arith.constant 0 : index
    %c0_403 = arith.constant 0 : index
    %1087 = vector.load %arg7[%c1_401, %c0_402, %c0_403] : memref<4x1x96xf32, #tpu.memory_space<vmem>>, vector<1x1x96xf32>
    %1088 = vector.shape_cast %1087 : vector<1x1x96xf32> to vector<1x96xf32>
    %1089 = vector.broadcast %1088 : vector<1x96xf32> to vector<16x96xf32>
    %1090 = arith.addf %1086, %1089 : vector<16x96xf32>
    %1091 = vector.extract_strided_slice %1090 {offsets = [0, 0], sizes = [8, 8], strides = [1, 1]} : vector<16x96xf32> to vector<8x8xf32>
    %1092 = vector.extract_strided_slice %1090 {offsets = [0, 32], sizes = [8, 8], strides = [1, 1]} : vector<16x96xf32> to vector<8x8xf32>
    %1093 = vector.extract_strided_slice %1090 {offsets = [0, 64], sizes = [8, 8], strides = [1, 1]} : vector<16x96xf32> to vector<8x8xf32>
    %cst_404 = arith.constant dense<0.000000e+00> : vector<8x8xf32>
    %1094 = tpu.matmul %1091, %1092, %cst_404 {dimension_numbers = #tpu.dot_dimension_numbers<[1], [1], [0], [0], [0, 0, 1, 0], [], []>} : vector<8x8xf32>, vector<8x8xf32>, vector<8x8xf32> -> vector<8x8xf32>
    %cst_405 = arith.constant 0.353553385 : f32
    %1095 = vector.broadcast %cst_405 : f32 to vector<8x8xf32>
    %1096 = arith.mulf %1094, %1095 : vector<8x8xf32>
    %cst_406 = arith.constant dense<0xFF800000> : vector<8xf32>
    %1097 = vector.multi_reduction <maximumf>, %1096, %cst_406 [1] : vector<8x8xf32> to vector<8xf32>
    %1098 = vector.shape_cast %1097 : vector<8xf32> to vector<8x1xf32>
    %1099 = vector.broadcast %1098 : vector<8x1xf32> to vector<8x8xf32>
    %1100 = arith.subf %1096, %1099 : vector<8x8xf32>
    %1101 = math.exp %1100 : vector<8x8xf32>
    %cst_407 = arith.constant dense<0.000000e+00> : vector<8xf32>
    %1102 = vector.multi_reduction <add>, %1101, %cst_407 [1] : vector<8x8xf32> to vector<8xf32>
    %1103 = vector.shape_cast %1102 : vector<8xf32> to vector<8x1xf32>
    %1104 = tpu.reciprocal %1103 {approx = true} : vector<8x1xf32> -> vector<8x1xf32>
    %1105 = vector.broadcast %1104 : vector<8x1xf32> to vector<8x8xf32>
    %1106 = arith.mulf %1101, %1105 : vector<8x8xf32>
    %cst_408 = arith.constant dense<0.000000e+00> : vector<8x8xf32>
    %1107 = tpu.matmul %1106, %1093, %cst_408 {dimension_numbers = #tpu.dot_dimension_numbers<[1], [0], [0], [1], [0, 0, 1, 1], [], []>} : vector<8x8xf32>, vector<8x8xf32>, vector<8x8xf32> -> vector<8x8xf32>
    %1108 = vector.extract_strided_slice %1090 {offsets = [0, 8], sizes = [8, 8], strides = [1, 1]} : vector<16x96xf32> to vector<8x8xf32>
    %1109 = vector.extract_strided_slice %1090 {offsets = [0, 40], sizes = [8, 8], strides = [1, 1]} : vector<16x96xf32> to vector<8x8xf32>
    %1110 = vector.extract_strided_slice %1090 {offsets = [0, 72], sizes = [8, 8], strides = [1, 1]} : vector<16x96xf32> to vector<8x8xf32>
    %cst_409 = arith.constant dense<0.000000e+00> : vector<8x8xf32>
    %1111 = tpu.matmul %1108, %1109, %cst_409 {dimension_numbers = #tpu.dot_dimension_numbers<[1], [1], [0], [0], [0, 0, 1, 0], [], []>} : vector<8x8xf32>, vector<8x8xf32>, vector<8x8xf32> -> vector<8x8xf32>
    %cst_410 = arith.constant 0.353553385 : f32
    %1112 = vector.broadcast %cst_410 : f32 to vector<8x8xf32>
    %1113 = arith.mulf %1111, %1112 : vector<8x8xf32>
    %cst_411 = arith.constant dense<0xFF800000> : vector<8xf32>
    %1114 = vector.multi_reduction <maximumf>, %1113, %cst_411 [1] : vector<8x8xf32> to vector<8xf32>
    %1115 = vector.shape_cast %1114 : vector<8xf32> to vector<8x1xf32>
    %1116 = vector.broadcast %1115 : vector<8x1xf32> to vector<8x8xf32>
    %1117 = arith.subf %1113, %1116 : vector<8x8xf32>
    %1118 = math.exp %1117 : vector<8x8xf32>
    %cst_412 = arith.constant dense<0.000000e+00> : vector<8xf32>
    %1119 = vector.multi_reduction <add>, %1118, %cst_412 [1] : vector<8x8xf32> to vector<8xf32>
    %1120 = vector.shape_cast %1119 : vector<8xf32> to vector<8x1xf32>
    %1121 = tpu.reciprocal %1120 {approx = true} : vector<8x1xf32> -> vector<8x1xf32>
    %1122 = vector.broadcast %1121 : vector<8x1xf32> to vector<8x8xf32>
    %1123 = arith.mulf %1118, %1122 : vector<8x8xf32>
    %cst_413 = arith.constant dense<0.000000e+00> : vector<8x8xf32>
    %1124 = tpu.matmul %1123, %1110, %cst_413 {dimension_numbers = #tpu.dot_dimension_numbers<[1], [0], [0], [1], [0, 0, 1, 1], [], []>} : vector<8x8xf32>, vector<8x8xf32>, vector<8x8xf32> -> vector<8x8xf32>
    %1125 = vector.extract_strided_slice %1090 {offsets = [0, 16], sizes = [8, 8], strides = [1, 1]} : vector<16x96xf32> to vector<8x8xf32>
    %1126 = vector.extract_strided_slice %1090 {offsets = [0, 48], sizes = [8, 8], strides = [1, 1]} : vector<16x96xf32> to vector<8x8xf32>
    %1127 = vector.extract_strided_slice %1090 {offsets = [0, 80], sizes = [8, 8], strides = [1, 1]} : vector<16x96xf32> to vector<8x8xf32>
    %cst_414 = arith.constant dense<0.000000e+00> : vector<8x8xf32>
    %1128 = tpu.matmul %1125, %1126, %cst_414 {dimension_numbers = #tpu.dot_dimension_numbers<[1], [1], [0], [0], [0, 0, 1, 0], [], []>} : vector<8x8xf32>, vector<8x8xf32>, vector<8x8xf32> -> vector<8x8xf32>
    %cst_415 = arith.constant 0.353553385 : f32
    %1129 = vector.broadcast %cst_415 : f32 to vector<8x8xf32>
    %1130 = arith.mulf %1128, %1129 : vector<8x8xf32>
    %cst_416 = arith.constant dense<0xFF800000> : vector<8xf32>
    %1131 = vector.multi_reduction <maximumf>, %1130, %cst_416 [1] : vector<8x8xf32> to vector<8xf32>
    %1132 = vector.shape_cast %1131 : vector<8xf32> to vector<8x1xf32>
    %1133 = vector.broadcast %1132 : vector<8x1xf32> to vector<8x8xf32>
    %1134 = arith.subf %1130, %1133 : vector<8x8xf32>
    %1135 = math.exp %1134 : vector<8x8xf32>
    %cst_417 = arith.constant dense<0.000000e+00> : vector<8xf32>
    %1136 = vector.multi_reduction <add>, %1135, %cst_417 [1] : vector<8x8xf32> to vector<8xf32>
    %1137 = vector.shape_cast %1136 : vector<8xf32> to vector<8x1xf32>
    %1138 = tpu.reciprocal %1137 {approx = true} : vector<8x1xf32> -> vector<8x1xf32>
    %1139 = vector.broadcast %1138 : vector<8x1xf32> to vector<8x8xf32>
    %1140 = arith.mulf %1135, %1139 : vector<8x8xf32>
    %cst_418 = arith.constant dense<0.000000e+00> : vector<8x8xf32>
    %1141 = tpu.matmul %1140, %1127, %cst_418 {dimension_numbers = #tpu.dot_dimension_numbers<[1], [0], [0], [1], [0, 0, 1, 1], [], []>} : vector<8x8xf32>, vector<8x8xf32>, vector<8x8xf32> -> vector<8x8xf32>
    %1142 = vector.extract_strided_slice %1090 {offsets = [0, 24], sizes = [8, 8], strides = [1, 1]} : vector<16x96xf32> to vector<8x8xf32>
    %1143 = vector.extract_strided_slice %1090 {offsets = [0, 56], sizes = [8, 8], strides = [1, 1]} : vector<16x96xf32> to vector<8x8xf32>
    %1144 = vector.extract_strided_slice %1090 {offsets = [0, 88], sizes = [8, 8], strides = [1, 1]} : vector<16x96xf32> to vector<8x8xf32>
    %cst_419 = arith.constant dense<0.000000e+00> : vector<8x8xf32>
    %1145 = tpu.matmul %1142, %1143, %cst_419 {dimension_numbers = #tpu.dot_dimension_numbers<[1], [1], [0], [0], [0, 0, 1, 0], [], []>} : vector<8x8xf32>, vector<8x8xf32>, vector<8x8xf32> -> vector<8x8xf32>
    %cst_420 = arith.constant 0.353553385 : f32
    %1146 = vector.broadcast %cst_420 : f32 to vector<8x8xf32>
    %1147 = arith.mulf %1145, %1146 : vector<8x8xf32>
    %cst_421 = arith.constant dense<0xFF800000> : vector<8xf32>
    %1148 = vector.multi_reduction <maximumf>, %1147, %cst_421 [1] : vector<8x8xf32> to vector<8xf32>
    %1149 = vector.shape_cast %1148 : vector<8xf32> to vector<8x1xf32>
    %1150 = vector.broadcast %1149 : vector<8x1xf32> to vector<8x8xf32>
    %1151 = arith.subf %1147, %1150 : vector<8x8xf32>
    %1152 = math.exp %1151 : vector<8x8xf32>
    %cst_422 = arith.constant dense<0.000000e+00> : vector<8xf32>
    %1153 = vector.multi_reduction <add>, %1152, %cst_422 [1] : vector<8x8xf32> to vector<8xf32>
    %1154 = vector.shape_cast %1153 : vector<8xf32> to vector<8x1xf32>
    %1155 = tpu.reciprocal %1154 {approx = true} : vector<8x1xf32> -> vector<8x1xf32>
    %1156 = vector.broadcast %1155 : vector<8x1xf32> to vector<8x8xf32>
    %1157 = arith.mulf %1152, %1156 : vector<8x8xf32>
    %cst_423 = arith.constant dense<0.000000e+00> : vector<8x8xf32>
    %1158 = tpu.matmul %1157, %1144, %cst_423 {dimension_numbers = #tpu.dot_dimension_numbers<[1], [0], [0], [1], [0, 0, 1, 1], [], []>} : vector<8x8xf32>, vector<8x8xf32>, vector<8x8xf32> -> vector<8x8xf32>
    %1159 = tpu.concatenate %1107, %1124, %1141, %1158 in 1 : vector<8x8xf32>, vector<8x8xf32>, vector<8x8xf32>, vector<8x8xf32> -> vector<8x32xf32>
    %1160 = vector.extract_strided_slice %1090 {offsets = [8, 0], sizes = [8, 8], strides = [1, 1]} : vector<16x96xf32> to vector<8x8xf32>
    %1161 = vector.extract_strided_slice %1090 {offsets = [8, 32], sizes = [8, 8], strides = [1, 1]} : vector<16x96xf32> to vector<8x8xf32>
    %1162 = vector.extract_strided_slice %1090 {offsets = [8, 64], sizes = [8, 8], strides = [1, 1]} : vector<16x96xf32> to vector<8x8xf32>
    %cst_424 = arith.constant dense<0.000000e+00> : vector<8x8xf32>
    %1163 = tpu.matmul %1160, %1161, %cst_424 {dimension_numbers = #tpu.dot_dimension_numbers<[1], [1], [0], [0], [0, 0, 1, 0], [], []>} : vector<8x8xf32>, vector<8x8xf32>, vector<8x8xf32> -> vector<8x8xf32>
    %cst_425 = arith.constant 0.353553385 : f32
    %1164 = vector.broadcast %cst_425 : f32 to vector<8x8xf32>
    %1165 = arith.mulf %1163, %1164 : vector<8x8xf32>
    %cst_426 = arith.constant dense<0xFF800000> : vector<8xf32>
    %1166 = vector.multi_reduction <maximumf>, %1165, %cst_426 [1] : vector<8x8xf32> to vector<8xf32>
    %1167 = vector.shape_cast %1166 : vector<8xf32> to vector<8x1xf32>
    %1168 = vector.broadcast %1167 : vector<8x1xf32> to vector<8x8xf32>
    %1169 = arith.subf %1165, %1168 : vector<8x8xf32>
    %1170 = math.exp %1169 : vector<8x8xf32>
    %cst_427 = arith.constant dense<0.000000e+00> : vector<8xf32>
    %1171 = vector.multi_reduction <add>, %1170, %cst_427 [1] : vector<8x8xf32> to vector<8xf32>
    %1172 = vector.shape_cast %1171 : vector<8xf32> to vector<8x1xf32>
    %1173 = tpu.reciprocal %1172 {approx = true} : vector<8x1xf32> -> vector<8x1xf32>
    %1174 = vector.broadcast %1173 : vector<8x1xf32> to vector<8x8xf32>
    %1175 = arith.mulf %1170, %1174 : vector<8x8xf32>
    %cst_428 = arith.constant dense<0.000000e+00> : vector<8x8xf32>
    %1176 = tpu.matmul %1175, %1162, %cst_428 {dimension_numbers = #tpu.dot_dimension_numbers<[1], [0], [0], [1], [0, 0, 1, 1], [], []>} : vector<8x8xf32>, vector<8x8xf32>, vector<8x8xf32> -> vector<8x8xf32>
    %1177 = vector.extract_strided_slice %1090 {offsets = [8, 8], sizes = [8, 8], strides = [1, 1]} : vector<16x96xf32> to vector<8x8xf32>
    %1178 = vector.extract_strided_slice %1090 {offsets = [8, 40], sizes = [8, 8], strides = [1, 1]} : vector<16x96xf32> to vector<8x8xf32>
    %1179 = vector.extract_strided_slice %1090 {offsets = [8, 72], sizes = [8, 8], strides = [1, 1]} : vector<16x96xf32> to vector<8x8xf32>
    %cst_429 = arith.constant dense<0.000000e+00> : vector<8x8xf32>
    %1180 = tpu.matmul %1177, %1178, %cst_429 {dimension_numbers = #tpu.dot_dimension_numbers<[1], [1], [0], [0], [0, 0, 1, 0], [], []>} : vector<8x8xf32>, vector<8x8xf32>, vector<8x8xf32> -> vector<8x8xf32>
    %cst_430 = arith.constant 0.353553385 : f32
    %1181 = vector.broadcast %cst_430 : f32 to vector<8x8xf32>
    %1182 = arith.mulf %1180, %1181 : vector<8x8xf32>
    %cst_431 = arith.constant dense<0xFF800000> : vector<8xf32>
    %1183 = vector.multi_reduction <maximumf>, %1182, %cst_431 [1] : vector<8x8xf32> to vector<8xf32>
    %1184 = vector.shape_cast %1183 : vector<8xf32> to vector<8x1xf32>
    %1185 = vector.broadcast %1184 : vector<8x1xf32> to vector<8x8xf32>
    %1186 = arith.subf %1182, %1185 : vector<8x8xf32>
    %1187 = math.exp %1186 : vector<8x8xf32>
    %cst_432 = arith.constant dense<0.000000e+00> : vector<8xf32>
    %1188 = vector.multi_reduction <add>, %1187, %cst_432 [1] : vector<8x8xf32> to vector<8xf32>
    %1189 = vector.shape_cast %1188 : vector<8xf32> to vector<8x1xf32>
    %1190 = tpu.reciprocal %1189 {approx = true} : vector<8x1xf32> -> vector<8x1xf32>
    %1191 = vector.broadcast %1190 : vector<8x1xf32> to vector<8x8xf32>
    %1192 = arith.mulf %1187, %1191 : vector<8x8xf32>
    %cst_433 = arith.constant dense<0.000000e+00> : vector<8x8xf32>
    %1193 = tpu.matmul %1192, %1179, %cst_433 {dimension_numbers = #tpu.dot_dimension_numbers<[1], [0], [0], [1], [0, 0, 1, 1], [], []>} : vector<8x8xf32>, vector<8x8xf32>, vector<8x8xf32> -> vector<8x8xf32>
    %1194 = vector.extract_strided_slice %1090 {offsets = [8, 16], sizes = [8, 8], strides = [1, 1]} : vector<16x96xf32> to vector<8x8xf32>
    %1195 = vector.extract_strided_slice %1090 {offsets = [8, 48], sizes = [8, 8], strides = [1, 1]} : vector<16x96xf32> to vector<8x8xf32>
    %1196 = vector.extract_strided_slice %1090 {offsets = [8, 80], sizes = [8, 8], strides = [1, 1]} : vector<16x96xf32> to vector<8x8xf32>
    %cst_434 = arith.constant dense<0.000000e+00> : vector<8x8xf32>
    %1197 = tpu.matmul %1194, %1195, %cst_434 {dimension_numbers = #tpu.dot_dimension_numbers<[1], [1], [0], [0], [0, 0, 1, 0], [], []>} : vector<8x8xf32>, vector<8x8xf32>, vector<8x8xf32> -> vector<8x8xf32>
    %cst_435 = arith.constant 0.353553385 : f32
    %1198 = vector.broadcast %cst_435 : f32 to vector<8x8xf32>
    %1199 = arith.mulf %1197, %1198 : vector<8x8xf32>
    %cst_436 = arith.constant dense<0xFF800000> : vector<8xf32>
    %1200 = vector.multi_reduction <maximumf>, %1199, %cst_436 [1] : vector<8x8xf32> to vector<8xf32>
    %1201 = vector.shape_cast %1200 : vector<8xf32> to vector<8x1xf32>
    %1202 = vector.broadcast %1201 : vector<8x1xf32> to vector<8x8xf32>
    %1203 = arith.subf %1199, %1202 : vector<8x8xf32>
    %1204 = math.exp %1203 : vector<8x8xf32>
    %cst_437 = arith.constant dense<0.000000e+00> : vector<8xf32>
    %1205 = vector.multi_reduction <add>, %1204, %cst_437 [1] : vector<8x8xf32> to vector<8xf32>
    %1206 = vector.shape_cast %1205 : vector<8xf32> to vector<8x1xf32>
    %1207 = tpu.reciprocal %1206 {approx = true} : vector<8x1xf32> -> vector<8x1xf32>
    %1208 = vector.broadcast %1207 : vector<8x1xf32> to vector<8x8xf32>
    %1209 = arith.mulf %1204, %1208 : vector<8x8xf32>
    %cst_438 = arith.constant dense<0.000000e+00> : vector<8x8xf32>
    %1210 = tpu.matmul %1209, %1196, %cst_438 {dimension_numbers = #tpu.dot_dimension_numbers<[1], [0], [0], [1], [0, 0, 1, 1], [], []>} : vector<8x8xf32>, vector<8x8xf32>, vector<8x8xf32> -> vector<8x8xf32>
    %1211 = vector.extract_strided_slice %1090 {offsets = [8, 24], sizes = [8, 8], strides = [1, 1]} : vector<16x96xf32> to vector<8x8xf32>
    %1212 = vector.extract_strided_slice %1090 {offsets = [8, 56], sizes = [8, 8], strides = [1, 1]} : vector<16x96xf32> to vector<8x8xf32>
    %1213 = vector.extract_strided_slice %1090 {offsets = [8, 88], sizes = [8, 8], strides = [1, 1]} : vector<16x96xf32> to vector<8x8xf32>
    %cst_439 = arith.constant dense<0.000000e+00> : vector<8x8xf32>
    %1214 = tpu.matmul %1211, %1212, %cst_439 {dimension_numbers = #tpu.dot_dimension_numbers<[1], [1], [0], [0], [0, 0, 1, 0], [], []>} : vector<8x8xf32>, vector<8x8xf32>, vector<8x8xf32> -> vector<8x8xf32>
    %cst_440 = arith.constant 0.353553385 : f32
    %1215 = vector.broadcast %cst_440 : f32 to vector<8x8xf32>
    %1216 = arith.mulf %1214, %1215 : vector<8x8xf32>
    %cst_441 = arith.constant dense<0xFF800000> : vector<8xf32>
    %1217 = vector.multi_reduction <maximumf>, %1216, %cst_441 [1] : vector<8x8xf32> to vector<8xf32>
    %1218 = vector.shape_cast %1217 : vector<8xf32> to vector<8x1xf32>
    %1219 = vector.broadcast %1218 : vector<8x1xf32> to vector<8x8xf32>
    %1220 = arith.subf %1216, %1219 : vector<8x8xf32>
    %1221 = math.exp %1220 : vector<8x8xf32>
    %cst_442 = arith.constant dense<0.000000e+00> : vector<8xf32>
    %1222 = vector.multi_reduction <add>, %1221, %cst_442 [1] : vector<8x8xf32> to vector<8xf32>
    %1223 = vector.shape_cast %1222 : vector<8xf32> to vector<8x1xf32>
    %1224 = tpu.reciprocal %1223 {approx = true} : vector<8x1xf32> -> vector<8x1xf32>
    %1225 = vector.broadcast %1224 : vector<8x1xf32> to vector<8x8xf32>
    %1226 = arith.mulf %1221, %1225 : vector<8x8xf32>
    %cst_443 = arith.constant dense<0.000000e+00> : vector<8x8xf32>
    %1227 = tpu.matmul %1226, %1213, %cst_443 {dimension_numbers = #tpu.dot_dimension_numbers<[1], [0], [0], [1], [0, 0, 1, 1], [], []>} : vector<8x8xf32>, vector<8x8xf32>, vector<8x8xf32> -> vector<8x8xf32>
    %1228 = tpu.concatenate %1176, %1193, %1210, %1227 in 1 : vector<8x8xf32>, vector<8x8xf32>, vector<8x8xf32>, vector<8x8xf32> -> vector<8x32xf32>
    %1229 = tpu.concatenate %1159, %1228 in 0 : vector<8x32xf32>, vector<8x32xf32> -> vector<16x32xf32>
    %c1_444 = arith.constant 1 : index
    %c0_445 = arith.constant 0 : index
    %c0_446 = arith.constant 0 : index
    %1230 = vector.load %arg8[%c1_444, %c0_445, %c0_446] : memref<4x32x32xf32, #tpu.memory_space<vmem>>, vector<1x32x32xf32>
    %1231 = vector.shape_cast %1230 : vector<1x32x32xf32> to vector<32x32xf32>
    %cst_447 = arith.constant dense<0.000000e+00> : vector<16x32xf32>
    %1232 = tpu.matmul %1229, %1231, %cst_447 {dimension_numbers = #tpu.dot_dimension_numbers<[1], [0], [0], [1], [0, 0, 1, 1], [], []>} : vector<16x32xf32>, vector<32x32xf32>, vector<16x32xf32> -> vector<16x32xf32>
    %c1_448 = arith.constant 1 : index
    %c0_449 = arith.constant 0 : index
    %c0_450 = arith.constant 0 : index
    %1233 = vector.load %arg9[%c1_448, %c0_449, %c0_450] : memref<4x1x32xf32, #tpu.memory_space<vmem>>, vector<1x1x32xf32>
    %1234 = vector.shape_cast %1233 : vector<1x1x32xf32> to vector<1x32xf32>
    %1235 = vector.broadcast %1234 : vector<1x32xf32> to vector<16x32xf32>
    %1236 = arith.addf %1232, %1235 : vector<16x32xf32>
    %1237 = arith.addf %1236, %1083 : vector<16x32xf32>
    %c1_451 = arith.constant 1 : index
    %c0_452 = arith.constant 0 : index
    %c0_453 = arith.constant 0 : index
    %1238 = vector.load %arg10[%c1_451, %c0_452, %c0_453] : memref<4x1x32xf32, #tpu.memory_space<vmem>>, vector<1x1x32xf32>
    %1239 = vector.shape_cast %1238 : vector<1x1x32xf32> to vector<1x32xf32>
    %c1_454 = arith.constant 1 : index
    %c0_455 = arith.constant 0 : index
    %c0_456 = arith.constant 0 : index
    %1240 = vector.load %arg11[%c1_454, %c0_455, %c0_456] : memref<4x1x32xf32, #tpu.memory_space<vmem>>, vector<1x1x32xf32>
    %1241 = vector.shape_cast %1240 : vector<1x1x32xf32> to vector<1x32xf32>
    %cst_457 = arith.constant dense<0.000000e+00> : vector<16xf32>
    %1242 = vector.multi_reduction <add>, %1237, %cst_457 [1] : vector<16x32xf32> to vector<16xf32>
    %1243 = vector.shape_cast %1242 : vector<16xf32> to vector<16x1xf32>
    %cst_458 = arith.constant 3.200000e+01 : f32
    %1244 = vector.broadcast %cst_458 : f32 to vector<16x1xf32>
    %1245 = arith.divf %1243, %1244 : vector<16x1xf32>
    %1246 = vector.broadcast %1245 : vector<16x1xf32> to vector<16x32xf32>
    %1247 = arith.subf %1237, %1246 : vector<16x32xf32>
    %1248 = arith.mulf %1247, %1247 : vector<16x32xf32>
    %cst_459 = arith.constant dense<0.000000e+00> : vector<16xf32>
    %1249 = vector.multi_reduction <add>, %1248, %cst_459 [1] : vector<16x32xf32> to vector<16xf32>
    %1250 = vector.shape_cast %1249 : vector<16xf32> to vector<16x1xf32>
    %cst_460 = arith.constant 3.200000e+01 : f32
    %1251 = vector.broadcast %cst_460 : f32 to vector<16x1xf32>
    %1252 = arith.divf %1250, %1251 : vector<16x1xf32>
    %1253 = vector.broadcast %1245 : vector<16x1xf32> to vector<16x32xf32>
    %1254 = arith.subf %1237, %1253 : vector<16x32xf32>
    %cst_461 = arith.constant 9.99999996E-13 : f32
    %1255 = vector.broadcast %cst_461 : f32 to vector<16x1xf32>
    %1256 = arith.addf %1252, %1255 : vector<16x1xf32>
    %1257 = math.rsqrt %1256 : vector<16x1xf32>
    %1258 = vector.broadcast %1257 : vector<16x1xf32> to vector<16x32xf32>
    %1259 = arith.mulf %1254, %1258 : vector<16x32xf32>
    %1260 = vector.broadcast %1239 : vector<1x32xf32> to vector<16x32xf32>
    %1261 = arith.mulf %1259, %1260 : vector<16x32xf32>
    %1262 = vector.broadcast %1241 : vector<1x32xf32> to vector<16x32xf32>
    %1263 = arith.addf %1261, %1262 : vector<16x32xf32>
    %c1_462 = arith.constant 1 : index
    %c0_463 = arith.constant 0 : index
    %c0_464 = arith.constant 0 : index
    %1264 = vector.load %arg12[%c1_462, %c0_463, %c0_464] : memref<4x32x64xf32, #tpu.memory_space<vmem>>, vector<1x32x64xf32>
    %1265 = vector.shape_cast %1264 : vector<1x32x64xf32> to vector<32x64xf32>
    %cst_465 = arith.constant dense<0.000000e+00> : vector<16x64xf32>
    %1266 = tpu.matmul %1263, %1265, %cst_465 {dimension_numbers = #tpu.dot_dimension_numbers<[1], [0], [0], [1], [0, 0, 1, 1], [], []>} : vector<16x32xf32>, vector<32x64xf32>, vector<16x64xf32> -> vector<16x64xf32>
    %c1_466 = arith.constant 1 : index
    %c0_467 = arith.constant 0 : index
    %c0_468 = arith.constant 0 : index
    %1267 = vector.load %arg13[%c1_466, %c0_467, %c0_468] : memref<4x1x64xf32, #tpu.memory_space<vmem>>, vector<1x1x64xf32>
    %1268 = vector.shape_cast %1267 : vector<1x1x64xf32> to vector<1x64xf32>
    %1269 = vector.broadcast %1268 : vector<1x64xf32> to vector<16x64xf32>
    %1270 = arith.addf %1266, %1269 : vector<16x64xf32>
    %1271 = arith.mulf %1270, %1270 : vector<16x64xf32>
    %1272 = arith.mulf %1270, %1271 : vector<16x64xf32>
    %cst_469 = arith.constant 4.471500e-02 : f32
    %1273 = vector.broadcast %cst_469 : f32 to vector<16x64xf32>
    %1274 = arith.mulf %1273, %1272 : vector<16x64xf32>
    %1275 = arith.addf %1270, %1274 : vector<16x64xf32>
    %cst_470 = arith.constant 0.797884583 : f32
    %1276 = vector.broadcast %cst_470 : f32 to vector<16x64xf32>
    %1277 = arith.mulf %1276, %1275 : vector<16x64xf32>
    %1278 = math.tanh %1277 : vector<16x64xf32>
    %cst_471 = arith.constant 1.000000e+00 : f32
    %1279 = vector.broadcast %cst_471 : f32 to vector<16x64xf32>
    %1280 = arith.addf %1279, %1278 : vector<16x64xf32>
    %cst_472 = arith.constant 5.000000e-01 : f32
    %1281 = vector.broadcast %cst_472 : f32 to vector<16x64xf32>
    %1282 = arith.mulf %1281, %1280 : vector<16x64xf32>
    %1283 = arith.mulf %1270, %1282 : vector<16x64xf32>
    %c1_473 = arith.constant 1 : index
    %c0_474 = arith.constant 0 : index
    %c0_475 = arith.constant 0 : index
    %1284 = vector.load %arg14[%c1_473, %c0_474, %c0_475] : memref<4x64x32xf32, #tpu.memory_space<vmem>>, vector<1x64x32xf32>
    %1285 = vector.shape_cast %1284 : vector<1x64x32xf32> to vector<64x32xf32>
    %cst_476 = arith.constant dense<0.000000e+00> : vector<16x32xf32>
    %1286 = tpu.matmul %1283, %1285, %cst_476 {dimension_numbers = #tpu.dot_dimension_numbers<[1], [0], [0], [1], [0, 0, 1, 1], [], []>} : vector<16x64xf32>, vector<64x32xf32>, vector<16x32xf32> -> vector<16x32xf32>
    %c1_477 = arith.constant 1 : index
    %c0_478 = arith.constant 0 : index
    %c0_479 = arith.constant 0 : index
    %1287 = vector.load %arg15[%c1_477, %c0_478, %c0_479] : memref<4x1x32xf32, #tpu.memory_space<vmem>>, vector<1x1x32xf32>
    %1288 = vector.shape_cast %1287 : vector<1x1x32xf32> to vector<1x32xf32>
    %1289 = vector.broadcast %1288 : vector<1x32xf32> to vector<16x32xf32>
    %1290 = arith.addf %1286, %1289 : vector<16x32xf32>
    %1291 = arith.addf %1290, %1263 : vector<16x32xf32>
    %c1_480 = arith.constant 1 : index
    %c0_481 = arith.constant 0 : index
    %c0_482 = arith.constant 0 : index
    %1292 = vector.load %arg16[%c1_480, %c0_481, %c0_482] : memref<4x1x32xf32, #tpu.memory_space<vmem>>, vector<1x1x32xf32>
    %1293 = vector.shape_cast %1292 : vector<1x1x32xf32> to vector<1x32xf32>
    %c1_483 = arith.constant 1 : index
    %c0_484 = arith.constant 0 : index
    %c0_485 = arith.constant 0 : index
    %1294 = vector.load %arg17[%c1_483, %c0_484, %c0_485] : memref<4x1x32xf32, #tpu.memory_space<vmem>>, vector<1x1x32xf32>
    %1295 = vector.shape_cast %1294 : vector<1x1x32xf32> to vector<1x32xf32>
    %cst_486 = arith.constant dense<0.000000e+00> : vector<16xf32>
    %1296 = vector.multi_reduction <add>, %1291, %cst_486 [1] : vector<16x32xf32> to vector<16xf32>
    %1297 = vector.shape_cast %1296 : vector<16xf32> to vector<16x1xf32>
    %cst_487 = arith.constant 3.200000e+01 : f32
    %1298 = vector.broadcast %cst_487 : f32 to vector<16x1xf32>
    %1299 = arith.divf %1297, %1298 : vector<16x1xf32>
    %1300 = vector.broadcast %1299 : vector<16x1xf32> to vector<16x32xf32>
    %1301 = arith.subf %1291, %1300 : vector<16x32xf32>
    %1302 = arith.mulf %1301, %1301 : vector<16x32xf32>
    %cst_488 = arith.constant dense<0.000000e+00> : vector<16xf32>
    %1303 = vector.multi_reduction <add>, %1302, %cst_488 [1] : vector<16x32xf32> to vector<16xf32>
    %1304 = vector.shape_cast %1303 : vector<16xf32> to vector<16x1xf32>
    %cst_489 = arith.constant 3.200000e+01 : f32
    %1305 = vector.broadcast %cst_489 : f32 to vector<16x1xf32>
    %1306 = arith.divf %1304, %1305 : vector<16x1xf32>
    %1307 = vector.broadcast %1299 : vector<16x1xf32> to vector<16x32xf32>
    %1308 = arith.subf %1291, %1307 : vector<16x32xf32>
    %cst_490 = arith.constant 9.99999996E-13 : f32
    %1309 = vector.broadcast %cst_490 : f32 to vector<16x1xf32>
    %1310 = arith.addf %1306, %1309 : vector<16x1xf32>
    %1311 = math.rsqrt %1310 : vector<16x1xf32>
    %1312 = vector.broadcast %1311 : vector<16x1xf32> to vector<16x32xf32>
    %1313 = arith.mulf %1308, %1312 : vector<16x32xf32>
    %1314 = vector.broadcast %1293 : vector<1x32xf32> to vector<16x32xf32>
    %1315 = arith.mulf %1313, %1314 : vector<16x32xf32>
    %1316 = vector.broadcast %1295 : vector<1x32xf32> to vector<16x32xf32>
    %1317 = arith.addf %1315, %1316 : vector<16x32xf32>
    %c2_491 = arith.constant 2 : index
    %c0_492 = arith.constant 0 : index
    %c0_493 = arith.constant 0 : index
    %1318 = vector.load %arg6[%c2_491, %c0_492, %c0_493] : memref<4x32x96xf32, #tpu.memory_space<vmem>>, vector<1x32x96xf32>
    %1319 = vector.shape_cast %1318 : vector<1x32x96xf32> to vector<32x96xf32>
    %cst_494 = arith.constant dense<0.000000e+00> : vector<16x96xf32>
    %1320 = tpu.matmul %1317, %1319, %cst_494 {dimension_numbers = #tpu.dot_dimension_numbers<[1], [0], [0], [1], [0, 0, 1, 1], [], []>} : vector<16x32xf32>, vector<32x96xf32>, vector<16x96xf32> -> vector<16x96xf32>
    %c2_495 = arith.constant 2 : index
    %c0_496 = arith.constant 0 : index
    %c0_497 = arith.constant 0 : index
    %1321 = vector.load %arg7[%c2_495, %c0_496, %c0_497] : memref<4x1x96xf32, #tpu.memory_space<vmem>>, vector<1x1x96xf32>
    %1322 = vector.shape_cast %1321 : vector<1x1x96xf32> to vector<1x96xf32>
    %1323 = vector.broadcast %1322 : vector<1x96xf32> to vector<16x96xf32>
    %1324 = arith.addf %1320, %1323 : vector<16x96xf32>
    %1325 = vector.extract_strided_slice %1324 {offsets = [0, 0], sizes = [8, 8], strides = [1, 1]} : vector<16x96xf32> to vector<8x8xf32>
    %1326 = vector.extract_strided_slice %1324 {offsets = [0, 32], sizes = [8, 8], strides = [1, 1]} : vector<16x96xf32> to vector<8x8xf32>
    %1327 = vector.extract_strided_slice %1324 {offsets = [0, 64], sizes = [8, 8], strides = [1, 1]} : vector<16x96xf32> to vector<8x8xf32>
    %cst_498 = arith.constant dense<0.000000e+00> : vector<8x8xf32>
    %1328 = tpu.matmul %1325, %1326, %cst_498 {dimension_numbers = #tpu.dot_dimension_numbers<[1], [1], [0], [0], [0, 0, 1, 0], [], []>} : vector<8x8xf32>, vector<8x8xf32>, vector<8x8xf32> -> vector<8x8xf32>
    %cst_499 = arith.constant 0.353553385 : f32
    %1329 = vector.broadcast %cst_499 : f32 to vector<8x8xf32>
    %1330 = arith.mulf %1328, %1329 : vector<8x8xf32>
    %cst_500 = arith.constant dense<0xFF800000> : vector<8xf32>
    %1331 = vector.multi_reduction <maximumf>, %1330, %cst_500 [1] : vector<8x8xf32> to vector<8xf32>
    %1332 = vector.shape_cast %1331 : vector<8xf32> to vector<8x1xf32>
    %1333 = vector.broadcast %1332 : vector<8x1xf32> to vector<8x8xf32>
    %1334 = arith.subf %1330, %1333 : vector<8x8xf32>
    %1335 = math.exp %1334 : vector<8x8xf32>
    %cst_501 = arith.constant dense<0.000000e+00> : vector<8xf32>
    %1336 = vector.multi_reduction <add>, %1335, %cst_501 [1] : vector<8x8xf32> to vector<8xf32>
    %1337 = vector.shape_cast %1336 : vector<8xf32> to vector<8x1xf32>
    %1338 = tpu.reciprocal %1337 {approx = true} : vector<8x1xf32> -> vector<8x1xf32>
    %1339 = vector.broadcast %1338 : vector<8x1xf32> to vector<8x8xf32>
    %1340 = arith.mulf %1335, %1339 : vector<8x8xf32>
    %cst_502 = arith.constant dense<0.000000e+00> : vector<8x8xf32>
    %1341 = tpu.matmul %1340, %1327, %cst_502 {dimension_numbers = #tpu.dot_dimension_numbers<[1], [0], [0], [1], [0, 0, 1, 1], [], []>} : vector<8x8xf32>, vector<8x8xf32>, vector<8x8xf32> -> vector<8x8xf32>
    %1342 = vector.extract_strided_slice %1324 {offsets = [0, 8], sizes = [8, 8], strides = [1, 1]} : vector<16x96xf32> to vector<8x8xf32>
    %1343 = vector.extract_strided_slice %1324 {offsets = [0, 40], sizes = [8, 8], strides = [1, 1]} : vector<16x96xf32> to vector<8x8xf32>
    %1344 = vector.extract_strided_slice %1324 {offsets = [0, 72], sizes = [8, 8], strides = [1, 1]} : vector<16x96xf32> to vector<8x8xf32>
    %cst_503 = arith.constant dense<0.000000e+00> : vector<8x8xf32>
    %1345 = tpu.matmul %1342, %1343, %cst_503 {dimension_numbers = #tpu.dot_dimension_numbers<[1], [1], [0], [0], [0, 0, 1, 0], [], []>} : vector<8x8xf32>, vector<8x8xf32>, vector<8x8xf32> -> vector<8x8xf32>
    %cst_504 = arith.constant 0.353553385 : f32
    %1346 = vector.broadcast %cst_504 : f32 to vector<8x8xf32>
    %1347 = arith.mulf %1345, %1346 : vector<8x8xf32>
    %cst_505 = arith.constant dense<0xFF800000> : vector<8xf32>
    %1348 = vector.multi_reduction <maximumf>, %1347, %cst_505 [1] : vector<8x8xf32> to vector<8xf32>
    %1349 = vector.shape_cast %1348 : vector<8xf32> to vector<8x1xf32>
    %1350 = vector.broadcast %1349 : vector<8x1xf32> to vector<8x8xf32>
    %1351 = arith.subf %1347, %1350 : vector<8x8xf32>
    %1352 = math.exp %1351 : vector<8x8xf32>
    %cst_506 = arith.constant dense<0.000000e+00> : vector<8xf32>
    %1353 = vector.multi_reduction <add>, %1352, %cst_506 [1] : vector<8x8xf32> to vector<8xf32>
    %1354 = vector.shape_cast %1353 : vector<8xf32> to vector<8x1xf32>
    %1355 = tpu.reciprocal %1354 {approx = true} : vector<8x1xf32> -> vector<8x1xf32>
    %1356 = vector.broadcast %1355 : vector<8x1xf32> to vector<8x8xf32>
    %1357 = arith.mulf %1352, %1356 : vector<8x8xf32>
    %cst_507 = arith.constant dense<0.000000e+00> : vector<8x8xf32>
    %1358 = tpu.matmul %1357, %1344, %cst_507 {dimension_numbers = #tpu.dot_dimension_numbers<[1], [0], [0], [1], [0, 0, 1, 1], [], []>} : vector<8x8xf32>, vector<8x8xf32>, vector<8x8xf32> -> vector<8x8xf32>
    %1359 = vector.extract_strided_slice %1324 {offsets = [0, 16], sizes = [8, 8], strides = [1, 1]} : vector<16x96xf32> to vector<8x8xf32>
    %1360 = vector.extract_strided_slice %1324 {offsets = [0, 48], sizes = [8, 8], strides = [1, 1]} : vector<16x96xf32> to vector<8x8xf32>
    %1361 = vector.extract_strided_slice %1324 {offsets = [0, 80], sizes = [8, 8], strides = [1, 1]} : vector<16x96xf32> to vector<8x8xf32>
    %cst_508 = arith.constant dense<0.000000e+00> : vector<8x8xf32>
    %1362 = tpu.matmul %1359, %1360, %cst_508 {dimension_numbers = #tpu.dot_dimension_numbers<[1], [1], [0], [0], [0, 0, 1, 0], [], []>} : vector<8x8xf32>, vector<8x8xf32>, vector<8x8xf32> -> vector<8x8xf32>
    %cst_509 = arith.constant 0.353553385 : f32
    %1363 = vector.broadcast %cst_509 : f32 to vector<8x8xf32>
    %1364 = arith.mulf %1362, %1363 : vector<8x8xf32>
    %cst_510 = arith.constant dense<0xFF800000> : vector<8xf32>
    %1365 = vector.multi_reduction <maximumf>, %1364, %cst_510 [1] : vector<8x8xf32> to vector<8xf32>
    %1366 = vector.shape_cast %1365 : vector<8xf32> to vector<8x1xf32>
    %1367 = vector.broadcast %1366 : vector<8x1xf32> to vector<8x8xf32>
    %1368 = arith.subf %1364, %1367 : vector<8x8xf32>
    %1369 = math.exp %1368 : vector<8x8xf32>
    %cst_511 = arith.constant dense<0.000000e+00> : vector<8xf32>
    %1370 = vector.multi_reduction <add>, %1369, %cst_511 [1] : vector<8x8xf32> to vector<8xf32>
    %1371 = vector.shape_cast %1370 : vector<8xf32> to vector<8x1xf32>
    %1372 = tpu.reciprocal %1371 {approx = true} : vector<8x1xf32> -> vector<8x1xf32>
    %1373 = vector.broadcast %1372 : vector<8x1xf32> to vector<8x8xf32>
    %1374 = arith.mulf %1369, %1373 : vector<8x8xf32>
    %cst_512 = arith.constant dense<0.000000e+00> : vector<8x8xf32>
    %1375 = tpu.matmul %1374, %1361, %cst_512 {dimension_numbers = #tpu.dot_dimension_numbers<[1], [0], [0], [1], [0, 0, 1, 1], [], []>} : vector<8x8xf32>, vector<8x8xf32>, vector<8x8xf32> -> vector<8x8xf32>
    %1376 = vector.extract_strided_slice %1324 {offsets = [0, 24], sizes = [8, 8], strides = [1, 1]} : vector<16x96xf32> to vector<8x8xf32>
    %1377 = vector.extract_strided_slice %1324 {offsets = [0, 56], sizes = [8, 8], strides = [1, 1]} : vector<16x96xf32> to vector<8x8xf32>
    %1378 = vector.extract_strided_slice %1324 {offsets = [0, 88], sizes = [8, 8], strides = [1, 1]} : vector<16x96xf32> to vector<8x8xf32>
    %cst_513 = arith.constant dense<0.000000e+00> : vector<8x8xf32>
    %1379 = tpu.matmul %1376, %1377, %cst_513 {dimension_numbers = #tpu.dot_dimension_numbers<[1], [1], [0], [0], [0, 0, 1, 0], [], []>} : vector<8x8xf32>, vector<8x8xf32>, vector<8x8xf32> -> vector<8x8xf32>
    %cst_514 = arith.constant 0.353553385 : f32
    %1380 = vector.broadcast %cst_514 : f32 to vector<8x8xf32>
    %1381 = arith.mulf %1379, %1380 : vector<8x8xf32>
    %cst_515 = arith.constant dense<0xFF800000> : vector<8xf32>
    %1382 = vector.multi_reduction <maximumf>, %1381, %cst_515 [1] : vector<8x8xf32> to vector<8xf32>
    %1383 = vector.shape_cast %1382 : vector<8xf32> to vector<8x1xf32>
    %1384 = vector.broadcast %1383 : vector<8x1xf32> to vector<8x8xf32>
    %1385 = arith.subf %1381, %1384 : vector<8x8xf32>
    %1386 = math.exp %1385 : vector<8x8xf32>
    %cst_516 = arith.constant dense<0.000000e+00> : vector<8xf32>
    %1387 = vector.multi_reduction <add>, %1386, %cst_516 [1] : vector<8x8xf32> to vector<8xf32>
    %1388 = vector.shape_cast %1387 : vector<8xf32> to vector<8x1xf32>
    %1389 = tpu.reciprocal %1388 {approx = true} : vector<8x1xf32> -> vector<8x1xf32>
    %1390 = vector.broadcast %1389 : vector<8x1xf32> to vector<8x8xf32>
    %1391 = arith.mulf %1386, %1390 : vector<8x8xf32>
    %cst_517 = arith.constant dense<0.000000e+00> : vector<8x8xf32>
    %1392 = tpu.matmul %1391, %1378, %cst_517 {dimension_numbers = #tpu.dot_dimension_numbers<[1], [0], [0], [1], [0, 0, 1, 1], [], []>} : vector<8x8xf32>, vector<8x8xf32>, vector<8x8xf32> -> vector<8x8xf32>
    %1393 = tpu.concatenate %1341, %1358, %1375, %1392 in 1 : vector<8x8xf32>, vector<8x8xf32>, vector<8x8xf32>, vector<8x8xf32> -> vector<8x32xf32>
    %1394 = vector.extract_strided_slice %1324 {offsets = [8, 0], sizes = [8, 8], strides = [1, 1]} : vector<16x96xf32> to vector<8x8xf32>
    %1395 = vector.extract_strided_slice %1324 {offsets = [8, 32], sizes = [8, 8], strides = [1, 1]} : vector<16x96xf32> to vector<8x8xf32>
    %1396 = vector.extract_strided_slice %1324 {offsets = [8, 64], sizes = [8, 8], strides = [1, 1]} : vector<16x96xf32> to vector<8x8xf32>
    %cst_518 = arith.constant dense<0.000000e+00> : vector<8x8xf32>
    %1397 = tpu.matmul %1394, %1395, %cst_518 {dimension_numbers = #tpu.dot_dimension_numbers<[1], [1], [0], [0], [0, 0, 1, 0], [], []>} : vector<8x8xf32>, vector<8x8xf32>, vector<8x8xf32> -> vector<8x8xf32>
    %cst_519 = arith.constant 0.353553385 : f32
    %1398 = vector.broadcast %cst_519 : f32 to vector<8x8xf32>
    %1399 = arith.mulf %1397, %1398 : vector<8x8xf32>
    %cst_520 = arith.constant dense<0xFF800000> : vector<8xf32>
    %1400 = vector.multi_reduction <maximumf>, %1399, %cst_520 [1] : vector<8x8xf32> to vector<8xf32>
    %1401 = vector.shape_cast %1400 : vector<8xf32> to vector<8x1xf32>
    %1402 = vector.broadcast %1401 : vector<8x1xf32> to vector<8x8xf32>
    %1403 = arith.subf %1399, %1402 : vector<8x8xf32>
    %1404 = math.exp %1403 : vector<8x8xf32>
    %cst_521 = arith.constant dense<0.000000e+00> : vector<8xf32>
    %1405 = vector.multi_reduction <add>, %1404, %cst_521 [1] : vector<8x8xf32> to vector<8xf32>
    %1406 = vector.shape_cast %1405 : vector<8xf32> to vector<8x1xf32>
    %1407 = tpu.reciprocal %1406 {approx = true} : vector<8x1xf32> -> vector<8x1xf32>
    %1408 = vector.broadcast %1407 : vector<8x1xf32> to vector<8x8xf32>
    %1409 = arith.mulf %1404, %1408 : vector<8x8xf32>
    %cst_522 = arith.constant dense<0.000000e+00> : vector<8x8xf32>
    %1410 = tpu.matmul %1409, %1396, %cst_522 {dimension_numbers = #tpu.dot_dimension_numbers<[1], [0], [0], [1], [0, 0, 1, 1], [], []>} : vector<8x8xf32>, vector<8x8xf32>, vector<8x8xf32> -> vector<8x8xf32>
    %1411 = vector.extract_strided_slice %1324 {offsets = [8, 8], sizes = [8, 8], strides = [1, 1]} : vector<16x96xf32> to vector<8x8xf32>
    %1412 = vector.extract_strided_slice %1324 {offsets = [8, 40], sizes = [8, 8], strides = [1, 1]} : vector<16x96xf32> to vector<8x8xf32>
    %1413 = vector.extract_strided_slice %1324 {offsets = [8, 72], sizes = [8, 8], strides = [1, 1]} : vector<16x96xf32> to vector<8x8xf32>
    %cst_523 = arith.constant dense<0.000000e+00> : vector<8x8xf32>
    %1414 = tpu.matmul %1411, %1412, %cst_523 {dimension_numbers = #tpu.dot_dimension_numbers<[1], [1], [0], [0], [0, 0, 1, 0], [], []>} : vector<8x8xf32>, vector<8x8xf32>, vector<8x8xf32> -> vector<8x8xf32>
    %cst_524 = arith.constant 0.353553385 : f32
    %1415 = vector.broadcast %cst_524 : f32 to vector<8x8xf32>
    %1416 = arith.mulf %1414, %1415 : vector<8x8xf32>
    %cst_525 = arith.constant dense<0xFF800000> : vector<8xf32>
    %1417 = vector.multi_reduction <maximumf>, %1416, %cst_525 [1] : vector<8x8xf32> to vector<8xf32>
    %1418 = vector.shape_cast %1417 : vector<8xf32> to vector<8x1xf32>
    %1419 = vector.broadcast %1418 : vector<8x1xf32> to vector<8x8xf32>
    %1420 = arith.subf %1416, %1419 : vector<8x8xf32>
    %1421 = math.exp %1420 : vector<8x8xf32>
    %cst_526 = arith.constant dense<0.000000e+00> : vector<8xf32>
    %1422 = vector.multi_reduction <add>, %1421, %cst_526 [1] : vector<8x8xf32> to vector<8xf32>
    %1423 = vector.shape_cast %1422 : vector<8xf32> to vector<8x1xf32>
    %1424 = tpu.reciprocal %1423 {approx = true} : vector<8x1xf32> -> vector<8x1xf32>
    %1425 = vector.broadcast %1424 : vector<8x1xf32> to vector<8x8xf32>
    %1426 = arith.mulf %1421, %1425 : vector<8x8xf32>
    %cst_527 = arith.constant dense<0.000000e+00> : vector<8x8xf32>
    %1427 = tpu.matmul %1426, %1413, %cst_527 {dimension_numbers = #tpu.dot_dimension_numbers<[1], [0], [0], [1], [0, 0, 1, 1], [], []>} : vector<8x8xf32>, vector<8x8xf32>, vector<8x8xf32> -> vector<8x8xf32>
    %1428 = vector.extract_strided_slice %1324 {offsets = [8, 16], sizes = [8, 8], strides = [1, 1]} : vector<16x96xf32> to vector<8x8xf32>
    %1429 = vector.extract_strided_slice %1324 {offsets = [8, 48], sizes = [8, 8], strides = [1, 1]} : vector<16x96xf32> to vector<8x8xf32>
    %1430 = vector.extract_strided_slice %1324 {offsets = [8, 80], sizes = [8, 8], strides = [1, 1]} : vector<16x96xf32> to vector<8x8xf32>
    %cst_528 = arith.constant dense<0.000000e+00> : vector<8x8xf32>
    %1431 = tpu.matmul %1428, %1429, %cst_528 {dimension_numbers = #tpu.dot_dimension_numbers<[1], [1], [0], [0], [0, 0, 1, 0], [], []>} : vector<8x8xf32>, vector<8x8xf32>, vector<8x8xf32> -> vector<8x8xf32>
    %cst_529 = arith.constant 0.353553385 : f32
    %1432 = vector.broadcast %cst_529 : f32 to vector<8x8xf32>
    %1433 = arith.mulf %1431, %1432 : vector<8x8xf32>
    %cst_530 = arith.constant dense<0xFF800000> : vector<8xf32>
    %1434 = vector.multi_reduction <maximumf>, %1433, %cst_530 [1] : vector<8x8xf32> to vector<8xf32>
    %1435 = vector.shape_cast %1434 : vector<8xf32> to vector<8x1xf32>
    %1436 = vector.broadcast %1435 : vector<8x1xf32> to vector<8x8xf32>
    %1437 = arith.subf %1433, %1436 : vector<8x8xf32>
    %1438 = math.exp %1437 : vector<8x8xf32>
    %cst_531 = arith.constant dense<0.000000e+00> : vector<8xf32>
    %1439 = vector.multi_reduction <add>, %1438, %cst_531 [1] : vector<8x8xf32> to vector<8xf32>
    %1440 = vector.shape_cast %1439 : vector<8xf32> to vector<8x1xf32>
    %1441 = tpu.reciprocal %1440 {approx = true} : vector<8x1xf32> -> vector<8x1xf32>
    %1442 = vector.broadcast %1441 : vector<8x1xf32> to vector<8x8xf32>
    %1443 = arith.mulf %1438, %1442 : vector<8x8xf32>
    %cst_532 = arith.constant dense<0.000000e+00> : vector<8x8xf32>
    %1444 = tpu.matmul %1443, %1430, %cst_532 {dimension_numbers = #tpu.dot_dimension_numbers<[1], [0], [0], [1], [0, 0, 1, 1], [], []>} : vector<8x8xf32>, vector<8x8xf32>, vector<8x8xf32> -> vector<8x8xf32>
    %1445 = vector.extract_strided_slice %1324 {offsets = [8, 24], sizes = [8, 8], strides = [1, 1]} : vector<16x96xf32> to vector<8x8xf32>
    %1446 = vector.extract_strided_slice %1324 {offsets = [8, 56], sizes = [8, 8], strides = [1, 1]} : vector<16x96xf32> to vector<8x8xf32>
    %1447 = vector.extract_strided_slice %1324 {offsets = [8, 88], sizes = [8, 8], strides = [1, 1]} : vector<16x96xf32> to vector<8x8xf32>
    %cst_533 = arith.constant dense<0.000000e+00> : vector<8x8xf32>
    %1448 = tpu.matmul %1445, %1446, %cst_533 {dimension_numbers = #tpu.dot_dimension_numbers<[1], [1], [0], [0], [0, 0, 1, 0], [], []>} : vector<8x8xf32>, vector<8x8xf32>, vector<8x8xf32> -> vector<8x8xf32>
    %cst_534 = arith.constant 0.353553385 : f32
    %1449 = vector.broadcast %cst_534 : f32 to vector<8x8xf32>
    %1450 = arith.mulf %1448, %1449 : vector<8x8xf32>
    %cst_535 = arith.constant dense<0xFF800000> : vector<8xf32>
    %1451 = vector.multi_reduction <maximumf>, %1450, %cst_535 [1] : vector<8x8xf32> to vector<8xf32>
    %1452 = vector.shape_cast %1451 : vector<8xf32> to vector<8x1xf32>
    %1453 = vector.broadcast %1452 : vector<8x1xf32> to vector<8x8xf32>
    %1454 = arith.subf %1450, %1453 : vector<8x8xf32>
    %1455 = math.exp %1454 : vector<8x8xf32>
    %cst_536 = arith.constant dense<0.000000e+00> : vector<8xf32>
    %1456 = vector.multi_reduction <add>, %1455, %cst_536 [1] : vector<8x8xf32> to vector<8xf32>
    %1457 = vector.shape_cast %1456 : vector<8xf32> to vector<8x1xf32>
    %1458 = tpu.reciprocal %1457 {approx = true} : vector<8x1xf32> -> vector<8x1xf32>
    %1459 = vector.broadcast %1458 : vector<8x1xf32> to vector<8x8xf32>
    %1460 = arith.mulf %1455, %1459 : vector<8x8xf32>
    %cst_537 = arith.constant dense<0.000000e+00> : vector<8x8xf32>
    %1461 = tpu.matmul %1460, %1447, %cst_537 {dimension_numbers = #tpu.dot_dimension_numbers<[1], [0], [0], [1], [0, 0, 1, 1], [], []>} : vector<8x8xf32>, vector<8x8xf32>, vector<8x8xf32> -> vector<8x8xf32>
    %1462 = tpu.concatenate %1410, %1427, %1444, %1461 in 1 : vector<8x8xf32>, vector<8x8xf32>, vector<8x8xf32>, vector<8x8xf32> -> vector<8x32xf32>
    %1463 = tpu.concatenate %1393, %1462 in 0 : vector<8x32xf32>, vector<8x32xf32> -> vector<16x32xf32>
    %c2_538 = arith.constant 2 : index
    %c0_539 = arith.constant 0 : index
    %c0_540 = arith.constant 0 : index
    %1464 = vector.load %arg8[%c2_538, %c0_539, %c0_540] : memref<4x32x32xf32, #tpu.memory_space<vmem>>, vector<1x32x32xf32>
    %1465 = vector.shape_cast %1464 : vector<1x32x32xf32> to vector<32x32xf32>
    %cst_541 = arith.constant dense<0.000000e+00> : vector<16x32xf32>
    %1466 = tpu.matmul %1463, %1465, %cst_541 {dimension_numbers = #tpu.dot_dimension_numbers<[1], [0], [0], [1], [0, 0, 1, 1], [], []>} : vector<16x32xf32>, vector<32x32xf32>, vector<16x32xf32> -> vector<16x32xf32>
    %c2_542 = arith.constant 2 : index
    %c0_543 = arith.constant 0 : index
    %c0_544 = arith.constant 0 : index
    %1467 = vector.load %arg9[%c2_542, %c0_543, %c0_544] : memref<4x1x32xf32, #tpu.memory_space<vmem>>, vector<1x1x32xf32>
    %1468 = vector.shape_cast %1467 : vector<1x1x32xf32> to vector<1x32xf32>
    %1469 = vector.broadcast %1468 : vector<1x32xf32> to vector<16x32xf32>
    %1470 = arith.addf %1466, %1469 : vector<16x32xf32>
    %1471 = arith.addf %1470, %1317 : vector<16x32xf32>
    %c2_545 = arith.constant 2 : index
    %c0_546 = arith.constant 0 : index
    %c0_547 = arith.constant 0 : index
    %1472 = vector.load %arg10[%c2_545, %c0_546, %c0_547] : memref<4x1x32xf32, #tpu.memory_space<vmem>>, vector<1x1x32xf32>
    %1473 = vector.shape_cast %1472 : vector<1x1x32xf32> to vector<1x32xf32>
    %c2_548 = arith.constant 2 : index
    %c0_549 = arith.constant 0 : index
    %c0_550 = arith.constant 0 : index
    %1474 = vector.load %arg11[%c2_548, %c0_549, %c0_550] : memref<4x1x32xf32, #tpu.memory_space<vmem>>, vector<1x1x32xf32>
    %1475 = vector.shape_cast %1474 : vector<1x1x32xf32> to vector<1x32xf32>
    %cst_551 = arith.constant dense<0.000000e+00> : vector<16xf32>
    %1476 = vector.multi_reduction <add>, %1471, %cst_551 [1] : vector<16x32xf32> to vector<16xf32>
    %1477 = vector.shape_cast %1476 : vector<16xf32> to vector<16x1xf32>
    %cst_552 = arith.constant 3.200000e+01 : f32
    %1478 = vector.broadcast %cst_552 : f32 to vector<16x1xf32>
    %1479 = arith.divf %1477, %1478 : vector<16x1xf32>
    %1480 = vector.broadcast %1479 : vector<16x1xf32> to vector<16x32xf32>
    %1481 = arith.subf %1471, %1480 : vector<16x32xf32>
    %1482 = arith.mulf %1481, %1481 : vector<16x32xf32>
    %cst_553 = arith.constant dense<0.000000e+00> : vector<16xf32>
    %1483 = vector.multi_reduction <add>, %1482, %cst_553 [1] : vector<16x32xf32> to vector<16xf32>
    %1484 = vector.shape_cast %1483 : vector<16xf32> to vector<16x1xf32>
    %cst_554 = arith.constant 3.200000e+01 : f32
    %1485 = vector.broadcast %cst_554 : f32 to vector<16x1xf32>
    %1486 = arith.divf %1484, %1485 : vector<16x1xf32>
    %1487 = vector.broadcast %1479 : vector<16x1xf32> to vector<16x32xf32>
    %1488 = arith.subf %1471, %1487 : vector<16x32xf32>
    %cst_555 = arith.constant 9.99999996E-13 : f32
    %1489 = vector.broadcast %cst_555 : f32 to vector<16x1xf32>
    %1490 = arith.addf %1486, %1489 : vector<16x1xf32>
    %1491 = math.rsqrt %1490 : vector<16x1xf32>
    %1492 = vector.broadcast %1491 : vector<16x1xf32> to vector<16x32xf32>
    %1493 = arith.mulf %1488, %1492 : vector<16x32xf32>
    %1494 = vector.broadcast %1473 : vector<1x32xf32> to vector<16x32xf32>
    %1495 = arith.mulf %1493, %1494 : vector<16x32xf32>
    %1496 = vector.broadcast %1475 : vector<1x32xf32> to vector<16x32xf32>
    %1497 = arith.addf %1495, %1496 : vector<16x32xf32>
    %c2_556 = arith.constant 2 : index
    %c0_557 = arith.constant 0 : index
    %c0_558 = arith.constant 0 : index
    %1498 = vector.load %arg12[%c2_556, %c0_557, %c0_558] : memref<4x32x64xf32, #tpu.memory_space<vmem>>, vector<1x32x64xf32>
    %1499 = vector.shape_cast %1498 : vector<1x32x64xf32> to vector<32x64xf32>
    %cst_559 = arith.constant dense<0.000000e+00> : vector<16x64xf32>
    %1500 = tpu.matmul %1497, %1499, %cst_559 {dimension_numbers = #tpu.dot_dimension_numbers<[1], [0], [0], [1], [0, 0, 1, 1], [], []>} : vector<16x32xf32>, vector<32x64xf32>, vector<16x64xf32> -> vector<16x64xf32>
    %c2_560 = arith.constant 2 : index
    %c0_561 = arith.constant 0 : index
    %c0_562 = arith.constant 0 : index
    %1501 = vector.load %arg13[%c2_560, %c0_561, %c0_562] : memref<4x1x64xf32, #tpu.memory_space<vmem>>, vector<1x1x64xf32>
    %1502 = vector.shape_cast %1501 : vector<1x1x64xf32> to vector<1x64xf32>
    %1503 = vector.broadcast %1502 : vector<1x64xf32> to vector<16x64xf32>
    %1504 = arith.addf %1500, %1503 : vector<16x64xf32>
    %1505 = arith.mulf %1504, %1504 : vector<16x64xf32>
    %1506 = arith.mulf %1504, %1505 : vector<16x64xf32>
    %cst_563 = arith.constant 4.471500e-02 : f32
    %1507 = vector.broadcast %cst_563 : f32 to vector<16x64xf32>
    %1508 = arith.mulf %1507, %1506 : vector<16x64xf32>
    %1509 = arith.addf %1504, %1508 : vector<16x64xf32>
    %cst_564 = arith.constant 0.797884583 : f32
    %1510 = vector.broadcast %cst_564 : f32 to vector<16x64xf32>
    %1511 = arith.mulf %1510, %1509 : vector<16x64xf32>
    %1512 = math.tanh %1511 : vector<16x64xf32>
    %cst_565 = arith.constant 1.000000e+00 : f32
    %1513 = vector.broadcast %cst_565 : f32 to vector<16x64xf32>
    %1514 = arith.addf %1513, %1512 : vector<16x64xf32>
    %cst_566 = arith.constant 5.000000e-01 : f32
    %1515 = vector.broadcast %cst_566 : f32 to vector<16x64xf32>
    %1516 = arith.mulf %1515, %1514 : vector<16x64xf32>
    %1517 = arith.mulf %1504, %1516 : vector<16x64xf32>
    %c2_567 = arith.constant 2 : index
    %c0_568 = arith.constant 0 : index
    %c0_569 = arith.constant 0 : index
    %1518 = vector.load %arg14[%c2_567, %c0_568, %c0_569] : memref<4x64x32xf32, #tpu.memory_space<vmem>>, vector<1x64x32xf32>
    %1519 = vector.shape_cast %1518 : vector<1x64x32xf32> to vector<64x32xf32>
    %cst_570 = arith.constant dense<0.000000e+00> : vector<16x32xf32>
    %1520 = tpu.matmul %1517, %1519, %cst_570 {dimension_numbers = #tpu.dot_dimension_numbers<[1], [0], [0], [1], [0, 0, 1, 1], [], []>} : vector<16x64xf32>, vector<64x32xf32>, vector<16x32xf32> -> vector<16x32xf32>
    %c2_571 = arith.constant 2 : index
    %c0_572 = arith.constant 0 : index
    %c0_573 = arith.constant 0 : index
    %1521 = vector.load %arg15[%c2_571, %c0_572, %c0_573] : memref<4x1x32xf32, #tpu.memory_space<vmem>>, vector<1x1x32xf32>
    %1522 = vector.shape_cast %1521 : vector<1x1x32xf32> to vector<1x32xf32>
    %1523 = vector.broadcast %1522 : vector<1x32xf32> to vector<16x32xf32>
    %1524 = arith.addf %1520, %1523 : vector<16x32xf32>
    %1525 = arith.addf %1524, %1497 : vector<16x32xf32>
    %c2_574 = arith.constant 2 : index
    %c0_575 = arith.constant 0 : index
    %c0_576 = arith.constant 0 : index
    %1526 = vector.load %arg16[%c2_574, %c0_575, %c0_576] : memref<4x1x32xf32, #tpu.memory_space<vmem>>, vector<1x1x32xf32>
    %1527 = vector.shape_cast %1526 : vector<1x1x32xf32> to vector<1x32xf32>
    %c2_577 = arith.constant 2 : index
    %c0_578 = arith.constant 0 : index
    %c0_579 = arith.constant 0 : index
    %1528 = vector.load %arg17[%c2_577, %c0_578, %c0_579] : memref<4x1x32xf32, #tpu.memory_space<vmem>>, vector<1x1x32xf32>
    %1529 = vector.shape_cast %1528 : vector<1x1x32xf32> to vector<1x32xf32>
    %cst_580 = arith.constant dense<0.000000e+00> : vector<16xf32>
    %1530 = vector.multi_reduction <add>, %1525, %cst_580 [1] : vector<16x32xf32> to vector<16xf32>
    %1531 = vector.shape_cast %1530 : vector<16xf32> to vector<16x1xf32>
    %cst_581 = arith.constant 3.200000e+01 : f32
    %1532 = vector.broadcast %cst_581 : f32 to vector<16x1xf32>
    %1533 = arith.divf %1531, %1532 : vector<16x1xf32>
    %1534 = vector.broadcast %1533 : vector<16x1xf32> to vector<16x32xf32>
    %1535 = arith.subf %1525, %1534 : vector<16x32xf32>
    %1536 = arith.mulf %1535, %1535 : vector<16x32xf32>
    %cst_582 = arith.constant dense<0.000000e+00> : vector<16xf32>
    %1537 = vector.multi_reduction <add>, %1536, %cst_582 [1] : vector<16x32xf32> to vector<16xf32>
    %1538 = vector.shape_cast %1537 : vector<16xf32> to vector<16x1xf32>
    %cst_583 = arith.constant 3.200000e+01 : f32
    %1539 = vector.broadcast %cst_583 : f32 to vector<16x1xf32>
    %1540 = arith.divf %1538, %1539 : vector<16x1xf32>
    %1541 = vector.broadcast %1533 : vector<16x1xf32> to vector<16x32xf32>
    %1542 = arith.subf %1525, %1541 : vector<16x32xf32>
    %cst_584 = arith.constant 9.99999996E-13 : f32
    %1543 = vector.broadcast %cst_584 : f32 to vector<16x1xf32>
    %1544 = arith.addf %1540, %1543 : vector<16x1xf32>
    %1545 = math.rsqrt %1544 : vector<16x1xf32>
    %1546 = vector.broadcast %1545 : vector<16x1xf32> to vector<16x32xf32>
    %1547 = arith.mulf %1542, %1546 : vector<16x32xf32>
    %1548 = vector.broadcast %1527 : vector<1x32xf32> to vector<16x32xf32>
    %1549 = arith.mulf %1547, %1548 : vector<16x32xf32>
    %1550 = vector.broadcast %1529 : vector<1x32xf32> to vector<16x32xf32>
    %1551 = arith.addf %1549, %1550 : vector<16x32xf32>
    %c3 = arith.constant 3 : index
    %c0_585 = arith.constant 0 : index
    %c0_586 = arith.constant 0 : index
    %1552 = vector.load %arg6[%c3, %c0_585, %c0_586] : memref<4x32x96xf32, #tpu.memory_space<vmem>>, vector<1x32x96xf32>
    %1553 = vector.shape_cast %1552 : vector<1x32x96xf32> to vector<32x96xf32>
    %cst_587 = arith.constant dense<0.000000e+00> : vector<16x96xf32>
    %1554 = tpu.matmul %1551, %1553, %cst_587 {dimension_numbers = #tpu.dot_dimension_numbers<[1], [0], [0], [1], [0, 0, 1, 1], [], []>} : vector<16x32xf32>, vector<32x96xf32>, vector<16x96xf32> -> vector<16x96xf32>
    %c3_588 = arith.constant 3 : index
    %c0_589 = arith.constant 0 : index
    %c0_590 = arith.constant 0 : index
    %1555 = vector.load %arg7[%c3_588, %c0_589, %c0_590] : memref<4x1x96xf32, #tpu.memory_space<vmem>>, vector<1x1x96xf32>
    %1556 = vector.shape_cast %1555 : vector<1x1x96xf32> to vector<1x96xf32>
    %1557 = vector.broadcast %1556 : vector<1x96xf32> to vector<16x96xf32>
    %1558 = arith.addf %1554, %1557 : vector<16x96xf32>
    %1559 = vector.extract_strided_slice %1558 {offsets = [0, 0], sizes = [8, 8], strides = [1, 1]} : vector<16x96xf32> to vector<8x8xf32>
    %1560 = vector.extract_strided_slice %1558 {offsets = [0, 32], sizes = [8, 8], strides = [1, 1]} : vector<16x96xf32> to vector<8x8xf32>
    %1561 = vector.extract_strided_slice %1558 {offsets = [0, 64], sizes = [8, 8], strides = [1, 1]} : vector<16x96xf32> to vector<8x8xf32>
    %cst_591 = arith.constant dense<0.000000e+00> : vector<8x8xf32>
    %1562 = tpu.matmul %1559, %1560, %cst_591 {dimension_numbers = #tpu.dot_dimension_numbers<[1], [1], [0], [0], [0, 0, 1, 0], [], []>} : vector<8x8xf32>, vector<8x8xf32>, vector<8x8xf32> -> vector<8x8xf32>
    %cst_592 = arith.constant 0.353553385 : f32
    %1563 = vector.broadcast %cst_592 : f32 to vector<8x8xf32>
    %1564 = arith.mulf %1562, %1563 : vector<8x8xf32>
    %cst_593 = arith.constant dense<0xFF800000> : vector<8xf32>
    %1565 = vector.multi_reduction <maximumf>, %1564, %cst_593 [1] : vector<8x8xf32> to vector<8xf32>
    %1566 = vector.shape_cast %1565 : vector<8xf32> to vector<8x1xf32>
    %1567 = vector.broadcast %1566 : vector<8x1xf32> to vector<8x8xf32>
    %1568 = arith.subf %1564, %1567 : vector<8x8xf32>
    %1569 = math.exp %1568 : vector<8x8xf32>
    %cst_594 = arith.constant dense<0.000000e+00> : vector<8xf32>
    %1570 = vector.multi_reduction <add>, %1569, %cst_594 [1] : vector<8x8xf32> to vector<8xf32>
    %1571 = vector.shape_cast %1570 : vector<8xf32> to vector<8x1xf32>
    %1572 = tpu.reciprocal %1571 {approx = true} : vector<8x1xf32> -> vector<8x1xf32>
    %1573 = vector.broadcast %1572 : vector<8x1xf32> to vector<8x8xf32>
    %1574 = arith.mulf %1569, %1573 : vector<8x8xf32>
    %cst_595 = arith.constant dense<0.000000e+00> : vector<8x8xf32>
    %1575 = tpu.matmul %1574, %1561, %cst_595 {dimension_numbers = #tpu.dot_dimension_numbers<[1], [0], [0], [1], [0, 0, 1, 1], [], []>} : vector<8x8xf32>, vector<8x8xf32>, vector<8x8xf32> -> vector<8x8xf32>
    %1576 = vector.extract_strided_slice %1558 {offsets = [0, 8], sizes = [8, 8], strides = [1, 1]} : vector<16x96xf32> to vector<8x8xf32>
    %1577 = vector.extract_strided_slice %1558 {offsets = [0, 40], sizes = [8, 8], strides = [1, 1]} : vector<16x96xf32> to vector<8x8xf32>
    %1578 = vector.extract_strided_slice %1558 {offsets = [0, 72], sizes = [8, 8], strides = [1, 1]} : vector<16x96xf32> to vector<8x8xf32>
    %cst_596 = arith.constant dense<0.000000e+00> : vector<8x8xf32>
    %1579 = tpu.matmul %1576, %1577, %cst_596 {dimension_numbers = #tpu.dot_dimension_numbers<[1], [1], [0], [0], [0, 0, 1, 0], [], []>} : vector<8x8xf32>, vector<8x8xf32>, vector<8x8xf32> -> vector<8x8xf32>
    %cst_597 = arith.constant 0.353553385 : f32
    %1580 = vector.broadcast %cst_597 : f32 to vector<8x8xf32>
    %1581 = arith.mulf %1579, %1580 : vector<8x8xf32>
    %cst_598 = arith.constant dense<0xFF800000> : vector<8xf32>
    %1582 = vector.multi_reduction <maximumf>, %1581, %cst_598 [1] : vector<8x8xf32> to vector<8xf32>
    %1583 = vector.shape_cast %1582 : vector<8xf32> to vector<8x1xf32>
    %1584 = vector.broadcast %1583 : vector<8x1xf32> to vector<8x8xf32>
    %1585 = arith.subf %1581, %1584 : vector<8x8xf32>
    %1586 = math.exp %1585 : vector<8x8xf32>
    %cst_599 = arith.constant dense<0.000000e+00> : vector<8xf32>
    %1587 = vector.multi_reduction <add>, %1586, %cst_599 [1] : vector<8x8xf32> to vector<8xf32>
    %1588 = vector.shape_cast %1587 : vector<8xf32> to vector<8x1xf32>
    %1589 = tpu.reciprocal %1588 {approx = true} : vector<8x1xf32> -> vector<8x1xf32>
    %1590 = vector.broadcast %1589 : vector<8x1xf32> to vector<8x8xf32>
    %1591 = arith.mulf %1586, %1590 : vector<8x8xf32>
    %cst_600 = arith.constant dense<0.000000e+00> : vector<8x8xf32>
    %1592 = tpu.matmul %1591, %1578, %cst_600 {dimension_numbers = #tpu.dot_dimension_numbers<[1], [0], [0], [1], [0, 0, 1, 1], [], []>} : vector<8x8xf32>, vector<8x8xf32>, vector<8x8xf32> -> vector<8x8xf32>
    %1593 = vector.extract_strided_slice %1558 {offsets = [0, 16], sizes = [8, 8], strides = [1, 1]} : vector<16x96xf32> to vector<8x8xf32>
    %1594 = vector.extract_strided_slice %1558 {offsets = [0, 48], sizes = [8, 8], strides = [1, 1]} : vector<16x96xf32> to vector<8x8xf32>
    %1595 = vector.extract_strided_slice %1558 {offsets = [0, 80], sizes = [8, 8], strides = [1, 1]} : vector<16x96xf32> to vector<8x8xf32>
    %cst_601 = arith.constant dense<0.000000e+00> : vector<8x8xf32>
    %1596 = tpu.matmul %1593, %1594, %cst_601 {dimension_numbers = #tpu.dot_dimension_numbers<[1], [1], [0], [0], [0, 0, 1, 0], [], []>} : vector<8x8xf32>, vector<8x8xf32>, vector<8x8xf32> -> vector<8x8xf32>
    %cst_602 = arith.constant 0.353553385 : f32
    %1597 = vector.broadcast %cst_602 : f32 to vector<8x8xf32>
    %1598 = arith.mulf %1596, %1597 : vector<8x8xf32>
    %cst_603 = arith.constant dense<0xFF800000> : vector<8xf32>
    %1599 = vector.multi_reduction <maximumf>, %1598, %cst_603 [1] : vector<8x8xf32> to vector<8xf32>
    %1600 = vector.shape_cast %1599 : vector<8xf32> to vector<8x1xf32>
    %1601 = vector.broadcast %1600 : vector<8x1xf32> to vector<8x8xf32>
    %1602 = arith.subf %1598, %1601 : vector<8x8xf32>
    %1603 = math.exp %1602 : vector<8x8xf32>
    %cst_604 = arith.constant dense<0.000000e+00> : vector<8xf32>
    %1604 = vector.multi_reduction <add>, %1603, %cst_604 [1] : vector<8x8xf32> to vector<8xf32>
    %1605 = vector.shape_cast %1604 : vector<8xf32> to vector<8x1xf32>
    %1606 = tpu.reciprocal %1605 {approx = true} : vector<8x1xf32> -> vector<8x1xf32>
    %1607 = vector.broadcast %1606 : vector<8x1xf32> to vector<8x8xf32>
    %1608 = arith.mulf %1603, %1607 : vector<8x8xf32>
    %cst_605 = arith.constant dense<0.000000e+00> : vector<8x8xf32>
    %1609 = tpu.matmul %1608, %1595, %cst_605 {dimension_numbers = #tpu.dot_dimension_numbers<[1], [0], [0], [1], [0, 0, 1, 1], [], []>} : vector<8x8xf32>, vector<8x8xf32>, vector<8x8xf32> -> vector<8x8xf32>
    %1610 = vector.extract_strided_slice %1558 {offsets = [0, 24], sizes = [8, 8], strides = [1, 1]} : vector<16x96xf32> to vector<8x8xf32>
    %1611 = vector.extract_strided_slice %1558 {offsets = [0, 56], sizes = [8, 8], strides = [1, 1]} : vector<16x96xf32> to vector<8x8xf32>
    %1612 = vector.extract_strided_slice %1558 {offsets = [0, 88], sizes = [8, 8], strides = [1, 1]} : vector<16x96xf32> to vector<8x8xf32>
    %cst_606 = arith.constant dense<0.000000e+00> : vector<8x8xf32>
    %1613 = tpu.matmul %1610, %1611, %cst_606 {dimension_numbers = #tpu.dot_dimension_numbers<[1], [1], [0], [0], [0, 0, 1, 0], [], []>} : vector<8x8xf32>, vector<8x8xf32>, vector<8x8xf32> -> vector<8x8xf32>
    %cst_607 = arith.constant 0.353553385 : f32
    %1614 = vector.broadcast %cst_607 : f32 to vector<8x8xf32>
    %1615 = arith.mulf %1613, %1614 : vector<8x8xf32>
    %cst_608 = arith.constant dense<0xFF800000> : vector<8xf32>
    %1616 = vector.multi_reduction <maximumf>, %1615, %cst_608 [1] : vector<8x8xf32> to vector<8xf32>
    %1617 = vector.shape_cast %1616 : vector<8xf32> to vector<8x1xf32>
    %1618 = vector.broadcast %1617 : vector<8x1xf32> to vector<8x8xf32>
    %1619 = arith.subf %1615, %1618 : vector<8x8xf32>
    %1620 = math.exp %1619 : vector<8x8xf32>
    %cst_609 = arith.constant dense<0.000000e+00> : vector<8xf32>
    %1621 = vector.multi_reduction <add>, %1620, %cst_609 [1] : vector<8x8xf32> to vector<8xf32>
    %1622 = vector.shape_cast %1621 : vector<8xf32> to vector<8x1xf32>
    %1623 = tpu.reciprocal %1622 {approx = true} : vector<8x1xf32> -> vector<8x1xf32>
    %1624 = vector.broadcast %1623 : vector<8x1xf32> to vector<8x8xf32>
    %1625 = arith.mulf %1620, %1624 : vector<8x8xf32>
    %cst_610 = arith.constant dense<0.000000e+00> : vector<8x8xf32>
    %1626 = tpu.matmul %1625, %1612, %cst_610 {dimension_numbers = #tpu.dot_dimension_numbers<[1], [0], [0], [1], [0, 0, 1, 1], [], []>} : vector<8x8xf32>, vector<8x8xf32>, vector<8x8xf32> -> vector<8x8xf32>
    %1627 = tpu.concatenate %1575, %1592, %1609, %1626 in 1 : vector<8x8xf32>, vector<8x8xf32>, vector<8x8xf32>, vector<8x8xf32> -> vector<8x32xf32>
    %1628 = vector.extract_strided_slice %1558 {offsets = [8, 0], sizes = [8, 8], strides = [1, 1]} : vector<16x96xf32> to vector<8x8xf32>
    %1629 = vector.extract_strided_slice %1558 {offsets = [8, 32], sizes = [8, 8], strides = [1, 1]} : vector<16x96xf32> to vector<8x8xf32>
    %1630 = vector.extract_strided_slice %1558 {offsets = [8, 64], sizes = [8, 8], strides = [1, 1]} : vector<16x96xf32> to vector<8x8xf32>
    %cst_611 = arith.constant dense<0.000000e+00> : vector<8x8xf32>
    %1631 = tpu.matmul %1628, %1629, %cst_611 {dimension_numbers = #tpu.dot_dimension_numbers<[1], [1], [0], [0], [0, 0, 1, 0], [], []>} : vector<8x8xf32>, vector<8x8xf32>, vector<8x8xf32> -> vector<8x8xf32>
    %cst_612 = arith.constant 0.353553385 : f32
    %1632 = vector.broadcast %cst_612 : f32 to vector<8x8xf32>
    %1633 = arith.mulf %1631, %1632 : vector<8x8xf32>
    %cst_613 = arith.constant dense<0xFF800000> : vector<8xf32>
    %1634 = vector.multi_reduction <maximumf>, %1633, %cst_613 [1] : vector<8x8xf32> to vector<8xf32>
    %1635 = vector.shape_cast %1634 : vector<8xf32> to vector<8x1xf32>
    %1636 = vector.broadcast %1635 : vector<8x1xf32> to vector<8x8xf32>
    %1637 = arith.subf %1633, %1636 : vector<8x8xf32>
    %1638 = math.exp %1637 : vector<8x8xf32>
    %cst_614 = arith.constant dense<0.000000e+00> : vector<8xf32>
    %1639 = vector.multi_reduction <add>, %1638, %cst_614 [1] : vector<8x8xf32> to vector<8xf32>
    %1640 = vector.shape_cast %1639 : vector<8xf32> to vector<8x1xf32>
    %1641 = tpu.reciprocal %1640 {approx = true} : vector<8x1xf32> -> vector<8x1xf32>
    %1642 = vector.broadcast %1641 : vector<8x1xf32> to vector<8x8xf32>
    %1643 = arith.mulf %1638, %1642 : vector<8x8xf32>
    %cst_615 = arith.constant dense<0.000000e+00> : vector<8x8xf32>
    %1644 = tpu.matmul %1643, %1630, %cst_615 {dimension_numbers = #tpu.dot_dimension_numbers<[1], [0], [0], [1], [0, 0, 1, 1], [], []>} : vector<8x8xf32>, vector<8x8xf32>, vector<8x8xf32> -> vector<8x8xf32>
    %1645 = vector.extract_strided_slice %1558 {offsets = [8, 8], sizes = [8, 8], strides = [1, 1]} : vector<16x96xf32> to vector<8x8xf32>
    %1646 = vector.extract_strided_slice %1558 {offsets = [8, 40], sizes = [8, 8], strides = [1, 1]} : vector<16x96xf32> to vector<8x8xf32>
    %1647 = vector.extract_strided_slice %1558 {offsets = [8, 72], sizes = [8, 8], strides = [1, 1]} : vector<16x96xf32> to vector<8x8xf32>
    %cst_616 = arith.constant dense<0.000000e+00> : vector<8x8xf32>
    %1648 = tpu.matmul %1645, %1646, %cst_616 {dimension_numbers = #tpu.dot_dimension_numbers<[1], [1], [0], [0], [0, 0, 1, 0], [], []>} : vector<8x8xf32>, vector<8x8xf32>, vector<8x8xf32> -> vector<8x8xf32>
    %cst_617 = arith.constant 0.353553385 : f32
    %1649 = vector.broadcast %cst_617 : f32 to vector<8x8xf32>
    %1650 = arith.mulf %1648, %1649 : vector<8x8xf32>
    %cst_618 = arith.constant dense<0xFF800000> : vector<8xf32>
    %1651 = vector.multi_reduction <maximumf>, %1650, %cst_618 [1] : vector<8x8xf32> to vector<8xf32>
    %1652 = vector.shape_cast %1651 : vector<8xf32> to vector<8x1xf32>
    %1653 = vector.broadcast %1652 : vector<8x1xf32> to vector<8x8xf32>
    %1654 = arith.subf %1650, %1653 : vector<8x8xf32>
    %1655 = math.exp %1654 : vector<8x8xf32>
    %cst_619 = arith.constant dense<0.000000e+00> : vector<8xf32>
    %1656 = vector.multi_reduction <add>, %1655, %cst_619 [1] : vector<8x8xf32> to vector<8xf32>
    %1657 = vector.shape_cast %1656 : vector<8xf32> to vector<8x1xf32>
    %1658 = tpu.reciprocal %1657 {approx = true} : vector<8x1xf32> -> vector<8x1xf32>
    %1659 = vector.broadcast %1658 : vector<8x1xf32> to vector<8x8xf32>
    %1660 = arith.mulf %1655, %1659 : vector<8x8xf32>
    %cst_620 = arith.constant dense<0.000000e+00> : vector<8x8xf32>
    %1661 = tpu.matmul %1660, %1647, %cst_620 {dimension_numbers = #tpu.dot_dimension_numbers<[1], [0], [0], [1], [0, 0, 1, 1], [], []>} : vector<8x8xf32>, vector<8x8xf32>, vector<8x8xf32> -> vector<8x8xf32>
    %1662 = vector.extract_strided_slice %1558 {offsets = [8, 16], sizes = [8, 8], strides = [1, 1]} : vector<16x96xf32> to vector<8x8xf32>
    %1663 = vector.extract_strided_slice %1558 {offsets = [8, 48], sizes = [8, 8], strides = [1, 1]} : vector<16x96xf32> to vector<8x8xf32>
    %1664 = vector.extract_strided_slice %1558 {offsets = [8, 80], sizes = [8, 8], strides = [1, 1]} : vector<16x96xf32> to vector<8x8xf32>
    %cst_621 = arith.constant dense<0.000000e+00> : vector<8x8xf32>
    %1665 = tpu.matmul %1662, %1663, %cst_621 {dimension_numbers = #tpu.dot_dimension_numbers<[1], [1], [0], [0], [0, 0, 1, 0], [], []>} : vector<8x8xf32>, vector<8x8xf32>, vector<8x8xf32> -> vector<8x8xf32>
    %cst_622 = arith.constant 0.353553385 : f32
    %1666 = vector.broadcast %cst_622 : f32 to vector<8x8xf32>
    %1667 = arith.mulf %1665, %1666 : vector<8x8xf32>
    %cst_623 = arith.constant dense<0xFF800000> : vector<8xf32>
    %1668 = vector.multi_reduction <maximumf>, %1667, %cst_623 [1] : vector<8x8xf32> to vector<8xf32>
    %1669 = vector.shape_cast %1668 : vector<8xf32> to vector<8x1xf32>
    %1670 = vector.broadcast %1669 : vector<8x1xf32> to vector<8x8xf32>
    %1671 = arith.subf %1667, %1670 : vector<8x8xf32>
    %1672 = math.exp %1671 : vector<8x8xf32>
    %cst_624 = arith.constant dense<0.000000e+00> : vector<8xf32>
    %1673 = vector.multi_reduction <add>, %1672, %cst_624 [1] : vector<8x8xf32> to vector<8xf32>
    %1674 = vector.shape_cast %1673 : vector<8xf32> to vector<8x1xf32>
    %1675 = tpu.reciprocal %1674 {approx = true} : vector<8x1xf32> -> vector<8x1xf32>
    %1676 = vector.broadcast %1675 : vector<8x1xf32> to vector<8x8xf32>
    %1677 = arith.mulf %1672, %1676 : vector<8x8xf32>
    %cst_625 = arith.constant dense<0.000000e+00> : vector<8x8xf32>
    %1678 = tpu.matmul %1677, %1664, %cst_625 {dimension_numbers = #tpu.dot_dimension_numbers<[1], [0], [0], [1], [0, 0, 1, 1], [], []>} : vector<8x8xf32>, vector<8x8xf32>, vector<8x8xf32> -> vector<8x8xf32>
    %1679 = vector.extract_strided_slice %1558 {offsets = [8, 24], sizes = [8, 8], strides = [1, 1]} : vector<16x96xf32> to vector<8x8xf32>
    %1680 = vector.extract_strided_slice %1558 {offsets = [8, 56], sizes = [8, 8], strides = [1, 1]} : vector<16x96xf32> to vector<8x8xf32>
    %1681 = vector.extract_strided_slice %1558 {offsets = [8, 88], sizes = [8, 8], strides = [1, 1]} : vector<16x96xf32> to vector<8x8xf32>
    %cst_626 = arith.constant dense<0.000000e+00> : vector<8x8xf32>
    %1682 = tpu.matmul %1679, %1680, %cst_626 {dimension_numbers = #tpu.dot_dimension_numbers<[1], [1], [0], [0], [0, 0, 1, 0], [], []>} : vector<8x8xf32>, vector<8x8xf32>, vector<8x8xf32> -> vector<8x8xf32>
    %cst_627 = arith.constant 0.353553385 : f32
    %1683 = vector.broadcast %cst_627 : f32 to vector<8x8xf32>
    %1684 = arith.mulf %1682, %1683 : vector<8x8xf32>
    %cst_628 = arith.constant dense<0xFF800000> : vector<8xf32>
    %1685 = vector.multi_reduction <maximumf>, %1684, %cst_628 [1] : vector<8x8xf32> to vector<8xf32>
    %1686 = vector.shape_cast %1685 : vector<8xf32> to vector<8x1xf32>
    %1687 = vector.broadcast %1686 : vector<8x1xf32> to vector<8x8xf32>
    %1688 = arith.subf %1684, %1687 : vector<8x8xf32>
    %1689 = math.exp %1688 : vector<8x8xf32>
    %cst_629 = arith.constant dense<0.000000e+00> : vector<8xf32>
    %1690 = vector.multi_reduction <add>, %1689, %cst_629 [1] : vector<8x8xf32> to vector<8xf32>
    %1691 = vector.shape_cast %1690 : vector<8xf32> to vector<8x1xf32>
    %1692 = tpu.reciprocal %1691 {approx = true} : vector<8x1xf32> -> vector<8x1xf32>
    %1693 = vector.broadcast %1692 : vector<8x1xf32> to vector<8x8xf32>
    %1694 = arith.mulf %1689, %1693 : vector<8x8xf32>
    %cst_630 = arith.constant dense<0.000000e+00> : vector<8x8xf32>
    %1695 = tpu.matmul %1694, %1681, %cst_630 {dimension_numbers = #tpu.dot_dimension_numbers<[1], [0], [0], [1], [0, 0, 1, 1], [], []>} : vector<8x8xf32>, vector<8x8xf32>, vector<8x8xf32> -> vector<8x8xf32>
    %1696 = tpu.concatenate %1644, %1661, %1678, %1695 in 1 : vector<8x8xf32>, vector<8x8xf32>, vector<8x8xf32>, vector<8x8xf32> -> vector<8x32xf32>
    %1697 = tpu.concatenate %1627, %1696 in 0 : vector<8x32xf32>, vector<8x32xf32> -> vector<16x32xf32>
    %c3_631 = arith.constant 3 : index
    %c0_632 = arith.constant 0 : index
    %c0_633 = arith.constant 0 : index
    %1698 = vector.load %arg8[%c3_631, %c0_632, %c0_633] : memref<4x32x32xf32, #tpu.memory_space<vmem>>, vector<1x32x32xf32>
    %1699 = vector.shape_cast %1698 : vector<1x32x32xf32> to vector<32x32xf32>
    %cst_634 = arith.constant dense<0.000000e+00> : vector<16x32xf32>
    %1700 = tpu.matmul %1697, %1699, %cst_634 {dimension_numbers = #tpu.dot_dimension_numbers<[1], [0], [0], [1], [0, 0, 1, 1], [], []>} : vector<16x32xf32>, vector<32x32xf32>, vector<16x32xf32> -> vector<16x32xf32>
    %c3_635 = arith.constant 3 : index
    %c0_636 = arith.constant 0 : index
    %c0_637 = arith.constant 0 : index
    %1701 = vector.load %arg9[%c3_635, %c0_636, %c0_637] : memref<4x1x32xf32, #tpu.memory_space<vmem>>, vector<1x1x32xf32>
    %1702 = vector.shape_cast %1701 : vector<1x1x32xf32> to vector<1x32xf32>
    %1703 = vector.broadcast %1702 : vector<1x32xf32> to vector<16x32xf32>
    %1704 = arith.addf %1700, %1703 : vector<16x32xf32>
    %1705 = arith.addf %1704, %1551 : vector<16x32xf32>
    %c3_638 = arith.constant 3 : index
    %c0_639 = arith.constant 0 : index
    %c0_640 = arith.constant 0 : index
    %1706 = vector.load %arg10[%c3_638, %c0_639, %c0_640] : memref<4x1x32xf32, #tpu.memory_space<vmem>>, vector<1x1x32xf32>
    %1707 = vector.shape_cast %1706 : vector<1x1x32xf32> to vector<1x32xf32>
    %c3_641 = arith.constant 3 : index
    %c0_642 = arith.constant 0 : index
    %c0_643 = arith.constant 0 : index
    %1708 = vector.load %arg11[%c3_641, %c0_642, %c0_643] : memref<4x1x32xf32, #tpu.memory_space<vmem>>, vector<1x1x32xf32>
    %1709 = vector.shape_cast %1708 : vector<1x1x32xf32> to vector<1x32xf32>
    %cst_644 = arith.constant dense<0.000000e+00> : vector<16xf32>
    %1710 = vector.multi_reduction <add>, %1705, %cst_644 [1] : vector<16x32xf32> to vector<16xf32>
    %1711 = vector.shape_cast %1710 : vector<16xf32> to vector<16x1xf32>
    %cst_645 = arith.constant 3.200000e+01 : f32
    %1712 = vector.broadcast %cst_645 : f32 to vector<16x1xf32>
    %1713 = arith.divf %1711, %1712 : vector<16x1xf32>
    %1714 = vector.broadcast %1713 : vector<16x1xf32> to vector<16x32xf32>
    %1715 = arith.subf %1705, %1714 : vector<16x32xf32>
    %1716 = arith.mulf %1715, %1715 : vector<16x32xf32>
    %cst_646 = arith.constant dense<0.000000e+00> : vector<16xf32>
    %1717 = vector.multi_reduction <add>, %1716, %cst_646 [1] : vector<16x32xf32> to vector<16xf32>
    %1718 = vector.shape_cast %1717 : vector<16xf32> to vector<16x1xf32>
    %cst_647 = arith.constant 3.200000e+01 : f32
    %1719 = vector.broadcast %cst_647 : f32 to vector<16x1xf32>
    %1720 = arith.divf %1718, %1719 : vector<16x1xf32>
    %1721 = vector.broadcast %1713 : vector<16x1xf32> to vector<16x32xf32>
    %1722 = arith.subf %1705, %1721 : vector<16x32xf32>
    %cst_648 = arith.constant 9.99999996E-13 : f32
    %1723 = vector.broadcast %cst_648 : f32 to vector<16x1xf32>
    %1724 = arith.addf %1720, %1723 : vector<16x1xf32>
    %1725 = math.rsqrt %1724 : vector<16x1xf32>
    %1726 = vector.broadcast %1725 : vector<16x1xf32> to vector<16x32xf32>
    %1727 = arith.mulf %1722, %1726 : vector<16x32xf32>
    %1728 = vector.broadcast %1707 : vector<1x32xf32> to vector<16x32xf32>
    %1729 = arith.mulf %1727, %1728 : vector<16x32xf32>
    %1730 = vector.broadcast %1709 : vector<1x32xf32> to vector<16x32xf32>
    %1731 = arith.addf %1729, %1730 : vector<16x32xf32>
    %c3_649 = arith.constant 3 : index
    %c0_650 = arith.constant 0 : index
    %c0_651 = arith.constant 0 : index
    %1732 = vector.load %arg12[%c3_649, %c0_650, %c0_651] : memref<4x32x64xf32, #tpu.memory_space<vmem>>, vector<1x32x64xf32>
    %1733 = vector.shape_cast %1732 : vector<1x32x64xf32> to vector<32x64xf32>
    %cst_652 = arith.constant dense<0.000000e+00> : vector<16x64xf32>
    %1734 = tpu.matmul %1731, %1733, %cst_652 {dimension_numbers = #tpu.dot_dimension_numbers<[1], [0], [0], [1], [0, 0, 1, 1], [], []>} : vector<16x32xf32>, vector<32x64xf32>, vector<16x64xf32> -> vector<16x64xf32>
    %c3_653 = arith.constant 3 : index
    %c0_654 = arith.constant 0 : index
    %c0_655 = arith.constant 0 : index
    %1735 = vector.load %arg13[%c3_653, %c0_654, %c0_655] : memref<4x1x64xf32, #tpu.memory_space<vmem>>, vector<1x1x64xf32>
    %1736 = vector.shape_cast %1735 : vector<1x1x64xf32> to vector<1x64xf32>
    %1737 = vector.broadcast %1736 : vector<1x64xf32> to vector<16x64xf32>
    %1738 = arith.addf %1734, %1737 : vector<16x64xf32>
    %1739 = arith.mulf %1738, %1738 : vector<16x64xf32>
    %1740 = arith.mulf %1738, %1739 : vector<16x64xf32>
    %cst_656 = arith.constant 4.471500e-02 : f32
    %1741 = vector.broadcast %cst_656 : f32 to vector<16x64xf32>
    %1742 = arith.mulf %1741, %1740 : vector<16x64xf32>
    %1743 = arith.addf %1738, %1742 : vector<16x64xf32>
    %cst_657 = arith.constant 0.797884583 : f32
    %1744 = vector.broadcast %cst_657 : f32 to vector<16x64xf32>
    %1745 = arith.mulf %1744, %1743 : vector<16x64xf32>
    %1746 = math.tanh %1745 : vector<16x64xf32>
    %cst_658 = arith.constant 1.000000e+00 : f32
    %1747 = vector.broadcast %cst_658 : f32 to vector<16x64xf32>
    %1748 = arith.addf %1747, %1746 : vector<16x64xf32>
    %cst_659 = arith.constant 5.000000e-01 : f32
    %1749 = vector.broadcast %cst_659 : f32 to vector<16x64xf32>
    %1750 = arith.mulf %1749, %1748 : vector<16x64xf32>
    %1751 = arith.mulf %1738, %1750 : vector<16x64xf32>
    %c3_660 = arith.constant 3 : index
    %c0_661 = arith.constant 0 : index
    %c0_662 = arith.constant 0 : index
    %1752 = vector.load %arg14[%c3_660, %c0_661, %c0_662] : memref<4x64x32xf32, #tpu.memory_space<vmem>>, vector<1x64x32xf32>
    %1753 = vector.shape_cast %1752 : vector<1x64x32xf32> to vector<64x32xf32>
    %cst_663 = arith.constant dense<0.000000e+00> : vector<16x32xf32>
    %1754 = tpu.matmul %1751, %1753, %cst_663 {dimension_numbers = #tpu.dot_dimension_numbers<[1], [0], [0], [1], [0, 0, 1, 1], [], []>} : vector<16x64xf32>, vector<64x32xf32>, vector<16x32xf32> -> vector<16x32xf32>
    %c3_664 = arith.constant 3 : index
    %c0_665 = arith.constant 0 : index
    %c0_666 = arith.constant 0 : index
    %1755 = vector.load %arg15[%c3_664, %c0_665, %c0_666] : memref<4x1x32xf32, #tpu.memory_space<vmem>>, vector<1x1x32xf32>
    %1756 = vector.shape_cast %1755 : vector<1x1x32xf32> to vector<1x32xf32>
    %1757 = vector.broadcast %1756 : vector<1x32xf32> to vector<16x32xf32>
    %1758 = arith.addf %1754, %1757 : vector<16x32xf32>
    %1759 = arith.addf %1758, %1731 : vector<16x32xf32>
    %c3_667 = arith.constant 3 : index
    %c0_668 = arith.constant 0 : index
    %c0_669 = arith.constant 0 : index
    %1760 = vector.load %arg16[%c3_667, %c0_668, %c0_669] : memref<4x1x32xf32, #tpu.memory_space<vmem>>, vector<1x1x32xf32>
    %1761 = vector.shape_cast %1760 : vector<1x1x32xf32> to vector<1x32xf32>
    %c3_670 = arith.constant 3 : index
    %c0_671 = arith.constant 0 : index
    %c0_672 = arith.constant 0 : index
    %1762 = vector.load %arg17[%c3_670, %c0_671, %c0_672] : memref<4x1x32xf32, #tpu.memory_space<vmem>>, vector<1x1x32xf32>
    %1763 = vector.shape_cast %1762 : vector<1x1x32xf32> to vector<1x32xf32>
    %cst_673 = arith.constant dense<0.000000e+00> : vector<16xf32>
    %1764 = vector.multi_reduction <add>, %1759, %cst_673 [1] : vector<16x32xf32> to vector<16xf32>
    %1765 = vector.shape_cast %1764 : vector<16xf32> to vector<16x1xf32>
    %cst_674 = arith.constant 3.200000e+01 : f32
    %1766 = vector.broadcast %cst_674 : f32 to vector<16x1xf32>
    %1767 = arith.divf %1765, %1766 : vector<16x1xf32>
    %1768 = vector.broadcast %1767 : vector<16x1xf32> to vector<16x32xf32>
    %1769 = arith.subf %1759, %1768 : vector<16x32xf32>
    %1770 = arith.mulf %1769, %1769 : vector<16x32xf32>
    %cst_675 = arith.constant dense<0.000000e+00> : vector<16xf32>
    %1771 = vector.multi_reduction <add>, %1770, %cst_675 [1] : vector<16x32xf32> to vector<16xf32>
    %1772 = vector.shape_cast %1771 : vector<16xf32> to vector<16x1xf32>
    %cst_676 = arith.constant 3.200000e+01 : f32
    %1773 = vector.broadcast %cst_676 : f32 to vector<16x1xf32>
    %1774 = arith.divf %1772, %1773 : vector<16x1xf32>
    %1775 = vector.broadcast %1767 : vector<16x1xf32> to vector<16x32xf32>
    %1776 = arith.subf %1759, %1775 : vector<16x32xf32>
    %cst_677 = arith.constant 9.99999996E-13 : f32
    %1777 = vector.broadcast %cst_677 : f32 to vector<16x1xf32>
    %1778 = arith.addf %1774, %1777 : vector<16x1xf32>
    %1779 = math.rsqrt %1778 : vector<16x1xf32>
    %1780 = vector.broadcast %1779 : vector<16x1xf32> to vector<16x32xf32>
    %1781 = arith.mulf %1776, %1780 : vector<16x32xf32>
    %1782 = vector.broadcast %1761 : vector<1x32xf32> to vector<16x32xf32>
    %1783 = arith.mulf %1781, %1782 : vector<16x32xf32>
    %1784 = vector.broadcast %1763 : vector<1x32xf32> to vector<16x32xf32>
    %1785 = arith.addf %1783, %1784 : vector<16x32xf32>
    %c0_678 = arith.constant 0 : index
    %c0_679 = arith.constant 0 : index
    %1786 = vector.load %arg18[%c0_678, %c0_679] : memref<32x32xf32, #tpu.memory_space<vmem>>, vector<32x32xf32>
    %cst_680 = arith.constant dense<0.000000e+00> : vector<16x32xf32>
    %1787 = tpu.matmul %1785, %1786, %cst_680 {dimension_numbers = #tpu.dot_dimension_numbers<[1], [0], [0], [1], [0, 0, 1, 1], [], []>} : vector<16x32xf32>, vector<32x32xf32>, vector<16x32xf32> -> vector<16x32xf32>
    %c0_681 = arith.constant 0 : index
    %c0_682 = arith.constant 0 : index
    %1788 = vector.load %arg19[%c0_681, %c0_682] : memref<1x32xf32, #tpu.memory_space<vmem>>, vector<1x32xf32>
    %1789 = vector.broadcast %1788 : vector<1x32xf32> to vector<16x32xf32>
    %1790 = arith.addf %1787, %1789 : vector<16x32xf32>
    %1791 = arith.mulf %1790, %1790 : vector<16x32xf32>
    %1792 = arith.mulf %1790, %1791 : vector<16x32xf32>
    %cst_683 = arith.constant 4.471500e-02 : f32
    %1793 = vector.broadcast %cst_683 : f32 to vector<16x32xf32>
    %1794 = arith.mulf %1793, %1792 : vector<16x32xf32>
    %1795 = arith.addf %1790, %1794 : vector<16x32xf32>
    %cst_684 = arith.constant 0.797884583 : f32
    %1796 = vector.broadcast %cst_684 : f32 to vector<16x32xf32>
    %1797 = arith.mulf %1796, %1795 : vector<16x32xf32>
    %1798 = math.tanh %1797 : vector<16x32xf32>
    %cst_685 = arith.constant 1.000000e+00 : f32
    %1799 = vector.broadcast %cst_685 : f32 to vector<16x32xf32>
    %1800 = arith.addf %1799, %1798 : vector<16x32xf32>
    %cst_686 = arith.constant 5.000000e-01 : f32
    %1801 = vector.broadcast %cst_686 : f32 to vector<16x32xf32>
    %1802 = arith.mulf %1801, %1800 : vector<16x32xf32>
    %1803 = arith.mulf %1790, %1802 : vector<16x32xf32>
    %c0_687 = arith.constant 0 : index
    %c0_688 = arith.constant 0 : index
    %1804 = vector.load %arg20[%c0_687, %c0_688] : memref<1x32xf32, #tpu.memory_space<vmem>>, vector<1x32xf32>
    %c0_689 = arith.constant 0 : index
    %c0_690 = arith.constant 0 : index
    %1805 = vector.load %arg21[%c0_689, %c0_690] : memref<1x32xf32, #tpu.memory_space<vmem>>, vector<1x32xf32>
    %cst_691 = arith.constant dense<0.000000e+00> : vector<16xf32>
    %1806 = vector.multi_reduction <add>, %1803, %cst_691 [1] : vector<16x32xf32> to vector<16xf32>
    %1807 = vector.shape_cast %1806 : vector<16xf32> to vector<16x1xf32>
    %cst_692 = arith.constant 3.200000e+01 : f32
    %1808 = vector.broadcast %cst_692 : f32 to vector<16x1xf32>
    %1809 = arith.divf %1807, %1808 : vector<16x1xf32>
    %1810 = vector.broadcast %1809 : vector<16x1xf32> to vector<16x32xf32>
    %1811 = arith.subf %1803, %1810 : vector<16x32xf32>
    %1812 = arith.mulf %1811, %1811 : vector<16x32xf32>
    %cst_693 = arith.constant dense<0.000000e+00> : vector<16xf32>
    %1813 = vector.multi_reduction <add>, %1812, %cst_693 [1] : vector<16x32xf32> to vector<16xf32>
    %1814 = vector.shape_cast %1813 : vector<16xf32> to vector<16x1xf32>
    %cst_694 = arith.constant 3.200000e+01 : f32
    %1815 = vector.broadcast %cst_694 : f32 to vector<16x1xf32>
    %1816 = arith.divf %1814, %1815 : vector<16x1xf32>
    %1817 = vector.broadcast %1809 : vector<16x1xf32> to vector<16x32xf32>
    %1818 = arith.subf %1803, %1817 : vector<16x32xf32>
    %cst_695 = arith.constant 9.99999996E-13 : f32
    %1819 = vector.broadcast %cst_695 : f32 to vector<16x1xf32>
    %1820 = arith.addf %1816, %1819 : vector<16x1xf32>
    %1821 = math.rsqrt %1820 : vector<16x1xf32>
    %1822 = vector.broadcast %1821 : vector<16x1xf32> to vector<16x32xf32>
    %1823 = arith.mulf %1818, %1822 : vector<16x32xf32>
    %1824 = vector.broadcast %1804 : vector<1x32xf32> to vector<16x32xf32>
    %1825 = arith.mulf %1823, %1824 : vector<16x32xf32>
    %1826 = vector.broadcast %1805 : vector<1x32xf32> to vector<16x32xf32>
    %1827 = arith.addf %1825, %1826 : vector<16x32xf32>
    %c0_696 = arith.constant 0 : index
    %c0_697 = arith.constant 0 : index
    %1828 = vector.load %arg22[%c0_696, %c0_697] : memref<32x128xf32, #tpu.memory_space<vmem>>, vector<32x128xf32>
    %cst_698 = arith.constant dense<0.000000e+00> : vector<16x128xf32>
    %1829 = tpu.matmul %1827, %1828, %cst_698 {dimension_numbers = #tpu.dot_dimension_numbers<[1], [0], [0], [1], [0, 0, 1, 1], [], []>} : vector<16x32xf32>, vector<32x128xf32>, vector<16x128xf32> -> vector<16x128xf32>
    %c0_699 = arith.constant 0 : index
    %c0_700 = arith.constant 0 : index
    %1830 = vector.load %arg23[%c0_699, %c0_700] : memref<1x128xf32, #tpu.memory_space<vmem>>, vector<1x128xf32>
    %1831 = vector.broadcast %1830 : vector<1x128xf32> to vector<16x128xf32>
    %1832 = arith.addf %1829, %1831 : vector<16x128xf32>
    %c0_701 = arith.constant 0 : index
    %c0_702 = arith.constant 0 : index
    %1833 = vector.load %arg24[%c0_701, %c0_702] : memref<16x128xf32, #tpu.memory_space<vmem>>, vector<16x128xf32>
    tpu.vector_store %arg24[%c0_701, %c0_702], %1832 {strides = array<i32>} : memref<16x128xf32, #tpu.memory_space<vmem>>, vector<16x128xf32>,
    return
  }
  func.func @transform_0(%arg0: i32) -> (i32, i32) {
    %c0_i32 = arith.constant 0 : i32
    %c0_i32_0 = arith.constant 0 : i32
    %c0_i32_1 = arith.constant 0 : i32
    return %c0_i32, %c0_i32_0 : i32, i32
  }
  func.func @transform_1(%arg0: i32) -> (i32, i32) {
    %c0_i32 = arith.constant 0 : i32
    %c0_i32_0 = arith.constant 0 : i32
    %c0_i32_1 = arith.constant 0 : i32
    return %c0_i32, %c0_i32_0 : i32, i32
  }
  func.func @transform_2(%arg0: i32) -> (i32, i32, i32) {
    %c0_i32 = arith.constant 0 : i32
    %c0_i32_0 = arith.constant 0 : i32
    %c0_i32_1 = arith.constant 0 : i32
    %c0_i32_2 = arith.constant 0 : i32
    return %c0_i32, %c0_i32_0, %c0_i32_1 : i32, i32, i32
  }
  func.func @transform_3(%arg0: i32) -> (i32, i32) {
    %c0_i32 = arith.constant 0 : i32
    %c0_i32_0 = arith.constant 0 : i32
    %c0_i32_1 = arith.constant 0 : i32
    return %c0_i32, %c0_i32_0 : i32, i32
  }
  func.func @transform_4(%arg0: i32) -> (i32, i32) {
    %c0_i32 = arith.constant 0 : i32
    %c0_i32_0 = arith.constant 0 : i32
    %c0_i32_1 = arith.constant 0 : i32
    return %c0_i32, %c0_i32_0 : i32, i32
  }
  func.func @transform_5(%arg0: i32) -> (i32, i32, i32) {
    %c0_i32 = arith.constant 0 : i32
    %c0_i32_0 = arith.constant 0 : i32
    %c0_i32_1 = arith.constant 0 : i32
    %c0_i32_2 = arith.constant 0 : i32
    return %c0_i32, %c0_i32_0, %c0_i32_1 : i32, i32, i32
  }
  func.func @transform_6(%arg0: i32) -> (i32, i32, i32) {
    %c0_i32 = arith.constant 0 : i32
    %c0_i32_0 = arith.constant 0 : i32
    %c0_i32_1 = arith.constant 0 : i32
    %c0_i32_2 = arith.constant 0 : i32
    return %c0_i32, %c0_i32_0, %c0_i32_1 : i32, i32, i32
  }
  func.func @transform_7(%arg0: i32) -> (i32, i32, i32) {
    %c0_i32 = arith.constant 0 : i32
    %c0_i32_0 = arith.constant 0 : i32
    %c0_i32_1 = arith.constant 0 : i32
    %c0_i32_2 = arith.constant 0 : i32
    return %c0_i32, %c0_i32_0, %c0_i32_1 : i32, i32, i32
  }
  func.func @transform_8(%arg0: i32) -> (i32, i32, i32) {
    %c0_i32 = arith.constant 0 : i32
    %c0_i32_0 = arith.constant 0 : i32
    %c0_i32_1 = arith.constant 0 : i32
    %c0_i32_2 = arith.constant 0 : i32
    return %c0_i32, %c0_i32_0, %c0_i32_1 : i32, i32, i32
  }
  func.func @transform_9(%arg0: i32) -> (i32, i32, i32) {
    %c0_i32 = arith.constant 0 : i32
    %c0_i32_0 = arith.constant 0 : i32
    %c0_i32_1 = arith.constant 0 : i32
    %c0_i32_2 = arith.constant 0 : i32
    return %c0_i32, %c0_i32_0, %c0_i32_1 : i32, i32, i32
  }
  func.func @transform_10(%arg0: i32) -> (i32, i32, i32) {
    %c0_i32 = arith.constant 0 : i32
    %c0_i32_0 = arith.constant 0 : i32
    %c0_i32_1 = arith.constant 0 : i32
    %c0_i32_2 = arith.constant 0 : i32
    return %c0_i32, %c0_i32_0, %c0_i32_1 : i32, i32, i32
  }
  func.func @transform_11(%arg0: i32) -> (i32, i32, i32) {
    %c0_i32 = arith.constant 0 : i32
    %c0_i32_0 = arith.constant 0 : i32
    %c0_i32_1 = arith.constant 0 : i32
    %c0_i32_2 = arith.constant 0 : i32
    return %c0_i32, %c0_i32_0, %c0_i32_1 : i32, i32, i32
  }
  func.func @transform_12(%arg0: i32) -> (i32, i32, i32) {
    %c0_i32 = arith.constant 0 : i32
    %c0_i32_0 = arith.constant 0 : i32
    %c0_i32_1 = arith.constant 0 : i32
    %c0_i32_2 = arith.constant 0 : i32
    return %c0_i32, %c0_i32_0, %c0_i32_1 : i32, i32, i32
  }
  func.func @transform_13(%arg0: i32) -> (i32, i32, i32) {
    %c0_i32 = arith.constant 0 : i32
    %c0_i32_0 = arith.constant 0 : i32
    %c0_i32_1 = arith.constant 0 : i32
    %c0_i32_2 = arith.constant 0 : i32
    return %c0_i32, %c0_i32_0, %c0_i32_1 : i32, i32, i32
  }
  func.func @transform_14(%arg0: i32) -> (i32, i32, i32) {
    %c0_i32 = arith.constant 0 : i32
    %c0_i32_0 = arith.constant 0 : i32
    %c0_i32_1 = arith.constant 0 : i32
    %c0_i32_2 = arith.constant 0 : i32
    return %c0_i32, %c0_i32_0, %c0_i32_1 : i32, i32, i32
  }
  func.func @transform_15(%arg0: i32) -> (i32, i32, i32) {
    %c0_i32 = arith.constant 0 : i32
    %c0_i32_0 = arith.constant 0 : i32
    %c0_i32_1 = arith.constant 0 : i32
    %c0_i32_2 = arith.constant 0 : i32
    return %c0_i32, %c0_i32_0, %c0_i32_1 : i32, i32, i32
  }
  func.func @transform_16(%arg0: i32) -> (i32, i32, i32) {
    %c0_i32 = arith.constant 0 : i32
    %c0_i32_0 = arith.constant 0 : i32
    %c0_i32_1 = arith.constant 0 : i32
    %c0_i32_2 = arith.constant 0 : i32
    return %c0_i32, %c0_i32_0, %c0_i32_1 : i32, i32, i32
  }
  func.func @transform_17(%arg0: i32) -> (i32, i32) {
    %c0_i32 = arith.constant 0 : i32
    %c0_i32_0 = arith.constant 0 : i32
    %c0_i32_1 = arith.constant 0 : i32
    return %c0_i32, %c0_i32_0 : i32, i32
  }
  func.func @transform_18(%arg0: i32) -> (i32, i32) {
    %c0_i32 = arith.constant 0 : i32
    %c0_i32_0 = arith.constant 0 : i32
    %c0_i32_1 = arith.constant 0 : i32
    return %c0_i32, %c0_i32_0 : i32, i32
  }
  func.func @transform_19(%arg0: i32) -> (i32, i32) {
    %c0_i32 = arith.constant 0 : i32
    %c0_i32_0 = arith.constant 0 : i32
    %c0_i32_1 = arith.constant 0 : i32
    return %c0_i32, %c0_i32_0 : i32, i32
  }
  func.func @transform_20(%arg0: i32) -> (i32, i32) {
    %c0_i32 = arith.constant 0 : i32
    %c0_i32_0 = arith.constant 0 : i32
    %c0_i32_1 = arith.constant 0 : i32
    return %c0_i32, %c0_i32_0 : i32, i32
  }
  func.func @transform_21(%arg0: i32) -> (i32, i32) {
    %c0_i32 = arith.constant 0 : i32
    %c0_i32_0 = arith.constant 0 : i32
    %c0_i32_1 = arith.constant 0 : i32
    return %c0_i32, %c0_i32_0 : i32, i32
  }
  func.func @transform_22(%arg0: i32) -> (i32, i32) {
    %c0_i32 = arith.constant 0 : i32
    %c0_i32_0 = arith.constant 0 : i32
    %c0_i32_1 = arith.constant 0 : i32
    return %c0_i32, %c0_i32_0 : i32, i32
  }
  func.func @transform_23(%arg0: i32) -> (i32, i32) {
    %c0_i32 = arith.constant 0 : i32
    %c0_i32_0 = arith.constant 0 : i32
    %c0_i32_1 = arith.constant 0 : i32
    return %c0_i32, %c0_i32_0 : i32, i32
  }
}

</mosaic_0001>

<bundles_post_ra>
// kernel: bert_ae_forward.1
= control target key start
LH: loop header
LB: loop body
LE: loop exit
PB: predicated region body
PF: predicated region fallthrough
CT: control target
= control target key end

     0   :  { %vm80_vm0 = vcmask 261120   ;;  %v15282_v34 = vmov 0.0   ;;  %vm15283_vm1 = vmmov 0   ;;  %s17602_s27 = smov 88   ;;  %s17598_s28 = smov 120   ;;  %vm219_vm2 = vcmask 64512   ;;  %s17550_s0 = inlined_call_operand.vmem [shape: f32[16,32], index: 0, kind: input, shape index: {}]   ;;  %s17551_s5 = inlined_call_operand.vmem [shape: f32[4,32,96], index: 5, kind: input, shape index: {}]   ;;  %s17552_s3 = inlined_call_operand.vmem [shape: f32[1,32], index: 3, kind: input, shape index: {}]   ;;  %s17553_s4 = inlined_call_operand.vmem [shape: f32[1,32], index: 4, kind: input, shape index: {}]   ;;  %s17554_s6 = inlined_call_operand.vmem [shape: f32[4,1,96], index: 6, kind: input, shape index: {}]   ;;  %s17555_s2 = inlined_call_operand.vmem [shape: f32[2,1,8], index: 2, kind: input, shape index: {}]   ;;  %s17556_s7 = inlined_call_operand.vmem [shape: f32[4,32,32], index: 7, kind: input, shape index: {}]   ;;  %s17557_s8 = inlined_call_operand.vmem [shape: f32[4,1,32], index: 8, kind: input, shape index: {}]   ;;  %s17558_s11 = inlined_call_operand.vmem [shape: f32[4,32,64], index: 11, kind: input, shape index: {}]   ;;  %s17559_s9 = inlined_call_operand.vmem [shape: f32[4,1,32], index: 9, kind: input, shape index: {}]   ;;  %s17560_s10 = inlined_call_operand.vmem [shape: f32[4,1,32], index: 10, kind: input, shape index: {}]   ;;  %s17561_s13 = inlined_call_operand.vmem [shape: f32[4,64,32], index: 13, kind: input, shape index: {}]   ;;  %s17562_s12 = inlined_call_operand.vmem [shape: f32[4,1,64], index: 12, kind: input, shape index: {}]   ;;  %s17563_s14 = inlined_call_operand.vmem [shape: f32[4,1,32], index: 14, kind: input, shape index: {}]   ;;  %s17564_s15 = inlined_call_operand.vmem [shape: f32[4,1,32], index: 15, kind: input, shape index: {}]   ;;  %s17565_s16 = inlined_call_operand.vmem [shape: f32[4,1,32], index: 16, kind: input, shape index: {}]   ;;  %s17566_s1 = inlined_call_operand.vmem [shape: f32[16,32], index: 1, kind: input, shape index: {}]   ;;  %s17567_s17 = inlined_call_operand.vmem [shape: f32[32,32], index: 17, kind: input, shape index: {}]   ;;  %s17568_s18 = inlined_call_operand.vmem [shape: f32[1,32], index: 18, kind: input, shape index: {}]   ;;  %s17569_s21 = inlined_call_operand.vmem [shape: f32[32,128], index: 21, kind: input, shape index: {}]   ;;  %s17570_s19 = inlined_call_operand.vmem [shape: f32[1,32], index: 19, kind: input, shape index: {}]   ;;  %s17571_s20 = inlined_call_operand.vmem [shape: f32[1,32], index: 20, kind: input, shape index: {}]   ;;  %s17572_s22 = inlined_call_operand.vmem [shape: f32[1,128], index: 22, kind: input, shape index: {}]   ;;  %s17573_s23 = inlined_call_operand.vmem [shape: f32[16,128], index: 23, kind: output, shape index: {}]  }
   0x1   :  { %17629 = sst [smem:[#allocation2_spill]] %s17550_s0  ;;  %13919 = vmatprep.subr.mxu1 %v15282_v34  ;;  %13921 = vmatprep.mubr.msk.f32.mxu1 %vm15283_vm1, %v15282_v34  ;;  %s17596_s29 = smov 112   ;;  %vm903_vm3 = vcmask 130048   ;;  %vm905_vm4 = vcmask 195584   ;;  %vm1858_vm5 = vcmask 523264  }
   0x2   :  { %17630 = sst [smem:[#allocation3_spill]] %s17551_s5  ;;  %s17592_s0 = smov 104  }
   0x3   :  { %17631 = sst [smem:[#allocation4_spill]] %s17552_s3  ;;  %s17582_s25 = smov 64  }
   0x4   :  { %17632 = sst [smem:[#allocation5_spill]] %s17553_s4  ;;  %s17594_s4 = smov 80  }
   0x5   :  { %17633 = sst [smem:[#allocation6_spill]] %s17554_s6  ;;  %s17590_s6 = smov 72  }
   0x6   :  { %17634 = sst [smem:[#allocation7_spill]] %s17555_s2  ;;  %s17588_s26 = smov 48  }
   0x7   :  { %17635 = sst [smem:[#allocation8_spill]] %s17556_s7 }
   0x8   :  { %17636 = sst [smem:[#allocation9_spill]] %s17557_s8  ;;  %s17600_s8 = smov 96  }
   0x9   :  { %17637 = sst [smem:[#allocation10_spill]] %s17563_s14 }
   0xa   :  { %17638 = sst [smem:[#allocation11_spill]] %s17566_s1 }
   0xb   :  { %17639 = sst [smem:[#allocation12_spill]] %s17567_s17  ;;  %s17667_s17 = smov 24  }
   0xc   :  { %17640 = sst [smem:[#allocation13_spill]] %s17568_s18  ;;  %s17683_s18 = smov 104  }
   0xd   :  { %17641 = sst [smem:[#allocation14_spill]] %s17569_s21  ;;  %s17666_s21 = smov 8  }
   0xe   :  { %17642 = sst [smem:[#allocation15_spill]] %s17570_s19  ;;  %s17665_s19 = smov 56  }
   0xf   :  { %17643 = sst [smem:[#allocation16_spill]] %s17571_s20  ;;  %s17664_s20 = smov 40  }
  0x10   :  { %17644 = sst [smem:[#allocation17_spill]] %s17572_s22  ;;  %s17663_s22 = smov 48  }
  0x11   :  { %17645 = sst [smem:[#allocation18_spill]] %s17573_s23  ;;  %s17661_s23 = smov 72  }
  0x12   :  { %s17646_s24 = sld [smem:[#allocation2_spill]] }
  0x13   :  { %s17647_s3 = sld [smem:[#allocation3_spill]] }
  0x14   :  { %s17648_s30 = sld [smem:[#allocation4_spill]] }
  0x15   :  { %s17649_s2 = sld [smem:[#allocation5_spill]] }
  0x16   :  { %s17650_s7 = sld [smem:[#allocation6_spill]] }
  0x17   :  { %s17651_s5 = sld [smem:[#allocation7_spill]] }
  0x18   :  { %v76_v0 = vld [vmem:[%s17646_s24] sm:$0xff]  ;;  %v77_v1 = vld [vmem:[%s17646_s24 + $0x8] sm:$0xff]  ;;  %s17586_s24 = smov 40   ;;  %s17673_s1 = sld [smem:[#allocation4_spill]] }
  0x19   :  { %v81_v2 = vsel %vm80_vm0, %v76_v0, 0.0  ;;  %v84_v3 = vsel %vm80_vm0, %v77_v1, 0.0  ;;  %v127_v14 = vld [vmem:[%s17647_s3 + $0x18] sm:$0xff]  ;;  %v126_v15 = vld [vmem:[%s17647_s3 + $0x10] sm:$0xff]  ;;  %v125_v16 = vld [vmem:[%s17647_s3 + $0x8] sm:$0xff] }
  0x1a   :  { %82 = vadd.xlane.f32.xlu0 %v81_v2  ;;  %13908 = vmatprep.subr.mxu0 %v127_v14  ;;  %v124_v17 = vld [vmem:[%s17647_s3] sm:$0xff] }
  0x1b   :  { %13909 = vmatpush3.msra.mxu0 %v127_v14  ;;  %v13124_v25 = vld [vmem:[%s17648_s30] ss:$0 sm:$0xff]  ;;  %s17670_s30 = smov 56  }
  0x1c   :  { %13910 = vmatprep.subr.mxu0 %v126_v15  ;;  %v13125_v27 = vld [vmem:[%s17649_s2] ss:$0 sm:$0xff]  ;;  %s17676_s2 = smov 56  }
  0x1d   :  { %13911 = vmatpush3.msra.mxu0 %v126_v15  ;;  %v13126_v36 = vld [vmem:[%s17650_s7] ss:$0 sm:$0xff] }
  0x1e   :  { %85 = vadd.xlane.f32.xlu0 %v84_v3  ;;  %13912 = vmatprep.subr.mxu0 %v125_v16  ;;  %v15537_v55 = vld [vmem:[%s17651_s5] ss:$0 sm:$0xff] }
  0x1f   :  { %13913 = vmatpush3.msra.mxu0 %v125_v16 }
  0x20   :  { %13914 = vmatprep.subr.mxu0 %v124_v17 }
  0x21   :  { %13915 = vmatpush3.msra.mxu0 %v124_v17 }
  0x22   :  { %13929 = vmatprep.subr.mxu0 %v15282_v34 }
  0xa3   :  { %v83_v4 = vpop.xlane.xlu0 %82 }
  0xa4   :  { %v88_v5 = vmul.f32 0.03125, %v83_v4 }
  0xa6   :  { %v90_v6 = vsub.f32 %v76_v0, %v88_v5 }
  0xa7   :  { %v86_v7 = vpop.xlane.xlu0 %85 }
  0xa8   :  { %v89_v8 = vmul.f32 0.03125, %v86_v7  ;;  %v92_v9 = vmul.f32 %v90_v6, %v90_v6 }
  0xaa   :  { %v91_v10 = vsub.f32 %v77_v1, %v89_v8  ;;  %v94_v11 = vsel %vm80_vm0, %v92_v9, 0.0 }
  0xab   :  { %95 = vadd.xlane.f32.xlu1 %v94_v11  ;;  %v15552_v11 = vld [vmem:[%s17651_s5 + $0x1] ss:$0 sm:$0xff] }
  0xac   :  { %v93_v12 = vmul.f32 %v91_v10, %v91_v10 }
  0xae   :  { %v97_v13 = vsel %vm80_vm0, %v93_v12, 0.0 }
  0xaf   :  { %98 = vadd.xlane.f32.xlu1 %v97_v13 }
 0x134   :  { %v96_v18 = vpop.xlane.xlu1 %95 }
 0x135   :  { %v100_v19 = vmul.f32 0.03125, %v96_v18 }
 0x137   :  { %v102_v20 = vadd.f32 1e-12, %v100_v19 }
 0x138   :  { %v99_v21 = vpop.xlane.xlu1 %98 }
 0x139   :  { %14870 = vrsqrt.f32 %v102_v20  ;;  %v101_v22 = vmul.f32 0.03125, %v99_v21 }
 0x13b   :  { %v103_v23 = vadd.f32 1e-12, %v101_v22 }
 0x13d   :  { %14872 = vrsqrt.f32 %v103_v23 }
 0x146   :  { %v14871_v24 = vpop.eup %14870 }
 0x147   :  { %v106_v26 = vmul.f32 %v14871_v24, %v90_v6 }
 0x149   :  { %v114_v28 = vmul.f32 %v13124_v25, %v106_v26 }
 0x14a   :  { %v14873_v29 = vpop.eup %14872 }
 0x14b   :  { %v15446_v30 = vadd.f32 %v13125_v27, %v114_v28  ;;  %v107_v31 = vmul.f32 %v14873_v29, %v91_v10 }
 0x14d   :  { %13916 = vmatprep.mubr.msk.f32.mxu0 %vm80_vm0, %v15446_v30  ;;  %v115_v32 = vmul.f32 %v13124_v25, %v107_v31 }
 0x14f   :  { %v15450_v33 = vadd.f32 %v13125_v27, %v115_v32 }
 0x151   :  { %13917 = vmatmul.mubr.msk.f32.vlgmr.msra.gmra.mxu0 %vm80_vm0, %v15450_v33 }
 0x152   :  { %13931 = vmatprep.mubr.msk.f32.mxu0 %vm15283_vm1, %v15282_v34 }
 0x211   :  { %v13918_v35 = vpop.f32.mrf.mxu0 }
 0x212   :  { %v15477_v39 = vadd.f32 %v13918_v35, %v13126_v36 }
 0x213   :  { %v207_v37 = vpop.f32.mrf.mxu0 }
 0x214   :  { %v15463_v38 = vadd.f32 %v13126_v36, %v207_v37 }
 0x216   :  { %391 = vrot.lane.b32.xlu1 %v15463_v38, %s17602_s27  ;;  %217 = vrot.lane.b32.xlu0 %v15463_v38, %s17600_s8 }
 0x21a   :  { %389 = vrot.lane.b32.xlu1 %v15463_v38, %s17598_s28  ;;  %556 = vrot.lane.b32.xlu0 %v15463_v38, %s17596_s29 }
 0x21e   :  { %558 = vrot.lane.b32.xlu1 %v15463_v38, %s17594_s4  ;;  %723 = vrot.lane.b32.xlu0 %v15463_v38, %s17592_s0 }
 0x222   :  { %725 = vrot.lane.b32.xlu1 %v15463_v38, %s17590_s6  ;;  %1081 = vrot.lane.b32.xlu0 %v15477_v39, %s17602_s27  ;;  %s17606_s27 = smov 24  }
 0x226   :  { %908 = vrot.lane.b32.xlu1 %v15477_v39, %s17600_s8  ;;  %1248 = vrot.lane.b32.xlu0 %v15477_v39, %s17594_s4  ;;  %s17653_s8 = smov 16   ;;  %s17654_s4 = sld [smem:[#allocation9_spill]] }
 0x22a   :  { %1079 = vrot.lane.b32.xlu1 %v15477_v39, %s17598_s28  ;;  %1415 = vrot.lane.b32.xlu0 %v15477_v39, %s17590_s6  ;;  %s17655_s28 = smov 88   ;;  %s17660_s6 = smov 104  }
 0x22e   :  { %1246 = vrot.lane.b32.xlu1 %v15477_v39, %s17596_s29  ;;  %s17656_s29 = smov 96  }
 0x232   :  { %1413 = vrot.lane.b32.xlu1 %v15477_v39, %s17592_s0  ;;  %s17652_s0 = sld [smem:[#allocation8_spill]] }
 0x288   :  { %v392_v40 = vpop.permute.xlu1 %391  ;;  %v218_v41 = vpop.permute.xlu0 %217 }
 0x289   :  { %13920 = vmatpush3.xpose.msk.msra.mxu1 %vm219_vm2, %v218_v41  ;;  %13930 = vmatpush3.xpose.msk.msra.mxu0 %vm219_vm2, %v392_v40 }
 0x28a   :  { %13939 = vmatprep.subr.mxu0 %v15282_v34  ;;  %13924 = vmatprep.subr.mxu1 %v15282_v34 }
 0x28c   :  { %v390_v42 = vpop.permute.xlu1 %389  ;;  %13922 = vmatmul.mubr.msk.f32.vlgmr.msra.gmra.mxu1 %vm219_vm2, %v15463_v38  ;;  %v557_v43 = vpop.permute.xlu0 %556 }
 0x28d   :  { %13932 = vmatmul.mubr.msk.f32.vlgmr.msra.gmra.mxu0 %vm219_vm2, %v390_v42  ;;  %13926 = vmatprep.mubr.msk.f32.mxu1 %vm15283_vm1, %v15282_v34 }
 0x28e   :  { %13941 = vmatprep.mubr.msk.f32.mxu0 %vm15283_vm1, %v15282_v34 }
 0x290   :  { %v559_v44 = vpop.permute.xlu1 %558  ;;  %v724_v45 = vpop.permute.xlu0 %723 }
 0x291   :  { %13940 = vmatpush3.xpose.msk.msra.mxu0 %vm219_vm2, %v559_v44 }
 0x292   :  { %13949 = vmatprep.subr.mxu0 %v15282_v34 }
 0x294   :  { %v726_v46 = vpop.permute.xlu1 %725  ;;  %13942 = vmatmul.mubr.msk.f32.vlgmr.msra.gmra.mxu0 %vm219_vm2, %v557_v43  ;;  %v1082_v47 = vpop.permute.xlu0 %1081 }
 0x295   :  { %13950 = vmatpush3.xpose.msk.msra.mxu0 %vm219_vm2, %v726_v46  ;;  %13951 = vmatprep.mubr.msk.f32.mxu0 %vm15283_vm1, %v15282_v34 }
 0x296   :  { %13959 = vmatprep.subr.mxu0 %v15282_v34 }
 0x298   :  { %v909_v48 = vpop.permute.xlu1 %908  ;;  %13952 = vmatmul.mubr.msk.f32.vlgmr.msra.gmra.mxu0 %vm219_vm2, %v724_v45  ;;  %v1249_v50 = vpop.permute.xlu0 %1248 }
 0x299   :  { %13960 = vmatpush3.xpose.msk.msra.mxu0 %vm219_vm2, %v909_v48  ;;  %13961 = vmatprep.mubr.msk.f32.mxu0 %vm15283_vm1, %v15282_v34 }
 0x29a   :  { %13969 = vmatprep.subr.mxu0 %v15282_v34 }
 0x29c   :  { %v1080_v49 = vpop.permute.xlu1 %1079  ;;  %13962 = vmatmul.mubr.msk.f32.vlgmr.msra.gmra.mxu0 %vm219_vm2, %v15477_v39  ;;  %v1416_v52 = vpop.permute.xlu0 %1415 }
 0x29d   :  { %13970 = vmatpush3.xpose.msk.msra.mxu0 %vm219_vm2, %v1082_v47  ;;  %13971 = vmatprep.mubr.msk.f32.mxu0 %vm15283_vm1, %v15282_v34 }
 0x29e   :  { %13979 = vmatprep.subr.mxu0 %v15282_v34 }
 0x2a0   :  { %13972 = vmatmul.mubr.msk.f32.vlgmr.msra.gmra.mxu0 %vm219_vm2, %v1080_v49  ;;  %v1247_v51 = vpop.permute.xlu1 %1246 }
 0x2a1   :  { %13980 = vmatpush3.xpose.msk.msra.mxu0 %vm219_vm2, %v1249_v50  ;;  %13981 = vmatprep.mubr.msk.f32.mxu0 %vm15283_vm1, %v15282_v34 }
 0x2a2   :  { %13989 = vmatprep.subr.mxu0 %v15282_v34 }
 0x2a4   :  { %13982 = vmatmul.mubr.msk.f32.vlgmr.msra.gmra.mxu0 %vm219_vm2, %v1247_v51  ;;  %v1414_v53 = vpop.permute.xlu1 %1413 }
 0x2a5   :  { %13990 = vmatpush3.xpose.msk.msra.mxu0 %vm219_vm2, %v1416_v52  ;;  %13991 = vmatprep.mubr.msk.f32.mxu0 %vm15283_vm1, %v15282_v34 }
 0x2a8   :  { %13992 = vmatmul.mubr.msk.f32.vlgmr.msra.gmra.mxu0 %vm219_vm2, %v1414_v53 }
 0x34c   :  { %v290_v54 = vpop.f32.mrf.mxu1 }
 0x34d   :  { %v294_v56 = vmul.f32 0.35355338, %v290_v54  ;;  %v463_v57 = vpop.f32.mrf.mxu0 }
 0x34e   :  { %v467_v58 = vmul.f32 0.35355338, %v463_v57  ;;  %v13923_v59 = vpop.f32.mrf.mxu1 }
 0x34f   :  { %v13933_v60 = vpop.f32.mrf.mxu0  ;;  %v301_v61 = vadd.f32 %v15537_v55, %v294_v56 }
 0x350   :  { %v468_v62 = vadd.f32 %v15537_v55, %v467_v58 }
 0x351   :  { %v302_v63 = vsel %vm219_vm2, %v301_v61, -inf }
 0x352   :  { %303 = vmax.xlane.f32.xlu0 %v302_v63  ;;  %v469_v0 = vsel %vm219_vm2, %v468_v62, -inf }
 0x353   :  { %470 = vmax.xlane.f32.xlu1 %v469_v0 }
 0x354   :  { %v630_v1 = vpop.f32.mrf.mxu0 }
 0x355   :  { %v634_v2 = vmul.f32 0.35355338, %v630_v1 }
 0x356   :  { %v13943_v3 = vpop.f32.mrf.mxu0 }
 0x357   :  { %v15544_v4 = vadd.f32 %v15537_v55, %v634_v2 }
 0x358   :  { %v797_v5 = vpop.f32.mrf.mxu0 }
 0x359   :  { %v801_v6 = vmul.f32 0.35355338, %v797_v5  ;;  %v636_v7 = vsel %vm219_vm2, %v15544_v4, -inf }
 0x35a   :  { %637 = vmax.xlane.f32.xlu0 %v636_v7  ;;  %v13953_v8 = vpop.f32.mrf.mxu0 }
 0x35b   :  { %v802_v9 = vadd.f32 %v15537_v55, %v801_v6 }
 0x35c   :  { %v980_v10 = vpop.f32.mrf.mxu0 }
 0x35d   :  { %v984_v12 = vmul.f32 0.35355338, %v980_v10  ;;  %v803_v13 = vsel %vm219_vm2, %v802_v9, -inf }
 0x35e   :  { %804 = vmax.xlane.f32.xlu0 %v803_v13  ;;  %v13963_v14 = vpop.f32.mrf.mxu0 }
 0x35f   :  { %v15556_v15 = vadd.f32 %v15552_v11, %v984_v12 }
 0x360   :  { %v1153_v16 = vpop.f32.mrf.mxu0 }
 0x361   :  { %v1157_v17 = vmul.f32 0.35355338, %v1153_v16  ;;  %v992_v18 = vsel %vm219_vm2, %v15556_v15, -inf }
 0x362   :  { %993 = vmax.xlane.f32.xlu0 %v992_v18  ;;  %v13973_v19 = vpop.f32.mrf.mxu0 }
 0x363   :  { %v1158_v20 = vadd.f32 %v15552_v11, %v1157_v17 }
 0x364   :  { %v1320_v21 = vpop.f32.mrf.mxu0 }
 0x365   :  { %v1324_v22 = vmul.f32 0.35355338, %v1320_v21  ;;  %v1159_v23 = vsel %vm219_vm2, %v1158_v20, -inf }
 0x366   :  { %1160 = vmax.xlane.f32.xlu1 %v1159_v23  ;;  %v13983_v24 = vpop.f32.mrf.mxu0 }
 0x367   :  { %v1325_v25 = vadd.f32 %v15552_v11, %v1324_v22 }
 0x368   :  { %v1487_v26 = vpop.f32.mrf.mxu0 }
 0x369   :  { %v1326_v27 = vsel %vm219_vm2, %v1325_v25, -inf  ;;  %v1491_v29 = vmul.f32 0.35355338, %v1487_v26 }
 0x36a   :  { %1327 = vmax.xlane.f32.xlu0 %v1326_v27  ;;  %v13993_v28 = vpop.f32.mrf.mxu0 }
 0x36b   :  { %v1492_v31 = vadd.f32 %v15552_v11, %v1491_v29 }
 0x36d   :  { %v1493_v32 = vsel %vm219_vm2, %v1492_v31, -inf }
 0x377   :  { %313 = vrot.lane.b32.xlu1 %v15463_v38, %s17582_s25 }
 0x39b   :  { %1494 = vmax.xlane.f32.xlu1 %v1493_v32 }
 0x3ac   :  { %647 = vrot.lane.b32.xlu1 %v15463_v38, %s17588_s26 }
 0x3b0   :  { %814 = vrot.lane.b32.xlu1 %v15463_v38, %s17586_s24 }
 0x3b4   :  { %1003 = vrot.lane.b32.xlu1 %v15477_v39, %s17582_s25  ;;  %s17584_s25 = smov 56  }
 0x3db   :  { %v304_v35 = vpop.xlane.xlu0 %303 }
 0x3dc   :  { %v305_v36 = vsub.f32 %v301_v61, %v304_v35  ;;  %v471_v37 = vpop.xlane.xlu1 %470 }
 0x3dd   :  { %v472_v40 = vsub.f32 %v468_v62, %v471_v37 }
 0x3de   :  { %v306_v41 = vmul.f32 1.442695, %v305_v36 }
 0x3df   :  { %v473_v42 = vmul.f32 1.442695, %v472_v40 }
 0x3e0   :  { %14874 = vpow2.f32 %v306_v41 }
 0x3e1   :  { %14876 = vpow2.f32 %v473_v42 }
 0x3e3   :  { %v638_v43 = vpop.xlane.xlu0 %637 }
 0x3e4   :  { %v639_v56 = vsub.f32 %v15544_v4, %v638_v43 }
 0x3e6   :  { %v640_v58 = vmul.f32 1.442695, %v639_v56  ;;  %v1598_v56 = vld [vmem:[%s17652_s0 + $0x18] sm:$0xff] }
 0x3e7   :  { %v805_v44 = vpop.xlane.xlu0 %804  ;;  %13999 = vmatprep.subr.mxu0 %v1598_v56 }
 0x3e8   :  { %v806_v45 = vsub.f32 %v802_v9, %v805_v44  ;;  %14000 = vmatpush3.msra.mxu0 %v1598_v56 }
 0x3ea   :  { %v807_v46 = vmul.f32 1.442695, %v806_v45 }
 0x3eb   :  { %v994_v57 = vpop.xlane.xlu0 %993 }
 0x3ec   :  { %14878 = vpow2.f32 %v807_v46  ;;  %v995_v59 = vsub.f32 %v15556_v15, %v994_v57  ;;  %v1597_v57 = vld [vmem:[%s17652_s0 + $0x10] sm:$0xff] }
 0x3ed   :  { %v14875_v47 = vpop.eup %14874  ;;  %14880 = vpow2.f32 %v640_v58  ;;  %14001 = vmatprep.subr.mxu0 %v1597_v57 }
 0x3ee   :  { %v15574_v48 = vpop.eup %14876  ;;  %v308_v49 = vsel %vm219_vm2, %v14875_v47, 0.0  ;;  %v996_v61 = vmul.f32 1.442695, %v995_v59  ;;  %14002 = vmatpush3.msra.mxu0 %v1597_v57 }
 0x3ef   :  { %v1161_v50 = vpop.xlane.xlu1 %1160  ;;  %309 = vadd.xlane.f32.xlu0 %v308_v49  ;;  %v475_v51 = vsel %vm219_vm2, %v15574_v48, 0.0 }
 0x3f0   :  { %476 = vadd.xlane.f32.xlu1 %v475_v51  ;;  %14882 = vpow2.f32 %v996_v61  ;;  %v1162_v63 = vsub.f32 %v1158_v20, %v1161_v50  ;;  %v1595_v61 = vld [vmem:[%s17652_s0] sm:$0xff] }
 0x3f2   :  { %v1163_v1 = vmul.f32 1.442695, %v1162_v63 }
 0x3f3   :  { %v314_v52 = vpop.permute.xlu1 %313  ;;  %v1328_v60 = vpop.xlane.xlu0 %1327 }
 0x3f4   :  { %13925 = vmatpush3.msra.mxu1 %v314_v52  ;;  %v1329_v62 = vsub.f32 %v1325_v25, %v1328_v60  ;;  %v1596_v60 = vld [vmem:[%s17652_s0 + $0x8] sm:$0xff] }
 0x3f5   :  { %13934 = vmatprep.subr.mxu1 %v15282_v34  ;;  %14003 = vmatprep.subr.mxu0 %v1596_v60 }
 0x3f6   :  { %v1330_v0 = vmul.f32 1.442695, %v1329_v62  ;;  %14004 = vmatpush3.msra.mxu0 %v1596_v60 }
 0x3f7   :  { %14005 = vmatprep.subr.mxu0 %v1595_v61 }
 0x3f8   :  { %14884 = vpow2.f32 %v1330_v0  ;;  %14006 = vmatpush3.msra.mxu0 %v1595_v61  ;;  %v1850_v61 = vld [vmem:[%s17561_s13 + $0x38] sm:$0xff] }
 0x3f9   :  { %v15580_v53 = vpop.eup %14878  ;;  %14886 = vpow2.f32 %v1163_v1  ;;  %14021 = vmatprep.subr.mxu0 %v1850_v61 }
 0x3fa   :  { %v809_v54 = vsel %vm219_vm2, %v15580_v53, 0.0 }
 0x3fb   :  { %810 = vadd.xlane.f32.xlu1 %v809_v54 }
 0x405   :  { %480 = vrot.lane.b32.xlu0 %v15463_v38, %s17584_s25  ;;  %v14881_v38 = vpop.eup %14880 }
 0x406   :  { %v642_v2 = vsel %vm219_vm2, %v14881_v38, 0.0  ;;  %v15591_v3 = vpop.eup %14882 }
 0x407   :  { %v998_v7 = vsel %vm219_vm2, %v15591_v3, 0.0  ;;  %v15595_v8 = vpop.eup %14884 }
 0x408   :  { %v1332_v9 = vsel %vm219_vm2, %v15595_v8, 0.0  ;;  %v14887_v10 = vpop.eup %14886 }
 0x409   :  { %v1165_v12 = vsel %vm219_vm2, %v14887_v10, 0.0 }
 0x40c   :  { %1170 = vrot.lane.b32.xlu1 %v15477_v39, %s17584_s25  ;;  %s17608_s25 = smov 8  }
 0x424   :  { %v1495_v4 = vpop.xlane.xlu1 %1494  ;;  %643 = vadd.xlane.f32.xlu0 %v642_v2 }
 0x425   :  { %v1496_v5 = vsub.f32 %v1492_v31, %v1495_v4 }
 0x427   :  { %v1497_v6 = vmul.f32 1.442695, %v1496_v5 }
 0x428   :  { %999 = vadd.xlane.f32.xlu0 %v998_v7  ;;  %v648_v15 = vpop.permute.xlu1 %647 }
 0x429   :  { %14888 = vpow2.f32 %v1497_v6 }
 0x42c   :  { %1333 = vadd.xlane.f32.xlu0 %v1332_v9  ;;  %v815_v16 = vpop.permute.xlu1 %814 }
 0x430   :  { %1166 = vadd.xlane.f32.xlu1 %v1165_v12  ;;  %v1004_v17 = vpop.permute.xlu1 %1003 }
 0x436   :  { %v15600_v13 = vpop.eup %14888 }
 0x437   :  { %v1499_v14 = vsel %vm219_vm2, %v15600_v13, 0.0 }
 0x438   :  { %1500 = vadd.xlane.f32.xlu0 %v1499_v14 }
 0x441   :  { %1504 = vrot.lane.b32.xlu1 %v15477_v39, %s17586_s24  ;;  %s17604_s24 = smov 16  }
 0x44e   :  { %1337 = vrot.lane.b32.xlu0 %v15477_v39, %s17588_s26  ;;  %s17658_s26 = smov 112  }
 0x478   :  { %v310_v18 = vpop.xlane.xlu0 %309 }
 0x479   :  { %14890 = vrcp.f32 %v310_v18  ;;  %v477_v19 = vpop.xlane.xlu1 %476 }
 0x47a   :  { %14892 = vrcp.f32 %v477_v19  ;;  %v13155_v19 = vld [vmem:[%s17654_s4] ss:$0 sm:$0xff] }
 0x47c   :  { %v481_v23 = vpop.permute.xlu0 %480 }
 0x484   :  { %v811_v24 = vpop.xlane.xlu1 %810 }
 0x486   :  { %v14891_v20 = vpop.eup %14890 }
 0x487   :  { %v312_v21 = vmul.f32 %v14891_v20, %v14875_v47  ;;  %v14893_v22 = vpop.eup %14892 }
 0x488   :  { %v479_v39 = vmul.f32 %v14893_v22, %v15574_v48  ;;  %v1171_v27 = vpop.permute.xlu1 %1170 }
 0x489   :  { %13927 = vmatmul.mubr.msk.f32.vlgmr.msra.gmra.mxu1 %vm219_vm2, %v312_v21 }
 0x48a   :  { %13935 = vmatpush3.msra.mxu1 %v481_v23  ;;  %13936 = vmatprep.mubr.msk.f32.mxu1 %vm15283_vm1, %v15282_v34 }
 0x48b   :  { %13944 = vmatprep.subr.mxu1 %v15282_v34 }
 0x48d   :  { %13937 = vmatmul.mubr.msk.f32.vlgmr.msra.gmra.mxu1 %vm219_vm2, %v479_v39 }
 0x48e   :  { %13945 = vmatpush3.msra.mxu1 %v648_v15  ;;  %13946 = vmatprep.mubr.msk.f32.mxu1 %vm15283_vm1, %v15282_v34 }
 0x48f   :  { %13954 = vmatprep.subr.mxu1 %v15282_v34 }
 0x4ad   :  { %v644_v25 = vpop.xlane.xlu0 %643 }
 0x4ae   :  { %14894 = vrcp.f32 %v644_v25 }
 0x4af   :  { %14896 = vrcp.f32 %v811_v24 }
 0x4b1   :  { %v1000_v26 = vpop.xlane.xlu0 %999 }
 0x4b2   :  { %14898 = vrcp.f32 %v1000_v26 }
 0x4b5   :  { %v1334_v28 = vpop.xlane.xlu0 %1333 }
 0x4b9   :  { %v1167_v29 = vpop.xlane.xlu1 %1166 }
 0x4ba   :  { %14900 = vrcp.f32 %v1167_v29 }
 0x4bb   :  { %v14895_v31 = vpop.eup %14894  ;;  %14902 = vrcp.f32 %v1334_v28 }
 0x4bc   :  { %v646_v32 = vmul.f32 %v14895_v31, %v14881_v38  ;;  %v14897_v35 = vpop.eup %14896 }
 0x4bd   :  { %v813_v36 = vmul.f32 %v14897_v35, %v15580_v53  ;;  %v1505_v47 = vpop.permute.xlu1 %1504 }
 0x4be   :  { %13947 = vmatmul.mubr.msk.f32.vlgmr.msra.gmra.mxu1 %vm219_vm2, %v646_v32 }
 0x4bf   :  { %13955 = vmatpush3.msra.mxu1 %v815_v16  ;;  %13956 = vmatprep.mubr.msk.f32.mxu1 %vm15283_vm1, %v15282_v34  ;;  %v14899_v37 = vpop.eup %14898 }
 0x4c0   :  { %13964 = vmatprep.subr.mxu1 %v15282_v34  ;;  %v1002_v41 = vmul.f32 %v14899_v37, %v15591_v3 }
 0x4c1   :  { %v1501_v40 = vpop.xlane.xlu0 %1500 }
 0x4c2   :  { %14904 = vrcp.f32 %v1501_v40  ;;  %13957 = vmatmul.mubr.msk.f32.vlgmr.msra.gmra.mxu1 %vm219_vm2, %v813_v36 }
 0x4c3   :  { %13965 = vmatpush3.msra.mxu1 %v1004_v17  ;;  %13966 = vmatprep.mubr.msk.f32.mxu1 %vm15283_vm1, %v15282_v34 }
 0x4c4   :  { %13974 = vmatprep.subr.mxu1 %v15282_v34 }
 0x4c5   :  { %v1338_v45 = vpop.permute.xlu0 %1337 }
 0x4c6   :  { %13967 = vmatmul.mubr.msk.f32.vlgmr.msra.gmra.mxu1 %vm219_vm2, %v1002_v41  ;;  %v1735_v41 = vld [vmem:[%s17558_s11 + $0x10] sm:$0xff] }
 0x4c7   :  { %v14901_v42 = vpop.eup %14900  ;;  %13975 = vmatpush3.msra.mxu1 %v1171_v27  ;;  %13976 = vmatprep.mubr.msk.f32.mxu1 %vm15283_vm1, %v15282_v34 }
 0x4c8   :  { %13984 = vmatprep.subr.mxu1 %v15282_v34  ;;  %v1169_v43 = vmul.f32 %v14901_v42, %v14887_v10  ;;  %v14903_v44 = vpop.eup %14902  ;;  %v1734_v42 = vld [vmem:[%s17558_s11 + $0x8] sm:$0xff] }
 0x4c9   :  { %v1336_v46 = vmul.f32 %v14903_v44, %v15595_v8 }
 0x4ca   :  { %13977 = vmatmul.mubr.msk.f32.vlgmr.msra.gmra.mxu1 %vm219_vm2, %v1169_v43  ;;  %v1733_v43 = vld [vmem:[%s17558_s11] sm:$0xff] }
 0x4cb   :  { %13985 = vmatpush3.msra.mxu1 %v1338_v45  ;;  %13986 = vmatprep.mubr.msk.f32.mxu1 %vm15283_vm1, %v15282_v34 }
 0x4cc   :  { %13994 = vmatprep.subr.mxu1 %v15282_v34 }
 0x4ce   :  { %13987 = vmatmul.mubr.msk.f32.vlgmr.msra.gmra.mxu1 %vm219_vm2, %v1336_v46 }
 0x4cf   :  { %v14905_v48 = vpop.eup %14904  ;;  %13995 = vmatpush3.msra.mxu1 %v1505_v47  ;;  %13996 = vmatprep.mubr.msk.f32.mxu1 %vm15283_vm1, %v15282_v34 }
 0x4d0   :  { %v1503_v49 = vmul.f32 %v14905_v48, %v15600_v13 }
 0x4d2   :  { %13997 = vmatmul.mubr.msk.f32.vlgmr.msra.gmra.mxu1 %vm219_vm2, %v1503_v49 }
 0x549   :  { %v385_v50 = vpop.f32.mrf.mxu1 }
 0x54b   :  { %v13928_v51 = vpop.f32.mrf.mxu1 }
 0x54c   :  { %v13158_v51 = vld [vmem:[%s17559_s9] ss:$0 sm:$0xff] }
 0x54d   :  { %v552_v52 = vpop.f32.mrf.mxu1 }
 0x54e   :  { %891 = vrot.lane.b32.xlu0 %v552_v52, %s17608_s25 }
 0x54f   :  { %v13938_v53 = vpop.f32.mrf.mxu1 }
 0x550   :  { %v13159_v53 = vld [vmem:[%s17560_s10] ss:$0 sm:$0xff] }
 0x57e   :  { %v719_v54 = vpop.f32.mrf.mxu1 }
 0x57f   :  { %895 = vrot.lane.b32.xlu1 %v719_v54, %s17604_s24  ;;  %s17659_s24 = smov 80  }
 0x580   :  { %v13948_v58 = vpop.f32.mrf.mxu1 }
 0x582   :  { %v886_v59 = vpop.f32.mrf.mxu1 }
 0x583   :  { %899 = vrot.lane.b32.xlu1 %v886_v59, %s17606_s27 }
 0x584   :  { %v13958_v62 = vpop.f32.mrf.mxu1 }
 0x585   :  { %v1849_v62 = vld [vmem:[%s17561_s13 + $0x30] sm:$0xff] }
 0x586   :  { %v1075_v63 = vpop.f32.mrf.mxu1 }
 0x588   :  { %v13968_v0 = vpop.f32.mrf.mxu1 }
 0x589   :  { %v1847_v0 = vld [vmem:[%s17561_s13 + $0x20] sm:$0xff] }
 0x58a   :  { %v1242_v1 = vpop.f32.mrf.mxu1 }
 0x58b   :  { %1581 = vrot.lane.b32.xlu0 %v1242_v1, %s17608_s25  ;;  %v1846_v1 = vld [vmem:[%s17561_s13 + $0x18] sm:$0xff]  ;;  %s17662_s25 = smov 64  }
 0x58c   :  { %v13978_v38 = vpop.f32.mrf.mxu1 }
 0x58d   :  { %v1845_v38 = vld [vmem:[%s17561_s13 + $0x10] sm:$0xff] }
 0x58e   :  { %v1409_v2 = vpop.f32.mrf.mxu1 }
 0x58f   :  { %1585 = vrot.lane.b32.xlu0 %v1409_v2, %s17653_s8  ;;  %v1844_v2 = vld [vmem:[%s17561_s13 + $0x8] sm:$0xff] }
 0x590   :  { %v13988_v3 = vpop.f32.mrf.mxu1 }
 0x591   :  { %v1843_v3 = vld [vmem:[%s17561_s13] sm:$0xff] }
 0x592   :  { %v1576_v4 = vpop.f32.mrf.mxu1 }
 0x593   :  { %1589 = vrot.lane.b32.xlu1 %v1576_v4, %s17606_s27  ;;  %v13160_v4 = vld [vmem:[%s17562_s12] ss:$0 sm:$0xff]  ;;  %s17657_s27 = smov 120  }
 0x594   :  { %v13998_v5 = vpop.f32.mrf.mxu1 }
 0x5c0   :  { %v892_v6 = vpop.permute.xlu0 %891 }
 0x5c1   :  { %v902_v8 = vsel %vm219_vm2, %v385_v50, %v892_v6 }
 0x5f1   :  { %v896_v7 = vpop.permute.xlu1 %895 }
 0x5f2   :  { %v904_v9 = vsel %vm903_vm3, %v902_v8, %v896_v7 }
 0x5f5   :  { %v900_v10 = vpop.permute.xlu1 %899 }
 0x5f6   :  { %v906_v12 = vsel %vm905_vm4, %v904_v9, %v900_v10 }
 0x5f7   :  { %14007 = vmatprep.mubr.msk.f32.mxu0 %vm80_vm0, %v906_v12 }
 0x5fd   :  { %v1582_v13 = vpop.permute.xlu0 %1581 }
 0x5fe   :  { %v1592_v15 = vsel %vm219_vm2, %v1075_v63, %v1582_v13  ;;  %v1848_v63 = vld [vmem:[%s17561_s13 + $0x28] sm:$0xff] }
 0x601   :  { %v1586_v14 = vpop.permute.xlu0 %1585 }
 0x602   :  { %v1593_v16 = vsel %vm903_vm3, %v1592_v15, %v1586_v14 }
 0x605   :  { %v1590_v17 = vpop.permute.xlu1 %1589 }
 0x606   :  { %v1594_v18 = vsel %vm905_vm4, %v1593_v16, %v1590_v17 }
 0x607   :  { %14008 = vmatmul.mubr.msk.f32.vlgmr.msra.gmra.mxu0 %vm80_vm0, %v1594_v18 }
 0x608   :  { %14022 = vmatpush3.msra.mxu0 %v1850_v61  ;;  %v13166_v61 = vld [vmem:[%s17564_s15] ss:$0 sm:$0xff] }
 0x609   :  { %14023 = vmatprep.subr.mxu0 %v1849_v62 }
 0x60a   :  { %14024 = vmatpush3.msra.mxu0 %v1849_v62 }
 0x60b   :  { %14025 = vmatprep.subr.mxu0 %v1848_v63 }
 0x60c   :  { %14026 = vmatpush3.msra.mxu0 %v1848_v63 }
 0x60d   :  { %14027 = vmatprep.subr.mxu0 %v1847_v0 }
 0x60e   :  { %14028 = vmatpush3.msra.mxu0 %v1847_v0 }
 0x60f   :  { %14029 = vmatprep.subr.mxu0 %v1846_v1 }
 0x610   :  { %14030 = vmatpush3.msra.mxu0 %v1846_v1 }
 0x611   :  { %14031 = vmatprep.subr.mxu0 %v1845_v38 }
 0x612   :  { %14032 = vmatpush3.msra.mxu0 %v1845_v38  ;;  %v13167_v38 = vld [vmem:[%s17565_s16] ss:$0 sm:$0xff] }
 0x613   :  { %14033 = vmatprep.subr.mxu0 %v1844_v2 }
 0x614   :  { %14034 = vmatpush3.msra.mxu0 %v1844_v2 }
 0x615   :  { %14035 = vmatprep.subr.mxu0 %v1843_v3 }
 0x616   :  { %14036 = vmatpush3.msra.mxu0 %v1843_v3 }
 0x617   :  { %14061 = vmatprep.subr.mxu0 %v15282_v34 }
 0x6c7   :  { %v14009_v20 = vpop.f32.mrf.mxu0 }
 0x6c8   :  { %v1684_v21 = vadd.f32 %v14009_v20, %v13155_v19 }
 0x6c9   :  { %v1678_v22 = vpop.f32.mrf.mxu0 }
 0x6ca   :  { %v1679_v23 = vadd.f32 %v13155_v19, %v1678_v22  ;;  %v1688_v39 = vadd.f32 %v1684_v21, %v15450_v33 }
 0x6cc   :  { %v1694_v24 = vsel %vm80_vm0, %v1688_v39, 0.0  ;;  %v1687_v25 = vadd.f32 %v1679_v23, %v15446_v30  ;;  %v1736_v30 = vld [vmem:[%s17558_s11 + $0x18] sm:$0xff] }
 0x6cd   :  { %1695 = vadd.xlane.f32.xlu1 %v1694_v24  ;;  %14010 = vmatprep.subr.mxu1 %v1736_v30 }
 0x6ce   :  { %v1691_v26 = vsel %vm80_vm0, %v1687_v25, 0.0  ;;  %14011 = vmatpush3.msra.mxu1 %v1736_v30 }
 0x6cf   :  { %1692 = vadd.xlane.f32.xlu0 %v1691_v26  ;;  %14012 = vmatprep.subr.mxu1 %v1735_v41 }
 0x6d0   :  { %14013 = vmatpush3.msra.mxu1 %v1735_v41 }
 0x6d1   :  { %14014 = vmatprep.subr.mxu1 %v1734_v42 }
 0x6d2   :  { %14015 = vmatpush3.msra.mxu1 %v1734_v42 }
 0x6d3   :  { %14016 = vmatprep.subr.mxu1 %v1733_v43 }
 0x6d4   :  { %14017 = vmatpush3.msra.mxu1 %v1733_v43 }
 0x756   :  { %v1696_v27 = vpop.xlane.xlu1 %1695 }
 0x757   :  { %v1698_v28 = vmul.f32 0.03125, %v1696_v27  ;;  %v13163_v27 = vld [vmem:[%s17563_s14] ss:$0 sm:$0xff] }
 0x758   :  { %v1693_v29 = vpop.xlane.xlu0 %1692 }
 0x759   :  { %v1697_v31 = vmul.f32 0.03125, %v1693_v29  ;;  %v1700_v32 = vsub.f32 %v1688_v39, %v1698_v28 }
 0x75b   :  { %v1699_v35 = vsub.f32 %v1687_v25, %v1697_v31  ;;  %v1702_v40 = vmul.f32 %v1700_v32, %v1700_v32 }
 0x75d   :  { %v1701_v36 = vmul.f32 %v1699_v35, %v1699_v35  ;;  %v1706_v33 = vsel %vm80_vm0, %v1702_v40, 0.0 }
 0x75f   :  { %v1703_v37 = vsel %vm80_vm0, %v1701_v36, 0.0 }
 0x760   :  { %1704 = vadd.xlane.f32.xlu0 %v1703_v37 }
 0x764   :  { %1707 = vadd.xlane.f32.xlu0 %v1706_v33 }
 0x7e9   :  { %v1705_v44 = vpop.xlane.xlu0 %1704 }
 0x7ea   :  { %v1709_v45 = vmul.f32 0.03125, %v1705_v44 }
 0x7ec   :  { %v1711_v46 = vadd.f32 1e-12, %v1709_v45 }
 0x7ed   :  { %v1708_v47 = vpop.xlane.xlu0 %1707 }
 0x7ee   :  { %14906 = vrsqrt.f32 %v1711_v46  ;;  %v1710_v48 = vmul.f32 0.03125, %v1708_v47 }
 0x7f0   :  { %v1712_v49 = vadd.f32 1e-12, %v1710_v48 }
 0x7f2   :  { %14908 = vrsqrt.f32 %v1712_v49  ;;  %v13171_v49 = vld [vmem:[%s17647_s3 + $0x38] sm:$0xff] }
 0x7f3   :  { %14040 = vmatprep.subr.mxu1 %v13171_v49 }
 0x7fb   :  { %v14907_v50 = vpop.eup %14906 }
 0x7fc   :  { %v1715_v52 = vmul.f32 %v14907_v50, %v1699_v35  ;;  %v13170_v50 = vld [vmem:[%s17647_s3 + $0x30] sm:$0xff] }
 0x7fe   :  { %v1723_v54 = vmul.f32 %v13158_v51, %v1715_v52  ;;  %v13168_v52 = vld [vmem:[%s17647_s3 + $0x20] sm:$0xff] }
 0x7ff   :  { %v14909_v56 = vpop.eup %14908 }
 0x800   :  { %v15694_v57 = vadd.f32 %v13159_v53, %v1723_v54  ;;  %v1716_v58 = vmul.f32 %v14909_v56, %v1700_v32 }
 0x802   :  { %14018 = vmatprep.mubr.msk.f32.mxu1 %vm80_vm0, %v15694_v57  ;;  %v1724_v59 = vmul.f32 %v13158_v51, %v1716_v58  ;;  %v13169_v51 = vld [vmem:[%s17647_s3 + $0x28] sm:$0xff] }
 0x804   :  { %v15698_v60 = vadd.f32 %v13159_v53, %v1724_v59 }
 0x806   :  { %14019 = vmatmul.mubr.msk.f32.vlgmr.msra.gmra.mxu1 %vm80_vm0, %v15698_v60 }
 0x807   :  { %14041 = vmatpush3.msra.mxu1 %v13171_v49 }
 0x808   :  { %14042 = vmatprep.subr.mxu1 %v13170_v50 }
 0x809   :  { %14043 = vmatpush3.msra.mxu1 %v13170_v50 }
 0x80a   :  { %14044 = vmatprep.subr.mxu1 %v13169_v51 }
 0x80b   :  { %14045 = vmatpush3.msra.mxu1 %v13169_v51 }
 0x80c   :  { %14046 = vmatprep.subr.mxu1 %v13168_v52 }
 0x80d   :  { %14047 = vmatpush3.msra.mxu1 %v13168_v52 }
 0x80e   :  { %14051 = vmatprep.subr.mxu1 %v15282_v34 }
 0x8c6   :  { %v14020_v5 = vpop.f32.mrf.mxu1 }
 0x8c7   :  { %v1822_v6 = vadd.f32 %v14020_v5, %v13160_v4 }
 0x8c8   :  { %v1816_v7 = vpop.f32.mrf.mxu1 }
 0x8c9   :  { %v1826_v8 = vmul.f32 %v1822_v6, %v1822_v6  ;;  %v1817_v9 = vadd.f32 %v13160_v4, %v1816_v7 }
 0x8cb   :  { %v1828_v10 = vmul.f32 %v1826_v8, %v1822_v6  ;;  %v1825_v12 = vmul.f32 %v1817_v9, %v1817_v9 }
 0x8cd   :  { %v1830_v13 = vmul.f32 0.044715, %v1828_v10  ;;  %v1827_v14 = vmul.f32 %v1825_v12, %v1817_v9 }
 0x8cf   :  { %v1832_v15 = vadd.f32 %v1830_v13, %v1822_v6  ;;  %v1829_v16 = vmul.f32 0.044715, %v1827_v14 }
 0x8d1   :  { %v1834_v17 = vmul.f32 0.7978846, %v1832_v15  ;;  %v1831_v18 = vadd.f32 %v1829_v16, %v1817_v9 }
 0x8d3   :  { %14910 = vtanh.f32 %v1834_v17  ;;  %v1833_v19 = vmul.f32 0.7978846, %v1831_v18 }
 0x8d5   :  { %14912 = vtanh.f32 %v1833_v19 }
 0x8e0   :  { %v14911_v20 = vpop.eup %14910 }
 0x8e1   :  { %v1838_v21 = vadd.f32 1.0, %v14911_v20 }
 0x8e2   :  { %v14913_v22 = vpop.eup %14912 }
 0x8e3   :  { %v1837_v23 = vadd.f32 1.0, %v14913_v22  ;;  %v1840_v39 = vmul.f32 0.5, %v1838_v21 }
 0x8e5   :  { %v1839_v24 = vmul.f32 0.5, %v1837_v23  ;;  %v1842_v26 = vmul.f32 %v1840_v39, %v1822_v6  ;;  %v13173_v6 = vld [vmem:[%s17650_s7 + $0x1] ss:$0 sm:$0xff] }
 0x8e7   :  { %v1841_v25 = vmul.f32 %v1839_v24, %v1817_v9 }
 0x8e9   :  { %14037 = vmatprep.mubr.msk.f32.mxu0 %vm1858_vm5, %v1841_v25 }
 0x8ea   :  { %14038 = vmatmul.mubr.msk.f32.vlgmr.msra.gmra.mxu0 %vm1858_vm5, %v1842_v26 }
 0x8eb   :  { %14063 = vmatprep.mubr.msk.f32.mxu0 %vm15283_vm1, %v15282_v34 }
 0x9aa   :  { %v14039_v28 = vpop.f32.mrf.mxu0 }
 0x9ab   :  { %v1937_v29 = vadd.f32 %v14039_v28, %v13163_v27 }
 0x9ac   :  { %v1931_v31 = vpop.f32.mrf.mxu0 }
 0x9ad   :  { %v1932_v32 = vadd.f32 %v13163_v27, %v1931_v31  ;;  %v1941_v35 = vadd.f32 %v1937_v29, %v15698_v60 }
 0x9af   :  { %v1947_v36 = vsel %vm80_vm0, %v1941_v35, 0.0  ;;  %v1940_v37 = vadd.f32 %v1932_v32, %v15694_v57 }
 0x9b0   :  { %1948 = vadd.xlane.f32.xlu1 %v1947_v36 }
 0x9b1   :  { %v1944_v40 = vsel %vm80_vm0, %v1940_v37, 0.0 }
 0x9b2   :  { %1945 = vadd.xlane.f32.xlu0 %v1944_v40 }
 0xa39   :  { %v1949_v33 = vpop.xlane.xlu1 %1948 }
 0xa3a   :  { %v1951_v30 = vmul.f32 0.03125, %v1949_v33 }
 0xa3b   :  { %v1946_v41 = vpop.xlane.xlu0 %1945 }
 0xa3c   :  { %v1953_v42 = vsub.f32 %v1941_v35, %v1951_v30  ;;  %v1950_v43 = vmul.f32 0.03125, %v1946_v41 }
 0xa3e   :  { %v1952_v44 = vsub.f32 %v1940_v37, %v1950_v43  ;;  %v1955_v45 = vmul.f32 %v1953_v42, %v1953_v42 }
 0xa40   :  { %v1959_v46 = vsel %vm80_vm0, %v1955_v45, 0.0  ;;  %v1954_v47 = vmul.f32 %v1952_v44, %v1952_v44 }
 0xa41   :  { %1960 = vadd.xlane.f32.xlu1 %v1959_v46 }
 0xa42   :  { %v1956_v48 = vsel %vm80_vm0, %v1954_v47, 0.0 }
 0xa43   :  { %1957 = vadd.xlane.f32.xlu0 %v1956_v48 }
 0xaca   :  { %v1961_v53 = vpop.xlane.xlu1 %1960 }
 0xacb   :  { %v1963_v54 = vmul.f32 0.03125, %v1961_v53 }
 0xacc   :  { %v1958_v56 = vpop.xlane.xlu0 %1957 }
 0xacd   :  { %v1965_v57 = vadd.f32 1e-12, %v1963_v54  ;;  %v1962_v58 = vmul.f32 0.03125, %v1958_v56 }
 0xacf   :  { %14914 = vrsqrt.f32 %v1965_v57  ;;  %v1964_v59 = vadd.f32 1e-12, %v1962_v58 }
 0xad1   :  { %14916 = vrsqrt.f32 %v1964_v59 }
 0xadc   :  { %v14915_v60 = vpop.eup %14914 }
 0xadd   :  { %v1969_v62 = vmul.f32 %v14915_v60, %v1953_v42 }
 0xade   :  { %v14917_v63 = vpop.eup %14916 }
 0xadf   :  { %v1968_v0 = vmul.f32 %v14917_v63, %v1952_v44  ;;  %v1977_v1 = vmul.f32 %v13166_v61, %v1969_v62 }
 0xae1   :  { %v1976_v2 = vmul.f32 %v13166_v61, %v1968_v0  ;;  %v15764_v4 = vadd.f32 %v13167_v38, %v1977_v1 }
 0xae3   :  { %v15762_v3 = vadd.f32 %v13167_v38, %v1976_v2 }
 0xae5   :  { %14048 = vmatprep.mubr.msk.f32.mxu1 %vm80_vm0, %v15762_v3 }
 0xae6   :  { %14049 = vmatmul.mubr.msk.f32.vlgmr.msra.gmra.mxu1 %vm80_vm0, %v15764_v4 }
 0xae7   :  { %14053 = vmatprep.mubr.msk.f32.mxu1 %vm15283_vm1, %v15282_v34 }
 0xba6   :  { %v14050_v5 = vpop.f32.mrf.mxu1 }
 0xba7   :  { %v15789_v9 = vadd.f32 %v14050_v5, %v13173_v6 }
 0xba8   :  { %v2071_v7 = vpop.f32.mrf.mxu1 }
 0xba9   :  { %v15775_v8 = vadd.f32 %v13173_v6, %v2071_v7 }
 0xbab   :  { %2248 = vrot.lane.b32.xlu1 %v15775_v8, %s17655_s28  ;;  %2081 = vrot.lane.b32.xlu0 %v15775_v8, %s17656_s29 }
 0xbaf   :  { %2246 = vrot.lane.b32.xlu1 %v15775_v8, %s17657_s27  ;;  %2413 = vrot.lane.b32.xlu0 %v15775_v8, %s17658_s26 }
 0xbb3   :  { %2415 = vrot.lane.b32.xlu1 %v15775_v8, %s17659_s24  ;;  %2580 = vrot.lane.b32.xlu0 %v15775_v8, %s17660_s6 }
 0xbb7   :  { %2582 = vrot.lane.b32.xlu1 %v15775_v8, %s17661_s23  ;;  %2930 = vrot.lane.b32.xlu0 %v15789_v9, %s17655_s28 }
 0xbbb   :  { %2763 = vrot.lane.b32.xlu1 %v15789_v9, %s17656_s29  ;;  %3097 = vrot.lane.b32.xlu0 %v15789_v9, %s17659_s24 }
 0xbbf   :  { %2928 = vrot.lane.b32.xlu1 %v15789_v9, %s17657_s27  ;;  %3264 = vrot.lane.b32.xlu0 %v15789_v9, %s17661_s23 }
 0xbc3   :  { %3095 = vrot.lane.b32.xlu1 %v15789_v9, %s17658_s26 }
 0xbc7   :  { %3262 = vrot.lane.b32.xlu1 %v15789_v9, %s17660_s6 }
 0xc1d   :  { %v2249_v10 = vpop.permute.xlu1 %2248  ;;  %v2082_v12 = vpop.permute.xlu0 %2081 }
 0xc1e   :  { %14052 = vmatpush3.xpose.msk.msra.mxu1 %vm219_vm2, %v2082_v12  ;;  %14062 = vmatpush3.xpose.msk.msra.mxu0 %vm219_vm2, %v2249_v10 }
 0xc1f   :  { %14071 = vmatprep.subr.mxu0 %v15282_v34  ;;  %14056 = vmatprep.subr.mxu1 %v15282_v34 }
 0xc21   :  { %v2247_v13 = vpop.permute.xlu1 %2246  ;;  %14054 = vmatmul.mubr.msk.f32.vlgmr.msra.gmra.mxu1 %vm219_vm2, %v15775_v8  ;;  %v2414_v14 = vpop.permute.xlu0 %2413 }
 0xc22   :  { %14064 = vmatmul.mubr.msk.f32.vlgmr.msra.gmra.mxu0 %vm219_vm2, %v2247_v13  ;;  %14058 = vmatprep.mubr.msk.f32.mxu1 %vm15283_vm1, %v15282_v34 }
 0xc23   :  { %14073 = vmatprep.mubr.msk.f32.mxu0 %vm15283_vm1, %v15282_v34 }
 0xc25   :  { %v2416_v15 = vpop.permute.xlu1 %2415  ;;  %v2581_v16 = vpop.permute.xlu0 %2580 }
 0xc26   :  { %14072 = vmatpush3.xpose.msk.msra.mxu0 %vm219_vm2, %v2416_v15 }
 0xc27   :  { %14081 = vmatprep.subr.mxu0 %v15282_v34 }
 0xc29   :  { %v2583_v17 = vpop.permute.xlu1 %2582  ;;  %14074 = vmatmul.mubr.msk.f32.vlgmr.msra.gmra.mxu0 %vm219_vm2, %v2414_v14  ;;  %v2931_v18 = vpop.permute.xlu0 %2930 }
 0xc2a   :  { %14082 = vmatpush3.xpose.msk.msra.mxu0 %vm219_vm2, %v2583_v17  ;;  %14083 = vmatprep.mubr.msk.f32.mxu0 %vm15283_vm1, %v15282_v34 }
 0xc2b   :  { %14091 = vmatprep.subr.mxu0 %v15282_v34 }
 0xc2d   :  { %v2764_v19 = vpop.permute.xlu1 %2763  ;;  %14084 = vmatmul.mubr.msk.f32.vlgmr.msra.gmra.mxu0 %vm219_vm2, %v2581_v16  ;;  %v3098_v21 = vpop.permute.xlu0 %3097 }
 0xc2e   :  { %14092 = vmatpush3.xpose.msk.msra.mxu0 %vm219_vm2, %v2764_v19  ;;  %14093 = vmatprep.mubr.msk.f32.mxu0 %vm15283_vm1, %v15282_v34 }
 0xc2f   :  { %14101 = vmatprep.subr.mxu0 %v15282_v34 }
 0xc31   :  { %v2929_v20 = vpop.permute.xlu1 %2928  ;;  %14094 = vmatmul.mubr.msk.f32.vlgmr.msra.gmra.mxu0 %vm219_vm2, %v15789_v9  ;;  %v3265_v23 = vpop.permute.xlu0 %3264 }
 0xc32   :  { %14102 = vmatpush3.xpose.msk.msra.mxu0 %vm219_vm2, %v2931_v18  ;;  %14103 = vmatprep.mubr.msk.f32.mxu0 %vm15283_vm1, %v15282_v34 }
 0xc33   :  { %14111 = vmatprep.subr.mxu0 %v15282_v34 }
 0xc35   :  { %14104 = vmatmul.mubr.msk.f32.vlgmr.msra.gmra.mxu0 %vm219_vm2, %v2929_v20  ;;  %v3096_v22 = vpop.permute.xlu1 %3095 }
 0xc36   :  { %14112 = vmatpush3.xpose.msk.msra.mxu0 %vm219_vm2, %v3098_v21  ;;  %14113 = vmatprep.mubr.msk.f32.mxu0 %vm15283_vm1, %v15282_v34 }
 0xc37   :  { %14121 = vmatprep.subr.mxu0 %v15282_v34 }
 0xc39   :  { %14114 = vmatmul.mubr.msk.f32.vlgmr.msra.gmra.mxu0 %vm219_vm2, %v3096_v22  ;;  %v3263_v39 = vpop.permute.xlu1 %3262 }
 0xc3a   :  { %14122 = vmatpush3.xpose.msk.msra.mxu0 %vm219_vm2, %v3265_v23  ;;  %14123 = vmatprep.mubr.msk.f32.mxu0 %vm15283_vm1, %v15282_v34 }
 0xc3d   :  { %14124 = vmatmul.mubr.msk.f32.vlgmr.msra.gmra.mxu0 %vm219_vm2, %v3263_v39 }
 0xce1   :  { %v2153_v24 = vpop.f32.mrf.mxu1 }
 0xce2   :  { %v2157_v25 = vmul.f32 0.35355338, %v2153_v24  ;;  %v2320_v26 = vpop.f32.mrf.mxu0 }
 0xce3   :  { %v2324_v27 = vmul.f32 0.35355338, %v2320_v26  ;;  %v14055_v28 = vpop.f32.mrf.mxu1 }
 0xce4   :  { %v14065_v29 = vpop.f32.mrf.mxu0  ;;  %v2158_v31 = vadd.f32 %v15537_v55, %v2157_v25 }
 0xce5   :  { %v2325_v32 = vadd.f32 %v15537_v55, %v2324_v27 }
 0xce6   :  { %v2159_v35 = vsel %vm219_vm2, %v2158_v31, -inf }
 0xce7   :  { %2160 = vmax.xlane.f32.xlu0 %v2159_v35  ;;  %v2326_v36 = vsel %vm219_vm2, %v2325_v32, -inf }
 0xce8   :  { %2327 = vmax.xlane.f32.xlu1 %v2326_v36 }
 0xce9   :  { %v2487_v37 = vpop.f32.mrf.mxu0 }
 0xcea   :  { %v2491_v40 = vmul.f32 0.35355338, %v2487_v37 }
 0xceb   :  { %v14075_v33 = vpop.f32.mrf.mxu0 }
 0xcec   :  { %v15851_v30 = vadd.f32 %v15537_v55, %v2491_v40 }
 0xced   :  { %v2654_v41 = vpop.f32.mrf.mxu0 }
 0xcee   :  { %v2658_v42 = vmul.f32 0.35355338, %v2654_v41  ;;  %v2493_v43 = vsel %vm219_vm2, %v15851_v30, -inf }
 0xcef   :  { %2494 = vmax.xlane.f32.xlu0 %v2493_v43  ;;  %v14085_v44 = vpop.f32.mrf.mxu0 }
 0xcf0   :  { %v2659_v45 = vadd.f32 %v15537_v55, %v2658_v42 }
 0xcf1   :  { %v2835_v46 = vpop.f32.mrf.mxu0 }
 0xcf2   :  { %v2839_v47 = vmul.f32 0.35355338, %v2835_v46  ;;  %v2660_v48 = vsel %vm219_vm2, %v2659_v45, -inf }
 0xcf3   :  { %2661 = vmax.xlane.f32.xlu0 %v2660_v48  ;;  %v14095_v49 = vpop.f32.mrf.mxu0 }
 0xcf4   :  { %v2840_v50 = vadd.f32 %v15552_v11, %v2839_v47 }
 0xcf5   :  { %v3002_v51 = vpop.f32.mrf.mxu0 }
 0xcf6   :  { %v3006_v52 = vmul.f32 0.35355338, %v3002_v51  ;;  %v2841_v53 = vsel %vm219_vm2, %v2840_v50, -inf }
 0xcf7   :  { %2842 = vmax.xlane.f32.xlu0 %v2841_v53  ;;  %v14105_v54 = vpop.f32.mrf.mxu0 }
 0xcf8   :  { %v3007_v56 = vadd.f32 %v15552_v11, %v3006_v52 }
 0xcf9   :  { %v3169_v57 = vpop.f32.mrf.mxu0 }
 0xcfa   :  { %v3173_v58 = vmul.f32 0.35355338, %v3169_v57  ;;  %v3008_v55 = vsel %vm219_vm2, %v3007_v56, -inf }
 0xcfb   :  { %3009 = vmax.xlane.f32.xlu1 %v3008_v55  ;;  %v14115_v59 = vpop.f32.mrf.mxu0 }
 0xcfc   :  { %v3174_v60 = vadd.f32 %v15552_v11, %v3173_v58 }
 0xcfd   :  { %v3336_v61 = vpop.f32.mrf.mxu0 }
 0xcfe   :  { %v3175_v62 = vsel %vm219_vm2, %v3174_v60, -inf  ;;  %v3340_v0 = vmul.f32 0.35355338, %v3336_v61 }
 0xcff   :  { %3176 = vmax.xlane.f32.xlu0 %v3175_v62  ;;  %v14125_v63 = vpop.f32.mrf.mxu0 }
 0xd00   :  { %v3341_v1 = vadd.f32 %v15552_v11, %v3340_v0 }
 0xd02   :  { %v3342_v38 = vsel %vm219_vm2, %v3341_v1, -inf }
 0xd0c   :  { %2170 = vrot.lane.b32.xlu1 %v15775_v8, %s17662_s25 }
 0xd30   :  { %3343 = vmax.xlane.f32.xlu1 %v3342_v38 }
 0xd41   :  { %2504 = vrot.lane.b32.xlu1 %v15775_v8, %s17663_s22 }
 0xd45   :  { %2671 = vrot.lane.b32.xlu1 %v15775_v8, %s17664_s20 }
 0xd49   :  { %2852 = vrot.lane.b32.xlu1 %v15789_v9, %s17662_s25 }
 0xd70   :  { %v2161_v2 = vpop.xlane.xlu0 %2160 }
 0xd71   :  { %v2162_v5 = vsub.f32 %v2158_v31, %v2161_v2  ;;  %v2328_v6 = vpop.xlane.xlu1 %2327 }
 0xd72   :  { %v2329_v7 = vsub.f32 %v2325_v32, %v2328_v6 }
 0xd73   :  { %v2163_v10 = vmul.f32 1.442695, %v2162_v5 }
 0xd74   :  { %v2330_v12 = vmul.f32 1.442695, %v2329_v7 }
 0xd75   :  { %14918 = vpow2.f32 %v2163_v10 }
 0xd76   :  { %14920 = vpow2.f32 %v2330_v12 }
 0xd78   :  { %v2495_v11 = vpop.xlane.xlu0 %2494 }
 0xd79   :  { %v2496_v39 = vsub.f32 %v15851_v30, %v2495_v11 }
 0xd7b   :  { %v2497_v25 = vmul.f32 1.442695, %v2496_v39 }
 0xd7c   :  { %v2662_v13 = vpop.xlane.xlu0 %2661 }
 0xd7d   :  { %v2663_v14 = vsub.f32 %v2659_v45, %v2662_v13 }
 0xd7f   :  { %v2664_v15 = vmul.f32 1.442695, %v2663_v14 }
 0xd80   :  { %v2843_v24 = vpop.xlane.xlu0 %2842 }
 0xd81   :  { %14922 = vpow2.f32 %v2664_v15  ;;  %v2844_v26 = vsub.f32 %v2840_v50, %v2843_v24 }
 0xd82   :  { %v14919_v16 = vpop.eup %14918  ;;  %14924 = vpow2.f32 %v2497_v25  ;;  %v13201_v25 = vld [vmem:[%s17652_s0 + $0x28] sm:$0xff] }
 0xd83   :  { %v15873_v17 = vpop.eup %14920  ;;  %v2165_v18 = vsel %vm219_vm2, %v14919_v16, 0.0  ;;  %v2845_v28 = vmul.f32 1.442695, %v2844_v26  ;;  %v13200_v26 = vld [vmem:[%s17652_s0 + $0x20] sm:$0xff] }
 0xd84   :  { %v3010_v19 = vpop.xlane.xlu1 %3009  ;;  %2166 = vadd.xlane.f32.xlu0 %v2165_v18  ;;  %v2332_v20 = vsel %vm219_vm2, %v15873_v17, 0.0 }
 0xd85   :  { %2333 = vadd.xlane.f32.xlu1 %v2332_v20  ;;  %14926 = vpow2.f32 %v2845_v28  ;;  %v3011_v31 = vsub.f32 %v3007_v56, %v3010_v19 }
 0xd87   :  { %v3012_v35 = vmul.f32 1.442695, %v3011_v31 }
 0xd88   :  { %v2171_v21 = vpop.permute.xlu1 %2170  ;;  %v3177_v27 = vpop.xlane.xlu0 %3176 }
 0xd89   :  { %14057 = vmatpush3.msra.mxu1 %v2171_v21  ;;  %v3178_v29 = vsub.f32 %v3174_v60, %v3177_v27 }
 0xd8a   :  { %14066 = vmatprep.subr.mxu1 %v15282_v34 }
 0xd8b   :  { %v3179_v32 = vmul.f32 1.442695, %v3178_v29 }
 0xd8d   :  { %14928 = vpow2.f32 %v3179_v32 }
 0xd8e   :  { %v15879_v22 = vpop.eup %14922  ;;  %14930 = vpow2.f32 %v3012_v35 }
 0xd8f   :  { %v2666_v23 = vsel %vm219_vm2, %v15879_v22, 0.0  ;;  %v14925_v36 = vpop.eup %14924 }
 0xd90   :  { %2667 = vadd.xlane.f32.xlu1 %v2666_v23  ;;  %v13202_v23 = vld [vmem:[%s17652_s0 + $0x30] sm:$0xff] }
 0xd92   :  { %v15889_v37 = vpop.eup %14926 }
 0xd93   :  { %v2847_v41 = vsel %vm219_vm2, %v15889_v37, 0.0 }
 0xd9a   :  { %2337 = vrot.lane.b32.xlu0 %v15775_v8, %s17665_s19  ;;  %v2499_v8 = vsel %vm219_vm2, %v14925_v36, 0.0  ;;  %v15893_v42 = vpop.eup %14928 }
 0xd9b   :  { %v3181_v43 = vsel %vm219_vm2, %v15893_v42, 0.0  ;;  %v14931_v44 = vpop.eup %14930 }
 0xd9c   :  { %v3014_v45 = vsel %vm219_vm2, %v14931_v44, 0.0 }
 0xda1   :  { %3019 = vrot.lane.b32.xlu1 %v15789_v9, %s17665_s19  ;;  %s17678_s19 = sld [smem:[#allocation10_spill]] }
 0xdb9   :  { %v3344_v40 = vpop.xlane.xlu1 %3343  ;;  %2500 = vadd.xlane.f32.xlu0 %v2499_v8 }
 0xdba   :  { %v3345_v33 = vsub.f32 %v3341_v1, %v3344_v40 }
 0xdbc   :  { %v3346_v30 = vmul.f32 1.442695, %v3345_v33 }
 0xdbd   :  { %2848 = vadd.xlane.f32.xlu0 %v2847_v41  ;;  %v2505_v48 = vpop.permute.xlu1 %2504 }
 0xdbe   :  { %14932 = vpow2.f32 %v3346_v30 }
 0xdc1   :  { %3182 = vadd.xlane.f32.xlu0 %v3181_v43  ;;  %v2672_v49 = vpop.permute.xlu1 %2671 }
 0xdc5   :  { %3015 = vadd.xlane.f32.xlu1 %v3014_v45  ;;  %v2853_v50 = vpop.permute.xlu1 %2852 }
 0xdcb   :  { %v15898_v46 = vpop.eup %14932 }
 0xdcc   :  { %v3348_v47 = vsel %vm219_vm2, %v15898_v46, 0.0 }
 0xdcd   :  { %3349 = vadd.xlane.f32.xlu0 %v3348_v47 }
 0xdd6   :  { %3353 = vrot.lane.b32.xlu1 %v15789_v9, %s17664_s20  ;;  %s17681_s20 = smov 72  }
 0xde3   :  { %3186 = vrot.lane.b32.xlu0 %v15789_v9, %s17663_s22  ;;  %s17669_s22 = smov 40  }
 0xe0d   :  { %v2167_v51 = vpop.xlane.xlu0 %2166 }
 0xe0e   :  { %14934 = vrcp.f32 %v2167_v51  ;;  %v2334_v52 = vpop.xlane.xlu1 %2333 }
 0xe0f   :  { %14936 = vrcp.f32 %v2334_v52 }
 0xe11   :  { %v2338_v57 = vpop.permute.xlu0 %2337 }
 0xe19   :  { %v2668_v58 = vpop.xlane.xlu1 %2667 }
 0xe1b   :  { %v14935_v53 = vpop.eup %14934 }
 0xe1c   :  { %v2169_v54 = vmul.f32 %v14935_v53, %v14919_v16  ;;  %v14937_v56 = vpop.eup %14936 }
 0xe1d   :  { %v2336_v9 = vmul.f32 %v14937_v56, %v15873_v17  ;;  %v3020_v60 = vpop.permute.xlu1 %3019 }
 0xe1e   :  { %14059 = vmatmul.mubr.msk.f32.vlgmr.msra.gmra.mxu1 %vm219_vm2, %v2169_v54 }
 0xe1f   :  { %14067 = vmatpush3.msra.mxu1 %v2338_v57  ;;  %14068 = vmatprep.mubr.msk.f32.mxu1 %vm15283_vm1, %v15282_v34 }
 0xe20   :  { %14076 = vmatprep.subr.mxu1 %v15282_v34 }
 0xe22   :  { %14069 = vmatmul.mubr.msk.f32.vlgmr.msra.gmra.mxu1 %vm219_vm2, %v2336_v9 }
 0xe23   :  { %14077 = vmatpush3.msra.mxu1 %v2505_v48  ;;  %14078 = vmatprep.mubr.msk.f32.mxu1 %vm15283_vm1, %v15282_v34 }
 0xe24   :  { %14086 = vmatprep.subr.mxu1 %v15282_v34 }
 0xe42   :  { %v2501_v55 = vpop.xlane.xlu0 %2500 }
 0xe43   :  { %14938 = vrcp.f32 %v2501_v55 }
 0xe44   :  { %14940 = vrcp.f32 %v2668_v58 }
 0xe46   :  { %v2849_v59 = vpop.xlane.xlu0 %2848 }
 0xe47   :  { %14942 = vrcp.f32 %v2849_v59 }
 0xe4a   :  { %v3183_v61 = vpop.xlane.xlu0 %3182 }
 0xe4e   :  { %v3016_v62 = vpop.xlane.xlu1 %3015 }
 0xe4f   :  { %14944 = vrcp.f32 %v3016_v62 }
 0xe50   :  { %v14939_v63 = vpop.eup %14938  ;;  %14946 = vrcp.f32 %v3183_v61 }
 0xe51   :  { %v2503_v0 = vmul.f32 %v14939_v63, %v14925_v36  ;;  %v14941_v1 = vpop.eup %14940 }
 0xe52   :  { %v2670_v38 = vmul.f32 %v14941_v1, %v15879_v22  ;;  %v3354_v14 = vpop.permute.xlu1 %3353  ;;  %v13203_v22 = vld [vmem:[%s17652_s0 + $0x38] sm:$0xff] }
 0xe53   :  { %14079 = vmatmul.mubr.msk.f32.vlgmr.msra.gmra.mxu1 %vm219_vm2, %v2503_v0  ;;  %14131 = vmatprep.subr.mxu0 %v13203_v22 }
 0xe54   :  { %14087 = vmatpush3.msra.mxu1 %v2672_v49  ;;  %14088 = vmatprep.mubr.msk.f32.mxu1 %vm15283_vm1, %v15282_v34  ;;  %v14943_v2 = vpop.eup %14942 }
 0xe55   :  { %14096 = vmatprep.subr.mxu1 %v15282_v34  ;;  %v2851_v6 = vmul.f32 %v14943_v2, %v15889_v37  ;;  %14132 = vmatpush3.msra.mxu0 %v13203_v22  ;;  %v13214_v2 = vld [vmem:[%s17558_s11 + $0x30] sm:$0xff] }
 0xe56   :  { %v3350_v5 = vpop.xlane.xlu0 %3349  ;;  %14133 = vmatprep.subr.mxu0 %v13202_v23 }
 0xe57   :  { %14948 = vrcp.f32 %v3350_v5  ;;  %14089 = vmatmul.mubr.msk.f32.vlgmr.msra.gmra.mxu1 %vm219_vm2, %v2670_v38  ;;  %14134 = vmatpush3.msra.mxu0 %v13202_v23  ;;  %v13213_v5 = vld [vmem:[%s17558_s11 + $0x28] sm:$0xff] }
 0xe58   :  { %14097 = vmatpush3.msra.mxu1 %v2853_v50  ;;  %14098 = vmatprep.mubr.msk.f32.mxu1 %vm15283_vm1, %v15282_v34  ;;  %v13205_v50 = vld [vmem:[%s17654_s4 + $0x1] ss:$0 sm:$0xff]  ;;  %s17671_s4 = sld [smem:[#allocation9_spill]] }
 0xe59   :  { %14106 = vmatprep.subr.mxu1 %v15282_v34  ;;  %14135 = vmatprep.subr.mxu0 %v13201_v25 }
 0xe5a   :  { %v3187_v11 = vpop.permute.xlu0 %3186  ;;  %14136 = vmatpush3.msra.mxu0 %v13201_v25  ;;  %v13226_v25 = vld [vmem:[%s17561_s13 + $0x70] sm:$0xff] }
 0xe5b   :  { %14099 = vmatmul.mubr.msk.f32.vlgmr.msra.gmra.mxu1 %vm219_vm2, %v2851_v6  ;;  %14137 = vmatprep.subr.mxu0 %v13200_v26  ;;  %v13212_v6 = vld [vmem:[%s17558_s11 + $0x20] sm:$0xff] }
 0xe5c   :  { %v14945_v7 = vpop.eup %14944  ;;  %14107 = vmatpush3.msra.mxu1 %v3020_v60  ;;  %14108 = vmatprep.mubr.msk.f32.mxu1 %vm15283_vm1, %v15282_v34 }
 0xe5d   :  { %14116 = vmatprep.subr.mxu1 %v15282_v34  ;;  %v3018_v10 = vmul.f32 %v14945_v7, %v14931_v44  ;;  %v14947_v12 = vpop.eup %14946  ;;  %14138 = vmatpush3.msra.mxu0 %v13200_v26  ;;  %v13225_v26 = vld [vmem:[%s17561_s13 + $0x68] sm:$0xff] }
 0xe5e   :  { %v3185_v13 = vmul.f32 %v14947_v12, %v15893_v42 }
 0xe5f   :  { %14109 = vmatmul.mubr.msk.f32.vlgmr.msra.gmra.mxu1 %vm219_vm2, %v3018_v10 }
 0xe60   :  { %14117 = vmatpush3.msra.mxu1 %v3187_v11  ;;  %14118 = vmatprep.mubr.msk.f32.mxu1 %vm15283_vm1, %v15282_v34 }
 0xe61   :  { %14126 = vmatprep.subr.mxu1 %v15282_v34 }
 0xe63   :  { %14119 = vmatmul.mubr.msk.f32.vlgmr.msra.gmra.mxu1 %vm219_vm2, %v3185_v13 }
 0xe64   :  { %v14949_v15 = vpop.eup %14948  ;;  %14127 = vmatpush3.msra.mxu1 %v3354_v14  ;;  %14128 = vmatprep.mubr.msk.f32.mxu1 %vm15283_vm1, %v15282_v34 }
 0xe65   :  { %v3352_v16 = vmul.f32 %v14949_v15, %v15898_v46 }
 0xe67   :  { %14129 = vmatmul.mubr.msk.f32.vlgmr.msra.gmra.mxu1 %vm219_vm2, %v3352_v16  ;;  %v13210_v16 = vld [vmem:[%s17559_s9 + $0x1] ss:$0 sm:$0xff] }
 0xede   :  { %v2242_v17 = vpop.f32.mrf.mxu1 }
 0xee0   :  { %v14060_v18 = vpop.f32.mrf.mxu1 }
 0xee1   :  { %v13211_v18 = vld [vmem:[%s17560_s10 + $0x1] ss:$0 sm:$0xff] }
 0xee2   :  { %v2409_v19 = vpop.f32.mrf.mxu1 }
 0xee3   :  { %2748 = vrot.lane.b32.xlu0 %v2409_v19, %s17666_s21 }
 0xee4   :  { %v14070_v20 = vpop.f32.mrf.mxu1 }
 0xf13   :  { %v2576_v21 = vpop.f32.mrf.mxu1 }
 0xf14   :  { %2752 = vrot.lane.b32.xlu1 %v2576_v21, %s17653_s8 }
 0xf15   :  { %v14080_v39 = vpop.f32.mrf.mxu1 }
 0xf17   :  { %v2743_v24 = vpop.f32.mrf.mxu1 }
 0xf18   :  { %2756 = vrot.lane.b32.xlu1 %v2743_v24, %s17667_s17  ;;  %v13227_v24 = vld [vmem:[%s17561_s13 + $0x78] sm:$0xff] }
 0xf19   :  { %v14090_v27 = vpop.f32.mrf.mxu1  ;;  %14153 = vmatprep.subr.mxu0 %v13227_v24 }
 0xf1a   :  { %v13224_v27 = vld [vmem:[%s17561_s13 + $0x60] sm:$0xff] }
 0xf1b   :  { %v2924_v28 = vpop.f32.mrf.mxu1 }
 0xf1d   :  { %v14100_v29 = vpop.f32.mrf.mxu1 }
 0xf1e   :  { %v13222_v29 = vld [vmem:[%s17561_s13 + $0x50] sm:$0xff] }
 0xf1f   :  { %v3091_v31 = vpop.f32.mrf.mxu1 }
 0xf20   :  { %3430 = vrot.lane.b32.xlu0 %v3091_v31, %s17666_s21  ;;  %v13221_v31 = vld [vmem:[%s17561_s13 + $0x48] sm:$0xff] }
 0xf21   :  { %v14110_v32 = vpop.f32.mrf.mxu1 }
 0xf22   :  { %v13220_v32 = vld [vmem:[%s17561_s13 + $0x40] sm:$0xff] }
 0xf23   :  { %v3258_v35 = vpop.f32.mrf.mxu1 }
 0xf24   :  { %3434 = vrot.lane.b32.xlu0 %v3258_v35, %s17653_s8  ;;  %v13217_v35 = vld [vmem:[%s17562_s12 + $0x1] ss:$0 sm:$0xff] }
 0xf25   :  { %v14120_v36 = vpop.f32.mrf.mxu1 }
 0xf27   :  { %v3425_v8 = vpop.f32.mrf.mxu1 }
 0xf28   :  { %3438 = vrot.lane.b32.xlu1 %v3425_v8, %s17667_s17 }
 0xf29   :  { %v14130_v37 = vpop.f32.mrf.mxu1 }
 0xf55   :  { %v2749_v40 = vpop.permute.xlu0 %2748 }
 0xf56   :  { %v2759_v30 = vsel %vm219_vm2, %v2242_v17, %v2749_v40 }
 0xf86   :  { %v2753_v33 = vpop.permute.xlu1 %2752 }
 0xf87   :  { %v2760_v41 = vsel %vm903_vm3, %v2759_v30, %v2753_v33 }
 0xf8a   :  { %v2757_v42 = vpop.permute.xlu1 %2756 }
 0xf8b   :  { %v2761_v43 = vsel %vm905_vm4, %v2760_v41, %v2757_v42 }
 0xf8c   :  { %14139 = vmatprep.mubr.msk.f32.mxu0 %vm80_vm0, %v2761_v43 }
 0xf92   :  { %v3431_v44 = vpop.permute.xlu0 %3430 }
 0xf93   :  { %v3441_v46 = vsel %vm219_vm2, %v2924_v28, %v3431_v44  ;;  %v13223_v28 = vld [vmem:[%s17561_s13 + $0x58] sm:$0xff] }
 0xf96   :  { %v3435_v45 = vpop.permute.xlu0 %3434 }
 0xf97   :  { %v3442_v47 = vsel %vm903_vm3, %v3441_v46, %v3435_v45 }
 0xf9a   :  { %v3439_v48 = vpop.permute.xlu1 %3438 }
 0xf9b   :  { %v3443_v49 = vsel %vm905_vm4, %v3442_v47, %v3439_v48 }
 0xf9c   :  { %14140 = vmatmul.mubr.msk.f32.vlgmr.msra.gmra.mxu0 %vm80_vm0, %v3443_v49 }
 0xf9d   :  { %14154 = vmatpush3.msra.mxu0 %v13227_v24 }
 0xf9e   :  { %14155 = vmatprep.subr.mxu0 %v13226_v25 }
 0xf9f   :  { %14156 = vmatpush3.msra.mxu0 %v13226_v25 }
 0xfa0   :  { %14157 = vmatprep.subr.mxu0 %v13225_v26 }
 0xfa1   :  { %14158 = vmatpush3.msra.mxu0 %v13225_v26 }
 0xfa2   :  { %14159 = vmatprep.subr.mxu0 %v13224_v27 }
 0xfa3   :  { %14160 = vmatpush3.msra.mxu0 %v13224_v27  ;;  %v13235_v27 = vld [vmem:[%s17565_s16 + $0x1] ss:$0 sm:$0xff] }
 0xfa4   :  { %14161 = vmatprep.subr.mxu0 %v13223_v28 }
 0xfa5   :  { %14162 = vmatpush3.msra.mxu0 %v13223_v28 }
 0xfa6   :  { %14163 = vmatprep.subr.mxu0 %v13222_v29 }
 0xfa7   :  { %14164 = vmatpush3.msra.mxu0 %v13222_v29 }
 0xfa8   :  { %14165 = vmatprep.subr.mxu0 %v13221_v31 }
 0xfa9   :  { %14166 = vmatpush3.msra.mxu0 %v13221_v31 }
 0xfaa   :  { %14167 = vmatprep.subr.mxu0 %v13220_v32 }
 0xfab   :  { %14168 = vmatpush3.msra.mxu0 %v13220_v32 }
 0xfac   :  { %14193 = vmatprep.subr.mxu0 %v15282_v34 }
0x105c   :  { %v14141_v51 = vpop.f32.mrf.mxu0 }
0x105d   :  { %v3535_v52 = vadd.f32 %v14141_v51, %v13205_v50 }
0x105e   :  { %v3529_v53 = vpop.f32.mrf.mxu0 }
0x105f   :  { %v3539_v54 = vadd.f32 %v3535_v52, %v15764_v4  ;;  %v3530_v56 = vadd.f32 %v13205_v50, %v3529_v53 }
0x1061   :  { %v3538_v57 = vadd.f32 %v3530_v56, %v15762_v3  ;;  %v3547_v9 = vsel %vm80_vm0, %v3539_v54, 0.0  ;;  %v13215_v3 = vld [vmem:[%s17558_s11 + $0x38] sm:$0xff] }
0x1062   :  { %3548 = vadd.xlane.f32.xlu1 %v3547_v9  ;;  %14142 = vmatprep.subr.mxu1 %v13215_v3  ;;  %v13229_v9 = vld [vmem:[%s17563_s14 + $0x1] ss:$0 sm:$0xff] }
0x1063   :  { %v3544_v58 = vsel %vm80_vm0, %v3538_v57, 0.0  ;;  %14143 = vmatpush3.msra.mxu1 %v13215_v3 }
0x1064   :  { %3545 = vadd.xlane.f32.xlu0 %v3544_v58  ;;  %14144 = vmatprep.subr.mxu1 %v13214_v2 }
0x1065   :  { %14145 = vmatpush3.msra.mxu1 %v13214_v2 }
0x1066   :  { %14146 = vmatprep.subr.mxu1 %v13213_v5 }
0x1067   :  { %14147 = vmatpush3.msra.mxu1 %v13213_v5 }
0x1068   :  { %14148 = vmatprep.subr.mxu1 %v13212_v6 }
0x1069   :  { %14149 = vmatpush3.msra.mxu1 %v13212_v6 }
0x10eb   :  { %v3549_v55 = vpop.xlane.xlu1 %3548 }
0x10ec   :  { %v3551_v59 = vmul.f32 0.03125, %v3549_v55 }
0x10ed   :  { %v3546_v60 = vpop.xlane.xlu0 %3545 }
0x10ee   :  { %v3550_v61 = vmul.f32 0.03125, %v3546_v60  ;;  %v3553_v62 = vsub.f32 %v3539_v54, %v3551_v59 }
0x10f0   :  { %v3552_v63 = vsub.f32 %v3538_v57, %v3550_v61  ;;  %v3555_v38 = vmul.f32 %v3553_v62, %v3553_v62 }
0x10f2   :  { %v3554_v0 = vmul.f32 %v3552_v63, %v3552_v63  ;;  %v3559_v4 = vsel %vm80_vm0, %v3555_v38, 0.0 }
0x10f4   :  { %v3556_v1 = vsel %vm80_vm0, %v3554_v0, 0.0 }
0x10f5   :  { %3557 = vadd.xlane.f32.xlu0 %v3556_v1 }
0x10f9   :  { %3560 = vadd.xlane.f32.xlu0 %v3559_v4 }
0x117e   :  { %v3558_v7 = vpop.xlane.xlu0 %3557 }
0x117f   :  { %v3562_v10 = vmul.f32 0.03125, %v3558_v7 }
0x1181   :  { %v3564_v12 = vadd.f32 1e-12, %v3562_v10 }
0x1182   :  { %v3561_v11 = vpop.xlane.xlu0 %3560 }
0x1183   :  { %14950 = vrsqrt.f32 %v3564_v12  ;;  %v3563_v13 = vmul.f32 0.03125, %v3561_v11  ;;  %v13239_v11 = vld [vmem:[%s17647_s3 + $0x58] sm:$0xff] }
0x1184   :  { %14172 = vmatprep.subr.mxu1 %v13239_v11 }
0x1185   :  { %v3565_v14 = vadd.f32 1e-12, %v3563_v13  ;;  %v13238_v13 = vld [vmem:[%s17647_s3 + $0x50] sm:$0xff] }
0x1187   :  { %14952 = vrsqrt.f32 %v3565_v14  ;;  %v13237_v14 = vld [vmem:[%s17647_s3 + $0x48] sm:$0xff] }
0x1190   :  { %v14951_v15 = vpop.eup %14950 }
0x1191   :  { %v3568_v17 = vmul.f32 %v14951_v15, %v3552_v63  ;;  %v13236_v15 = vld [vmem:[%s17647_s3 + $0x40] sm:$0xff] }
0x1193   :  { %v3576_v19 = vmul.f32 %v13210_v16, %v3568_v17 }
0x1194   :  { %v14953_v20 = vpop.eup %14952 }
0x1195   :  { %v15992_v21 = vadd.f32 %v13211_v18, %v3576_v19  ;;  %v3569_v22 = vmul.f32 %v14953_v20, %v3553_v62 }
0x1197   :  { %14150 = vmatprep.mubr.msk.f32.mxu1 %vm80_vm0, %v15992_v21  ;;  %v3577_v23 = vmul.f32 %v13210_v16, %v3569_v22 }
0x1199   :  { %v3585_v39 = vadd.f32 %v13211_v18, %v3577_v23  ;;  %v13234_v23 = vld [vmem:[%s17564_s15 + $0x1] ss:$0 sm:$0xff] }
0x119b   :  { %14151 = vmatmul.mubr.msk.f32.vlgmr.msra.gmra.mxu1 %vm80_vm0, %v3585_v39 }
0x119c   :  { %14173 = vmatpush3.msra.mxu1 %v13239_v11  ;;  %v15195_v11 = vld [vmem:[%s17651_s5 + $0x1] ss:$0 sm:$0xff] }
0x119d   :  { %14174 = vmatprep.subr.mxu1 %v13238_v13 }
0x119e   :  { %14175 = vmatpush3.msra.mxu1 %v13238_v13 }
0x119f   :  { %14176 = vmatprep.subr.mxu1 %v13237_v14 }
0x11a0   :  { %14177 = vmatpush3.msra.mxu1 %v13237_v14 }
0x11a1   :  { %14178 = vmatprep.subr.mxu1 %v13236_v15 }
0x11a2   :  { %14179 = vmatpush3.msra.mxu1 %v13236_v15 }
0x11a3   :  { %14183 = vmatprep.subr.mxu1 %v15282_v34 }
0x125b   :  { %v14152_v36 = vpop.f32.mrf.mxu1 }
0x125c   :  { %v3677_v8 = vadd.f32 %v14152_v36, %v13217_v35 }
0x125d   :  { %v3671_v37 = vpop.f32.mrf.mxu1 }
0x125e   :  { %v3681_v40 = vmul.f32 %v3677_v8, %v3677_v8  ;;  %v3672_v33 = vadd.f32 %v13217_v35, %v3671_v37  ;;  %v13241_v35 = vld [vmem:[%s17650_s7 + $0x2] ss:$0 sm:$0xff] }
0x1260   :  { %v3683_v30 = vmul.f32 %v3681_v40, %v3677_v8  ;;  %v3680_v41 = vmul.f32 %v3672_v33, %v3672_v33 }
0x1262   :  { %v3685_v42 = vmul.f32 0.044715, %v3683_v30  ;;  %v3682_v43 = vmul.f32 %v3680_v41, %v3672_v33 }
0x1264   :  { %v3687_v44 = vadd.f32 %v3685_v42, %v3677_v8  ;;  %v3684_v45 = vmul.f32 0.044715, %v3682_v43 }
0x1266   :  { %v3689_v46 = vmul.f32 0.7978846, %v3687_v44  ;;  %v3686_v47 = vadd.f32 %v3684_v45, %v3672_v33 }
0x1268   :  { %14954 = vtanh.f32 %v3689_v46  ;;  %v3688_v48 = vmul.f32 0.7978846, %v3686_v47 }
0x126a   :  { %14956 = vtanh.f32 %v3688_v48 }
0x1275   :  { %v14955_v49 = vpop.eup %14954 }
0x1276   :  { %v3693_v50 = vadd.f32 1.0, %v14955_v49 }
0x1277   :  { %v14957_v51 = vpop.eup %14956 }
0x1278   :  { %v3692_v52 = vadd.f32 1.0, %v14957_v51  ;;  %v3695_v53 = vmul.f32 0.5, %v3693_v50 }
0x127a   :  { %v3694_v54 = vmul.f32 0.5, %v3692_v52  ;;  %v3697_v57 = vmul.f32 %v3695_v53, %v3677_v8 }
0x127c   :  { %v3696_v56 = vmul.f32 %v3694_v54, %v3672_v33 }
0x127e   :  { %14169 = vmatprep.mubr.msk.f32.mxu0 %vm1858_vm5, %v3696_v56 }
0x127f   :  { %14170 = vmatmul.mubr.msk.f32.vlgmr.msra.gmra.mxu0 %vm1858_vm5, %v3697_v57 }
0x1280   :  { %14195 = vmatprep.mubr.msk.f32.mxu0 %vm15283_vm1, %v15282_v34 }
0x133f   :  { %v14171_v58 = vpop.f32.mrf.mxu0 }
0x1340   :  { %v3793_v55 = vadd.f32 %v14171_v58, %v13229_v9 }
0x1341   :  { %v3787_v59 = vpop.f32.mrf.mxu0 }
0x1342   :  { %v3797_v60 = vadd.f32 %v3793_v55, %v3585_v39  ;;  %v3788_v61 = vadd.f32 %v13229_v9, %v3787_v59  ;;  %v15194_v9 = vld [vmem:[%s17651_s5] ss:$0 sm:$0xff]  ;;  %s17668_s5 = smov 48  }
0x1344   :  { %v3796_v62 = vadd.f32 %v3788_v61, %v15992_v21  ;;  %v3805_v63 = vsel %vm80_vm0, %v3797_v60, 0.0 }
0x1345   :  { %3806 = vadd.xlane.f32.xlu1 %v3805_v63 }
0x1346   :  { %v3802_v0 = vsel %vm80_vm0, %v3796_v62, 0.0 }
0x1347   :  { %3803 = vadd.xlane.f32.xlu0 %v3802_v0 }
0x13ce   :  { %v3807_v1 = vpop.xlane.xlu1 %3806 }
0x13cf   :  { %v3809_v38 = vmul.f32 0.03125, %v3807_v1 }
0x13d0   :  { %v3804_v4 = vpop.xlane.xlu0 %3803 }
0x13d1   :  { %v3811_v3 = vsub.f32 %v3797_v60, %v3809_v38  ;;  %v3808_v2 = vmul.f32 0.03125, %v3804_v4 }
0x13d3   :  { %v3810_v5 = vsub.f32 %v3796_v62, %v3808_v2  ;;  %v3813_v6 = vmul.f32 %v3811_v3, %v3811_v3 }
0x13d5   :  { %v3817_v7 = vsel %vm80_vm0, %v3813_v6, 0.0  ;;  %v3812_v10 = vmul.f32 %v3810_v5, %v3810_v5 }
0x13d6   :  { %3818 = vadd.xlane.f32.xlu1 %v3817_v7 }
0x13d7   :  { %v3814_v12 = vsel %vm80_vm0, %v3812_v10, 0.0 }
0x13d8   :  { %3815 = vadd.xlane.f32.xlu0 %v3814_v12 }
0x145f   :  { %v3819_v16 = vpop.xlane.xlu1 %3818 }
0x1460   :  { %v3821_v17 = vmul.f32 0.03125, %v3819_v16 }
0x1461   :  { %v3816_v18 = vpop.xlane.xlu0 %3815 }
0x1462   :  { %v3823_v19 = vadd.f32 1e-12, %v3821_v17  ;;  %v3820_v20 = vmul.f32 0.03125, %v3816_v18 }
0x1464   :  { %14958 = vrsqrt.f32 %v3823_v19  ;;  %v3822_v21 = vadd.f32 1e-12, %v3820_v20 }
0x1466   :  { %14960 = vrsqrt.f32 %v3822_v21 }
0x1471   :  { %v14959_v22 = vpop.eup %14958 }
0x1472   :  { %v3827_v39 = vmul.f32 %v14959_v22, %v3811_v3 }
0x1473   :  { %v14961_v24 = vpop.eup %14960 }
0x1474   :  { %v3826_v25 = vmul.f32 %v14961_v24, %v3810_v5  ;;  %v3835_v26 = vmul.f32 %v13234_v23, %v3827_v39 }
0x1476   :  { %v3834_v28 = vmul.f32 %v13234_v23, %v3826_v25  ;;  %v16058_v31 = vadd.f32 %v13235_v27, %v3835_v26 }
0x1478   :  { %v16056_v29 = vadd.f32 %v13235_v27, %v3834_v28 }
0x147a   :  { %14180 = vmatprep.mubr.msk.f32.mxu1 %vm80_vm0, %v16056_v29 }
0x147b   :  { %14181 = vmatmul.mubr.msk.f32.vlgmr.msra.gmra.mxu1 %vm80_vm0, %v16058_v31 }
0x147c   :  { %14185 = vmatprep.mubr.msk.f32.mxu1 %vm15283_vm1, %v15282_v34 }
0x153b   :  { %v14182_v32 = vpop.f32.mrf.mxu1 }
0x153c   :  { %v16083_v37 = vadd.f32 %v14182_v32, %v13241_v35 }
0x153d   :  { %v3929_v36 = vpop.f32.mrf.mxu1 }
0x153e   :  { %v16069_v8 = vadd.f32 %v13241_v35, %v3929_v36 }
0x1540   :  { %4106 = vrot.lane.b32.xlu1 %v16069_v8, %s17655_s28  ;;  %3939 = vrot.lane.b32.xlu0 %v16069_v8, %s17656_s29 }
0x1544   :  { %4104 = vrot.lane.b32.xlu1 %v16069_v8, %s17657_s27  ;;  %4271 = vrot.lane.b32.xlu0 %v16069_v8, %s17658_s26 }
0x1548   :  { %4273 = vrot.lane.b32.xlu1 %v16069_v8, %s17659_s24  ;;  %4438 = vrot.lane.b32.xlu0 %v16069_v8, %s17660_s6 }
0x154c   :  { %4440 = vrot.lane.b32.xlu1 %v16069_v8, %s17661_s23  ;;  %4788 = vrot.lane.b32.xlu0 %v16083_v37, %s17655_s28 }
0x1550   :  { %4621 = vrot.lane.b32.xlu1 %v16083_v37, %s17656_s29  ;;  %4955 = vrot.lane.b32.xlu0 %v16083_v37, %s17659_s24 }
0x1554   :  { %4786 = vrot.lane.b32.xlu1 %v16083_v37, %s17657_s27  ;;  %5122 = vrot.lane.b32.xlu0 %v16083_v37, %s17661_s23 }
0x1558   :  { %4953 = vrot.lane.b32.xlu1 %v16083_v37, %s17658_s26 }
0x155c   :  { %5120 = vrot.lane.b32.xlu1 %v16083_v37, %s17660_s6 }
0x15b2   :  { %v4107_v40 = vpop.permute.xlu1 %4106  ;;  %v3940_v33 = vpop.permute.xlu0 %3939 }
0x15b3   :  { %14184 = vmatpush3.xpose.msk.msra.mxu1 %vm219_vm2, %v3940_v33  ;;  %14194 = vmatpush3.xpose.msk.msra.mxu0 %vm219_vm2, %v4107_v40 }
0x15b4   :  { %14203 = vmatprep.subr.mxu0 %v15282_v34  ;;  %14188 = vmatprep.subr.mxu1 %v15282_v34 }
0x15b6   :  { %v4105_v30 = vpop.permute.xlu1 %4104  ;;  %14186 = vmatmul.mubr.msk.f32.vlgmr.msra.gmra.mxu1 %vm219_vm2, %v16069_v8  ;;  %v4272_v41 = vpop.permute.xlu0 %4271 }
0x15b7   :  { %14196 = vmatmul.mubr.msk.f32.vlgmr.msra.gmra.mxu0 %vm219_vm2, %v4105_v30  ;;  %14190 = vmatprep.mubr.msk.f32.mxu1 %vm15283_vm1, %v15282_v34 }
0x15b8   :  { %14205 = vmatprep.mubr.msk.f32.mxu0 %vm15283_vm1, %v15282_v34 }
0x15ba   :  { %v4274_v42 = vpop.permute.xlu1 %4273  ;;  %v4439_v43 = vpop.permute.xlu0 %4438 }
0x15bb   :  { %14204 = vmatpush3.xpose.msk.msra.mxu0 %vm219_vm2, %v4274_v42 }
0x15bc   :  { %14213 = vmatprep.subr.mxu0 %v15282_v34 }
0x15be   :  { %v4441_v44 = vpop.permute.xlu1 %4440  ;;  %14206 = vmatmul.mubr.msk.f32.vlgmr.msra.gmra.mxu0 %vm219_vm2, %v4272_v41  ;;  %v4789_v45 = vpop.permute.xlu0 %4788 }
0x15bf   :  { %14214 = vmatpush3.xpose.msk.msra.mxu0 %vm219_vm2, %v4441_v44  ;;  %14215 = vmatprep.mubr.msk.f32.mxu0 %vm15283_vm1, %v15282_v34 }
0x15c0   :  { %14223 = vmatprep.subr.mxu0 %v15282_v34 }
0x15c2   :  { %v4622_v46 = vpop.permute.xlu1 %4621  ;;  %14216 = vmatmul.mubr.msk.f32.vlgmr.msra.gmra.mxu0 %vm219_vm2, %v4439_v43  ;;  %v4956_v48 = vpop.permute.xlu0 %4955 }
0x15c3   :  { %14224 = vmatpush3.xpose.msk.msra.mxu0 %vm219_vm2, %v4622_v46  ;;  %14225 = vmatprep.mubr.msk.f32.mxu0 %vm15283_vm1, %v15282_v34 }
0x15c4   :  { %14233 = vmatprep.subr.mxu0 %v15282_v34 }
0x15c6   :  { %v4787_v47 = vpop.permute.xlu1 %4786  ;;  %14226 = vmatmul.mubr.msk.f32.vlgmr.msra.gmra.mxu0 %vm219_vm2, %v16083_v37  ;;  %v5123_v50 = vpop.permute.xlu0 %5122 }
0x15c7   :  { %14234 = vmatpush3.xpose.msk.msra.mxu0 %vm219_vm2, %v4789_v45  ;;  %14235 = vmatprep.mubr.msk.f32.mxu0 %vm15283_vm1, %v15282_v34 }
0x15c8   :  { %14243 = vmatprep.subr.mxu0 %v15282_v34 }
0x15ca   :  { %14236 = vmatmul.mubr.msk.f32.vlgmr.msra.gmra.mxu0 %vm219_vm2, %v4787_v47  ;;  %v4954_v49 = vpop.permute.xlu1 %4953 }
0x15cb   :  { %14244 = vmatpush3.xpose.msk.msra.mxu0 %vm219_vm2, %v4956_v48  ;;  %14245 = vmatprep.mubr.msk.f32.mxu0 %vm15283_vm1, %v15282_v34 }
0x15cc   :  { %14253 = vmatprep.subr.mxu0 %v15282_v34 }
0x15ce   :  { %14246 = vmatmul.mubr.msk.f32.vlgmr.msra.gmra.mxu0 %vm219_vm2, %v4954_v49  ;;  %v5121_v51 = vpop.permute.xlu1 %5120 }
0x15cf   :  { %14254 = vmatpush3.xpose.msk.msra.mxu0 %vm219_vm2, %v5123_v50  ;;  %14255 = vmatprep.mubr.msk.f32.mxu0 %vm15283_vm1, %v15282_v34 }
0x15d2   :  { %14256 = vmatmul.mubr.msk.f32.vlgmr.msra.gmra.mxu0 %vm219_vm2, %v5121_v51 }
0x1676   :  { %v4011_v52 = vpop.f32.mrf.mxu1 }
0x1677   :  { %v4015_v53 = vmul.f32 0.35355338, %v4011_v52  ;;  %v4178_v54 = vpop.f32.mrf.mxu0 }
0x1678   :  { %v4182_v56 = vmul.f32 0.35355338, %v4178_v54  ;;  %v14187_v57 = vpop.f32.mrf.mxu1 }
0x1679   :  { %v4016_v58 = vadd.f32 %v15194_v9, %v4015_v53  ;;  %v14197_v55 = vpop.f32.mrf.mxu0 }
0x167a   :  { %v4183_v59 = vadd.f32 %v15194_v9, %v4182_v56 }
0x167b   :  { %v4017_v60 = vsel %vm219_vm2, %v4016_v58, -inf }
0x167c   :  { %4018 = vmax.xlane.f32.xlu0 %v4017_v60  ;;  %v4184_v61 = vsel %vm219_vm2, %v4183_v59, -inf }
0x167d   :  { %4185 = vmax.xlane.f32.xlu1 %v4184_v61 }
0x167e   :  { %v4345_v62 = vpop.f32.mrf.mxu0 }
0x167f   :  { %v4349_v63 = vmul.f32 0.35355338, %v4345_v62 }
0x1680   :  { %v14207_v0 = vpop.f32.mrf.mxu0 }
0x1681   :  { %v16145_v1 = vadd.f32 %v15194_v9, %v4349_v63 }
0x1682   :  { %v4512_v38 = vpop.f32.mrf.mxu0 }
0x1683   :  { %v4516_v4 = vmul.f32 0.35355338, %v4512_v38  ;;  %v4351_v3 = vsel %vm219_vm2, %v16145_v1, -inf }
0x1684   :  { %4352 = vmax.xlane.f32.xlu0 %v4351_v3  ;;  %v14217_v2 = vpop.f32.mrf.mxu0 }
0x1685   :  { %v4517_v5 = vadd.f32 %v15194_v9, %v4516_v4 }
0x1686   :  { %v4693_v6 = vpop.f32.mrf.mxu0 }
0x1687   :  { %v4697_v7 = vmul.f32 0.35355338, %v4693_v6  ;;  %v4518_v10 = vsel %vm219_vm2, %v4517_v5, -inf }
0x1688   :  { %4519 = vmax.xlane.f32.xlu0 %v4518_v10  ;;  %v14227_v12 = vpop.f32.mrf.mxu0 }
0x1689   :  { %v4698_v13 = vadd.f32 %v15195_v11, %v4697_v7 }
0x168a   :  { %v4860_v14 = vpop.f32.mrf.mxu0 }
0x168b   :  { %v4864_v15 = vmul.f32 0.35355338, %v4860_v14  ;;  %v4699_v16 = vsel %vm219_vm2, %v4698_v13, -inf }
0x168c   :  { %4700 = vmax.xlane.f32.xlu0 %v4699_v16  ;;  %v14237_v17 = vpop.f32.mrf.mxu0 }
0x168d   :  { %v4865_v18 = vadd.f32 %v15195_v11, %v4864_v15 }
0x168e   :  { %v5027_v19 = vpop.f32.mrf.mxu0 }
0x168f   :  { %v5031_v20 = vmul.f32 0.35355338, %v5027_v19  ;;  %v4866_v21 = vsel %vm219_vm2, %v4865_v18, -inf }
0x1690   :  { %4867 = vmax.xlane.f32.xlu1 %v4866_v21  ;;  %v14247_v22 = vpop.f32.mrf.mxu0 }
0x1691   :  { %v5032_v23 = vadd.f32 %v15195_v11, %v5031_v20 }
0x1692   :  { %v5194_v39 = vpop.f32.mrf.mxu0 }
0x1693   :  { %v5033_v24 = vsel %vm219_vm2, %v5032_v23, -inf  ;;  %v5198_v26 = vmul.f32 0.35355338, %v5194_v39 }
0x1694   :  { %5034 = vmax.xlane.f32.xlu0 %v5033_v24  ;;  %v14257_v25 = vpop.f32.mrf.mxu0 }
0x1695   :  { %v5199_v27 = vadd.f32 %v15195_v11, %v5198_v26 }
0x1697   :  { %v5200_v28 = vsel %vm219_vm2, %v5199_v27, -inf }
0x16a1   :  { %4028 = vrot.lane.b32.xlu1 %v16069_v8, %s17662_s25 }
0x16c5   :  { %5201 = vmax.xlane.f32.xlu1 %v5200_v28 }
0x16d6   :  { %4362 = vrot.lane.b32.xlu1 %v16069_v8, %s17668_s5 }
0x16da   :  { %4529 = vrot.lane.b32.xlu1 %v16069_v8, %s17669_s22 }
0x16de   :  { %4710 = vrot.lane.b32.xlu1 %v16083_v37, %s17662_s25 }
0x1705   :  { %v4019_v32 = vpop.xlane.xlu0 %4018 }
0x1706   :  { %v4020_v35 = vsub.f32 %v4016_v58, %v4019_v32  ;;  %v4186_v36 = vpop.xlane.xlu1 %4185 }
0x1707   :  { %v4187_v40 = vsub.f32 %v4183_v59, %v4186_v36 }
0x1708   :  { %v4021_v33 = vmul.f32 1.442695, %v4020_v35 }
0x1709   :  { %v4188_v30 = vmul.f32 1.442695, %v4187_v40 }
0x170a   :  { %14962 = vpow2.f32 %v4021_v33 }
0x170b   :  { %14964 = vpow2.f32 %v4188_v30 }
0x170d   :  { %v4353_v41 = vpop.xlane.xlu0 %4352 }
0x170e   :  { %v4354_v53 = vsub.f32 %v16145_v1, %v4353_v41 }
0x1710   :  { %v4355_v56 = vmul.f32 1.442695, %v4354_v53 }
0x1711   :  { %v4520_v42 = vpop.xlane.xlu0 %4519 }
0x1712   :  { %v4521_v43 = vsub.f32 %v4517_v5, %v4520_v42 }
0x1714   :  { %v4522_v44 = vmul.f32 1.442695, %v4521_v43 }
0x1715   :  { %v4701_v54 = vpop.xlane.xlu0 %4700 }
0x1716   :  { %14966 = vpow2.f32 %v4522_v44  ;;  %v4702_v57 = vsub.f32 %v4698_v13, %v4701_v54 }
0x1717   :  { %v14963_v45 = vpop.eup %14962  ;;  %14968 = vpow2.f32 %v4355_v56  ;;  %v13269_v56 = vld [vmem:[%s17652_s0 + $0x48] sm:$0xff] }
0x1718   :  { %v16165_v46 = vpop.eup %14964  ;;  %v4023_v47 = vsel %vm219_vm2, %v14963_v45, 0.0  ;;  %v4703_v58 = vmul.f32 1.442695, %v4702_v57  ;;  %v13268_v57 = vld [vmem:[%s17652_s0 + $0x40] sm:$0xff] }
0x1719   :  { %v4868_v48 = vpop.xlane.xlu1 %4867  ;;  %4024 = vadd.xlane.f32.xlu0 %v4023_v47  ;;  %v4190_v49 = vsel %vm219_vm2, %v16165_v46, 0.0 }
0x171a   :  { %4191 = vadd.xlane.f32.xlu1 %v4190_v49  ;;  %14970 = vpow2.f32 %v4703_v58  ;;  %v4869_v59 = vsub.f32 %v4865_v18, %v4868_v48 }
0x171c   :  { %v4870_v61 = vmul.f32 1.442695, %v4869_v59 }
0x171d   :  { %v4029_v50 = vpop.permute.xlu1 %4028  ;;  %v5035_v9 = vpop.xlane.xlu0 %5034 }
0x171e   :  { %14189 = vmatpush3.msra.mxu1 %v4029_v50  ;;  %v5036_v55 = vsub.f32 %v5032_v23, %v5035_v9 }
0x171f   :  { %14198 = vmatprep.subr.mxu1 %v15282_v34 }
0x1720   :  { %v5037_v60 = vmul.f32 1.442695, %v5036_v55 }
0x1722   :  { %14972 = vpow2.f32 %v5037_v60 }
0x1723   :  { %v16171_v51 = vpop.eup %14966  ;;  %14974 = vpow2.f32 %v4870_v61 }
0x1724   :  { %v4524_v52 = vsel %vm219_vm2, %v16171_v51, 0.0  ;;  %v14969_v62 = vpop.eup %14968 }
0x1725   :  { %4525 = vadd.xlane.f32.xlu1 %v4524_v52  ;;  %v13270_v52 = vld [vmem:[%s17652_s0 + $0x50] sm:$0xff] }
0x1727   :  { %v16181_v63 = vpop.eup %14970 }
0x1728   :  { %v4705_v4 = vsel %vm219_vm2, %v16181_v63, 0.0 }
0x172f   :  { %4195 = vrot.lane.b32.xlu0 %v16069_v8, %s17670_s30  ;;  %v4357_v8 = vsel %vm219_vm2, %v14969_v62, 0.0  ;;  %v16185_v3 = vpop.eup %14972 }
0x1730   :  { %v5039_v2 = vsel %vm219_vm2, %v16185_v3, 0.0  ;;  %v14975_v5 = vpop.eup %14974 }
0x1731   :  { %v4872_v6 = vsel %vm219_vm2, %v14975_v5, 0.0 }
0x1736   :  { %4877 = vrot.lane.b32.xlu1 %v16083_v37, %s17670_s30  ;;  %s17692_s30 = sld [smem:[#allocation18_spill]] }
0x174e   :  { %v5202_v0 = vpop.xlane.xlu1 %5201  ;;  %4358 = vadd.xlane.f32.xlu0 %v4357_v8 }
0x174f   :  { %v5203_v1 = vsub.f32 %v5199_v27, %v5202_v0 }
0x1751   :  { %v5204_v38 = vmul.f32 1.442695, %v5203_v1 }
0x1752   :  { %4706 = vadd.xlane.f32.xlu0 %v4705_v4  ;;  %v4363_v12 = vpop.permute.xlu1 %4362 }
0x1753   :  { %14976 = vpow2.f32 %v5204_v38 }
0x1756   :  { %5040 = vadd.xlane.f32.xlu0 %v5039_v2  ;;  %v4530_v11 = vpop.permute.xlu1 %4529 }
0x175a   :  { %4873 = vadd.xlane.f32.xlu1 %v4872_v6  ;;  %v4711_v13 = vpop.permute.xlu1 %4710 }
0x1760   :  { %v16190_v7 = vpop.eup %14976 }
0x1761   :  { %v5206_v10 = vsel %vm219_vm2, %v16190_v7, 0.0 }
0x1762   :  { %5207 = vadd.xlane.f32.xlu0 %v5206_v10 }
0x176b   :  { %5211 = vrot.lane.b32.xlu1 %v16083_v37, %s17669_s22  ;;  %s17672_s22 = sld [smem:[#allocation11_spill]] }
0x1778   :  { %5044 = vrot.lane.b32.xlu0 %v16083_v37, %s17668_s5 }
0x17a2   :  { %v4025_v14 = vpop.xlane.xlu0 %4024 }
0x17a3   :  { %14978 = vrcp.f32 %v4025_v14  ;;  %v4192_v15 = vpop.xlane.xlu1 %4191 }
0x17a4   :  { %14980 = vrcp.f32 %v4192_v15 }
0x17a6   :  { %v4196_v19 = vpop.permute.xlu0 %4195 }
0x17ae   :  { %v4526_v20 = vpop.xlane.xlu1 %4525 }
0x17b0   :  { %v14979_v16 = vpop.eup %14978 }
0x17b1   :  { %v4027_v17 = vmul.f32 %v14979_v16, %v14963_v45  ;;  %v14981_v18 = vpop.eup %14980 }
0x17b2   :  { %v4194_v37 = vmul.f32 %v14981_v18, %v16165_v46  ;;  %v4878_v23 = vpop.permute.xlu1 %4877 }
0x17b3   :  { %14191 = vmatmul.mubr.msk.f32.vlgmr.msra.gmra.mxu1 %vm219_vm2, %v4027_v17 }
0x17b4   :  { %14199 = vmatpush3.msra.mxu1 %v4196_v19  ;;  %14200 = vmatprep.mubr.msk.f32.mxu1 %vm15283_vm1, %v15282_v34 }
0x17b5   :  { %14208 = vmatprep.subr.mxu1 %v15282_v34 }
0x17b7   :  { %14201 = vmatmul.mubr.msk.f32.vlgmr.msra.gmra.mxu1 %vm219_vm2, %v4194_v37 }
0x17b8   :  { %14209 = vmatpush3.msra.mxu1 %v4363_v12  ;;  %14210 = vmatprep.mubr.msk.f32.mxu1 %vm15283_vm1, %v15282_v34 }
0x17b9   :  { %14218 = vmatprep.subr.mxu1 %v15282_v34 }
0x17d7   :  { %v4359_v21 = vpop.xlane.xlu0 %4358 }
0x17d8   :  { %14982 = vrcp.f32 %v4359_v21 }
0x17d9   :  { %14984 = vrcp.f32 %v4526_v20 }
0x17db   :  { %v4707_v22 = vpop.xlane.xlu0 %4706 }
0x17dc   :  { %14986 = vrcp.f32 %v4707_v22 }
0x17df   :  { %v5041_v39 = vpop.xlane.xlu0 %5040 }
0x17e3   :  { %v4874_v24 = vpop.xlane.xlu1 %4873 }
0x17e4   :  { %14988 = vrcp.f32 %v4874_v24 }
0x17e5   :  { %v14983_v25 = vpop.eup %14982  ;;  %14990 = vrcp.f32 %v5041_v39 }
0x17e6   :  { %v4361_v26 = vmul.f32 %v14983_v25, %v14969_v62  ;;  %v14985_v27 = vpop.eup %14984 }
0x17e7   :  { %v4528_v28 = vmul.f32 %v14985_v27, %v16171_v51  ;;  %v5212_v43 = vpop.permute.xlu1 %5211  ;;  %v13271_v51 = vld [vmem:[%s17652_s0 + $0x58] sm:$0xff] }
0x17e8   :  { %14211 = vmatmul.mubr.msk.f32.vlgmr.msra.gmra.mxu1 %vm219_vm2, %v4361_v26  ;;  %14263 = vmatprep.subr.mxu0 %v13271_v51 }
0x17e9   :  { %14219 = vmatpush3.msra.mxu1 %v4530_v11  ;;  %14220 = vmatprep.mubr.msk.f32.mxu1 %vm15283_vm1, %v15282_v34  ;;  %v14987_v32 = vpop.eup %14986 }
0x17ea   :  { %14228 = vmatprep.subr.mxu1 %v15282_v34  ;;  %v4709_v36 = vmul.f32 %v14987_v32, %v16181_v63  ;;  %14264 = vmatpush3.msra.mxu0 %v13271_v51  ;;  %v13282_v32 = vld [vmem:[%s17558_s11 + $0x50] sm:$0xff] }
0x17eb   :  { %v5208_v35 = vpop.xlane.xlu0 %5207  ;;  %14265 = vmatprep.subr.mxu0 %v13270_v52 }
0x17ec   :  { %14992 = vrcp.f32 %v5208_v35  ;;  %14221 = vmatmul.mubr.msk.f32.vlgmr.msra.gmra.mxu1 %vm219_vm2, %v4528_v28  ;;  %14266 = vmatpush3.msra.mxu0 %v13270_v52  ;;  %v13281_v35 = vld [vmem:[%s17558_s11 + $0x48] sm:$0xff] }
0x17ed   :  { %14229 = vmatpush3.msra.mxu1 %v4711_v13  ;;  %14230 = vmatprep.mubr.msk.f32.mxu1 %vm15283_vm1, %v15282_v34  ;;  %v13273_v13 = vld [vmem:[%s17671_s4 + $0x2] ss:$0 sm:$0xff]  ;;  %s17674_s4 = sld [smem:[#allocation5_spill]] }
0x17ee   :  { %14238 = vmatprep.subr.mxu1 %v15282_v34  ;;  %14267 = vmatprep.subr.mxu0 %v13269_v56 }
0x17ef   :  { %v5045_v41 = vpop.permute.xlu0 %5044  ;;  %14268 = vmatpush3.msra.mxu0 %v13269_v56  ;;  %v15197_v56 = vld [vmem:[%s17647_s3 + $0x10] sm:$0xff] }
0x17f0   :  { %14231 = vmatmul.mubr.msk.f32.vlgmr.msra.gmra.mxu1 %vm219_vm2, %v4709_v36  ;;  %14269 = vmatprep.subr.mxu0 %v13268_v57  ;;  %v13280_v36 = vld [vmem:[%s17558_s11 + $0x40] sm:$0xff] }
0x17f1   :  { %v14989_v40 = vpop.eup %14988  ;;  %14239 = vmatpush3.msra.mxu1 %v4878_v23  ;;  %14240 = vmatprep.mubr.msk.f32.mxu1 %vm15283_vm1, %v15282_v34 }
0x17f2   :  { %14248 = vmatprep.subr.mxu1 %v15282_v34  ;;  %v4876_v33 = vmul.f32 %v14989_v40, %v14975_v5  ;;  %v14991_v30 = vpop.eup %14990  ;;  %14270 = vmatpush3.msra.mxu0 %v13268_v57  ;;  %v15196_v40 = vld [vmem:[%s17647_s3 + $0x18] sm:$0xff]  ;;  %v15198_v57 = vld [vmem:[%s17647_s3 + $0x8] sm:$0xff] }
0x17f3   :  { %v5043_v42 = vmul.f32 %v14991_v30, %v16185_v3 }
0x17f4   :  { %14241 = vmatmul.mubr.msk.f32.vlgmr.msra.gmra.mxu1 %vm219_vm2, %v4876_v33 }
0x17f5   :  { %14249 = vmatpush3.msra.mxu1 %v5045_v41  ;;  %14250 = vmatprep.mubr.msk.f32.mxu1 %vm15283_vm1, %v15282_v34 }
0x17f6   :  { %14258 = vmatprep.subr.mxu1 %v15282_v34 }
0x17f8   :  { %14251 = vmatmul.mubr.msk.f32.vlgmr.msra.gmra.mxu1 %vm219_vm2, %v5043_v42 }
0x17f9   :  { %v14993_v44 = vpop.eup %14992  ;;  %14259 = vmatpush3.msra.mxu1 %v5212_v43  ;;  %14260 = vmatprep.mubr.msk.f32.mxu1 %vm15283_vm1, %v15282_v34 }
0x17fa   :  { %v5210_v45 = vmul.f32 %v14993_v44, %v16190_v7 }
0x17fc   :  { %14261 = vmatmul.mubr.msk.f32.vlgmr.msra.gmra.mxu1 %vm219_vm2, %v5210_v45 }
0x1873   :  { %v4100_v46 = vpop.f32.mrf.mxu1 }
0x1875   :  { %v14192_v47 = vpop.f32.mrf.mxu1 }
0x1877   :  { %v4267_v48 = vpop.f32.mrf.mxu1 }
0x1878   :  { %4606 = vrot.lane.b32.xlu0 %v4267_v48, %s17666_s21  ;;  %v13279_v48 = vld [vmem:[%s17560_s10 + $0x2] ss:$0 sm:$0xff] }
0x1879   :  { %v14202_v49 = vpop.f32.mrf.mxu1 }
0x18a8   :  { %v4434_v50 = vpop.f32.mrf.mxu1 }
0x18a9   :  { %4610 = vrot.lane.b32.xlu1 %v4434_v50, %s17653_s8 }
0x18aa   :  { %v14212_v53 = vpop.f32.mrf.mxu1 }
0x18ac   :  { %v4601_v54 = vpop.f32.mrf.mxu1 }
0x18ad   :  { %4614 = vrot.lane.b32.xlu1 %v4601_v54, %s17667_s17 }
0x18ae   :  { %v14222_v9 = vpop.f32.mrf.mxu1 }
0x18af   :  { %v15199_v9 = vld [vmem:[%s17647_s3] sm:$0xff] }
0x18b0   :  { %v4782_v58 = vpop.f32.mrf.mxu1 }
0x18b2   :  { %v14232_v55 = vpop.f32.mrf.mxu1 }
0x18b3   :  { %v13294_v55 = vld [vmem:[%s17561_s13 + $0xb0] sm:$0xff] }
0x18b4   :  { %v4949_v59 = vpop.f32.mrf.mxu1 }
0x18b5   :  { %5288 = vrot.lane.b32.xlu0 %v4949_v59, %s17666_s21  ;;  %v13293_v59 = vld [vmem:[%s17561_s13 + $0xa8] sm:$0xff] }
0x18b6   :  { %v14242_v60 = vpop.f32.mrf.mxu1 }
0x18b7   :  { %v13292_v60 = vld [vmem:[%s17561_s13 + $0xa0] sm:$0xff] }
0x18b8   :  { %v5116_v61 = vpop.f32.mrf.mxu1 }
0x18b9   :  { %5292 = vrot.lane.b32.xlu0 %v5116_v61, %s17653_s8  ;;  %v13291_v61 = vld [vmem:[%s17561_s13 + $0x98] sm:$0xff] }
0x18ba   :  { %v14252_v62 = vpop.f32.mrf.mxu1 }
0x18bb   :  { %v13290_v62 = vld [vmem:[%s17561_s13 + $0x90] sm:$0xff] }
0x18bc   :  { %v5283_v8 = vpop.f32.mrf.mxu1 }
0x18bd   :  { %5296 = vrot.lane.b32.xlu1 %v5283_v8, %s17667_s17  ;;  %v13289_v8 = vld [vmem:[%s17561_s13 + $0x88] sm:$0xff] }
0x18be   :  { %v14262_v63 = vpop.f32.mrf.mxu1 }
0x18bf   :  { %v13288_v63 = vld [vmem:[%s17561_s13 + $0x80] sm:$0xff] }
0x18ea   :  { %v4607_v0 = vpop.permute.xlu0 %4606 }
0x18eb   :  { %v4617_v38 = vsel %vm219_vm2, %v4100_v46, %v4607_v0  ;;  %v13278_v46 = vld [vmem:[%s17559_s9 + $0x2] ss:$0 sm:$0xff] }
0x18ec   :  { %v13285_v0 = vld [vmem:[%s17562_s12 + $0x2] ss:$0 sm:$0xff] }
0x191b   :  { %v4611_v1 = vpop.permute.xlu1 %4610 }
0x191c   :  { %v4618_v4 = vsel %vm903_vm3, %v4617_v38, %v4611_v1 }
0x191f   :  { %v4615_v3 = vpop.permute.xlu1 %4614 }
0x1920   :  { %v4619_v2 = vsel %vm905_vm4, %v4618_v4, %v4615_v3 }
0x1921   :  { %14271 = vmatprep.mubr.msk.f32.mxu0 %vm80_vm0, %v4619_v2 }
0x1927   :  { %v5289_v5 = vpop.permute.xlu0 %5288 }
0x1928   :  { %v5299_v7 = vsel %vm219_vm2, %v4782_v58, %v5289_v5  ;;  %v13295_v58 = vld [vmem:[%s17561_s13 + $0xb8] sm:$0xff] }
0x1929   :  { %14285 = vmatprep.subr.mxu0 %v13295_v58 }
0x192b   :  { %v5293_v6 = vpop.permute.xlu0 %5292 }
0x192c   :  { %v5300_v10 = vsel %vm903_vm3, %v5299_v7, %v5293_v6 }
0x192f   :  { %v5297_v12 = vpop.permute.xlu1 %5296 }
0x1930   :  { %v5301_v11 = vsel %vm905_vm4, %v5300_v10, %v5297_v12 }
0x1931   :  { %14272 = vmatmul.mubr.msk.f32.vlgmr.msra.gmra.mxu0 %vm80_vm0, %v5301_v11 }
0x1932   :  { %14286 = vmatpush3.msra.mxu0 %v13295_v58  ;;  %v5703_v58 = vld [vmem:[%s17672_s22 + $0x8] sm:$0xff] }
0x1933   :  { %14287 = vmatprep.subr.mxu0 %v13294_v55 }
0x1934   :  { %14288 = vmatpush3.msra.mxu0 %v13294_v55 }
0x1935   :  { %14289 = vmatprep.subr.mxu0 %v13293_v59 }
0x1936   :  { %14290 = vmatpush3.msra.mxu0 %v13293_v59 }
0x1937   :  { %14291 = vmatprep.subr.mxu0 %v13292_v60 }
0x1938   :  { %14292 = vmatpush3.msra.mxu0 %v13292_v60  ;;  %v5702_v60 = vld [vmem:[%s17672_s22] sm:$0xff] }
0x1939   :  { %14293 = vmatprep.subr.mxu0 %v13291_v61 }
0x193a   :  { %14294 = vmatpush3.msra.mxu0 %v13291_v61 }
0x193b   :  { %14295 = vmatprep.subr.mxu0 %v13290_v62 }
0x193c   :  { %14296 = vmatpush3.msra.mxu0 %v13290_v62 }
0x193d   :  { %14297 = vmatprep.subr.mxu0 %v13289_v8 }
0x193e   :  { %14298 = vmatpush3.msra.mxu0 %v13289_v8 }
0x193f   :  { %14299 = vmatprep.subr.mxu0 %v13288_v63 }
0x1940   :  { %14300 = vmatpush3.msra.mxu0 %v13288_v63 }
0x1941   :  { %14325 = vmatprep.subr.mxu0 %v15282_v34 }
0x19f1   :  { %v14273_v14 = vpop.f32.mrf.mxu0 }
0x19f2   :  { %v5393_v15 = vadd.f32 %v14273_v14, %v13273_v13 }
0x19f3   :  { %v5387_v16 = vpop.f32.mrf.mxu0 }
0x19f4   :  { %v5397_v17 = vadd.f32 %v5393_v15, %v16058_v31  ;;  %v5388_v18 = vadd.f32 %v13273_v13, %v5387_v16 }
0x19f6   :  { %v5396_v19 = vadd.f32 %v5388_v18, %v16056_v29  ;;  %v5405_v37 = vsel %vm80_vm0, %v5397_v17, 0.0  ;;  %v13283_v29 = vld [vmem:[%s17558_s11 + $0x58] sm:$0xff] }
0x19f7   :  { %5406 = vadd.xlane.f32.xlu1 %v5405_v37  ;;  %14274 = vmatprep.subr.mxu1 %v13283_v29 }
0x19f8   :  { %v5402_v20 = vsel %vm80_vm0, %v5396_v19, 0.0  ;;  %14275 = vmatpush3.msra.mxu1 %v13283_v29 }
0x19f9   :  { %5403 = vadd.xlane.f32.xlu0 %v5402_v20  ;;  %14276 = vmatprep.subr.mxu1 %v13282_v32 }
0x19fa   :  { %14277 = vmatpush3.msra.mxu1 %v13282_v32 }
0x19fb   :  { %14278 = vmatprep.subr.mxu1 %v13281_v35 }
0x19fc   :  { %14279 = vmatpush3.msra.mxu1 %v13281_v35 }
0x19fd   :  { %14280 = vmatprep.subr.mxu1 %v13280_v36 }
0x19fe   :  { %14281 = vmatpush3.msra.mxu1 %v13280_v36 }
0x19ff   :  { %14304 = vmatprep.subr.mxu1 %v15196_v40 }
0x1a80   :  { %v5407_v21 = vpop.xlane.xlu1 %5406 }
0x1a81   :  { %v5409_v22 = vmul.f32 0.03125, %v5407_v21 }
0x1a82   :  { %v5404_v23 = vpop.xlane.xlu0 %5403 }
0x1a83   :  { %v5408_v39 = vmul.f32 0.03125, %v5404_v23  ;;  %v5411_v24 = vsub.f32 %v5397_v17, %v5409_v22  ;;  %v13297_v23 = vld [vmem:[%s17563_s14 + $0x2] ss:$0 sm:$0xff]  ;;  %s17675_s14 = smov 40  }
0x1a85   :  { %v5410_v25 = vsub.f32 %v5396_v19, %v5408_v39  ;;  %v5413_v28 = vmul.f32 %v5411_v24, %v5411_v24 }
0x1a87   :  { %v5412_v26 = vmul.f32 %v5410_v25, %v5410_v25  ;;  %v5417_v31 = vsel %vm80_vm0, %v5413_v28, 0.0 }
0x1a89   :  { %v5414_v27 = vsel %vm80_vm0, %v5412_v26, 0.0 }
0x1a8a   :  { %5415 = vadd.xlane.f32.xlu0 %v5414_v27 }
0x1a8e   :  { %5418 = vadd.xlane.f32.xlu0 %v5417_v31 }
0x1b13   :  { %v5416_v33 = vpop.xlane.xlu0 %5415 }
0x1b14   :  { %v5420_v30 = vmul.f32 0.03125, %v5416_v33 }
0x1b16   :  { %v5422_v41 = vadd.f32 1e-12, %v5420_v30 }
0x1b17   :  { %v5419_v42 = vpop.xlane.xlu0 %5418 }
0x1b18   :  { %14994 = vrsqrt.f32 %v5422_v41  ;;  %v5421_v43 = vmul.f32 0.03125, %v5419_v42 }
0x1b1a   :  { %v5423_v44 = vadd.f32 1e-12, %v5421_v43 }
0x1b1c   :  { %14996 = vrsqrt.f32 %v5423_v44 }
0x1b25   :  { %v14995_v45 = vpop.eup %14994 }
0x1b26   :  { %v5426_v47 = vmul.f32 %v14995_v45, %v5410_v25 }
0x1b28   :  { %v5434_v49 = vmul.f32 %v13278_v46, %v5426_v47 }
0x1b29   :  { %v14997_v50 = vpop.eup %14996 }
0x1b2a   :  { %v16287_v51 = vadd.f32 %v13279_v48, %v5434_v49  ;;  %v5427_v52 = vmul.f32 %v14997_v50, %v5411_v24 }
0x1b2c   :  { %14282 = vmatprep.mubr.msk.f32.mxu1 %vm80_vm0, %v16287_v51  ;;  %v5435_v53 = vmul.f32 %v13278_v46, %v5427_v52  ;;  %v13302_v52 = vld [vmem:[%s17564_s15 + $0x2] ss:$0 sm:$0xff] }
0x1b2e   :  { %v16291_v54 = vadd.f32 %v13279_v48, %v5435_v53 }
0x1b30   :  { %14283 = vmatmul.mubr.msk.f32.vlgmr.msra.gmra.mxu1 %vm80_vm0, %v16291_v54 }
0x1b31   :  { %14305 = vmatpush3.msra.mxu1 %v15196_v40 }
0x1b32   :  { %14306 = vmatprep.subr.mxu1 %v15197_v56 }
0x1b33   :  { %14307 = vmatpush3.msra.mxu1 %v15197_v56  ;;  %v13303_v56 = vld [vmem:[%s17565_s16 + $0x2] ss:$0 sm:$0xff] }
0x1b34   :  { %14308 = vmatprep.subr.mxu1 %v15198_v57 }
0x1b35   :  { %14309 = vmatpush3.msra.mxu1 %v15198_v57 }
0x1b36   :  { %14310 = vmatprep.subr.mxu1 %v15199_v9 }
0x1b37   :  { %14311 = vmatpush3.msra.mxu1 %v15199_v9 }
0x1b38   :  { %14315 = vmatprep.subr.mxu1 %v15282_v34 }
0x1bf0   :  { %v14284_v1 = vpop.f32.mrf.mxu1 }
0x1bf1   :  { %v5535_v38 = vadd.f32 %v14284_v1, %v13285_v0 }
0x1bf2   :  { %v5529_v4 = vpop.f32.mrf.mxu1 }
0x1bf3   :  { %v5539_v3 = vmul.f32 %v5535_v38, %v5535_v38  ;;  %v5530_v2 = vadd.f32 %v13285_v0, %v5529_v4 }
0x1bf5   :  { %v5541_v5 = vmul.f32 %v5539_v3, %v5535_v38  ;;  %v5538_v6 = vmul.f32 %v5530_v2, %v5530_v2 }
0x1bf7   :  { %v5543_v7 = vmul.f32 0.044715, %v5541_v5  ;;  %v5540_v10 = vmul.f32 %v5538_v6, %v5530_v2 }
0x1bf9   :  { %v5545_v12 = vadd.f32 %v5543_v7, %v5535_v38  ;;  %v5542_v11 = vmul.f32 0.044715, %v5540_v10 }
0x1bfb   :  { %v5547_v13 = vmul.f32 0.7978846, %v5545_v12  ;;  %v5544_v14 = vadd.f32 %v5542_v11, %v5530_v2 }
0x1bfd   :  { %14998 = vtanh.f32 %v5547_v13  ;;  %v5546_v15 = vmul.f32 0.7978846, %v5544_v14 }
0x1bff   :  { %15000 = vtanh.f32 %v5546_v15 }
0x1c0a   :  { %v14999_v16 = vpop.eup %14998 }
0x1c0b   :  { %v5551_v17 = vadd.f32 1.0, %v14999_v16 }
0x1c0c   :  { %v15001_v18 = vpop.eup %15000 }
0x1c0d   :  { %v5550_v19 = vadd.f32 1.0, %v15001_v18  ;;  %v5553_v37 = vmul.f32 0.5, %v5551_v17 }
0x1c0f   :  { %v5552_v20 = vmul.f32 0.5, %v5550_v19  ;;  %v5555_v22 = vmul.f32 %v5553_v37, %v5535_v38 }
0x1c11   :  { %v5554_v21 = vmul.f32 %v5552_v20, %v5530_v2 }
0x1c13   :  { %14301 = vmatprep.mubr.msk.f32.mxu0 %vm1858_vm5, %v5554_v21  ;;  %v15200_v21 = vld [vmem:[%s17673_s1] ss:$0 sm:$0xff] }
0x1c14   :  { %14302 = vmatmul.mubr.msk.f32.vlgmr.msra.gmra.mxu0 %vm1858_vm5, %v5555_v22 }
0x1c15   :  { %14327 = vmatprep.mubr.msk.f32.mxu0 %vm15283_vm1, %v15282_v34 }
0x1cd4   :  { %v14303_v39 = vpop.f32.mrf.mxu0 }
0x1cd5   :  { %v5651_v24 = vadd.f32 %v14303_v39, %v13297_v23  ;;  %v15201_v39 = vld [vmem:[%s17674_s4] ss:$0 sm:$0xff]  ;;  %s17680_s4 = smov 104  }
0x1cd6   :  { %v5645_v25 = vpop.f32.mrf.mxu0 }
0x1cd7   :  { %v5655_v26 = vadd.f32 %v5651_v24, %v16291_v54  ;;  %v5646_v27 = vadd.f32 %v13297_v23, %v5645_v25 }
0x1cd9   :  { %v5654_v28 = vadd.f32 %v5646_v27, %v16287_v51  ;;  %v5663_v31 = vsel %vm80_vm0, %v5655_v26, 0.0 }
0x1cda   :  { %5664 = vadd.xlane.f32.xlu1 %v5663_v31 }
0x1cdb   :  { %v5660_v29 = vsel %vm80_vm0, %v5654_v28, 0.0 }
0x1cdc   :  { %5661 = vadd.xlane.f32.xlu0 %v5660_v29 }
0x1d63   :  { %v5665_v32 = vpop.xlane.xlu1 %5664 }
0x1d64   :  { %v5667_v35 = vmul.f32 0.03125, %v5665_v32 }
0x1d65   :  { %v5662_v36 = vpop.xlane.xlu0 %5661 }
0x1d66   :  { %v5669_v40 = vsub.f32 %v5655_v26, %v5667_v35  ;;  %v5666_v33 = vmul.f32 0.03125, %v5662_v36 }
0x1d68   :  { %v5668_v30 = vsub.f32 %v5654_v28, %v5666_v33  ;;  %v5671_v41 = vmul.f32 %v5669_v40, %v5669_v40  ;;  %v15202_v28 = vld [vmem:[%s17650_s7] ss:$0 sm:$0xff] }
0x1d6a   :  { %v5675_v42 = vsel %vm80_vm0, %v5671_v41, 0.0  ;;  %v5670_v43 = vmul.f32 %v5668_v30, %v5668_v30 }
0x1d6b   :  { %5676 = vadd.xlane.f32.xlu1 %v5675_v42 }
0x1d6c   :  { %v5672_v44 = vsel %vm80_vm0, %v5670_v43, 0.0 }
0x1d6d   :  { %5673 = vadd.xlane.f32.xlu0 %v5672_v44 }
0x1df4   :  { %v5677_v45 = vpop.xlane.xlu1 %5676 }
0x1df5   :  { %v5679_v46 = vmul.f32 0.03125, %v5677_v45 }
0x1df6   :  { %v5674_v47 = vpop.xlane.xlu0 %5673 }
0x1df7   :  { %v5681_v48 = vadd.f32 1e-12, %v5679_v46  ;;  %v5678_v49 = vmul.f32 0.03125, %v5674_v47 }
0x1df9   :  { %15002 = vrsqrt.f32 %v5681_v48  ;;  %v5680_v50 = vadd.f32 1e-12, %v5678_v49  ;;  %v15203_v48 = vld [vmem:[%s17652_s0 + $0x18] sm:$0xff] }
0x1dfb   :  { %15004 = vrsqrt.f32 %v5680_v50  ;;  %v15204_v50 = vld [vmem:[%s17652_s0 + $0x10] sm:$0xff] }
0x1e06   :  { %v15003_v51 = vpop.eup %15002 }
0x1e07   :  { %v5685_v53 = vmul.f32 %v15003_v51, %v5669_v40  ;;  %v15205_v51 = vld [vmem:[%s17652_s0 + $0x8] sm:$0xff] }
0x1e08   :  { %v15005_v54 = vpop.eup %15004 }
0x1e09   :  { %v5693_v57 = vmul.f32 %v13302_v52, %v5685_v53  ;;  %v5684_v9 = vmul.f32 %v15005_v54, %v5668_v30  ;;  %v16467_v53 = vld [vmem:[%s17561_s13 + $0x38] sm:$0xff] }
0x1e0b   :  { %v5701_v55 = vadd.f32 %v13303_v56, %v5693_v57  ;;  %v5692_v59 = vmul.f32 %v13302_v52, %v5684_v9  ;;  %v15206_v52 = vld [vmem:[%s17652_s0] sm:$0xff] }
0x1e0d   :  { %v5705_v61 = vadd.f32 %v5703_v58, %v5701_v55  ;;  %v5700_v62 = vadd.f32 %v13303_v56, %v5692_v59 }
0x1e0f   :  { %v5709_v8 = vsel %vm80_vm0, %v5705_v61, 0.0  ;;  %v5704_v63 = vadd.f32 %v5702_v60, %v5700_v62 }
0x1e10   :  { %5710 = vadd.xlane.f32.xlu1 %v5709_v8 }
0x1e11   :  { %v5706_v0 = vsel %vm80_vm0, %v5704_v63, 0.0 }
0x1e12   :  { %5707 = vadd.xlane.f32.xlu0 %v5706_v0 }
0x1e99   :  { %v5711_v1 = vpop.xlane.xlu1 %5710 }
0x1e9a   :  { %v5713_v38 = vmul.f32 0.03125, %v5711_v1 }
0x1e9b   :  { %v5708_v4 = vpop.xlane.xlu0 %5707 }
0x1e9c   :  { %v5715_v3 = vsub.f32 %v5705_v61, %v5713_v38  ;;  %v5712_v2 = vmul.f32 0.03125, %v5708_v4 }
0x1e9e   :  { %v5714_v5 = vsub.f32 %v5704_v63, %v5712_v2  ;;  %v5717_v6 = vmul.f32 %v5715_v3, %v5715_v3 }
0x1ea0   :  { %v5721_v7 = vsel %vm80_vm0, %v5717_v6, 0.0  ;;  %v5716_v10 = vmul.f32 %v5714_v5, %v5714_v5 }
0x1ea1   :  { %5722 = vadd.xlane.f32.xlu1 %v5721_v7 }
0x1ea2   :  { %v5718_v12 = vsel %vm80_vm0, %v5716_v10, 0.0 }
0x1ea3   :  { %5719 = vadd.xlane.f32.xlu0 %v5718_v12 }
0x1f2a   :  { %v5723_v11 = vpop.xlane.xlu1 %5722 }
0x1f2b   :  { %v5725_v13 = vmul.f32 0.03125, %v5723_v11 }
0x1f2c   :  { %v5720_v14 = vpop.xlane.xlu0 %5719 }
0x1f2d   :  { %v5727_v15 = vadd.f32 1e-12, %v5725_v13  ;;  %v5724_v16 = vmul.f32 0.03125, %v5720_v14 }
0x1f2f   :  { %15006 = vrsqrt.f32 %v5727_v15  ;;  %v5726_v17 = vadd.f32 1e-12, %v5724_v16 }
0x1f31   :  { %15008 = vrsqrt.f32 %v5726_v17 }
0x1f3c   :  { %v15007_v18 = vpop.eup %15006 }
0x1f3d   :  { %v5731_v19 = vmul.f32 %v15007_v18, %v5715_v3 }
0x1f3e   :  { %v15009_v37 = vpop.eup %15008 }
0x1f3f   :  { %v5730_v20 = vmul.f32 %v15009_v37, %v5714_v5  ;;  %v5733_v22 = vmul.f32 %v15200_v21, %v5731_v19 }
0x1f41   :  { %v5732_v23 = vmul.f32 %v15200_v21, %v5730_v20  ;;  %v16370_v25 = vadd.f32 %v15201_v39, %v5733_v22 }
0x1f43   :  { %v16368_v24 = vadd.f32 %v15201_v39, %v5732_v23 }
0x1f45   :  { %14312 = vmatprep.mubr.msk.f32.mxu1 %vm80_vm0, %v16368_v24 }
0x1f46   :  { %14313 = vmatmul.mubr.msk.f32.vlgmr.msra.gmra.mxu1 %vm80_vm0, %v16370_v25 }
0x1f47   :  { %14317 = vmatprep.mubr.msk.f32.mxu1 %vm15283_vm1, %v15282_v34 }
0x2006   :  { %v14314_v26 = vpop.f32.mrf.mxu1 }
0x2007   :  { %v16395_v29 = vadd.f32 %v15202_v28, %v14314_v26 }
0x2008   :  { %v5808_v27 = vpop.f32.mrf.mxu1 }
0x2009   :  { %v16381_v31 = vadd.f32 %v15202_v28, %v5808_v27 }
0x200b   :  { %5984 = vrot.lane.b32.xlu1 %v16381_v31, %s17655_s28  ;;  %5818 = vrot.lane.b32.xlu0 %v16381_v31, %s17656_s29 }
0x200f   :  { %5982 = vrot.lane.b32.xlu1 %v16381_v31, %s17657_s27  ;;  %6148 = vrot.lane.b32.xlu0 %v16381_v31, %s17658_s26 }
0x2013   :  { %6150 = vrot.lane.b32.xlu1 %v16381_v31, %s17659_s24  ;;  %6314 = vrot.lane.b32.xlu0 %v16381_v31, %s17660_s6 }
0x2017   :  { %6316 = vrot.lane.b32.xlu1 %v16381_v31, %s17661_s23  ;;  %6662 = vrot.lane.b32.xlu0 %v16395_v29, %s17655_s28 }
0x201b   :  { %6496 = vrot.lane.b32.xlu1 %v16395_v29, %s17656_s29  ;;  %6828 = vrot.lane.b32.xlu0 %v16395_v29, %s17659_s24 }
0x201f   :  { %6660 = vrot.lane.b32.xlu1 %v16395_v29, %s17657_s27  ;;  %6994 = vrot.lane.b32.xlu0 %v16395_v29, %s17661_s23 }
0x2023   :  { %6826 = vrot.lane.b32.xlu1 %v16395_v29, %s17658_s26 }
0x2027   :  { %6992 = vrot.lane.b32.xlu1 %v16395_v29, %s17660_s6 }
0x207d   :  { %v5985_v32 = vpop.permute.xlu1 %5984  ;;  %v5819_v35 = vpop.permute.xlu0 %5818 }
0x207e   :  { %14316 = vmatpush3.xpose.msk.msra.mxu1 %vm219_vm2, %v5819_v35  ;;  %14326 = vmatpush3.xpose.msk.msra.mxu0 %vm219_vm2, %v5985_v32 }
0x207f   :  { %14335 = vmatprep.subr.mxu0 %v15282_v34  ;;  %14320 = vmatprep.subr.mxu1 %v15282_v34 }
0x2081   :  { %v5983_v36 = vpop.permute.xlu1 %5982  ;;  %14318 = vmatmul.mubr.msk.f32.vlgmr.msra.gmra.mxu1 %vm219_vm2, %v16381_v31  ;;  %v6149_v40 = vpop.permute.xlu0 %6148 }
0x2082   :  { %14328 = vmatmul.mubr.msk.f32.vlgmr.msra.gmra.mxu0 %vm219_vm2, %v5983_v36  ;;  %14322 = vmatprep.mubr.msk.f32.mxu1 %vm15283_vm1, %v15282_v34 }
0x2083   :  { %14337 = vmatprep.mubr.msk.f32.mxu0 %vm15283_vm1, %v15282_v34 }
0x2085   :  { %v6151_v33 = vpop.permute.xlu1 %6150  ;;  %v6315_v30 = vpop.permute.xlu0 %6314 }
0x2086   :  { %14336 = vmatpush3.xpose.msk.msra.mxu0 %vm219_vm2, %v6151_v33 }
0x2087   :  { %14345 = vmatprep.subr.mxu0 %v15282_v34 }
0x2089   :  { %v6317_v41 = vpop.permute.xlu1 %6316  ;;  %14338 = vmatmul.mubr.msk.f32.vlgmr.msra.gmra.mxu0 %vm219_vm2, %v6149_v40  ;;  %v6663_v42 = vpop.permute.xlu0 %6662 }
0x208a   :  { %14346 = vmatpush3.xpose.msk.msra.mxu0 %vm219_vm2, %v6317_v41  ;;  %14347 = vmatprep.mubr.msk.f32.mxu0 %vm15283_vm1, %v15282_v34 }
0x208b   :  { %14355 = vmatprep.subr.mxu0 %v15282_v34 }
0x208d   :  { %v6497_v43 = vpop.permute.xlu1 %6496  ;;  %14348 = vmatmul.mubr.msk.f32.vlgmr.msra.gmra.mxu0 %vm219_vm2, %v6315_v30  ;;  %v6829_v45 = vpop.permute.xlu0 %6828 }
0x208e   :  { %14356 = vmatpush3.xpose.msk.msra.mxu0 %vm219_vm2, %v6497_v43  ;;  %14357 = vmatprep.mubr.msk.f32.mxu0 %vm15283_vm1, %v15282_v34 }
0x208f   :  { %14365 = vmatprep.subr.mxu0 %v15282_v34 }
0x2091   :  { %v6661_v44 = vpop.permute.xlu1 %6660  ;;  %14358 = vmatmul.mubr.msk.f32.vlgmr.msra.gmra.mxu0 %vm219_vm2, %v16395_v29  ;;  %v6995_v47 = vpop.permute.xlu0 %6994 }
0x2092   :  { %14366 = vmatpush3.xpose.msk.msra.mxu0 %vm219_vm2, %v6663_v42  ;;  %14367 = vmatprep.mubr.msk.f32.mxu0 %vm15283_vm1, %v15282_v34 }
0x2093   :  { %14375 = vmatprep.subr.mxu0 %v15282_v34 }
0x2095   :  { %14368 = vmatmul.mubr.msk.f32.vlgmr.msra.gmra.mxu0 %vm219_vm2, %v6661_v44  ;;  %v6827_v46 = vpop.permute.xlu1 %6826 }
0x2096   :  { %14376 = vmatpush3.xpose.msk.msra.mxu0 %vm219_vm2, %v6829_v45  ;;  %14377 = vmatprep.mubr.msk.f32.mxu0 %vm15283_vm1, %v15282_v34 }
0x2097   :  { %14385 = vmatprep.subr.mxu0 %v15282_v34 }
0x2099   :  { %14378 = vmatmul.mubr.msk.f32.vlgmr.msra.gmra.mxu0 %vm219_vm2, %v6827_v46  ;;  %v6993_v49 = vpop.permute.xlu1 %6992 }
0x209a   :  { %14386 = vmatpush3.xpose.msk.msra.mxu0 %vm219_vm2, %v6995_v47  ;;  %14387 = vmatprep.mubr.msk.f32.mxu0 %vm15283_vm1, %v15282_v34 }
0x209b   :  { %14395 = vmatprep.subr.mxu0 %v15203_v48 }
0x209d   :  { %14388 = vmatmul.mubr.msk.f32.vlgmr.msra.gmra.mxu0 %vm219_vm2, %v6993_v49 }
0x209e   :  { %14396 = vmatpush3.msra.mxu0 %v15203_v48 }
0x209f   :  { %14397 = vmatprep.subr.mxu0 %v15204_v50 }
0x20a0   :  { %14398 = vmatpush3.msra.mxu0 %v15204_v50 }
0x20a1   :  { %14399 = vmatprep.subr.mxu0 %v15205_v51 }
0x20a2   :  { %14400 = vmatpush3.msra.mxu0 %v15205_v51 }
0x20a3   :  { %14401 = vmatprep.subr.mxu0 %v15206_v52 }
0x20a4   :  { %14402 = vmatpush3.msra.mxu0 %v15206_v52 }
0x20a5   :  { %14417 = vmatprep.subr.mxu0 %v16467_v53 }
0x2141   :  { %v5890_v54 = vpop.f32.mrf.mxu1 }
0x2142   :  { %v5894_v56 = vmul.f32 0.35355338, %v5890_v54  ;;  %v6056_v57 = vpop.f32.mrf.mxu0 }
0x2143   :  { %v6060_v9 = vmul.f32 0.35355338, %v6056_v57  ;;  %v14319_v58 = vpop.f32.mrf.mxu1 }
0x2144   :  { %v14329_v55 = vpop.f32.mrf.mxu0  ;;  %v5895_v59 = vsel %vm219_vm2, %v5894_v56, -inf }
0x2145   :  { %5896 = vmax.xlane.f32.xlu0 %v5895_v59  ;;  %v6061_v60 = vsel %vm219_vm2, %v6060_v9, -inf }
0x2146   :  { %6062 = vmax.xlane.f32.xlu1 %v6061_v60 }
0x2149   :  { %v6222_v61 = vpop.f32.mrf.mxu0 }
0x214a   :  { %v16472_v62 = vmul.f32 0.35355338, %v6222_v61 }
0x214b   :  { %v14339_v8 = vpop.f32.mrf.mxu0 }
0x214c   :  { %v6227_v63 = vsel %vm219_vm2, %v16472_v62, -inf }
0x214d   :  { %6228 = vmax.xlane.f32.xlu0 %v6227_v63  ;;  %v6388_v0 = vpop.f32.mrf.mxu0 }
0x214e   :  { %v6392_v1 = vmul.f32 0.35355338, %v6388_v0 }
0x214f   :  { %v14349_v38 = vpop.f32.mrf.mxu0 }
0x2150   :  { %v6393_v4 = vsel %vm219_vm2, %v6392_v1, -inf }
0x2151   :  { %6394 = vmax.xlane.f32.xlu0 %v6393_v4  ;;  %v6568_v3 = vpop.f32.mrf.mxu0 }
0x2152   :  { %v6572_v2 = vmul.f32 0.35355338, %v6568_v3 }
0x2153   :  { %v14359_v5 = vpop.f32.mrf.mxu0 }
0x2154   :  { %v6573_v6 = vsel %vm219_vm2, %v6572_v2, -inf }
0x2155   :  { %6574 = vmax.xlane.f32.xlu0 %v6573_v6  ;;  %v6734_v7 = vpop.f32.mrf.mxu0 }
0x2156   :  { %v6738_v10 = vmul.f32 0.35355338, %v6734_v7 }
0x2157   :  { %v14369_v12 = vpop.f32.mrf.mxu0 }
0x2158   :  { %v6739_v11 = vsel %vm219_vm2, %v6738_v10, -inf }
0x2159   :  { %6740 = vmax.xlane.f32.xlu1 %v6739_v11  ;;  %v6900_v13 = vpop.f32.mrf.mxu0 }
0x215a   :  { %v6904_v14 = vmul.f32 0.35355338, %v6900_v13 }
0x215b   :  { %v14379_v15 = vpop.f32.mrf.mxu0 }
0x215c   :  { %v6905_v16 = vsel %vm219_vm2, %v6904_v14, -inf }
0x215d   :  { %6906 = vmax.xlane.f32.xlu0 %v6905_v16  ;;  %v7066_v17 = vpop.f32.mrf.mxu0 }
0x215e   :  { %v7070_v19 = vmul.f32 0.35355338, %v7066_v17 }
0x215f   :  { %v14389_v18 = vpop.f32.mrf.mxu0 }
0x2160   :  { %v7071_v37 = vsel %vm219_vm2, %v7070_v19, -inf }
0x216a   :  { %5906 = vrot.lane.b32.xlu1 %v16381_v31, %s17662_s25 }
0x218e   :  { %7072 = vmax.xlane.f32.xlu1 %v7071_v37 }
0x219f   :  { %6238 = vrot.lane.b32.xlu1 %v16381_v31, %s17668_s5 }
0x21a3   :  { %6404 = vrot.lane.b32.xlu1 %v16381_v31, %s17675_s14 }
0x21a7   :  { %6584 = vrot.lane.b32.xlu1 %v16395_v29, %s17662_s25 }
0x21ce   :  { %v5897_v20 = vpop.xlane.xlu0 %5896 }
0x21cf   :  { %v5898_v21 = vsub.f32 %v5894_v56, %v5897_v20  ;;  %v6063_v22 = vpop.xlane.xlu1 %6062 }
0x21d0   :  { %v6064_v23 = vsub.f32 %v6060_v9, %v6063_v22 }
0x21d1   :  { %v5899_v39 = vmul.f32 1.442695, %v5898_v21 }
0x21d2   :  { %v6065_v26 = vmul.f32 1.442695, %v6064_v23 }
0x21d3   :  { %15010 = vpow2.f32 %v5899_v39 }
0x21d4   :  { %15012 = vpow2.f32 %v6065_v26 }
0x21d6   :  { %v6229_v27 = vpop.xlane.xlu0 %6228 }
0x21d7   :  { %v6230_v45 = vsub.f32 %v16472_v62, %v6229_v27 }
0x21d9   :  { %v6231_v47 = vmul.f32 1.442695, %v6230_v45 }
0x21da   :  { %v6395_v28 = vpop.xlane.xlu0 %6394 }
0x21db   :  { %v6396_v32 = vsub.f32 %v6392_v1, %v6395_v28 }
0x21dd   :  { %v6397_v35 = vmul.f32 1.442695, %v6396_v32 }
0x21de   :  { %v6575_v46 = vpop.xlane.xlu0 %6574 }
0x21df   :  { %15014 = vpow2.f32 %v6397_v35  ;;  %v6576_v48 = vsub.f32 %v6572_v2, %v6575_v46 }
0x21e0   :  { %v15011_v36 = vpop.eup %15010  ;;  %15016 = vpow2.f32 %v6231_v47 }
0x21e1   :  { %v16489_v40 = vpop.eup %15012  ;;  %v5901_v33 = vsel %vm219_vm2, %v15011_v36, 0.0  ;;  %v6577_v50 = vmul.f32 1.442695, %v6576_v48 }
0x21e2   :  { %v6741_v30 = vpop.xlane.xlu1 %6740  ;;  %5902 = vadd.xlane.f32.xlu0 %v5901_v33  ;;  %v6067_v41 = vsel %vm219_vm2, %v16489_v40, 0.0  ;;  %v15208_v33 = vld [vmem:[%s17558_s11 + $0x18] sm:$0xff] }
0x21e3   :  { %6068 = vadd.xlane.f32.xlu1 %v6067_v41  ;;  %15018 = vpow2.f32 %v6577_v50  ;;  %v6742_v52 = vsub.f32 %v6738_v10, %v6741_v30  ;;  %v15209_v30 = vld [vmem:[%s17558_s11 + $0x10] sm:$0xff]  ;;  %v15210_v41 = vld [vmem:[%s17558_s11 + $0x8] sm:$0xff] }
0x21e5   :  { %v6743_v56 = vmul.f32 1.442695, %v6742_v52 }
0x21e6   :  { %v5907_v42 = vpop.permute.xlu1 %5906  ;;  %v6907_v49 = vpop.xlane.xlu0 %6906 }
0x21e7   :  { %14321 = vmatpush3.msra.mxu1 %v5907_v42  ;;  %v6908_v51 = vsub.f32 %v6904_v14, %v6907_v49  ;;  %v15211_v42 = vld [vmem:[%s17558_s11] sm:$0xff] }
0x21e8   :  { %14330 = vmatprep.subr.mxu1 %v15282_v34 }
0x21e9   :  { %v6909_v54 = vmul.f32 1.442695, %v6908_v51 }
0x21eb   :  { %15020 = vpow2.f32 %v6909_v54 }
0x21ec   :  { %v16495_v43 = vpop.eup %15014  ;;  %15022 = vpow2.f32 %v6743_v56 }
0x21ed   :  { %v6399_v44 = vsel %vm219_vm2, %v16495_v43, 0.0  ;;  %v15017_v57 = vpop.eup %15016 }
0x21ee   :  { %6400 = vadd.xlane.f32.xlu1 %v6399_v44 }
0x21f0   :  { %v16505_v9 = vpop.eup %15018 }
0x21f1   :  { %v6579_v60 = vsel %vm219_vm2, %v16505_v9, 0.0 }
0x21f8   :  { %6072 = vrot.lane.b32.xlu0 %v16381_v31, %s17676_s2  ;;  %v6233_v31 = vsel %vm219_vm2, %v15017_v57, 0.0  ;;  %v16509_v61 = vpop.eup %15020 }
0x21f9   :  { %v6911_v62 = vsel %vm219_vm2, %v16509_v61, 0.0  ;;  %v15023_v8 = vpop.eup %15022 }
0x21fa   :  { %v6745_v63 = vsel %vm219_vm2, %v15023_v8, 0.0 }
0x21ff   :  { %6750 = vrot.lane.b32.xlu1 %v16395_v29, %s17676_s2  ;;  %s17677_s2 = sld [smem:[#allocation9_spill]] }
0x2217   :  { %v7073_v58 = vpop.xlane.xlu1 %7072  ;;  %6234 = vadd.xlane.f32.xlu0 %v6233_v31 }
0x2218   :  { %v7074_v55 = vsub.f32 %v7070_v19, %v7073_v58 }
0x221a   :  { %v7075_v59 = vmul.f32 1.442695, %v7074_v55 }
0x221b   :  { %6580 = vadd.xlane.f32.xlu0 %v6579_v60  ;;  %v6239_v38 = vpop.permute.xlu1 %6238 }
0x221c   :  { %15024 = vpow2.f32 %v7075_v59 }
0x221f   :  { %6912 = vadd.xlane.f32.xlu0 %v6911_v62  ;;  %v6405_v4 = vpop.permute.xlu1 %6404 }
0x2223   :  { %6746 = vadd.xlane.f32.xlu1 %v6745_v63  ;;  %v6585_v3 = vpop.permute.xlu1 %6584 }
0x2229   :  { %v16514_v0 = vpop.eup %15024 }
0x222a   :  { %v7077_v1 = vsel %vm219_vm2, %v16514_v0, 0.0 }
0x222b   :  { %7078 = vadd.xlane.f32.xlu0 %v7077_v1 }
0x2234   :  { %7082 = vrot.lane.b32.xlu1 %v16395_v29, %s17675_s14 }
0x2241   :  { %6916 = vrot.lane.b32.xlu0 %v16395_v29, %s17668_s5 }
0x226b   :  { %v5903_v2 = vpop.xlane.xlu0 %5902 }
0x226c   :  { %15026 = vrcp.f32 %v5903_v2  ;;  %v6069_v5 = vpop.xlane.xlu1 %6068 }
0x226d   :  { %15028 = vrcp.f32 %v6069_v5  ;;  %v15213_v5 = vld [vmem:[%s17561_s13 + $0x30] sm:$0xff] }
0x226f   :  { %v6073_v12 = vpop.permute.xlu0 %6072 }
0x2277   :  { %v6401_v11 = vpop.xlane.xlu1 %6400 }
0x2279   :  { %v15027_v6 = vpop.eup %15026 }
0x227a   :  { %v5905_v7 = vmul.f32 %v15027_v6, %v15011_v36  ;;  %v15029_v10 = vpop.eup %15028  ;;  %v15214_v6 = vld [vmem:[%s17561_s13 + $0x28] sm:$0xff] }
0x227b   :  { %v6071_v29 = vmul.f32 %v15029_v10, %v16489_v40  ;;  %v6751_v15 = vpop.permute.xlu1 %6750  ;;  %v15217_v10 = vld [vmem:[%s17561_s13 + $0x10] sm:$0xff] }
0x227c   :  { %14323 = vmatmul.mubr.msk.f32.vlgmr.msra.gmra.mxu1 %vm219_vm2, %v5905_v7  ;;  %v15215_v7 = vld [vmem:[%s17561_s13 + $0x20] sm:$0xff] }
0x227d   :  { %14331 = vmatpush3.msra.mxu1 %v6073_v12  ;;  %14332 = vmatprep.mubr.msk.f32.mxu1 %vm15283_vm1, %v15282_v34  ;;  %v15218_v12 = vld [vmem:[%s17561_s13 + $0x8] sm:$0xff] }
0x227e   :  { %14340 = vmatprep.subr.mxu1 %v15282_v34 }
0x2280   :  { %14333 = vmatmul.mubr.msk.f32.vlgmr.msra.gmra.mxu1 %vm219_vm2, %v6071_v29  ;;  %v15219_v29 = vld [vmem:[%s17561_s13] sm:$0xff] }
0x2281   :  { %14341 = vmatpush3.msra.mxu1 %v6239_v38  ;;  %14342 = vmatprep.mubr.msk.f32.mxu1 %vm15283_vm1, %v15282_v34 }
0x2282   :  { %14350 = vmatprep.subr.mxu1 %v15282_v34 }
0x22a0   :  { %v6235_v13 = vpop.xlane.xlu0 %6234 }
0x22a1   :  { %15030 = vrcp.f32 %v6235_v13  ;;  %v15220_v13 = vld [vmem:[%s17677_s2] ss:$0 sm:$0xff] }
0x22a2   :  { %15032 = vrcp.f32 %v6401_v11 }
0x22a4   :  { %v6581_v14 = vpop.xlane.xlu0 %6580 }
0x22a5   :  { %15034 = vrcp.f32 %v6581_v14 }
0x22a8   :  { %v6913_v16 = vpop.xlane.xlu0 %6912 }
0x22ac   :  { %v6747_v17 = vpop.xlane.xlu1 %6746 }
0x22ad   :  { %15036 = vrcp.f32 %v6747_v17 }
0x22ae   :  { %v15031_v18 = vpop.eup %15030  ;;  %15038 = vrcp.f32 %v6913_v16 }
0x22af   :  { %v6237_v19 = vmul.f32 %v15031_v18, %v15017_v57  ;;  %v15033_v37 = vpop.eup %15032 }
0x22b0   :  { %v6403_v20 = vmul.f32 %v15033_v37, %v16495_v43  ;;  %v7083_v35 = vpop.permute.xlu1 %7082  ;;  %v16570_v43 = vld [vmem:[%s17647_s3 + $0x38] sm:$0xff] }
0x22b1   :  { %14343 = vmatmul.mubr.msk.f32.vlgmr.msra.gmra.mxu1 %vm219_vm2, %v6237_v19 }
0x22b2   :  { %14351 = vmatpush3.msra.mxu1 %v6405_v4  ;;  %14352 = vmatprep.mubr.msk.f32.mxu1 %vm15283_vm1, %v15282_v34  ;;  %v15035_v21 = vpop.eup %15034 }
0x22b3   :  { %14360 = vmatprep.subr.mxu1 %v15282_v34  ;;  %v6583_v23 = vmul.f32 %v15035_v21, %v16505_v9 }
0x22b4   :  { %v7079_v22 = vpop.xlane.xlu0 %7078 }
0x22b5   :  { %15040 = vrcp.f32 %v7079_v22  ;;  %14353 = vmatmul.mubr.msk.f32.vlgmr.msra.gmra.mxu1 %vm219_vm2, %v6403_v20 }
0x22b6   :  { %14361 = vmatpush3.msra.mxu1 %v6585_v3  ;;  %14362 = vmatprep.mubr.msk.f32.mxu1 %vm15283_vm1, %v15282_v34 }
0x22b7   :  { %14370 = vmatprep.subr.mxu1 %v15282_v34 }
0x22b8   :  { %v6917_v28 = vpop.permute.xlu0 %6916 }
0x22b9   :  { %14363 = vmatmul.mubr.msk.f32.vlgmr.msra.gmra.mxu1 %vm219_vm2, %v6583_v23 }
0x22ba   :  { %v15037_v39 = vpop.eup %15036  ;;  %14371 = vmatpush3.msra.mxu1 %v6751_v15  ;;  %14372 = vmatprep.mubr.msk.f32.mxu1 %vm15283_vm1, %v15282_v34 }
0x22bb   :  { %14380 = vmatprep.subr.mxu1 %v15282_v34  ;;  %v6749_v26 = vmul.f32 %v15037_v39, %v15023_v8  ;;  %v15039_v27 = vpop.eup %15038 }
0x22bc   :  { %v6915_v32 = vmul.f32 %v15039_v27, %v16509_v61 }
0x22bd   :  { %14373 = vmatmul.mubr.msk.f32.vlgmr.msra.gmra.mxu1 %vm219_vm2, %v6749_v26 }
0x22be   :  { %14381 = vmatpush3.msra.mxu1 %v6917_v28  ;;  %14382 = vmatprep.mubr.msk.f32.mxu1 %vm15283_vm1, %v15282_v34 }
0x22bf   :  { %14390 = vmatprep.subr.mxu1 %v15282_v34 }
0x22c1   :  { %14383 = vmatmul.mubr.msk.f32.vlgmr.msra.gmra.mxu1 %vm219_vm2, %v6915_v32 }
0x22c2   :  { %v15041_v36 = vpop.eup %15040  ;;  %14391 = vmatpush3.msra.mxu1 %v7083_v35  ;;  %14392 = vmatprep.mubr.msk.f32.mxu1 %vm15283_vm1, %v15282_v34 }
0x22c3   :  { %v7081_v40 = vmul.f32 %v15041_v36, %v16514_v0  ;;  %14406 = vmatprep.subr.mxu1 %v15208_v33 }
0x22c5   :  { %14393 = vmatmul.mubr.msk.f32.vlgmr.msra.gmra.mxu1 %vm219_vm2, %v7081_v40 }
0x22c6   :  { %14407 = vmatpush3.msra.mxu1 %v15208_v33 }
0x22c7   :  { %14408 = vmatprep.subr.mxu1 %v15209_v30 }
0x22c8   :  { %14409 = vmatpush3.msra.mxu1 %v15209_v30 }
0x22c9   :  { %14410 = vmatprep.subr.mxu1 %v15210_v41 }
0x22ca   :  { %14411 = vmatpush3.msra.mxu1 %v15210_v41 }
0x22cb   :  { %14412 = vmatprep.subr.mxu1 %v15211_v42 }
0x22cc   :  { %14413 = vmatpush3.msra.mxu1 %v15211_v42 }
0x22cd   :  { %14436 = vmatprep.subr.mxu1 %v16570_v43 }
0x233c   :  { %v5978_v44 = vpop.f32.mrf.mxu1 }
0x233e   :  { %v14324_v45 = vpop.f32.mrf.mxu1 }
0x2340   :  { %v6144_v46 = vpop.f32.mrf.mxu1 }
0x2341   :  { %6481 = vrot.lane.b32.xlu0 %v6144_v46, %s17666_s21 }
0x2342   :  { %v14334_v47 = vpop.f32.mrf.mxu1 }
0x2343   :  { %v15222_v47 = vld [vmem:[%s17560_s10] ss:$0 sm:$0xff] }
0x2371   :  { %v6310_v48 = vpop.f32.mrf.mxu1 }
0x2372   :  { %6485 = vrot.lane.b32.xlu1 %v6310_v48, %s17653_s8 }
0x2373   :  { %v14344_v49 = vpop.f32.mrf.mxu1 }
0x2375   :  { %v6476_v50 = vpop.f32.mrf.mxu1 }
0x2376   :  { %6489 = vrot.lane.b32.xlu1 %v6476_v50, %s17667_s17 }
0x2377   :  { %v14354_v51 = vpop.f32.mrf.mxu1 }
0x2379   :  { %v6656_v52 = vpop.f32.mrf.mxu1 }
0x237b   :  { %v14364_v54 = vpop.f32.mrf.mxu1 }
0x237c   :  { %v15224_v54 = vld [vmem:[%s17647_s3 + $0x28] sm:$0xff] }
0x237d   :  { %v6822_v56 = vpop.f32.mrf.mxu1 }
0x237e   :  { %7159 = vrot.lane.b32.xlu0 %v6822_v56, %s17666_s21  ;;  %v15225_v56 = vld [vmem:[%s17647_s3 + $0x20] sm:$0xff] }
0x237f   :  { %v14374_v57 = vpop.f32.mrf.mxu1 }
0x2380   :  { %v15226_v57 = vld [vmem:[%s17562_s12] ss:$0 sm:$0xff] }
0x2381   :  { %v6988_v31 = vpop.f32.mrf.mxu1 }
0x2382   :  { %7163 = vrot.lane.b32.xlu0 %v6988_v31, %s17653_s8 }
0x2383   :  { %v14384_v9 = vpop.f32.mrf.mxu1 }
0x2385   :  { %v7154_v58 = vpop.f32.mrf.mxu1 }
0x2386   :  { %7167 = vrot.lane.b32.xlu1 %v7154_v58, %s17667_s17 }
0x2387   :  { %v14394_v55 = vpop.f32.mrf.mxu1 }
0x23b3   :  { %v6482_v59 = vpop.permute.xlu0 %6481 }
0x23b4   :  { %v6492_v61 = vsel %vm219_vm2, %v5978_v44, %v6482_v59  ;;  %v15221_v44 = vld [vmem:[%s17559_s9] ss:$0 sm:$0xff] }
0x23e4   :  { %v6486_v60 = vpop.permute.xlu1 %6485 }
0x23e5   :  { %v6493_v62 = vsel %vm903_vm3, %v6492_v61, %v6486_v60 }
0x23e8   :  { %v6490_v8 = vpop.permute.xlu1 %6489 }
0x23e9   :  { %v6494_v63 = vsel %vm905_vm4, %v6493_v62, %v6490_v8 }
0x23ea   :  { %14403 = vmatprep.mubr.msk.f32.mxu0 %vm80_vm0, %v6494_v63 }
0x23f0   :  { %v7160_v0 = vpop.permute.xlu0 %7159 }
0x23f1   :  { %v7170_v38 = vsel %vm219_vm2, %v6656_v52, %v7160_v0  ;;  %v15223_v52 = vld [vmem:[%s17647_s3 + $0x30] sm:$0xff] }
0x23f4   :  { %v7164_v1 = vpop.permute.xlu0 %7163 }
0x23f5   :  { %v7171_v4 = vsel %vm903_vm3, %v7170_v38, %v7164_v1 }
0x23f8   :  { %v7168_v3 = vpop.permute.xlu1 %7167 }
0x23f9   :  { %v7172_v2 = vsel %vm905_vm4, %v7171_v4, %v7168_v3 }
0x23fa   :  { %14404 = vmatmul.mubr.msk.f32.vlgmr.msra.gmra.mxu0 %vm80_vm0, %v7172_v2 }
0x23fb   :  { %14418 = vmatpush3.msra.mxu0 %v16467_v53  ;;  %v15216_v53 = vld [vmem:[%s17561_s13 + $0x18] sm:$0xff] }
0x23fc   :  { %14419 = vmatprep.subr.mxu0 %v15213_v5 }
0x23fd   :  { %14420 = vmatpush3.msra.mxu0 %v15213_v5 }
0x23fe   :  { %14421 = vmatprep.subr.mxu0 %v15214_v6 }
0x23ff   :  { %14422 = vmatpush3.msra.mxu0 %v15214_v6 }
0x2400   :  { %14423 = vmatprep.subr.mxu0 %v15215_v7 }
0x2401   :  { %14424 = vmatpush3.msra.mxu0 %v15215_v7 }
0x2402   :  { %14425 = vmatprep.subr.mxu0 %v15216_v53 }
0x2403   :  { %14426 = vmatpush3.msra.mxu0 %v15216_v53 }
0x2404   :  { %14427 = vmatprep.subr.mxu0 %v15217_v10 }
0x2405   :  { %14428 = vmatpush3.msra.mxu0 %v15217_v10 }
0x2406   :  { %14429 = vmatprep.subr.mxu0 %v15218_v12 }
0x2407   :  { %14430 = vmatpush3.msra.mxu0 %v15218_v12 }
0x2408   :  { %14431 = vmatprep.subr.mxu0 %v15219_v29 }
0x2409   :  { %14432 = vmatpush3.msra.mxu0 %v15219_v29  ;;  %v15227_v29 = vld [vmem:[%s17678_s19] ss:$0 sm:$0xff] }
0x240a   :  { %14457 = vmatprep.subr.mxu0 %v15282_v34 }
0x24ba   :  { %v14405_v11 = vpop.f32.mrf.mxu0 }
0x24bb   :  { %v7251_v14 = vadd.f32 %v15220_v13, %v14405_v11 }
0x24bc   :  { %v7245_v15 = vpop.f32.mrf.mxu0 }
0x24bd   :  { %v7255_v16 = vadd.f32 %v7251_v14, %v16370_v25  ;;  %v7246_v17 = vadd.f32 %v15220_v13, %v7245_v15 }
0x24bf   :  { %v7254_v18 = vadd.f32 %v7246_v17, %v16368_v24  ;;  %v7259_v19 = vsel %vm80_vm0, %v7255_v16, 0.0 }
0x24c0   :  { %7260 = vadd.xlane.f32.xlu1 %v7259_v19 }
0x24c1   :  { %v7256_v37 = vsel %vm80_vm0, %v7254_v18, 0.0 }
0x24c2   :  { %7257 = vadd.xlane.f32.xlu0 %v7256_v37 }
0x2549   :  { %v7261_v20 = vpop.xlane.xlu1 %7260 }
0x254a   :  { %v7263_v21 = vmul.f32 0.03125, %v7261_v20 }
0x254b   :  { %v7258_v22 = vpop.xlane.xlu0 %7257 }
0x254c   :  { %v7262_v23 = vmul.f32 0.03125, %v7258_v22  ;;  %v7265_v39 = vsub.f32 %v7255_v16, %v7263_v21 }
0x254e   :  { %v7264_v26 = vsub.f32 %v7254_v18, %v7262_v23  ;;  %v7267_v32 = vmul.f32 %v7265_v39, %v7265_v39 }
0x2550   :  { %v7266_v27 = vmul.f32 %v7264_v26, %v7264_v26  ;;  %v7271_v25 = vsel %vm80_vm0, %v7267_v32, 0.0 }
0x2552   :  { %v7268_v28 = vsel %vm80_vm0, %v7266_v27, 0.0 }
0x2553   :  { %7269 = vadd.xlane.f32.xlu0 %v7268_v28 }
0x2557   :  { %7272 = vadd.xlane.f32.xlu0 %v7271_v25 }
0x25dc   :  { %v7270_v24 = vpop.xlane.xlu0 %7269 }
0x25dd   :  { %v7274_v35 = vmul.f32 0.03125, %v7270_v24 }
0x25df   :  { %v7276_v36 = vadd.f32 1e-12, %v7274_v35 }
0x25e0   :  { %v7273_v40 = vpop.xlane.xlu0 %7272 }
0x25e1   :  { %15042 = vrsqrt.f32 %v7276_v36  ;;  %v7275_v33 = vmul.f32 0.03125, %v7273_v40 }
0x25e3   :  { %v7277_v30 = vadd.f32 1e-12, %v7275_v33 }
0x25e5   :  { %15044 = vrsqrt.f32 %v7277_v30 }
0x25ee   :  { %v15043_v41 = vpop.eup %15042 }
0x25ef   :  { %v7280_v42 = vmul.f32 %v15043_v41, %v7264_v26 }
0x25f1   :  { %v7282_v45 = vmul.f32 %v15221_v44, %v7280_v42 }
0x25f2   :  { %v15045_v46 = vpop.eup %15044 }
0x25f3   :  { %v7284_v48 = vadd.f32 %v15222_v47, %v7282_v45  ;;  %v7281_v49 = vmul.f32 %v15045_v46, %v7265_v39 }
0x25f5   :  { %14414 = vmatprep.mubr.msk.f32.mxu1 %vm80_vm0, %v7284_v48  ;;  %v7283_v50 = vmul.f32 %v15221_v44, %v7281_v49  ;;  %v15228_v44 = vld [vmem:[%s17564_s15] ss:$0 sm:$0xff] }
0x25f7   :  { %v7285_v51 = vadd.f32 %v15222_v47, %v7283_v50  ;;  %v15229_v47 = vld [vmem:[%s17565_s16] ss:$0 sm:$0xff] }
0x25f9   :  { %14415 = vmatmul.mubr.msk.f32.vlgmr.msra.gmra.mxu1 %vm80_vm0, %v7285_v51 }
0x25fa   :  { %14437 = vmatpush3.msra.mxu1 %v16570_v43 }
0x25fb   :  { %14438 = vmatprep.subr.mxu1 %v15223_v52 }
0x25fc   :  { %14439 = vmatpush3.msra.mxu1 %v15223_v52  ;;  %v15230_v52 = vld [vmem:[%s17650_s7 + $0x1] ss:$0 sm:$0xff] }
0x25fd   :  { %14440 = vmatprep.subr.mxu1 %v15224_v54 }
0x25fe   :  { %14441 = vmatpush3.msra.mxu1 %v15224_v54 }
0x25ff   :  { %14442 = vmatprep.subr.mxu1 %v15225_v56 }
0x2600   :  { %14443 = vmatpush3.msra.mxu1 %v15225_v56 }
0x2601   :  { %14447 = vmatprep.subr.mxu1 %v15282_v34 }
0x26b9   :  { %v14416_v43 = vpop.f32.mrf.mxu1 }
0x26ba   :  { %v7364_v31 = vadd.f32 %v15226_v57, %v14416_v43 }
0x26bb   :  { %v7358_v9 = vpop.f32.mrf.mxu1 }
0x26bc   :  { %v7368_v58 = vmul.f32 %v7364_v31, %v7364_v31  ;;  %v7359_v55 = vadd.f32 %v15226_v57, %v7358_v9 }
0x26be   :  { %v7370_v59 = vmul.f32 %v7368_v58, %v7364_v31  ;;  %v7367_v60 = vmul.f32 %v7359_v55, %v7359_v55 }
0x26c0   :  { %v7372_v61 = vmul.f32 0.044715, %v7370_v59  ;;  %v7369_v62 = vmul.f32 %v7367_v60, %v7359_v55 }
0x26c2   :  { %v7374_v8 = vadd.f32 %v7372_v61, %v7364_v31  ;;  %v7371_v63 = vmul.f32 0.044715, %v7369_v62 }
0x26c4   :  { %v7376_v0 = vmul.f32 0.7978846, %v7374_v8  ;;  %v7373_v1 = vadd.f32 %v7371_v63, %v7359_v55 }
0x26c6   :  { %15046 = vtanh.f32 %v7376_v0  ;;  %v7375_v38 = vmul.f32 0.7978846, %v7373_v1  ;;  %v15231_v1 = vld [vmem:[%s17652_s0 + $0x38] sm:$0xff] }
0x26c8   :  { %15048 = vtanh.f32 %v7375_v38 }
0x26d3   :  { %v15047_v4 = vpop.eup %15046 }
0x26d4   :  { %v7380_v3 = vadd.f32 1.0, %v15047_v4  ;;  %v15232_v4 = vld [vmem:[%s17652_s0 + $0x30] sm:$0xff] }
0x26d5   :  { %v15049_v2 = vpop.eup %15048 }
0x26d6   :  { %v7379_v5 = vadd.f32 1.0, %v15049_v2  ;;  %v7382_v6 = vmul.f32 0.5, %v7380_v3  ;;  %v15233_v3 = vld [vmem:[%s17652_s0 + $0x28] sm:$0xff]  ;;  %v15234_v2 = vld [vmem:[%s17652_s0 + $0x20] sm:$0xff] }
0x26d8   :  { %v7381_v7 = vmul.f32 0.5, %v7379_v5  ;;  %v7384_v10 = vmul.f32 %v7382_v6, %v7364_v31  ;;  %v16757_v5 = vld [vmem:[%s17561_s13 + $0x78] sm:$0xff] }
0x26da   :  { %v7383_v53 = vmul.f32 %v7381_v7, %v7359_v55 }
0x26dc   :  { %14433 = vmatprep.mubr.msk.f32.mxu0 %vm1858_vm5, %v7383_v53 }
0x26dd   :  { %14434 = vmatmul.mubr.msk.f32.vlgmr.msra.gmra.mxu0 %vm1858_vm5, %v7384_v10 }
0x26de   :  { %14459 = vmatprep.mubr.msk.f32.mxu0 %vm15283_vm1, %v15282_v34 }
0x279d   :  { %v14435_v12 = vpop.f32.mrf.mxu0 }
0x279e   :  { %v7463_v11 = vadd.f32 %v15227_v29, %v14435_v12 }
0x279f   :  { %v7457_v13 = vpop.f32.mrf.mxu0 }
0x27a0   :  { %v7467_v14 = vadd.f32 %v7463_v11, %v7285_v51  ;;  %v7458_v15 = vadd.f32 %v15227_v29, %v7457_v13 }
0x27a2   :  { %v7466_v16 = vadd.f32 %v7458_v15, %v7284_v48  ;;  %v7471_v17 = vsel %vm80_vm0, %v7467_v14, 0.0 }
0x27a3   :  { %7472 = vadd.xlane.f32.xlu1 %v7471_v17 }
0x27a4   :  { %v7468_v18 = vsel %vm80_vm0, %v7466_v16, 0.0 }
0x27a5   :  { %7469 = vadd.xlane.f32.xlu0 %v7468_v18 }
0x282c   :  { %v7473_v19 = vpop.xlane.xlu1 %7472 }
0x282d   :  { %v7475_v37 = vmul.f32 0.03125, %v7473_v19 }
0x282e   :  { %v7470_v20 = vpop.xlane.xlu0 %7469 }
0x282f   :  { %v7477_v21 = vsub.f32 %v7467_v14, %v7475_v37  ;;  %v7474_v22 = vmul.f32 0.03125, %v7470_v20 }
0x2831   :  { %v7476_v23 = vsub.f32 %v7466_v16, %v7474_v22  ;;  %v7479_v39 = vmul.f32 %v7477_v21, %v7477_v21 }
0x2833   :  { %v7483_v26 = vsel %vm80_vm0, %v7479_v39, 0.0  ;;  %v7478_v27 = vmul.f32 %v7476_v23, %v7476_v23 }
0x2834   :  { %7484 = vadd.xlane.f32.xlu1 %v7483_v26 }
0x2835   :  { %v7480_v28 = vsel %vm80_vm0, %v7478_v27, 0.0 }
0x2836   :  { %7481 = vadd.xlane.f32.xlu0 %v7480_v28 }
0x28bd   :  { %v7485_v32 = vpop.xlane.xlu1 %7484 }
0x28be   :  { %v7487_v25 = vmul.f32 0.03125, %v7485_v32 }
0x28bf   :  { %v7482_v24 = vpop.xlane.xlu0 %7481 }
0x28c0   :  { %v7489_v35 = vadd.f32 1e-12, %v7487_v25  ;;  %v7486_v36 = vmul.f32 0.03125, %v7482_v24 }
0x28c2   :  { %15050 = vrsqrt.f32 %v7489_v35  ;;  %v7488_v40 = vadd.f32 1e-12, %v7486_v36 }
0x28c4   :  { %15052 = vrsqrt.f32 %v7488_v40 }
0x28cf   :  { %v15051_v33 = vpop.eup %15050 }
0x28d0   :  { %v7493_v30 = vmul.f32 %v15051_v33, %v7477_v21 }
0x28d1   :  { %v15053_v41 = vpop.eup %15052 }
0x28d2   :  { %v7492_v42 = vmul.f32 %v15053_v41, %v7476_v23  ;;  %v7495_v45 = vmul.f32 %v15228_v44, %v7493_v30 }
0x28d4   :  { %v7494_v46 = vmul.f32 %v15228_v44, %v7492_v42  ;;  %v16660_v49 = vadd.f32 %v15229_v47, %v7495_v45 }
0x28d6   :  { %v16658_v48 = vadd.f32 %v15229_v47, %v7494_v46 }
0x28d8   :  { %14444 = vmatprep.mubr.msk.f32.mxu1 %vm80_vm0, %v16658_v48 }
0x28d9   :  { %14445 = vmatmul.mubr.msk.f32.vlgmr.msra.gmra.mxu1 %vm80_vm0, %v16660_v49 }
0x28da   :  { %14449 = vmatprep.mubr.msk.f32.mxu1 %vm15283_vm1, %v15282_v34 }
0x2999   :  { %v14446_v50 = vpop.f32.mrf.mxu1 }
0x299a   :  { %v16685_v56 = vadd.f32 %v15230_v52, %v14446_v50 }
0x299b   :  { %v7570_v51 = vpop.f32.mrf.mxu1 }
0x299c   :  { %v16671_v54 = vadd.f32 %v15230_v52, %v7570_v51 }
0x299e   :  { %7746 = vrot.lane.b32.xlu1 %v16671_v54, %s17655_s28  ;;  %7580 = vrot.lane.b32.xlu0 %v16671_v54, %s17656_s29 }
0x29a2   :  { %7744 = vrot.lane.b32.xlu1 %v16671_v54, %s17657_s27  ;;  %7910 = vrot.lane.b32.xlu0 %v16671_v54, %s17658_s26 }
0x29a6   :  { %7912 = vrot.lane.b32.xlu1 %v16671_v54, %s17659_s24  ;;  %8076 = vrot.lane.b32.xlu0 %v16671_v54, %s17660_s6 }
0x29aa   :  { %8078 = vrot.lane.b32.xlu1 %v16671_v54, %s17661_s23  ;;  %8424 = vrot.lane.b32.xlu0 %v16685_v56, %s17655_s28 }
0x29ae   :  { %8258 = vrot.lane.b32.xlu1 %v16685_v56, %s17656_s29  ;;  %8590 = vrot.lane.b32.xlu0 %v16685_v56, %s17659_s24 }
0x29b2   :  { %8422 = vrot.lane.b32.xlu1 %v16685_v56, %s17657_s27  ;;  %8756 = vrot.lane.b32.xlu0 %v16685_v56, %s17661_s23  ;;  %s17689_s23 = sld [smem:[#allocation15_spill]] }
0x29b6   :  { %8588 = vrot.lane.b32.xlu1 %v16685_v56, %s17658_s26 }
0x29ba   :  { %8754 = vrot.lane.b32.xlu1 %v16685_v56, %s17660_s6  ;;  %s17679_s6 = smov 56  }
0x2a10   :  { %v7747_v43 = vpop.permute.xlu1 %7746  ;;  %v7581_v57 = vpop.permute.xlu0 %7580 }
0x2a11   :  { %14448 = vmatpush3.xpose.msk.msra.mxu1 %vm219_vm2, %v7581_v57  ;;  %14458 = vmatpush3.xpose.msk.msra.mxu0 %vm219_vm2, %v7747_v43 }
0x2a12   :  { %14467 = vmatprep.subr.mxu0 %v15282_v34  ;;  %14452 = vmatprep.subr.mxu1 %v15282_v34 }
0x2a14   :  { %v7745_v31 = vpop.permute.xlu1 %7744  ;;  %14450 = vmatmul.mubr.msk.f32.vlgmr.msra.gmra.mxu1 %vm219_vm2, %v16671_v54  ;;  %v7911_v9 = vpop.permute.xlu0 %7910 }
0x2a15   :  { %14460 = vmatmul.mubr.msk.f32.vlgmr.msra.gmra.mxu0 %vm219_vm2, %v7745_v31  ;;  %14454 = vmatprep.mubr.msk.f32.mxu1 %vm15283_vm1, %v15282_v34 }
0x2a16   :  { %14469 = vmatprep.mubr.msk.f32.mxu0 %vm15283_vm1, %v15282_v34 }
0x2a18   :  { %v7913_v58 = vpop.permute.xlu1 %7912  ;;  %v8077_v55 = vpop.permute.xlu0 %8076 }
0x2a19   :  { %14468 = vmatpush3.xpose.msk.msra.mxu0 %vm219_vm2, %v7913_v58 }
0x2a1a   :  { %14477 = vmatprep.subr.mxu0 %v15282_v34 }
0x2a1c   :  { %v8079_v59 = vpop.permute.xlu1 %8078  ;;  %14470 = vmatmul.mubr.msk.f32.vlgmr.msra.gmra.mxu0 %vm219_vm2, %v7911_v9  ;;  %v8425_v60 = vpop.permute.xlu0 %8424 }
0x2a1d   :  { %14478 = vmatpush3.xpose.msk.msra.mxu0 %vm219_vm2, %v8079_v59  ;;  %14479 = vmatprep.mubr.msk.f32.mxu0 %vm15283_vm1, %v15282_v34 }
0x2a1e   :  { %14487 = vmatprep.subr.mxu0 %v15282_v34 }
0x2a20   :  { %v8259_v61 = vpop.permute.xlu1 %8258  ;;  %14480 = vmatmul.mubr.msk.f32.vlgmr.msra.gmra.mxu0 %vm219_vm2, %v8077_v55  ;;  %v8591_v8 = vpop.permute.xlu0 %8590 }
0x2a21   :  { %14488 = vmatpush3.xpose.msk.msra.mxu0 %vm219_vm2, %v8259_v61  ;;  %14489 = vmatprep.mubr.msk.f32.mxu0 %vm15283_vm1, %v15282_v34 }
0x2a22   :  { %14497 = vmatprep.subr.mxu0 %v15282_v34 }
0x2a24   :  { %v8423_v62 = vpop.permute.xlu1 %8422  ;;  %14490 = vmatmul.mubr.msk.f32.vlgmr.msra.gmra.mxu0 %vm219_vm2, %v16685_v56  ;;  %v8757_v0 = vpop.permute.xlu0 %8756 }
0x2a25   :  { %14498 = vmatpush3.xpose.msk.msra.mxu0 %vm219_vm2, %v8425_v60  ;;  %14499 = vmatprep.mubr.msk.f32.mxu0 %vm15283_vm1, %v15282_v34 }
0x2a26   :  { %14507 = vmatprep.subr.mxu0 %v15282_v34 }
0x2a28   :  { %14500 = vmatmul.mubr.msk.f32.vlgmr.msra.gmra.mxu0 %vm219_vm2, %v8423_v62  ;;  %v8589_v63 = vpop.permute.xlu1 %8588 }
0x2a29   :  { %14508 = vmatpush3.xpose.msk.msra.mxu0 %vm219_vm2, %v8591_v8  ;;  %14509 = vmatprep.mubr.msk.f32.mxu0 %vm15283_vm1, %v15282_v34 }
0x2a2a   :  { %14517 = vmatprep.subr.mxu0 %v15282_v34 }
0x2a2c   :  { %14510 = vmatmul.mubr.msk.f32.vlgmr.msra.gmra.mxu0 %vm219_vm2, %v8589_v63  ;;  %v8755_v38 = vpop.permute.xlu1 %8754 }
0x2a2d   :  { %14518 = vmatpush3.xpose.msk.msra.mxu0 %vm219_vm2, %v8757_v0  ;;  %14519 = vmatprep.mubr.msk.f32.mxu0 %vm15283_vm1, %v15282_v34 }
0x2a2e   :  { %14527 = vmatprep.subr.mxu0 %v15231_v1 }
0x2a30   :  { %14520 = vmatmul.mubr.msk.f32.vlgmr.msra.gmra.mxu0 %vm219_vm2, %v8755_v38 }
0x2a31   :  { %14528 = vmatpush3.msra.mxu0 %v15231_v1 }
0x2a32   :  { %14529 = vmatprep.subr.mxu0 %v15232_v4 }
0x2a33   :  { %14530 = vmatpush3.msra.mxu0 %v15232_v4 }
0x2a34   :  { %14531 = vmatprep.subr.mxu0 %v15233_v3 }
0x2a35   :  { %14532 = vmatpush3.msra.mxu0 %v15233_v3 }
0x2a36   :  { %14533 = vmatprep.subr.mxu0 %v15234_v2 }
0x2a37   :  { %14534 = vmatpush3.msra.mxu0 %v15234_v2 }
0x2a38   :  { %14549 = vmatprep.subr.mxu0 %v16757_v5 }
0x2ad4   :  { %v7652_v6 = vpop.f32.mrf.mxu1 }
0x2ad5   :  { %v7656_v7 = vmul.f32 0.35355338, %v7652_v6  ;;  %v7818_v53 = vpop.f32.mrf.mxu0 }
0x2ad6   :  { %v7822_v10 = vmul.f32 0.35355338, %v7818_v53  ;;  %v14451_v12 = vpop.f32.mrf.mxu1 }
0x2ad7   :  { %v14461_v29 = vpop.f32.mrf.mxu0  ;;  %v7657_v11 = vsel %vm219_vm2, %v7656_v7, -inf }
0x2ad8   :  { %7658 = vmax.xlane.f32.xlu0 %v7657_v11  ;;  %v7823_v13 = vsel %vm219_vm2, %v7822_v10, -inf }
0x2ad9   :  { %7824 = vmax.xlane.f32.xlu1 %v7823_v13 }
0x2adc   :  { %v7984_v14 = vpop.f32.mrf.mxu0 }
0x2add   :  { %v16762_v15 = vmul.f32 0.35355338, %v7984_v14 }
0x2ade   :  { %v14471_v16 = vpop.f32.mrf.mxu0 }
0x2adf   :  { %v7989_v17 = vsel %vm219_vm2, %v16762_v15, -inf }
0x2ae0   :  { %7990 = vmax.xlane.f32.xlu0 %v7989_v17  ;;  %v8150_v18 = vpop.f32.mrf.mxu0 }
0x2ae1   :  { %v8154_v19 = vmul.f32 0.35355338, %v8150_v18 }
0x2ae2   :  { %v14481_v37 = vpop.f32.mrf.mxu0 }
0x2ae3   :  { %v8155_v20 = vsel %vm219_vm2, %v8154_v19, -inf }
0x2ae4   :  { %8156 = vmax.xlane.f32.xlu0 %v8155_v20  ;;  %v8330_v21 = vpop.f32.mrf.mxu0 }
0x2ae5   :  { %v8334_v22 = vmul.f32 0.35355338, %v8330_v21 }
0x2ae6   :  { %v14491_v23 = vpop.f32.mrf.mxu0 }
0x2ae7   :  { %v8335_v39 = vsel %vm219_vm2, %v8334_v22, -inf }
0x2ae8   :  { %8336 = vmax.xlane.f32.xlu0 %v8335_v39  ;;  %v8496_v26 = vpop.f32.mrf.mxu0 }
0x2ae9   :  { %v8500_v27 = vmul.f32 0.35355338, %v8496_v26 }
0x2aea   :  { %v14501_v28 = vpop.f32.mrf.mxu0 }
0x2aeb   :  { %v8501_v32 = vsel %vm219_vm2, %v8500_v27, -inf }
0x2aec   :  { %8502 = vmax.xlane.f32.xlu1 %v8501_v32  ;;  %v8662_v25 = vpop.f32.mrf.mxu0 }
0x2aed   :  { %v8666_v24 = vmul.f32 0.35355338, %v8662_v25 }
0x2aee   :  { %v14511_v35 = vpop.f32.mrf.mxu0 }
0x2aef   :  { %v8667_v36 = vsel %vm219_vm2, %v8666_v24, -inf }
0x2af0   :  { %8668 = vmax.xlane.f32.xlu0 %v8667_v36  ;;  %v8828_v40 = vpop.f32.mrf.mxu0 }
0x2af1   :  { %v8832_v30 = vmul.f32 0.35355338, %v8828_v40 }
0x2af2   :  { %v14521_v33 = vpop.f32.mrf.mxu0 }
0x2af3   :  { %v8833_v41 = vsel %vm219_vm2, %v8832_v30, -inf }
0x2afd   :  { %7668 = vrot.lane.b32.xlu1 %v16671_v54, %s17662_s25 }
0x2b21   :  { %8834 = vmax.xlane.f32.xlu1 %v8833_v41 }
0x2b32   :  { %8000 = vrot.lane.b32.xlu1 %v16671_v54, %s17668_s5 }
0x2b36   :  { %8166 = vrot.lane.b32.xlu1 %v16671_v54, %s17675_s14 }
0x2b3a   :  { %8346 = vrot.lane.b32.xlu1 %v16685_v56, %s17662_s25 }
0x2b61   :  { %v7659_v42 = vpop.xlane.xlu0 %7658 }
0x2b62   :  { %v7660_v44 = vsub.f32 %v7656_v7, %v7659_v42  ;;  %v7825_v45 = vpop.xlane.xlu1 %7824 }
0x2b63   :  { %v7826_v46 = vsub.f32 %v7822_v10, %v7825_v45 }
0x2b64   :  { %v7661_v47 = vmul.f32 1.442695, %v7660_v44 }
0x2b65   :  { %v7827_v50 = vmul.f32 1.442695, %v7826_v46 }
0x2b66   :  { %15054 = vpow2.f32 %v7661_v47 }
0x2b67   :  { %15056 = vpow2.f32 %v7827_v50 }
0x2b69   :  { %v7991_v51 = vpop.xlane.xlu0 %7990 }
0x2b6a   :  { %v7992_v8 = vsub.f32 %v16762_v15, %v7991_v51 }
0x2b6c   :  { %v7993_v0 = vmul.f32 1.442695, %v7992_v8 }
0x2b6d   :  { %v8157_v52 = vpop.xlane.xlu0 %8156 }
0x2b6e   :  { %v8158_v43 = vsub.f32 %v8154_v19, %v8157_v52 }
0x2b70   :  { %v8159_v57 = vmul.f32 1.442695, %v8158_v43 }
0x2b71   :  { %v8337_v63 = vpop.xlane.xlu0 %8336 }
0x2b72   :  { %15058 = vpow2.f32 %v8159_v57  ;;  %v8338_v1 = vsub.f32 %v8334_v22, %v8337_v63 }
0x2b73   :  { %v15055_v31 = vpop.eup %15054  ;;  %15060 = vpow2.f32 %v7993_v0 }
0x2b74   :  { %v16779_v9 = vpop.eup %15056  ;;  %v7663_v58 = vsel %vm219_vm2, %v15055_v31, 0.0  ;;  %v8339_v4 = vmul.f32 1.442695, %v8338_v1 }
0x2b75   :  { %v8503_v55 = vpop.xlane.xlu1 %8502  ;;  %7664 = vadd.xlane.f32.xlu0 %v7663_v58  ;;  %v7829_v59 = vsel %vm219_vm2, %v16779_v9, 0.0  ;;  %v15236_v58 = vld [vmem:[%s17558_s11 + $0x38] sm:$0xff] }
0x2b76   :  { %7830 = vadd.xlane.f32.xlu1 %v7829_v59  ;;  %15062 = vpow2.f32 %v8339_v4  ;;  %v8504_v2 = vsub.f32 %v8500_v27, %v8503_v55  ;;  %v15237_v55 = vld [vmem:[%s17558_s11 + $0x30] sm:$0xff]  ;;  %v15238_v59 = vld [vmem:[%s17558_s11 + $0x28] sm:$0xff] }
0x2b78   :  { %v8505_v7 = vmul.f32 1.442695, %v8504_v2 }
0x2b79   :  { %v7669_v60 = vpop.permute.xlu1 %7668  ;;  %v8669_v38 = vpop.xlane.xlu0 %8668 }
0x2b7a   :  { %14453 = vmatpush3.msra.mxu1 %v7669_v60  ;;  %v8670_v3 = vsub.f32 %v8666_v24, %v8669_v38  ;;  %v15239_v60 = vld [vmem:[%s17558_s11 + $0x20] sm:$0xff] }
0x2b7b   :  { %14462 = vmatprep.subr.mxu1 %v15282_v34 }
0x2b7c   :  { %v8671_v6 = vmul.f32 1.442695, %v8670_v3 }
0x2b7e   :  { %15064 = vpow2.f32 %v8671_v6 }
0x2b7f   :  { %v16785_v61 = vpop.eup %15058  ;;  %15066 = vpow2.f32 %v8505_v7 }
0x2b80   :  { %v8161_v62 = vsel %vm219_vm2, %v16785_v61, 0.0  ;;  %v15061_v53 = vpop.eup %15060 }
0x2b81   :  { %8162 = vadd.xlane.f32.xlu1 %v8161_v62 }
0x2b83   :  { %v16795_v10 = vpop.eup %15062 }
0x2b84   :  { %v8341_v13 = vsel %vm219_vm2, %v16795_v10, 0.0 }
0x2b8b   :  { %7834 = vrot.lane.b32.xlu0 %v16671_v54, %s17679_s6  ;;  %v7995_v54 = vsel %vm219_vm2, %v15061_v53, 0.0  ;;  %v16799_v14 = vpop.eup %15064 }
0x2b8c   :  { %v8673_v15 = vsel %vm219_vm2, %v16799_v14, 0.0  ;;  %v15067_v16 = vpop.eup %15066 }
0x2b8d   :  { %v8507_v17 = vsel %vm219_vm2, %v15067_v16, 0.0 }
0x2b92   :  { %8512 = vrot.lane.b32.xlu1 %v16685_v56, %s17679_s6 }
0x2baa   :  { %v8835_v12 = vpop.xlane.xlu1 %8834  ;;  %7996 = vadd.xlane.f32.xlu0 %v7995_v54 }
0x2bab   :  { %v8836_v29 = vsub.f32 %v8832_v30, %v8835_v12 }
0x2bad   :  { %v8837_v11 = vmul.f32 1.442695, %v8836_v29 }
0x2bae   :  { %8342 = vadd.xlane.f32.xlu0 %v8341_v13  ;;  %v8001_v37 = vpop.permute.xlu1 %8000 }
0x2baf   :  { %15068 = vpow2.f32 %v8837_v11 }
0x2bb2   :  { %8674 = vadd.xlane.f32.xlu0 %v8673_v15  ;;  %v8167_v20 = vpop.permute.xlu1 %8166 }
0x2bb6   :  { %8508 = vadd.xlane.f32.xlu1 %v8507_v17  ;;  %v8347_v21 = vpop.permute.xlu1 %8346 }
0x2bbc   :  { %v16804_v18 = vpop.eup %15068 }
0x2bbd   :  { %v8839_v19 = vsel %vm219_vm2, %v16804_v18, 0.0 }
0x2bbe   :  { %8840 = vadd.xlane.f32.xlu0 %v8839_v19 }
0x2bc7   :  { %8844 = vrot.lane.b32.xlu1 %v16685_v56, %s17675_s14 }
0x2bd4   :  { %8678 = vrot.lane.b32.xlu0 %v16685_v56, %s17668_s5 }
0x2bfe   :  { %v7665_v22 = vpop.xlane.xlu0 %7664 }
0x2bff   :  { %15070 = vrcp.f32 %v7665_v22  ;;  %v7831_v23 = vpop.xlane.xlu1 %7830 }
0x2c00   :  { %15072 = vrcp.f32 %v7831_v23  ;;  %v15241_v23 = vld [vmem:[%s17561_s13 + $0x70] sm:$0xff] }
0x2c02   :  { %v7835_v28 = vpop.permute.xlu0 %7834 }
0x2c0a   :  { %v8163_v32 = vpop.xlane.xlu1 %8162 }
0x2c0c   :  { %v15071_v39 = vpop.eup %15070 }
0x2c0d   :  { %v7667_v26 = vmul.f32 %v15071_v39, %v15055_v31  ;;  %v15073_v27 = vpop.eup %15072  ;;  %v15242_v39 = vld [vmem:[%s17561_s13 + $0x68] sm:$0xff] }
0x2c0e   :  { %v7833_v56 = vmul.f32 %v15073_v27, %v16779_v9  ;;  %v8513_v35 = vpop.permute.xlu1 %8512  ;;  %v15245_v27 = vld [vmem:[%s17561_s13 + $0x50] sm:$0xff] }
0x2c0f   :  { %14455 = vmatmul.mubr.msk.f32.vlgmr.msra.gmra.mxu1 %vm219_vm2, %v7667_v26  ;;  %v15243_v26 = vld [vmem:[%s17561_s13 + $0x60] sm:$0xff] }
0x2c10   :  { %14463 = vmatpush3.msra.mxu1 %v7835_v28  ;;  %14464 = vmatprep.mubr.msk.f32.mxu1 %vm15283_vm1, %v15282_v34  ;;  %v15246_v28 = vld [vmem:[%s17561_s13 + $0x48] sm:$0xff] }
0x2c11   :  { %14472 = vmatprep.subr.mxu1 %v15282_v34 }
0x2c13   :  { %14465 = vmatmul.mubr.msk.f32.vlgmr.msra.gmra.mxu1 %vm219_vm2, %v7833_v56  ;;  %v15247_v56 = vld [vmem:[%s17561_s13 + $0x40] sm:$0xff] }
0x2c14   :  { %14473 = vmatpush3.msra.mxu1 %v8001_v37  ;;  %14474 = vmatprep.mubr.msk.f32.mxu1 %vm15283_vm1, %v15282_v34 }
0x2c15   :  { %14482 = vmatprep.subr.mxu1 %v15282_v34 }
0x2c33   :  { %v7997_v25 = vpop.xlane.xlu0 %7996 }
0x2c34   :  { %15074 = vrcp.f32 %v7997_v25  ;;  %v15248_v25 = vld [vmem:[%s17677_s2 + $0x1] ss:$0 sm:$0xff] }
0x2c35   :  { %15076 = vrcp.f32 %v8163_v32 }
0x2c37   :  { %v8343_v24 = vpop.xlane.xlu0 %8342 }
0x2c38   :  { %15078 = vrcp.f32 %v8343_v24 }
0x2c3b   :  { %v8675_v36 = vpop.xlane.xlu0 %8674 }
0x2c3f   :  { %v8509_v40 = vpop.xlane.xlu1 %8508 }
0x2c40   :  { %15080 = vrcp.f32 %v8509_v40 }
0x2c41   :  { %v15075_v33 = vpop.eup %15074  ;;  %15082 = vrcp.f32 %v8675_v36 }
0x2c42   :  { %v7999_v30 = vmul.f32 %v15075_v33, %v15061_v53  ;;  %v15077_v41 = vpop.eup %15076 }
0x2c43   :  { %v8165_v42 = vmul.f32 %v15077_v41, %v16785_v61  ;;  %v8845_v57 = vpop.permute.xlu1 %8844  ;;  %v16860_v61 = vld [vmem:[%s17647_s3 + $0x58] sm:$0xff] }
0x2c44   :  { %14475 = vmatmul.mubr.msk.f32.vlgmr.msra.gmra.mxu1 %vm219_vm2, %v7999_v30 }
0x2c45   :  { %14483 = vmatpush3.msra.mxu1 %v8167_v20  ;;  %14484 = vmatprep.mubr.msk.f32.mxu1 %vm15283_vm1, %v15282_v34  ;;  %v15079_v44 = vpop.eup %15078 }
0x2c46   :  { %14492 = vmatprep.subr.mxu1 %v15282_v34  ;;  %v8345_v46 = vmul.f32 %v15079_v44, %v16795_v10 }
0x2c47   :  { %v8841_v45 = vpop.xlane.xlu0 %8840 }
0x2c48   :  { %15084 = vrcp.f32 %v8841_v45  ;;  %14485 = vmatmul.mubr.msk.f32.vlgmr.msra.gmra.mxu1 %vm219_vm2, %v8165_v42 }
0x2c49   :  { %14493 = vmatpush3.msra.mxu1 %v8347_v21  ;;  %14494 = vmatprep.mubr.msk.f32.mxu1 %vm15283_vm1, %v15282_v34 }
0x2c4a   :  { %14502 = vmatprep.subr.mxu1 %v15282_v34 }
0x2c4b   :  { %v8679_v52 = vpop.permute.xlu0 %8678 }
0x2c4c   :  { %14495 = vmatmul.mubr.msk.f32.vlgmr.msra.gmra.mxu1 %vm219_vm2, %v8345_v46 }
0x2c4d   :  { %v15081_v47 = vpop.eup %15080  ;;  %14503 = vmatpush3.msra.mxu1 %v8513_v35  ;;  %14504 = vmatprep.mubr.msk.f32.mxu1 %vm15283_vm1, %v15282_v34 }
0x2c4e   :  { %14512 = vmatprep.subr.mxu1 %v15282_v34  ;;  %v8511_v50 = vmul.f32 %v15081_v47, %v15067_v16  ;;  %v15083_v51 = vpop.eup %15082 }
0x2c4f   :  { %v8677_v43 = vmul.f32 %v15083_v51, %v16799_v14 }
0x2c50   :  { %14505 = vmatmul.mubr.msk.f32.vlgmr.msra.gmra.mxu1 %vm219_vm2, %v8511_v50 }
0x2c51   :  { %14513 = vmatpush3.msra.mxu1 %v8679_v52  ;;  %14514 = vmatprep.mubr.msk.f32.mxu1 %vm15283_vm1, %v15282_v34 }
0x2c52   :  { %14522 = vmatprep.subr.mxu1 %v15282_v34 }
0x2c54   :  { %14515 = vmatmul.mubr.msk.f32.vlgmr.msra.gmra.mxu1 %vm219_vm2, %v8677_v43 }
0x2c55   :  { %v15085_v31 = vpop.eup %15084  ;;  %14523 = vmatpush3.msra.mxu1 %v8845_v57  ;;  %14524 = vmatprep.mubr.msk.f32.mxu1 %vm15283_vm1, %v15282_v34 }
0x2c56   :  { %v8843_v9 = vmul.f32 %v15085_v31, %v16804_v18  ;;  %14538 = vmatprep.subr.mxu1 %v15236_v58 }
0x2c58   :  { %14525 = vmatmul.mubr.msk.f32.vlgmr.msra.gmra.mxu1 %vm219_vm2, %v8843_v9 }
0x2c59   :  { %14539 = vmatpush3.msra.mxu1 %v15236_v58 }
0x2c5a   :  { %14540 = vmatprep.subr.mxu1 %v15237_v55 }
0x2c5b   :  { %14541 = vmatpush3.msra.mxu1 %v15237_v55 }
0x2c5c   :  { %14542 = vmatprep.subr.mxu1 %v15238_v59 }
0x2c5d   :  { %14543 = vmatpush3.msra.mxu1 %v15238_v59 }
0x2c5e   :  { %14544 = vmatprep.subr.mxu1 %v15239_v60 }
0x2c5f   :  { %14545 = vmatpush3.msra.mxu1 %v15239_v60 }
0x2c60   :  { %14568 = vmatprep.subr.mxu1 %v16860_v61 }
0x2ccf   :  { %v7740_v62 = vpop.f32.mrf.mxu1 }
0x2cd1   :  { %v14456_v8 = vpop.f32.mrf.mxu1 }
0x2cd3   :  { %v7906_v63 = vpop.f32.mrf.mxu1 }
0x2cd4   :  { %8243 = vrot.lane.b32.xlu0 %v7906_v63, %s17666_s21 }
0x2cd5   :  { %v14466_v0 = vpop.f32.mrf.mxu1 }
0x2cd6   :  { %v15250_v0 = vld [vmem:[%s17560_s10 + $0x1] ss:$0 sm:$0xff] }
0x2d04   :  { %v8072_v1 = vpop.f32.mrf.mxu1 }
0x2d05   :  { %8247 = vrot.lane.b32.xlu1 %v8072_v1, %s17653_s8 }
0x2d06   :  { %v14476_v38 = vpop.f32.mrf.mxu1 }
0x2d08   :  { %v8238_v4 = vpop.f32.mrf.mxu1 }
0x2d09   :  { %8251 = vrot.lane.b32.xlu1 %v8238_v4, %s17667_s17 }
0x2d0a   :  { %v14486_v3 = vpop.f32.mrf.mxu1 }
0x2d0c   :  { %v8418_v2 = vpop.f32.mrf.mxu1 }
0x2d0e   :  { %v14496_v6 = vpop.f32.mrf.mxu1 }
0x2d0f   :  { %v15252_v6 = vld [vmem:[%s17647_s3 + $0x48] sm:$0xff] }
0x2d10   :  { %v8584_v7 = vpop.f32.mrf.mxu1 }
0x2d11   :  { %8921 = vrot.lane.b32.xlu0 %v8584_v7, %s17666_s21  ;;  %v15253_v7 = vld [vmem:[%s17647_s3 + $0x40] sm:$0xff] }
0x2d12   :  { %v14506_v53 = vpop.f32.mrf.mxu1 }
0x2d13   :  { %v15254_v53 = vld [vmem:[%s17562_s12 + $0x1] ss:$0 sm:$0xff] }
0x2d14   :  { %v8750_v54 = vpop.f32.mrf.mxu1 }
0x2d15   :  { %8925 = vrot.lane.b32.xlu0 %v8750_v54, %s17653_s8 }
0x2d16   :  { %v14516_v10 = vpop.f32.mrf.mxu1 }
0x2d18   :  { %v8916_v12 = vpop.f32.mrf.mxu1 }
0x2d19   :  { %8929 = vrot.lane.b32.xlu1 %v8916_v12, %s17667_s17 }
0x2d1a   :  { %v14526_v29 = vpop.f32.mrf.mxu1 }
0x2d46   :  { %v8244_v11 = vpop.permute.xlu0 %8243 }
0x2d47   :  { %v8254_v14 = vsel %vm219_vm2, %v7740_v62, %v8244_v11  ;;  %v15249_v62 = vld [vmem:[%s17559_s9 + $0x1] ss:$0 sm:$0xff] }
0x2d77   :  { %v8248_v13 = vpop.permute.xlu1 %8247 }
0x2d78   :  { %v8255_v15 = vsel %vm903_vm3, %v8254_v14, %v8248_v13 }
0x2d7b   :  { %v8252_v16 = vpop.permute.xlu1 %8251 }
0x2d7c   :  { %v8256_v17 = vsel %vm905_vm4, %v8255_v15, %v8252_v16 }
0x2d7d   :  { %14535 = vmatprep.mubr.msk.f32.mxu0 %vm80_vm0, %v8256_v17 }
0x2d83   :  { %v8922_v18 = vpop.permute.xlu0 %8921 }
0x2d84   :  { %v8932_v37 = vsel %vm219_vm2, %v8418_v2, %v8922_v18  ;;  %v15251_v2 = vld [vmem:[%s17647_s3 + $0x50] sm:$0xff] }
0x2d87   :  { %v8926_v19 = vpop.permute.xlu0 %8925 }
0x2d88   :  { %v8933_v20 = vsel %vm903_vm3, %v8932_v37, %v8926_v19 }
0x2d8b   :  { %v8930_v21 = vpop.permute.xlu1 %8929 }
0x2d8c   :  { %v8934_v22 = vsel %vm905_vm4, %v8933_v20, %v8930_v21 }
0x2d8d   :  { %14536 = vmatmul.mubr.msk.f32.vlgmr.msra.gmra.mxu0 %vm80_vm0, %v8934_v22 }
0x2d8e   :  { %14550 = vmatpush3.msra.mxu0 %v16757_v5  ;;  %v15244_v5 = vld [vmem:[%s17561_s13 + $0x58] sm:$0xff] }
0x2d8f   :  { %14551 = vmatprep.subr.mxu0 %v15241_v23 }
0x2d90   :  { %14552 = vmatpush3.msra.mxu0 %v15241_v23 }
0x2d91   :  { %14553 = vmatprep.subr.mxu0 %v15242_v39 }
0x2d92   :  { %14554 = vmatpush3.msra.mxu0 %v15242_v39 }
0x2d93   :  { %14555 = vmatprep.subr.mxu0 %v15243_v26 }
0x2d94   :  { %14556 = vmatpush3.msra.mxu0 %v15243_v26 }
0x2d95   :  { %14557 = vmatprep.subr.mxu0 %v15244_v5 }
0x2d96   :  { %14558 = vmatpush3.msra.mxu0 %v15244_v5 }
0x2d97   :  { %14559 = vmatprep.subr.mxu0 %v15245_v27 }
0x2d98   :  { %14560 = vmatpush3.msra.mxu0 %v15245_v27 }
0x2d99   :  { %14561 = vmatprep.subr.mxu0 %v15246_v28 }
0x2d9a   :  { %14562 = vmatpush3.msra.mxu0 %v15246_v28 }
0x2d9b   :  { %14563 = vmatprep.subr.mxu0 %v15247_v56 }
0x2d9c   :  { %14564 = vmatpush3.msra.mxu0 %v15247_v56  ;;  %v15255_v56 = vld [vmem:[%s17678_s19 + $0x1] ss:$0 sm:$0xff] }
0x2d9d   :  { %14589 = vmatprep.subr.mxu0 %v15282_v34 }
0x2e4d   :  { %v14537_v32 = vpop.f32.mrf.mxu0 }
0x2e4e   :  { %v9013_v24 = vadd.f32 %v15248_v25, %v14537_v32 }
0x2e4f   :  { %v9007_v35 = vpop.f32.mrf.mxu0 }
0x2e50   :  { %v9017_v36 = vadd.f32 %v9013_v24, %v16660_v49  ;;  %v9008_v40 = vadd.f32 %v15248_v25, %v9007_v35 }
0x2e52   :  { %v9016_v33 = vadd.f32 %v9008_v40, %v16658_v48  ;;  %v9021_v30 = vsel %vm80_vm0, %v9017_v36, 0.0 }
0x2e53   :  { %9022 = vadd.xlane.f32.xlu1 %v9021_v30 }
0x2e54   :  { %v9018_v41 = vsel %vm80_vm0, %v9016_v33, 0.0 }
0x2e55   :  { %9019 = vadd.xlane.f32.xlu0 %v9018_v41 }
0x2edc   :  { %v9023_v42 = vpop.xlane.xlu1 %9022 }
0x2edd   :  { %v9025_v44 = vmul.f32 0.03125, %v9023_v42 }
0x2ede   :  { %v9020_v45 = vpop.xlane.xlu0 %9019 }
0x2edf   :  { %v9024_v46 = vmul.f32 0.03125, %v9020_v45  ;;  %v9027_v47 = vsub.f32 %v9017_v36, %v9025_v44 }
0x2ee1   :  { %v9026_v50 = vsub.f32 %v9016_v33, %v9024_v46  ;;  %v9029_v43 = vmul.f32 %v9027_v47, %v9027_v47 }
0x2ee3   :  { %v9028_v51 = vmul.f32 %v9026_v50, %v9026_v50  ;;  %v9033_v49 = vsel %vm80_vm0, %v9029_v43, 0.0 }
0x2ee5   :  { %v9030_v52 = vsel %vm80_vm0, %v9028_v51, 0.0 }
0x2ee6   :  { %9031 = vadd.xlane.f32.xlu0 %v9030_v52 }
0x2eea   :  { %9034 = vadd.xlane.f32.xlu0 %v9033_v49 }
0x2f6f   :  { %v9032_v48 = vpop.xlane.xlu0 %9031 }
0x2f70   :  { %v9036_v57 = vmul.f32 0.03125, %v9032_v48 }
0x2f72   :  { %v9038_v31 = vadd.f32 1e-12, %v9036_v57 }
0x2f73   :  { %v9035_v9 = vpop.xlane.xlu0 %9034 }
0x2f74   :  { %15086 = vrsqrt.f32 %v9038_v31  ;;  %v9037_v58 = vmul.f32 0.03125, %v9035_v9 }
0x2f76   :  { %v9039_v55 = vadd.f32 1e-12, %v9037_v58 }
0x2f78   :  { %15088 = vrsqrt.f32 %v9039_v55 }
0x2f81   :  { %v15087_v59 = vpop.eup %15086 }
0x2f82   :  { %v9042_v60 = vmul.f32 %v15087_v59, %v9026_v50 }
0x2f84   :  { %v9044_v8 = vmul.f32 %v15249_v62, %v9042_v60 }
0x2f85   :  { %v15089_v63 = vpop.eup %15088 }
0x2f86   :  { %v9046_v1 = vadd.f32 %v15250_v0, %v9044_v8  ;;  %v9043_v38 = vmul.f32 %v15089_v63, %v9027_v47 }
0x2f88   :  { %14546 = vmatprep.mubr.msk.f32.mxu1 %vm80_vm0, %v9046_v1  ;;  %v9045_v4 = vmul.f32 %v15249_v62, %v9043_v38  ;;  %v15256_v62 = vld [vmem:[%s17564_s15 + $0x1] ss:$0 sm:$0xff] }
0x2f8a   :  { %v9047_v3 = vadd.f32 %v15250_v0, %v9045_v4  ;;  %v15257_v0 = vld [vmem:[%s17565_s16 + $0x1] ss:$0 sm:$0xff] }
0x2f8c   :  { %14547 = vmatmul.mubr.msk.f32.vlgmr.msra.gmra.mxu1 %vm80_vm0, %v9047_v3 }
0x2f8d   :  { %14569 = vmatpush3.msra.mxu1 %v16860_v61 }
0x2f8e   :  { %14570 = vmatprep.subr.mxu1 %v15251_v2 }
0x2f8f   :  { %14571 = vmatpush3.msra.mxu1 %v15251_v2  ;;  %v15258_v2 = vld [vmem:[%s17650_s7 + $0x2] ss:$0 sm:$0xff] }
0x2f90   :  { %14572 = vmatprep.subr.mxu1 %v15252_v6 }
0x2f91   :  { %14573 = vmatpush3.msra.mxu1 %v15252_v6 }
0x2f92   :  { %14574 = vmatprep.subr.mxu1 %v15253_v7 }
0x2f93   :  { %14575 = vmatpush3.msra.mxu1 %v15253_v7 }
0x2f94   :  { %14579 = vmatprep.subr.mxu1 %v15282_v34 }
0x304c   :  { %v14548_v61 = vpop.f32.mrf.mxu1 }
0x304d   :  { %v9126_v54 = vadd.f32 %v15254_v53, %v14548_v61 }
0x304e   :  { %v9120_v10 = vpop.f32.mrf.mxu1 }
0x304f   :  { %v9130_v12 = vmul.f32 %v9126_v54, %v9126_v54  ;;  %v9121_v29 = vadd.f32 %v15254_v53, %v9120_v10 }
0x3051   :  { %v9132_v11 = vmul.f32 %v9130_v12, %v9126_v54  ;;  %v9129_v13 = vmul.f32 %v9121_v29, %v9121_v29 }
0x3053   :  { %v9134_v14 = vmul.f32 0.044715, %v9132_v11  ;;  %v9131_v15 = vmul.f32 %v9129_v13, %v9121_v29 }
0x3055   :  { %v9136_v16 = vadd.f32 %v9134_v14, %v9126_v54  ;;  %v9133_v17 = vmul.f32 0.044715, %v9131_v15 }
0x3057   :  { %v9138_v18 = vmul.f32 0.7978846, %v9136_v16  ;;  %v9135_v19 = vadd.f32 %v9133_v17, %v9121_v29 }
0x3059   :  { %15090 = vtanh.f32 %v9138_v18  ;;  %v9137_v37 = vmul.f32 0.7978846, %v9135_v19  ;;  %v15259_v19 = vld [vmem:[%s17652_s0 + $0x58] sm:$0xff] }
0x305b   :  { %15092 = vtanh.f32 %v9137_v37 }
0x3066   :  { %v15091_v20 = vpop.eup %15090 }
0x3067   :  { %v9142_v21 = vadd.f32 1.0, %v15091_v20  ;;  %v15260_v20 = vld [vmem:[%s17652_s0 + $0x50] sm:$0xff] }
0x3068   :  { %v15093_v22 = vpop.eup %15092 }
0x3069   :  { %v9141_v23 = vadd.f32 1.0, %v15093_v22  ;;  %v9144_v39 = vmul.f32 0.5, %v9142_v21  ;;  %v15261_v21 = vld [vmem:[%s17652_s0 + $0x48] sm:$0xff]  ;;  %v15262_v22 = vld [vmem:[%s17652_s0 + $0x40] sm:$0xff] }
0x306b   :  { %v9143_v26 = vmul.f32 0.5, %v9141_v23  ;;  %v9146_v27 = vmul.f32 %v9144_v39, %v9126_v54  ;;  %v17047_v23 = vld [vmem:[%s17561_s13 + $0xb8] sm:$0xff] }
0x306d   :  { %v9145_v5 = vmul.f32 %v9143_v26, %v9121_v29 }
0x306f   :  { %14565 = vmatprep.mubr.msk.f32.mxu0 %vm1858_vm5, %v9145_v5 }
0x3070   :  { %14566 = vmatmul.mubr.msk.f32.vlgmr.msra.gmra.mxu0 %vm1858_vm5, %v9146_v27 }
0x3071   :  { %14591 = vmatprep.mubr.msk.f32.mxu0 %vm15283_vm1, %v15282_v34 }
0x3130   :  { %v14567_v28 = vpop.f32.mrf.mxu0 }
0x3131   :  { %v9225_v32 = vadd.f32 %v15255_v56, %v14567_v28 }
0x3132   :  { %v9219_v25 = vpop.f32.mrf.mxu0 }
0x3133   :  { %v9229_v24 = vadd.f32 %v9225_v32, %v9047_v3  ;;  %v9220_v35 = vadd.f32 %v15255_v56, %v9219_v25 }
0x3135   :  { %v9228_v36 = vadd.f32 %v9220_v35, %v9046_v1  ;;  %v9233_v40 = vsel %vm80_vm0, %v9229_v24, 0.0 }
0x3136   :  { %9234 = vadd.xlane.f32.xlu1 %v9233_v40 }
0x3137   :  { %v9230_v33 = vsel %vm80_vm0, %v9228_v36, 0.0 }
0x3138   :  { %9231 = vadd.xlane.f32.xlu0 %v9230_v33 }
0x31bf   :  { %v9235_v30 = vpop.xlane.xlu1 %9234 }
0x31c0   :  { %v9237_v41 = vmul.f32 0.03125, %v9235_v30 }
0x31c1   :  { %v9232_v42 = vpop.xlane.xlu0 %9231 }
0x31c2   :  { %v9239_v44 = vsub.f32 %v9229_v24, %v9237_v41  ;;  %v9236_v45 = vmul.f32 0.03125, %v9232_v42 }
0x31c4   :  { %v9238_v46 = vsub.f32 %v9228_v36, %v9236_v45  ;;  %v9241_v47 = vmul.f32 %v9239_v44, %v9239_v44 }
0x31c6   :  { %v9245_v50 = vsel %vm80_vm0, %v9241_v47, 0.0  ;;  %v9240_v51 = vmul.f32 %v9238_v46, %v9238_v46 }
0x31c7   :  { %9246 = vadd.xlane.f32.xlu1 %v9245_v50 }
0x31c8   :  { %v9242_v52 = vsel %vm80_vm0, %v9240_v51, 0.0 }
0x31c9   :  { %9243 = vadd.xlane.f32.xlu0 %v9242_v52 }
0x3250   :  { %v9247_v43 = vpop.xlane.xlu1 %9246 }
0x3251   :  { %v9249_v49 = vmul.f32 0.03125, %v9247_v43 }
0x3252   :  { %v9244_v48 = vpop.xlane.xlu0 %9243 }
0x3253   :  { %v9251_v57 = vadd.f32 1e-12, %v9249_v49  ;;  %v9248_v31 = vmul.f32 0.03125, %v9244_v48 }
0x3255   :  { %15094 = vrsqrt.f32 %v9251_v57  ;;  %v9250_v9 = vadd.f32 1e-12, %v9248_v31 }
0x3257   :  { %15096 = vrsqrt.f32 %v9250_v9 }
0x3262   :  { %v15095_v58 = vpop.eup %15094 }
0x3263   :  { %v9255_v55 = vmul.f32 %v15095_v58, %v9239_v44 }
0x3264   :  { %v15097_v59 = vpop.eup %15096 }
0x3265   :  { %v9254_v60 = vmul.f32 %v15097_v59, %v9238_v46  ;;  %v9257_v8 = vmul.f32 %v15256_v62, %v9255_v55 }
0x3267   :  { %v9256_v63 = vmul.f32 %v15256_v62, %v9254_v60  ;;  %v16950_v38 = vadd.f32 %v15257_v0, %v9257_v8 }
0x3269   :  { %v16948_v1 = vadd.f32 %v15257_v0, %v9256_v63 }
0x326b   :  { %14576 = vmatprep.mubr.msk.f32.mxu1 %vm80_vm0, %v16948_v1 }
0x326c   :  { %14577 = vmatmul.mubr.msk.f32.vlgmr.msra.gmra.mxu1 %vm80_vm0, %v16950_v38 }
0x326d   :  { %14581 = vmatprep.mubr.msk.f32.mxu1 %vm15283_vm1, %v15282_v34 }
0x332c   :  { %v14578_v4 = vpop.f32.mrf.mxu1 }
0x332d   :  { %v16975_v7 = vadd.f32 %v15258_v2, %v14578_v4 }
0x332e   :  { %v9332_v3 = vpop.f32.mrf.mxu1 }
0x332f   :  { %v16961_v6 = vadd.f32 %v15258_v2, %v9332_v3 }
0x3331   :  { %9508 = vrot.lane.b32.xlu1 %v16961_v6, %s17655_s28  ;;  %9342 = vrot.lane.b32.xlu0 %v16961_v6, %s17656_s29 }
0x3335   :  { %9506 = vrot.lane.b32.xlu1 %v16961_v6, %s17657_s27  ;;  %9672 = vrot.lane.b32.xlu0 %v16961_v6, %s17658_s26 }
0x3339   :  { %9674 = vrot.lane.b32.xlu1 %v16961_v6, %s17659_s24  ;;  %9838 = vrot.lane.b32.xlu0 %v16961_v6, %s17680_s4 }
0x333d   :  { %9840 = vrot.lane.b32.xlu1 %v16961_v6, %s17681_s20  ;;  %10186 = vrot.lane.b32.xlu0 %v16975_v7, %s17655_s28 }
0x3341   :  { %10020 = vrot.lane.b32.xlu1 %v16975_v7, %s17656_s29  ;;  %10352 = vrot.lane.b32.xlu0 %v16975_v7, %s17659_s24 }
0x3345   :  { %10184 = vrot.lane.b32.xlu1 %v16975_v7, %s17657_s27  ;;  %10518 = vrot.lane.b32.xlu0 %v16975_v7, %s17681_s20 }
0x3349   :  { %10350 = vrot.lane.b32.xlu1 %v16975_v7, %s17658_s26 }
0x334d   :  { %10516 = vrot.lane.b32.xlu1 %v16975_v7, %s17680_s4  ;;  %s17682_s4 = smov 56  }
0x33a3   :  { %v9509_v61 = vpop.permute.xlu1 %9508  ;;  %v9343_v53 = vpop.permute.xlu0 %9342 }
0x33a4   :  { %14580 = vmatpush3.xpose.msk.msra.mxu1 %vm219_vm2, %v9343_v53  ;;  %14590 = vmatpush3.xpose.msk.msra.mxu0 %vm219_vm2, %v9509_v61 }
0x33a5   :  { %14599 = vmatprep.subr.mxu0 %v15282_v34  ;;  %14584 = vmatprep.subr.mxu1 %v15282_v34 }
0x33a7   :  { %v9507_v54 = vpop.permute.xlu1 %9506  ;;  %14582 = vmatmul.mubr.msk.f32.vlgmr.msra.gmra.mxu1 %vm219_vm2, %v16961_v6  ;;  %v9673_v10 = vpop.permute.xlu0 %9672 }
0x33a8   :  { %14592 = vmatmul.mubr.msk.f32.vlgmr.msra.gmra.mxu0 %vm219_vm2, %v9507_v54  ;;  %14586 = vmatprep.mubr.msk.f32.mxu1 %vm15283_vm1, %v15282_v34 }
0x33a9   :  { %14601 = vmatprep.mubr.msk.f32.mxu0 %vm15283_vm1, %v15282_v34 }
0x33ab   :  { %v9675_v12 = vpop.permute.xlu1 %9674  ;;  %v9839_v29 = vpop.permute.xlu0 %9838 }
0x33ac   :  { %14600 = vmatpush3.xpose.msk.msra.mxu0 %vm219_vm2, %v9675_v12 }
0x33ad   :  { %14609 = vmatprep.subr.mxu0 %v15282_v34 }
0x33af   :  { %v9841_v11 = vpop.permute.xlu1 %9840  ;;  %14602 = vmatmul.mubr.msk.f32.vlgmr.msra.gmra.mxu0 %vm219_vm2, %v9673_v10  ;;  %v10187_v13 = vpop.permute.xlu0 %10186 }
0x33b0   :  { %14610 = vmatpush3.xpose.msk.msra.mxu0 %vm219_vm2, %v9841_v11  ;;  %14611 = vmatprep.mubr.msk.f32.mxu0 %vm15283_vm1, %v15282_v34 }
0x33b1   :  { %14619 = vmatprep.subr.mxu0 %v15282_v34 }
0x33b3   :  { %v10021_v14 = vpop.permute.xlu1 %10020  ;;  %14612 = vmatmul.mubr.msk.f32.vlgmr.msra.gmra.mxu0 %vm219_vm2, %v9839_v29  ;;  %v10353_v16 = vpop.permute.xlu0 %10352 }
0x33b4   :  { %14620 = vmatpush3.xpose.msk.msra.mxu0 %vm219_vm2, %v10021_v14  ;;  %14621 = vmatprep.mubr.msk.f32.mxu0 %vm15283_vm1, %v15282_v34 }
0x33b5   :  { %14629 = vmatprep.subr.mxu0 %v15282_v34 }
0x33b7   :  { %v10185_v15 = vpop.permute.xlu1 %10184  ;;  %14622 = vmatmul.mubr.msk.f32.vlgmr.msra.gmra.mxu0 %vm219_vm2, %v16975_v7  ;;  %v10519_v18 = vpop.permute.xlu0 %10518 }
0x33b8   :  { %14630 = vmatpush3.xpose.msk.msra.mxu0 %vm219_vm2, %v10187_v13  ;;  %14631 = vmatprep.mubr.msk.f32.mxu0 %vm15283_vm1, %v15282_v34 }
0x33b9   :  { %14639 = vmatprep.subr.mxu0 %v15282_v34 }
0x33bb   :  { %14632 = vmatmul.mubr.msk.f32.vlgmr.msra.gmra.mxu0 %vm219_vm2, %v10185_v15  ;;  %v10351_v17 = vpop.permute.xlu1 %10350 }
0x33bc   :  { %14640 = vmatpush3.xpose.msk.msra.mxu0 %vm219_vm2, %v10353_v16  ;;  %14641 = vmatprep.mubr.msk.f32.mxu0 %vm15283_vm1, %v15282_v34 }
0x33bd   :  { %14649 = vmatprep.subr.mxu0 %v15282_v34 }
0x33bf   :  { %14642 = vmatmul.mubr.msk.f32.vlgmr.msra.gmra.mxu0 %vm219_vm2, %v10351_v17  ;;  %v10517_v37 = vpop.permute.xlu1 %10516 }
0x33c0   :  { %14650 = vmatpush3.xpose.msk.msra.mxu0 %vm219_vm2, %v10519_v18  ;;  %14651 = vmatprep.mubr.msk.f32.mxu0 %vm15283_vm1, %v15282_v34 }
0x33c1   :  { %14659 = vmatprep.subr.mxu0 %v15259_v19 }
0x33c3   :  { %14652 = vmatmul.mubr.msk.f32.vlgmr.msra.gmra.mxu0 %vm219_vm2, %v10517_v37 }
0x33c4   :  { %14660 = vmatpush3.msra.mxu0 %v15259_v19 }
0x33c5   :  { %14661 = vmatprep.subr.mxu0 %v15260_v20 }
0x33c6   :  { %14662 = vmatpush3.msra.mxu0 %v15260_v20 }
0x33c7   :  { %14663 = vmatprep.subr.mxu0 %v15261_v21 }
0x33c8   :  { %14664 = vmatpush3.msra.mxu0 %v15261_v21 }
0x33c9   :  { %14665 = vmatprep.subr.mxu0 %v15262_v22 }
0x33ca   :  { %14666 = vmatpush3.msra.mxu0 %v15262_v22 }
0x33cb   :  { %14681 = vmatprep.subr.mxu0 %v17047_v23 }
0x3467   :  { %v9414_v39 = vpop.f32.mrf.mxu1 }
0x3468   :  { %v9418_v26 = vmul.f32 0.35355338, %v9414_v39  ;;  %v9580_v5 = vpop.f32.mrf.mxu0 }
0x3469   :  { %v9584_v27 = vmul.f32 0.35355338, %v9580_v5  ;;  %v14583_v28 = vpop.f32.mrf.mxu1 }
0x346a   :  { %v14593_v56 = vpop.f32.mrf.mxu0  ;;  %v9419_v32 = vsel %vm219_vm2, %v9418_v26, -inf }
0x346b   :  { %9420 = vmax.xlane.f32.xlu0 %v9419_v32  ;;  %v9585_v25 = vsel %vm219_vm2, %v9584_v27, -inf }
0x346c   :  { %9586 = vmax.xlane.f32.xlu1 %v9585_v25 }
0x346f   :  { %v9746_v24 = vpop.f32.mrf.mxu0 }
0x3470   :  { %v17052_v35 = vmul.f32 0.35355338, %v9746_v24 }
0x3471   :  { %v14603_v36 = vpop.f32.mrf.mxu0 }
0x3472   :  { %v9751_v40 = vsel %vm219_vm2, %v17052_v35, -inf }
0x3473   :  { %9752 = vmax.xlane.f32.xlu0 %v9751_v40  ;;  %v9912_v33 = vpop.f32.mrf.mxu0 }
0x3474   :  { %v9916_v30 = vmul.f32 0.35355338, %v9912_v33 }
0x3475   :  { %v14613_v41 = vpop.f32.mrf.mxu0 }
0x3476   :  { %v9917_v42 = vsel %vm219_vm2, %v9916_v30, -inf }
0x3477   :  { %9918 = vmax.xlane.f32.xlu0 %v9917_v42  ;;  %v10092_v44 = vpop.f32.mrf.mxu0 }
0x3478   :  { %v10096_v45 = vmul.f32 0.35355338, %v10092_v44 }
0x3479   :  { %v14623_v46 = vpop.f32.mrf.mxu0 }
0x347a   :  { %v10097_v47 = vsel %vm219_vm2, %v10096_v45, -inf }
0x347b   :  { %10098 = vmax.xlane.f32.xlu0 %v10097_v47  ;;  %v10258_v50 = vpop.f32.mrf.mxu0 }
0x347c   :  { %v10262_v51 = vmul.f32 0.35355338, %v10258_v50 }
0x347d   :  { %v14633_v52 = vpop.f32.mrf.mxu0 }
0x347e   :  { %v10263_v43 = vsel %vm219_vm2, %v10262_v51, -inf }
0x347f   :  { %10264 = vmax.xlane.f32.xlu1 %v10263_v43  ;;  %v10424_v49 = vpop.f32.mrf.mxu0 }
0x3480   :  { %v10428_v48 = vmul.f32 0.35355338, %v10424_v49 }
0x3481   :  { %v14643_v57 = vpop.f32.mrf.mxu0 }
0x3482   :  { %v10429_v31 = vsel %vm219_vm2, %v10428_v48, -inf }
0x3483   :  { %10430 = vmax.xlane.f32.xlu0 %v10429_v31  ;;  %v10590_v9 = vpop.f32.mrf.mxu0 }
0x3484   :  { %v10594_v55 = vmul.f32 0.35355338, %v10590_v9 }
0x3485   :  { %v14653_v58 = vpop.f32.mrf.mxu0 }
0x3486   :  { %v10595_v59 = vsel %vm219_vm2, %v10594_v55, -inf }
0x3490   :  { %9430 = vrot.lane.b32.xlu1 %v16961_v6, %s17662_s25 }
0x34b4   :  { %10596 = vmax.xlane.f32.xlu1 %v10595_v59 }
0x34c5   :  { %9762 = vrot.lane.b32.xlu1 %v16961_v6, %s17668_s5 }
0x34c9   :  { %9928 = vrot.lane.b32.xlu1 %v16961_v6, %s17675_s14 }
0x34cd   :  { %10108 = vrot.lane.b32.xlu1 %v16975_v7, %s17662_s25 }
0x34f4   :  { %v9421_v60 = vpop.xlane.xlu0 %9420 }
0x34f5   :  { %v9422_v62 = vsub.f32 %v9418_v26, %v9421_v60  ;;  %v9587_v8 = vpop.xlane.xlu1 %9586 }
0x34f6   :  { %v9588_v63 = vsub.f32 %v9584_v27, %v9587_v8 }
0x34f7   :  { %v9423_v0 = vmul.f32 1.442695, %v9422_v62 }
0x34f8   :  { %v9589_v4 = vmul.f32 1.442695, %v9588_v63 }
0x34f9   :  { %15098 = vpow2.f32 %v9423_v0 }
0x34fa   :  { %15100 = vpow2.f32 %v9589_v4 }
0x34fc   :  { %v9753_v3 = vpop.xlane.xlu0 %9752 }
0x34fd   :  { %v9754_v16 = vsub.f32 %v17052_v35, %v9753_v3 }
0x34ff   :  { %v9755_v18 = vmul.f32 1.442695, %v9754_v16 }
0x3500   :  { %v9919_v2 = vpop.xlane.xlu0 %9918 }
0x3501   :  { %v9920_v61 = vsub.f32 %v9916_v30, %v9919_v2 }
0x3503   :  { %v9921_v53 = vmul.f32 1.442695, %v9920_v61 }
0x3504   :  { %v10099_v17 = vpop.xlane.xlu0 %10098 }
0x3505   :  { %15102 = vpow2.f32 %v9921_v53  ;;  %v10100_v19 = vsub.f32 %v10096_v45, %v10099_v17 }
0x3506   :  { %v15099_v54 = vpop.eup %15098  ;;  %15104 = vpow2.f32 %v9755_v18 }
0x3507   :  { %v17069_v10 = vpop.eup %15100  ;;  %v9425_v12 = vsel %vm219_vm2, %v15099_v54, 0.0  ;;  %v10101_v20 = vmul.f32 1.442695, %v10100_v19 }
0x3508   :  { %v10265_v29 = vpop.xlane.xlu1 %10264  ;;  %9426 = vadd.xlane.f32.xlu0 %v9425_v12  ;;  %v9591_v11 = vsel %vm219_vm2, %v17069_v10, 0.0  ;;  %v15264_v12 = vld [vmem:[%s17558_s11 + $0x58] sm:$0xff] }
0x3509   :  { %9592 = vadd.xlane.f32.xlu1 %v9591_v11  ;;  %15106 = vpow2.f32 %v10101_v20  ;;  %v10266_v22 = vsub.f32 %v10262_v51, %v10265_v29  ;;  %v15265_v29 = vld [vmem:[%s17558_s11 + $0x50] sm:$0xff]  ;;  %v15266_v11 = vld [vmem:[%s17558_s11 + $0x48] sm:$0xff] }
0x350b   :  { %v10267_v26 = vmul.f32 1.442695, %v10266_v22 }
0x350c   :  { %v9431_v13 = vpop.permute.xlu1 %9430  ;;  %v10431_v37 = vpop.xlane.xlu0 %10430 }
0x350d   :  { %14585 = vmatpush3.msra.mxu1 %v9431_v13  ;;  %v10432_v21 = vsub.f32 %v10428_v48, %v10431_v37  ;;  %v15267_v13 = vld [vmem:[%s17558_s11 + $0x40] sm:$0xff] }
0x350e   :  { %14594 = vmatprep.subr.mxu1 %v15282_v34 }
0x350f   :  { %v10433_v39 = vmul.f32 1.442695, %v10432_v21 }
0x3511   :  { %15108 = vpow2.f32 %v10433_v39 }
0x3512   :  { %v17075_v14 = vpop.eup %15102  ;;  %15110 = vpow2.f32 %v10267_v26 }
0x3513   :  { %v9923_v15 = vsel %vm219_vm2, %v17075_v14, 0.0  ;;  %v15105_v5 = vpop.eup %15104 }
0x3514   :  { %9924 = vadd.xlane.f32.xlu1 %v9923_v15 }
0x3516   :  { %v17085_v27 = vpop.eup %15106 }
0x3517   :  { %v10103_v25 = vsel %vm219_vm2, %v17085_v27, 0.0 }
0x351e   :  { %9596 = vrot.lane.b32.xlu0 %v16961_v6, %s17682_s4  ;;  %v9757_v6 = vsel %vm219_vm2, %v15105_v5, 0.0  ;;  %v17089_v24 = vpop.eup %15108 }
0x351f   :  { %v10435_v35 = vsel %vm219_vm2, %v17089_v24, 0.0  ;;  %v15111_v36 = vpop.eup %15110 }
0x3520   :  { %v10269_v40 = vsel %vm219_vm2, %v15111_v36, 0.0 }
0x3525   :  { %10274 = vrot.lane.b32.xlu1 %v16975_v7, %s17682_s4 }
0x353d   :  { %v10597_v28 = vpop.xlane.xlu1 %10596  ;;  %9758 = vadd.xlane.f32.xlu0 %v9757_v6 }
0x353e   :  { %v10598_v56 = vsub.f32 %v10594_v55, %v10597_v28 }
0x3540   :  { %v10599_v32 = vmul.f32 1.442695, %v10598_v56 }
0x3541   :  { %10104 = vadd.xlane.f32.xlu0 %v10103_v25  ;;  %v9763_v41 = vpop.permute.xlu1 %9762 }
0x3542   :  { %15112 = vpow2.f32 %v10599_v32 }
0x3545   :  { %10436 = vadd.xlane.f32.xlu0 %v10435_v35  ;;  %v9929_v42 = vpop.permute.xlu1 %9928 }
0x3549   :  { %10270 = vadd.xlane.f32.xlu1 %v10269_v40  ;;  %v10109_v44 = vpop.permute.xlu1 %10108 }
0x354f   :  { %v17094_v33 = vpop.eup %15112 }
0x3550   :  { %v10601_v30 = vsel %vm219_vm2, %v17094_v33, 0.0 }
0x3551   :  { %10602 = vadd.xlane.f32.xlu0 %v10601_v30 }
0x355a   :  { %10606 = vrot.lane.b32.xlu1 %v16975_v7, %s17675_s14 }
0x3567   :  { %10440 = vrot.lane.b32.xlu0 %v16975_v7, %s17668_s5 }
0x3591   :  { %v9427_v45 = vpop.xlane.xlu0 %9426 }
0x3592   :  { %15114 = vrcp.f32 %v9427_v45  ;;  %v9593_v46 = vpop.xlane.xlu1 %9592  ;;  %v15268_v45 = vld [vmem:[%s17561_s13 + $0xb0] sm:$0xff] }
0x3593   :  { %15116 = vrcp.f32 %v9593_v46  ;;  %v15269_v46 = vld [vmem:[%s17561_s13 + $0xa8] sm:$0xff] }
0x3595   :  { %v9597_v52 = vpop.permute.xlu0 %9596 }
0x359d   :  { %v9925_v7 = vpop.xlane.xlu1 %9924 }
0x359f   :  { %v15115_v47 = vpop.eup %15114 }
0x35a0   :  { %v9429_v50 = vmul.f32 %v15115_v47, %v15099_v54  ;;  %v15117_v51 = vpop.eup %15116  ;;  %v15270_v47 = vld [vmem:[%s17561_s13 + $0xa0] sm:$0xff] }
0x35a1   :  { %v9595_v43 = vmul.f32 %v15117_v51, %v17069_v10  ;;  %v10275_v57 = vpop.permute.xlu1 %10274  ;;  %v15273_v51 = vld [vmem:[%s17561_s13 + $0x88] sm:$0xff] }
0x35a2   :  { %14587 = vmatmul.mubr.msk.f32.vlgmr.msra.gmra.mxu1 %vm219_vm2, %v9429_v50  ;;  %v15272_v50 = vld [vmem:[%s17561_s13 + $0x90] sm:$0xff] }
0x35a3   :  { %14595 = vmatpush3.msra.mxu1 %v9597_v52  ;;  %14596 = vmatprep.mubr.msk.f32.mxu1 %vm15283_vm1, %v15282_v34  ;;  %v15274_v52 = vld [vmem:[%s17561_s13 + $0x80] sm:$0xff] }
0x35a4   :  { %14604 = vmatprep.subr.mxu1 %v15282_v34 }
0x35a6   :  { %14597 = vmatmul.mubr.msk.f32.vlgmr.msra.gmra.mxu1 %vm219_vm2, %v9595_v43 }
0x35a7   :  { %14605 = vmatpush3.msra.mxu1 %v9763_v41  ;;  %14606 = vmatprep.mubr.msk.f32.mxu1 %vm15283_vm1, %v15282_v34 }
0x35a8   :  { %14614 = vmatprep.subr.mxu1 %v15282_v34 }
0x35c6   :  { %v9759_v49 = vpop.xlane.xlu0 %9758 }
0x35c7   :  { %15118 = vrcp.f32 %v9759_v49 }
0x35c8   :  { %15120 = vrcp.f32 %v9925_v7  ;;  %v15275_v7 = vld [vmem:[%s17677_s2 + $0x2] ss:$0 sm:$0xff] }
0x35ca   :  { %v10105_v48 = vpop.xlane.xlu0 %10104 }
0x35cb   :  { %15122 = vrcp.f32 %v10105_v48 }
0x35ce   :  { %v10437_v31 = vpop.xlane.xlu0 %10436 }
0x35d2   :  { %v10271_v9 = vpop.xlane.xlu1 %10270 }
0x35d3   :  { %15124 = vrcp.f32 %v10271_v9 }
0x35d4   :  { %v15119_v58 = vpop.eup %15118  ;;  %15126 = vrcp.f32 %v10437_v31 }
0x35d5   :  { %v9761_v55 = vmul.f32 %v15119_v58, %v15105_v5  ;;  %v15121_v59 = vpop.eup %15120 }
0x35d6   :  { %v9927_v60 = vmul.f32 %v15121_v59, %v17075_v14  ;;  %v10607_v53 = vpop.permute.xlu1 %10606 }
0x35d7   :  { %14607 = vmatmul.mubr.msk.f32.vlgmr.msra.gmra.mxu1 %vm219_vm2, %v9761_v55 }
0x35d8   :  { %14615 = vmatpush3.msra.mxu1 %v9929_v42  ;;  %14616 = vmatprep.mubr.msk.f32.mxu1 %vm15283_vm1, %v15282_v34  ;;  %v15123_v62 = vpop.eup %15122 }
0x35d9   :  { %14624 = vmatprep.subr.mxu1 %v15282_v34  ;;  %v10107_v63 = vmul.f32 %v15123_v62, %v17085_v27 }
0x35da   :  { %v10603_v8 = vpop.xlane.xlu0 %10602 }
0x35db   :  { %15128 = vrcp.f32 %v10603_v8  ;;  %14617 = vmatmul.mubr.msk.f32.vlgmr.msra.gmra.mxu1 %vm219_vm2, %v9927_v60 }
0x35dc   :  { %14625 = vmatpush3.msra.mxu1 %v10109_v44  ;;  %14626 = vmatprep.mubr.msk.f32.mxu1 %vm15283_vm1, %v15282_v34 }
0x35dd   :  { %14634 = vmatprep.subr.mxu1 %v15282_v34 }
0x35de   :  { %v10441_v2 = vpop.permute.xlu0 %10440 }
0x35df   :  { %14627 = vmatmul.mubr.msk.f32.vlgmr.msra.gmra.mxu1 %vm219_vm2, %v10107_v63 }
0x35e0   :  { %v15125_v0 = vpop.eup %15124  ;;  %14635 = vmatpush3.msra.mxu1 %v10275_v57  ;;  %14636 = vmatprep.mubr.msk.f32.mxu1 %vm15283_vm1, %v15282_v34 }
0x35e1   :  { %v10273_v4 = vmul.f32 %v15125_v0, %v15111_v36  ;;  %14644 = vmatprep.subr.mxu1 %v15282_v34  ;;  %v15127_v3 = vpop.eup %15126 }
0x35e2   :  { %v10439_v61 = vmul.f32 %v15127_v3, %v17089_v24 }
0x35e3   :  { %14637 = vmatmul.mubr.msk.f32.vlgmr.msra.gmra.mxu1 %vm219_vm2, %v10273_v4 }
0x35e4   :  { %14645 = vmatpush3.msra.mxu1 %v10441_v2  ;;  %14646 = vmatprep.mubr.msk.f32.mxu1 %vm15283_vm1, %v15282_v34 }
0x35e5   :  { %14654 = vmatprep.subr.mxu1 %v15282_v34 }
0x35e7   :  { %14647 = vmatmul.mubr.msk.f32.vlgmr.msra.gmra.mxu1 %vm219_vm2, %v10439_v61 }
0x35e8   :  { %v15129_v54 = vpop.eup %15128  ;;  %14655 = vmatpush3.msra.mxu1 %v10607_v53  ;;  %14656 = vmatprep.mubr.msk.f32.mxu1 %vm15283_vm1, %v15282_v34 }
0x35e9   :  { %v10605_v10 = vmul.f32 %v15129_v54, %v17094_v33  ;;  %14670 = vmatprep.subr.mxu1 %v15264_v12 }
0x35eb   :  { %14657 = vmatmul.mubr.msk.f32.vlgmr.msra.gmra.mxu1 %vm219_vm2, %v10605_v10 }
0x35ec   :  { %14671 = vmatpush3.msra.mxu1 %v15264_v12 }
0x35ed   :  { %14672 = vmatprep.subr.mxu1 %v15265_v29 }
0x35ee   :  { %14673 = vmatpush3.msra.mxu1 %v15265_v29 }
0x35ef   :  { %14674 = vmatprep.subr.mxu1 %v15266_v11 }
0x35f0   :  { %14675 = vmatpush3.msra.mxu1 %v15266_v11 }
0x35f1   :  { %14676 = vmatprep.subr.mxu1 %v15267_v13 }
0x35f2   :  { %14677 = vmatpush3.msra.mxu1 %v15267_v13  ;;  %v15276_v13 = vld [vmem:[%s17559_s9 + $0x2] ss:$0 sm:$0xff] }
0x3662   :  { %v9502_v14 = vpop.f32.mrf.mxu1 }
0x3664   :  { %v14588_v15 = vpop.f32.mrf.mxu1 }
0x3666   :  { %v9668_v16 = vpop.f32.mrf.mxu1 }
0x3667   :  { %10005 = vrot.lane.b32.xlu0 %v9668_v16, %s17666_s21 }
0x3668   :  { %v14598_v17 = vpop.f32.mrf.mxu1 }
0x3669   :  { %v15277_v17 = vld [vmem:[%s17560_s10 + $0x2] ss:$0 sm:$0xff] }
0x3697   :  { %v9834_v18 = vpop.f32.mrf.mxu1 }
0x3698   :  { %10009 = vrot.lane.b32.xlu1 %v9834_v18, %s17653_s8 }
0x3699   :  { %v14608_v19 = vpop.f32.mrf.mxu1 }
0x369b   :  { %v10000_v37 = vpop.f32.mrf.mxu1 }
0x369c   :  { %10013 = vrot.lane.b32.xlu1 %v10000_v37, %s17667_s17 }
0x369d   :  { %v14618_v20 = vpop.f32.mrf.mxu1 }
0x369f   :  { %v10180_v21 = vpop.f32.mrf.mxu1 }
0x36a1   :  { %v14628_v22 = vpop.f32.mrf.mxu1 }
0x36a3   :  { %v10346_v39 = vpop.f32.mrf.mxu1 }
0x36a4   :  { %10683 = vrot.lane.b32.xlu0 %v10346_v39, %s17666_s21 }
0x36a5   :  { %v14638_v26 = vpop.f32.mrf.mxu1 }
0x36a7   :  { %v10512_v5 = vpop.f32.mrf.mxu1 }
0x36a8   :  { %10687 = vrot.lane.b32.xlu0 %v10512_v5, %s17653_s8 }
0x36a9   :  { %v14648_v6 = vpop.f32.mrf.mxu1 }
0x36ab   :  { %v10678_v27 = vpop.f32.mrf.mxu1 }
0x36ac   :  { %10691 = vrot.lane.b32.xlu1 %v10678_v27, %s17667_s17 }
0x36ad   :  { %v14658_v28 = vpop.f32.mrf.mxu1 }
0x36d9   :  { %v10006_v56 = vpop.permute.xlu0 %10005 }
0x36da   :  { %v10016_v25 = vsel %vm219_vm2, %v9502_v14, %v10006_v56 }
0x370a   :  { %v10010_v32 = vpop.permute.xlu1 %10009 }
0x370b   :  { %v10017_v24 = vsel %vm903_vm3, %v10016_v25, %v10010_v32 }
0x370e   :  { %v10014_v35 = vpop.permute.xlu1 %10013 }
0x370f   :  { %v10018_v36 = vsel %vm905_vm4, %v10017_v24, %v10014_v35 }
0x3710   :  { %14667 = vmatprep.mubr.msk.f32.mxu0 %vm80_vm0, %v10018_v36 }
0x3716   :  { %v10684_v40 = vpop.permute.xlu0 %10683 }
0x3717   :  { %v10694_v30 = vsel %vm219_vm2, %v10180_v21, %v10684_v40  ;;  %v15278_v21 = vld [vmem:[%s17562_s12 + $0x2] ss:$0 sm:$0xff] }
0x371a   :  { %v10688_v33 = vpop.permute.xlu0 %10687 }
0x371b   :  { %v10695_v41 = vsel %vm903_vm3, %v10694_v30, %v10688_v33 }
0x371e   :  { %v10692_v42 = vpop.permute.xlu1 %10691 }
0x371f   :  { %v10696_v44 = vsel %vm905_vm4, %v10695_v41, %v10692_v42 }
0x3720   :  { %14668 = vmatmul.mubr.msk.f32.vlgmr.msra.gmra.mxu0 %vm80_vm0, %v10696_v44 }
0x3721   :  { %14682 = vmatpush3.msra.mxu0 %v17047_v23  ;;  %v15271_v23 = vld [vmem:[%s17561_s13 + $0x98] sm:$0xff] }
0x3722   :  { %14683 = vmatprep.subr.mxu0 %v15268_v45 }
0x3723   :  { %14684 = vmatpush3.msra.mxu0 %v15268_v45 }
0x3724   :  { %14685 = vmatprep.subr.mxu0 %v15269_v46 }
0x3725   :  { %14686 = vmatpush3.msra.mxu0 %v15269_v46 }
0x3726   :  { %14687 = vmatprep.subr.mxu0 %v15270_v47 }
0x3727   :  { %14688 = vmatpush3.msra.mxu0 %v15270_v47 }
0x3728   :  { %14689 = vmatprep.subr.mxu0 %v15271_v23 }
0x3729   :  { %14690 = vmatpush3.msra.mxu0 %v15271_v23  ;;  %v15279_v23 = vld [vmem:[%s17678_s19 + $0x2] ss:$0 sm:$0xff] }
0x372a   :  { %14691 = vmatprep.subr.mxu0 %v15272_v50 }
0x372b   :  { %14692 = vmatpush3.msra.mxu0 %v15272_v50 }
0x372c   :  { %14693 = vmatprep.subr.mxu0 %v15273_v51 }
0x372d   :  { %14694 = vmatpush3.msra.mxu0 %v15273_v51 }
0x372e   :  { %14695 = vmatprep.subr.mxu0 %v15274_v52 }
0x372f   :  { %14696 = vmatpush3.msra.mxu0 %v15274_v52 }
0x3730   :  { %14721 = vmatprep.subr.mxu0 %v15282_v34 }
0x37e0   :  { %v14669_v43 = vpop.f32.mrf.mxu0 }
0x37e1   :  { %v10775_v49 = vadd.f32 %v15275_v7, %v14669_v43 }
0x37e2   :  { %v10769_v48 = vpop.f32.mrf.mxu0 }
0x37e3   :  { %v10779_v57 = vadd.f32 %v10775_v49, %v16950_v38  ;;  %v10770_v31 = vadd.f32 %v15275_v7, %v10769_v48 }
0x37e5   :  { %v10778_v9 = vadd.f32 %v10770_v31, %v16948_v1  ;;  %v10783_v58 = vsel %vm80_vm0, %v10779_v57, 0.0 }
0x37e6   :  { %10784 = vadd.xlane.f32.xlu1 %v10783_v58 }
0x37e7   :  { %v10780_v55 = vsel %vm80_vm0, %v10778_v9, 0.0 }
0x37e8   :  { %10781 = vadd.xlane.f32.xlu0 %v10780_v55 }
0x386f   :  { %v10785_v59 = vpop.xlane.xlu1 %10784 }
0x3870   :  { %v10787_v60 = vmul.f32 0.03125, %v10785_v59 }
0x3871   :  { %v10782_v62 = vpop.xlane.xlu0 %10781 }
0x3872   :  { %v10786_v8 = vmul.f32 0.03125, %v10782_v62  ;;  %v10789_v63 = vsub.f32 %v10779_v57, %v10787_v60 }
0x3874   :  { %v10788_v0 = vsub.f32 %v10778_v9, %v10786_v8  ;;  %v10791_v2 = vmul.f32 %v10789_v63, %v10789_v63 }
0x3876   :  { %v10790_v4 = vmul.f32 %v10788_v0, %v10788_v0  ;;  %v10795_v38 = vsel %vm80_vm0, %v10791_v2, 0.0  ;;  %v13400_v2 = vld [vmem:[%s17647_s3 + $0x60] sm:$0xff] }
0x3878   :  { %v10792_v3 = vsel %vm80_vm0, %v10790_v4, 0.0  ;;  %v13402_v4 = vld [vmem:[%s17647_s3 + $0x70] sm:$0xff] }
0x3879   :  { %10793 = vadd.xlane.f32.xlu0 %v10792_v3  ;;  %v13401_v3 = vld [vmem:[%s17647_s3 + $0x68] sm:$0xff] }
0x387d   :  { %10796 = vadd.xlane.f32.xlu0 %v10795_v38 }
0x3902   :  { %v10794_v1 = vpop.xlane.xlu0 %10793 }
0x3903   :  { %v10798_v61 = vmul.f32 0.03125, %v10794_v1 }
0x3905   :  { %v10800_v53 = vadd.f32 1e-12, %v10798_v61 }
0x3906   :  { %v10797_v54 = vpop.xlane.xlu0 %10796 }
0x3907   :  { %15130 = vrsqrt.f32 %v10800_v53  ;;  %v10799_v10 = vmul.f32 0.03125, %v10797_v54 }
0x3909   :  { %v10801_v12 = vadd.f32 1e-12, %v10799_v10 }
0x390b   :  { %15132 = vrsqrt.f32 %v10801_v12 }
0x3914   :  { %v15131_v29 = vpop.eup %15130 }
0x3915   :  { %v10804_v11 = vmul.f32 %v15131_v29, %v10788_v0  ;;  %v13403_v0 = vld [vmem:[%s17647_s3 + $0x78] sm:$0xff]  ;;  %s17686_s3 = sld [smem:[#allocation12_spill]] }
0x3916   :  { %14700 = vmatprep.subr.mxu1 %v13403_v0 }
0x3917   :  { %v10806_v14 = vmul.f32 %v15276_v13, %v10804_v11 }
0x3918   :  { %v15133_v15 = vpop.eup %15132 }
0x3919   :  { %v10805_v16 = vmul.f32 %v15133_v15, %v10789_v63  ;;  %v10808_v18 = vadd.f32 %v15277_v17, %v10806_v14  ;;  %v15280_v14 = vld [vmem:[%s17564_s15 + $0x2] ss:$0 sm:$0xff] }
0x391b   :  { %v10807_v19 = vmul.f32 %v15276_v13, %v10805_v16  ;;  %14678 = vmatprep.mubr.msk.f32.mxu1 %vm80_vm0, %v10808_v18 }
0x391d   :  { %v10809_v37 = vadd.f32 %v15277_v17, %v10807_v19  ;;  %v15281_v17 = vld [vmem:[%s17565_s16 + $0x2] ss:$0 sm:$0xff] }
0x391f   :  { %14679 = vmatmul.mubr.msk.f32.vlgmr.msra.gmra.mxu1 %vm80_vm0, %v10809_v37 }
0x3920   :  { %14701 = vmatpush3.msra.mxu1 %v13403_v0 }
0x3921   :  { %14702 = vmatprep.subr.mxu1 %v13402_v4 }
0x3922   :  { %14703 = vmatpush3.msra.mxu1 %v13402_v4 }
0x3923   :  { %14704 = vmatprep.subr.mxu1 %v13401_v3 }
0x3924   :  { %14705 = vmatpush3.msra.mxu1 %v13401_v3 }
0x3925   :  { %14706 = vmatprep.subr.mxu1 %v13400_v2 }
0x3926   :  { %14707 = vmatpush3.msra.mxu1 %v13400_v2 }
0x3927   :  { %14711 = vmatprep.subr.mxu1 %v15282_v34 }
0x39df   :  { %v14680_v20 = vpop.f32.mrf.mxu1 }
0x39e0   :  { %v10888_v22 = vadd.f32 %v15278_v21, %v14680_v20  ;;  %v13405_v20 = vld [vmem:[%s17650_s7 + $0x3] ss:$0 sm:$0xff]  ;;  %s17684_s7 = smov 72  }
0x39e1   :  { %v10882_v39 = vpop.f32.mrf.mxu1 }
0x39e2   :  { %v10892_v26 = vmul.f32 %v10888_v22, %v10888_v22  ;;  %v10883_v5 = vadd.f32 %v15278_v21, %v10882_v39 }
0x39e4   :  { %v10894_v6 = vmul.f32 %v10892_v26, %v10888_v22  ;;  %v10891_v27 = vmul.f32 %v10883_v5, %v10883_v5 }
0x39e6   :  { %v10896_v28 = vmul.f32 0.044715, %v10894_v6  ;;  %v10893_v56 = vmul.f32 %v10891_v27, %v10883_v5 }
0x39e8   :  { %v10898_v32 = vadd.f32 %v10896_v28, %v10888_v22  ;;  %v10895_v25 = vmul.f32 0.044715, %v10893_v56 }
0x39ea   :  { %v10900_v24 = vmul.f32 0.7978846, %v10898_v32  ;;  %v10897_v35 = vadd.f32 %v10895_v25, %v10883_v5 }
0x39ec   :  { %15134 = vtanh.f32 %v10900_v24  ;;  %v10899_v36 = vmul.f32 0.7978846, %v10897_v35 }
0x39ee   :  { %15136 = vtanh.f32 %v10899_v36 }
0x39f9   :  { %v15135_v40 = vpop.eup %15134 }
0x39fa   :  { %v10904_v33 = vadd.f32 1.0, %v15135_v40 }
0x39fb   :  { %v15137_v30 = vpop.eup %15136 }
0x39fc   :  { %v10903_v41 = vadd.f32 1.0, %v15137_v30  ;;  %v10906_v42 = vmul.f32 0.5, %v10904_v33 }
0x39fe   :  { %v10905_v44 = vmul.f32 0.5, %v10903_v41  ;;  %v10908_v46 = vmul.f32 %v10906_v42, %v10888_v22 }
0x3a00   :  { %v10907_v45 = vmul.f32 %v10905_v44, %v10883_v5 }
0x3a02   :  { %14697 = vmatprep.mubr.msk.f32.mxu0 %vm1858_vm5, %v10907_v45 }
0x3a03   :  { %14698 = vmatmul.mubr.msk.f32.vlgmr.msra.gmra.mxu0 %vm1858_vm5, %v10908_v46 }
0x3a04   :  { %14723 = vmatprep.mubr.msk.f32.mxu0 %vm15283_vm1, %v15282_v34 }
0x3ac3   :  { %v14699_v47 = vpop.f32.mrf.mxu0 }
0x3ac4   :  { %v10987_v50 = vadd.f32 %v15279_v23, %v14699_v47 }
0x3ac5   :  { %v10981_v51 = vpop.f32.mrf.mxu0 }
0x3ac6   :  { %v10991_v52 = vadd.f32 %v10987_v50, %v10809_v37  ;;  %v10982_v43 = vadd.f32 %v15279_v23, %v10981_v51 }
0x3ac8   :  { %v10990_v7 = vadd.f32 %v10982_v43, %v10808_v18  ;;  %v10995_v49 = vsel %vm80_vm0, %v10991_v52, 0.0 }
0x3ac9   :  { %10996 = vadd.xlane.f32.xlu1 %v10995_v49 }
0x3aca   :  { %v10992_v48 = vsel %vm80_vm0, %v10990_v7, 0.0 }
0x3acb   :  { %10993 = vadd.xlane.f32.xlu0 %v10992_v48 }
0x3b52   :  { %v10997_v57 = vpop.xlane.xlu1 %10996 }
0x3b53   :  { %v10999_v31 = vmul.f32 0.03125, %v10997_v57 }
0x3b54   :  { %v10994_v9 = vpop.xlane.xlu0 %10993 }
0x3b55   :  { %v11001_v58 = vsub.f32 %v10991_v52, %v10999_v31  ;;  %v10998_v55 = vmul.f32 0.03125, %v10994_v9 }
0x3b57   :  { %v11000_v59 = vsub.f32 %v10990_v7, %v10998_v55  ;;  %v11003_v60 = vmul.f32 %v11001_v58, %v11001_v58 }
0x3b59   :  { %v11007_v62 = vsel %vm80_vm0, %v11003_v60, 0.0  ;;  %v11002_v8 = vmul.f32 %v11000_v59, %v11000_v59 }
0x3b5a   :  { %11008 = vadd.xlane.f32.xlu1 %v11007_v62 }
0x3b5b   :  { %v11004_v63 = vsel %vm80_vm0, %v11002_v8, 0.0 }
0x3b5c   :  { %11005 = vadd.xlane.f32.xlu0 %v11004_v63 }
0x3be3   :  { %v11009_v38 = vpop.xlane.xlu1 %11008 }
0x3be4   :  { %v11011_v1 = vmul.f32 0.03125, %v11009_v38 }
0x3be5   :  { %v11006_v61 = vpop.xlane.xlu0 %11005 }
0x3be6   :  { %v11013_v53 = vadd.f32 1e-12, %v11011_v1  ;;  %v11010_v54 = vmul.f32 0.03125, %v11006_v61 }
0x3be8   :  { %15138 = vrsqrt.f32 %v11013_v53  ;;  %v11012_v10 = vadd.f32 1e-12, %v11010_v54 }
0x3bea   :  { %15140 = vrsqrt.f32 %v11012_v10 }
0x3bf5   :  { %v15139_v12 = vpop.eup %15138 }
0x3bf6   :  { %v11017_v29 = vmul.f32 %v15139_v12, %v11001_v58 }
0x3bf7   :  { %v15141_v11 = vpop.eup %15140 }
0x3bf8   :  { %v11016_v13 = vmul.f32 %v15141_v11, %v11000_v59  ;;  %v11019_v15 = vmul.f32 %v15280_v14, %v11017_v29 }
0x3bfa   :  { %v11018_v16 = vmul.f32 %v15280_v14, %v11016_v13  ;;  %v17236_v19 = vadd.f32 %v15281_v17, %v11019_v15 }
0x3bfc   :  { %v17234_v18 = vadd.f32 %v15281_v17, %v11018_v16 }
0x3bfe   :  { %14708 = vmatprep.mubr.msk.f32.mxu1 %vm80_vm0, %v17234_v18 }
0x3bff   :  { %14709 = vmatmul.mubr.msk.f32.vlgmr.msra.gmra.mxu1 %vm80_vm0, %v17236_v19 }
0x3c00   :  { %14713 = vmatprep.mubr.msk.f32.mxu1 %vm15283_vm1, %v15282_v34 }
0x3cbf   :  { %v14710_v37 = vpop.f32.mrf.mxu1 }
0x3cc0   :  { %v17261_v39 = vadd.f32 %v14710_v37, %v13405_v20 }
0x3cc1   :  { %v11107_v21 = vpop.f32.mrf.mxu1 }
0x3cc2   :  { %v17247_v22 = vadd.f32 %v13405_v20, %v11107_v21 }
0x3cc4   :  { %11283 = vrot.lane.b32.xlu1 %v17247_v22, %s17655_s28  ;;  %11117 = vrot.lane.b32.xlu0 %v17247_v22, %s17656_s29 }
0x3cc8   :  { %11281 = vrot.lane.b32.xlu1 %v17247_v22, %s17657_s27  ;;  %11447 = vrot.lane.b32.xlu0 %v17247_v22, %s17658_s26 }
0x3ccc   :  { %11449 = vrot.lane.b32.xlu1 %v17247_v22, %s17659_s24  ;;  %11613 = vrot.lane.b32.xlu0 %v17247_v22, %s17683_s18 }
0x3cd0   :  { %11615 = vrot.lane.b32.xlu1 %v17247_v22, %s17684_s7  ;;  %11961 = vrot.lane.b32.xlu0 %v17261_v39, %s17655_s28 }
0x3cd4   :  { %11795 = vrot.lane.b32.xlu1 %v17261_v39, %s17656_s29  ;;  %12127 = vrot.lane.b32.xlu0 %v17261_v39, %s17659_s24  ;;  %s17688_s24 = sld [smem:[#allocation14_spill]] }
0x3cd8   :  { %11959 = vrot.lane.b32.xlu1 %v17261_v39, %s17657_s27  ;;  %12293 = vrot.lane.b32.xlu0 %v17261_v39, %s17684_s7  ;;  %s17685_s27 = sld [smem:[#allocation8_spill]] }
0x3cdc   :  { %12125 = vrot.lane.b32.xlu1 %v17261_v39, %s17658_s26  ;;  %s17687_s26 = sld [smem:[#allocation13_spill]] }
0x3ce0   :  { %12291 = vrot.lane.b32.xlu1 %v17261_v39, %s17683_s18 }
0x3d36   :  { %v11284_v26 = vpop.permute.xlu1 %11283  ;;  %v11118_v5 = vpop.permute.xlu0 %11117 }
0x3d37   :  { %14712 = vmatpush3.xpose.msk.msra.mxu1 %vm219_vm2, %v11118_v5  ;;  %14722 = vmatpush3.xpose.msk.msra.mxu0 %vm219_vm2, %v11284_v26 }
0x3d38   :  { %14731 = vmatprep.subr.mxu0 %v15282_v34  ;;  %14716 = vmatprep.subr.mxu1 %v15282_v34 }
0x3d3a   :  { %v11282_v6 = vpop.permute.xlu1 %11281  ;;  %14714 = vmatmul.mubr.msk.f32.vlgmr.msra.gmra.mxu1 %vm219_vm2, %v17247_v22  ;;  %v11448_v27 = vpop.permute.xlu0 %11447 }
0x3d3b   :  { %14724 = vmatmul.mubr.msk.f32.vlgmr.msra.gmra.mxu0 %vm219_vm2, %v11282_v6  ;;  %14718 = vmatprep.mubr.msk.f32.mxu1 %vm15283_vm1, %v15282_v34 }
0x3d3c   :  { %14733 = vmatprep.mubr.msk.f32.mxu0 %vm15283_vm1, %v15282_v34 }
0x3d3e   :  { %v11450_v28 = vpop.permute.xlu1 %11449  ;;  %v11614_v56 = vpop.permute.xlu0 %11613 }
0x3d3f   :  { %14732 = vmatpush3.xpose.msk.msra.mxu0 %vm219_vm2, %v11450_v28 }
0x3d40   :  { %14741 = vmatprep.subr.mxu0 %v15282_v34 }
0x3d42   :  { %v11616_v32 = vpop.permute.xlu1 %11615  ;;  %14734 = vmatmul.mubr.msk.f32.vlgmr.msra.gmra.mxu0 %vm219_vm2, %v11448_v27  ;;  %v11962_v25 = vpop.permute.xlu0 %11961 }
0x3d43   :  { %14742 = vmatpush3.xpose.msk.msra.mxu0 %vm219_vm2, %v11616_v32  ;;  %14743 = vmatprep.mubr.msk.f32.mxu0 %vm15283_vm1, %v15282_v34 }
0x3d44   :  { %14751 = vmatprep.subr.mxu0 %v15282_v34 }
0x3d46   :  { %v11796_v24 = vpop.permute.xlu1 %11795  ;;  %14744 = vmatmul.mubr.msk.f32.vlgmr.msra.gmra.mxu0 %vm219_vm2, %v11614_v56  ;;  %v12128_v36 = vpop.permute.xlu0 %12127 }
0x3d47   :  { %14752 = vmatpush3.xpose.msk.msra.mxu0 %vm219_vm2, %v11796_v24  ;;  %14753 = vmatprep.mubr.msk.f32.mxu0 %vm15283_vm1, %v15282_v34 }
0x3d48   :  { %14761 = vmatprep.subr.mxu0 %v15282_v34 }
0x3d4a   :  { %v11960_v35 = vpop.permute.xlu1 %11959  ;;  %14754 = vmatmul.mubr.msk.f32.vlgmr.msra.gmra.mxu0 %vm219_vm2, %v17261_v39  ;;  %v12294_v33 = vpop.permute.xlu0 %12293 }
0x3d4b   :  { %14762 = vmatpush3.xpose.msk.msra.mxu0 %vm219_vm2, %v11962_v25  ;;  %14763 = vmatprep.mubr.msk.f32.mxu0 %vm15283_vm1, %v15282_v34 }
0x3d4c   :  { %14771 = vmatprep.subr.mxu0 %v15282_v34 }
0x3d4e   :  { %14764 = vmatmul.mubr.msk.f32.vlgmr.msra.gmra.mxu0 %vm219_vm2, %v11960_v35  ;;  %v12126_v40 = vpop.permute.xlu1 %12125 }
0x3d4f   :  { %14772 = vmatpush3.xpose.msk.msra.mxu0 %vm219_vm2, %v12128_v36  ;;  %14773 = vmatprep.mubr.msk.f32.mxu0 %vm15283_vm1, %v15282_v34 }
0x3d50   :  { %14781 = vmatprep.subr.mxu0 %v15282_v34 }
0x3d52   :  { %14774 = vmatmul.mubr.msk.f32.vlgmr.msra.gmra.mxu0 %vm219_vm2, %v12126_v40  ;;  %v12292_v30 = vpop.permute.xlu1 %12291 }
0x3d53   :  { %14782 = vmatpush3.xpose.msk.msra.mxu0 %vm219_vm2, %v12294_v33  ;;  %14783 = vmatprep.mubr.msk.f32.mxu0 %vm15283_vm1, %v15282_v34 }
0x3d56   :  { %14784 = vmatmul.mubr.msk.f32.vlgmr.msra.gmra.mxu0 %vm219_vm2, %v12292_v30 }
0x3dfa   :  { %v11189_v41 = vpop.f32.mrf.mxu1 }
0x3dfb   :  { %v11193_v42 = vmul.f32 0.35355338, %v11189_v41  ;;  %v11355_v44 = vpop.f32.mrf.mxu0 }
0x3dfc   :  { %v11359_v45 = vmul.f32 0.35355338, %v11355_v44  ;;  %v14715_v46 = vpop.f32.mrf.mxu1 }
0x3dfd   :  { %v14725_v47 = vpop.f32.mrf.mxu0  ;;  %v11194_v23 = vsel %vm219_vm2, %v11193_v42, -inf }
0x3dfe   :  { %11195 = vmax.xlane.f32.xlu0 %v11194_v23  ;;  %v11360_v50 = vsel %vm219_vm2, %v11359_v45, -inf }
0x3dff   :  { %11361 = vmax.xlane.f32.xlu1 %v11360_v50 }
0x3e02   :  { %v11521_v51 = vpop.f32.mrf.mxu0 }
0x3e03   :  { %v17320_v52 = vmul.f32 0.35355338, %v11521_v51 }
0x3e04   :  { %v14735_v43 = vpop.f32.mrf.mxu0 }
0x3e05   :  { %v11526_v7 = vsel %vm219_vm2, %v17320_v52, -inf }
0x3e06   :  { %11527 = vmax.xlane.f32.xlu0 %v11526_v7  ;;  %v11687_v49 = vpop.f32.mrf.mxu0 }
0x3e07   :  { %v11691_v48 = vmul.f32 0.35355338, %v11687_v49 }
0x3e08   :  { %v14745_v57 = vpop.f32.mrf.mxu0 }
0x3e09   :  { %v11692_v31 = vsel %vm219_vm2, %v11691_v48, -inf }
0x3e0a   :  { %11693 = vmax.xlane.f32.xlu0 %v11692_v31  ;;  %v11867_v9 = vpop.f32.mrf.mxu0 }
0x3e0b   :  { %v11871_v58 = vmul.f32 0.35355338, %v11867_v9 }
0x3e0c   :  { %v14755_v55 = vpop.f32.mrf.mxu0 }
0x3e0d   :  { %v11872_v59 = vsel %vm219_vm2, %v11871_v58, -inf }
0x3e0e   :  { %11873 = vmax.xlane.f32.xlu0 %v11872_v59  ;;  %v12033_v60 = vpop.f32.mrf.mxu0 }
0x3e0f   :  { %v12037_v62 = vmul.f32 0.35355338, %v12033_v60 }
0x3e10   :  { %v14765_v8 = vpop.f32.mrf.mxu0 }
0x3e11   :  { %v12038_v63 = vsel %vm219_vm2, %v12037_v62, -inf }
0x3e12   :  { %12039 = vmax.xlane.f32.xlu1 %v12038_v63  ;;  %v12199_v0 = vpop.f32.mrf.mxu0 }
0x3e13   :  { %v12203_v4 = vmul.f32 0.35355338, %v12199_v0 }
0x3e14   :  { %v14775_v3 = vpop.f32.mrf.mxu0 }
0x3e15   :  { %v12204_v2 = vsel %vm219_vm2, %v12203_v4, -inf }
0x3e16   :  { %12205 = vmax.xlane.f32.xlu0 %v12204_v2  ;;  %v12365_v38 = vpop.f32.mrf.mxu0 }
0x3e17   :  { %v12369_v61 = vmul.f32 0.35355338, %v12365_v38 }
0x3e18   :  { %v14785_v1 = vpop.f32.mrf.mxu0 }
0x3e19   :  { %v12370_v53 = vsel %vm219_vm2, %v12369_v61, -inf }
0x3e23   :  { %11205 = vrot.lane.b32.xlu1 %v17247_v22, %s17662_s25 }
0x3e47   :  { %12371 = vmax.xlane.f32.xlu1 %v12370_v53 }
0x3e58   :  { %11537 = vrot.lane.b32.xlu1 %v17247_v22, %s17668_s5 }
0x3e5c   :  { %11703 = vrot.lane.b32.xlu1 %v17247_v22, %s17675_s14 }
0x3e60   :  { %11883 = vrot.lane.b32.xlu1 %v17261_v39, %s17662_s25 }
0x3e87   :  { %v11196_v54 = vpop.xlane.xlu0 %11195 }
0x3e88   :  { %v11197_v10 = vsub.f32 %v11193_v42, %v11196_v54  ;;  %v11362_v12 = vpop.xlane.xlu1 %11361 }
0x3e89   :  { %v11363_v29 = vsub.f32 %v11359_v45, %v11362_v12 }
0x3e8a   :  { %v11198_v11 = vmul.f32 1.442695, %v11197_v10 }
0x3e8b   :  { %v11364_v13 = vmul.f32 1.442695, %v11363_v29 }
0x3e8c   :  { %15142 = vpow2.f32 %v11198_v11 }
0x3e8d   :  { %15144 = vpow2.f32 %v11364_v13 }
0x3e8f   :  { %v11528_v14 = vpop.xlane.xlu0 %11527 }
0x3e90   :  { %v11529_v56 = vsub.f32 %v17320_v52, %v11528_v14 }
0x3e92   :  { %v11530_v25 = vmul.f32 1.442695, %v11529_v56 }
0x3e93   :  { %v11694_v15 = vpop.xlane.xlu0 %11693 }
0x3e94   :  { %v11695_v16 = vsub.f32 %v11691_v48, %v11694_v15 }
0x3e96   :  { %v11696_v17 = vmul.f32 1.442695, %v11695_v16 }
0x3e97   :  { %v11874_v32 = vpop.xlane.xlu0 %11873 }
0x3e98   :  { %15146 = vpow2.f32 %v11696_v17  ;;  %v11875_v24 = vsub.f32 %v11871_v58, %v11874_v32  ;;  %v13433_v32 = vld [vmem:[%s17685_s27 + $0x68] sm:$0xff] }
0x3e99   :  { %v15143_v37 = vpop.eup %15142  ;;  %15148 = vpow2.f32 %v11530_v25  ;;  %v13432_v25 = vld [vmem:[%s17685_s27 + $0x60] sm:$0xff] }
0x3e9a   :  { %v17337_v20 = vpop.eup %15144  ;;  %v11200_v21 = vsel %vm219_vm2, %v15143_v37, 0.0  ;;  %v11876_v36 = vmul.f32 1.442695, %v11875_v24 }
0x3e9b   :  { %v12040_v26 = vpop.xlane.xlu1 %12039  ;;  %11201 = vadd.xlane.f32.xlu0 %v11200_v21  ;;  %v11366_v5 = vsel %vm219_vm2, %v17337_v20, 0.0 }
0x3e9c   :  { %11367 = vadd.xlane.f32.xlu1 %v11366_v5  ;;  %15150 = vpow2.f32 %v11876_v36  ;;  %v12041_v33 = vsub.f32 %v12037_v62, %v12040_v26 }
0x3e9e   :  { %v12042_v41 = vmul.f32 1.442695, %v12041_v33 }
0x3e9f   :  { %v11206_v6 = vpop.permute.xlu1 %11205  ;;  %v12206_v35 = vpop.xlane.xlu0 %12205 }
0x3ea0   :  { %14717 = vmatpush3.msra.mxu1 %v11206_v6  ;;  %v12207_v40 = vsub.f32 %v12203_v4, %v12206_v35 }
0x3ea1   :  { %14726 = vmatprep.subr.mxu1 %v15282_v34 }
0x3ea2   :  { %v12208_v30 = vmul.f32 1.442695, %v12207_v40 }
0x3ea4   :  { %15152 = vpow2.f32 %v12208_v30 }
0x3ea5   :  { %v17343_v27 = vpop.eup %15146  ;;  %15154 = vpow2.f32 %v12042_v41 }
0x3ea6   :  { %v11698_v28 = vsel %vm219_vm2, %v17343_v27, 0.0  ;;  %v15149_v42 = vpop.eup %15148 }
0x3ea7   :  { %11699 = vadd.xlane.f32.xlu1 %v11698_v28  ;;  %v13434_v28 = vld [vmem:[%s17685_s27 + $0x70] sm:$0xff] }
0x3ea9   :  { %v17353_v44 = vpop.eup %15150 }
0x3eaa   :  { %v11878_v23 = vsel %vm219_vm2, %v17353_v44, 0.0 }
0x3eb1   :  { %11371 = vrot.lane.b32.xlu0 %v17247_v22, %s17682_s4  ;;  %v11532_v22 = vsel %vm219_vm2, %v15149_v42, 0.0  ;;  %v17357_v50 = vpop.eup %15152 }
0x3eb2   :  { %v12210_v51 = vsel %vm219_vm2, %v17357_v50, 0.0  ;;  %v15155_v52 = vpop.eup %15154 }
0x3eb3   :  { %v12044_v43 = vsel %vm219_vm2, %v15155_v52, 0.0 }
0x3eb8   :  { %12049 = vrot.lane.b32.xlu1 %v17261_v39, %s17682_s4 }
0x3ed0   :  { %v12372_v45 = vpop.xlane.xlu1 %12371  ;;  %11533 = vadd.xlane.f32.xlu0 %v11532_v22 }
0x3ed1   :  { %v12373_v46 = vsub.f32 %v12369_v61, %v12372_v45 }
0x3ed3   :  { %v12374_v47 = vmul.f32 1.442695, %v12373_v46 }
0x3ed4   :  { %11879 = vadd.xlane.f32.xlu0 %v11878_v23  ;;  %v11538_v48 = vpop.permute.xlu1 %11537 }
0x3ed5   :  { %15156 = vpow2.f32 %v12374_v47 }
0x3ed8   :  { %12211 = vadd.xlane.f32.xlu0 %v12210_v51  ;;  %v11704_v57 = vpop.permute.xlu1 %11703 }
0x3edc   :  { %12045 = vadd.xlane.f32.xlu1 %v12044_v43  ;;  %v11884_v31 = vpop.permute.xlu1 %11883 }
0x3ee2   :  { %v17362_v7 = vpop.eup %15156 }
0x3ee3   :  { %v12376_v49 = vsel %vm219_vm2, %v17362_v7, 0.0 }
0x3ee4   :  { %12377 = vadd.xlane.f32.xlu0 %v12376_v49 }
0x3eed   :  { %12381 = vrot.lane.b32.xlu1 %v17261_v39, %s17675_s14 }
0x3efa   :  { %12215 = vrot.lane.b32.xlu0 %v17261_v39, %s17668_s5 }
0x3f24   :  { %v11202_v9 = vpop.xlane.xlu0 %11201 }
0x3f25   :  { %15158 = vrcp.f32 %v11202_v9  ;;  %v11368_v58 = vpop.xlane.xlu1 %11367 }
0x3f26   :  { %15160 = vrcp.f32 %v11368_v58 }
0x3f28   :  { %v11372_v62 = vpop.permute.xlu0 %11371 }
0x3f30   :  { %v11700_v39 = vpop.xlane.xlu1 %11699 }
0x3f32   :  { %v15159_v55 = vpop.eup %15158 }
0x3f33   :  { %v11204_v59 = vmul.f32 %v15159_v55, %v15143_v37  ;;  %v15161_v60 = vpop.eup %15160 }
0x3f34   :  { %v11370_v8 = vmul.f32 %v15161_v60, %v17337_v20  ;;  %v12050_v4 = vpop.permute.xlu1 %12049 }
0x3f35   :  { %14719 = vmatmul.mubr.msk.f32.vlgmr.msra.gmra.mxu1 %vm219_vm2, %v11204_v59 }
0x3f36   :  { %14727 = vmatpush3.msra.mxu1 %v11372_v62  ;;  %14728 = vmatprep.mubr.msk.f32.mxu1 %vm15283_vm1, %v15282_v34 }
0x3f37   :  { %14736 = vmatprep.subr.mxu1 %v15282_v34 }
0x3f39   :  { %14729 = vmatmul.mubr.msk.f32.vlgmr.msra.gmra.mxu1 %vm219_vm2, %v11370_v8 }
0x3f3a   :  { %14737 = vmatpush3.msra.mxu1 %v11538_v48  ;;  %14738 = vmatprep.mubr.msk.f32.mxu1 %vm15283_vm1, %v15282_v34 }
0x3f3b   :  { %14746 = vmatprep.subr.mxu1 %v15282_v34 }
0x3f59   :  { %v11534_v63 = vpop.xlane.xlu0 %11533 }
0x3f5a   :  { %15162 = vrcp.f32 %v11534_v63 }
0x3f5b   :  { %15164 = vrcp.f32 %v11700_v39 }
0x3f5d   :  { %v11880_v0 = vpop.xlane.xlu0 %11879 }
0x3f5e   :  { %15166 = vrcp.f32 %v11880_v0 }
0x3f61   :  { %v12212_v3 = vpop.xlane.xlu0 %12211 }
0x3f65   :  { %v12046_v2 = vpop.xlane.xlu1 %12045 }
0x3f66   :  { %15168 = vrcp.f32 %v12046_v2 }
0x3f67   :  { %v15163_v38 = vpop.eup %15162  ;;  %15170 = vrcp.f32 %v12212_v3 }
0x3f68   :  { %v11536_v1 = vmul.f32 %v15163_v38, %v15149_v42  ;;  %v15165_v61 = vpop.eup %15164 }
0x3f69   :  { %v11702_v53 = vmul.f32 %v15165_v61, %v17343_v27  ;;  %v12382_v16 = vpop.permute.xlu1 %12381  ;;  %v13435_v27 = vld [vmem:[%s17685_s27 + $0x78] sm:$0xff] }
0x3f6a   :  { %14739 = vmatmul.mubr.msk.f32.vlgmr.msra.gmra.mxu1 %vm219_vm2, %v11536_v1  ;;  %14791 = vmatprep.subr.mxu0 %v13435_v27 }
0x3f6b   :  { %14747 = vmatpush3.msra.mxu1 %v11704_v57  ;;  %14748 = vmatprep.mubr.msk.f32.mxu1 %vm15283_vm1, %v15282_v34  ;;  %v15167_v54 = vpop.eup %15166  ;;  %v13437_v57 = vld [vmem:[%s17677_s2 + $0x3] ss:$0 sm:$0xff] }
0x3f6c   :  { %14756 = vmatprep.subr.mxu1 %v15282_v34  ;;  %v11882_v12 = vmul.f32 %v15167_v54, %v17353_v44  ;;  %14792 = vmatpush3.msra.mxu0 %v13435_v27  ;;  %v13445_v54 = vld [vmem:[%s17558_s11 + $0x68] sm:$0xff] }
0x3f6d   :  { %v12378_v10 = vpop.xlane.xlu0 %12377  ;;  %14793 = vmatprep.subr.mxu0 %v13434_v28 }
0x3f6e   :  { %15172 = vrcp.f32 %v12378_v10  ;;  %14749 = vmatmul.mubr.msk.f32.vlgmr.msra.gmra.mxu1 %vm219_vm2, %v11702_v53  ;;  %14794 = vmatpush3.msra.mxu0 %v13434_v28  ;;  %v13446_v53 = vld [vmem:[%s17558_s11 + $0x70] sm:$0xff]  ;;  %v13444_v10 = vld [vmem:[%s17558_s11 + $0x60] sm:$0xff] }
0x3f6f   :  { %14757 = vmatpush3.msra.mxu1 %v11884_v31  ;;  %14758 = vmatprep.mubr.msk.f32.mxu1 %vm15283_vm1, %v15282_v34 }
0x3f70   :  { %14766 = vmatprep.subr.mxu1 %v15282_v34  ;;  %14795 = vmatprep.subr.mxu0 %v13433_v32 }
0x3f71   :  { %v12216_v14 = vpop.permute.xlu0 %12215  ;;  %14796 = vmatpush3.msra.mxu0 %v13433_v32  ;;  %v13457_v32 = vld [vmem:[%s17561_s13 + $0xe8] sm:$0xff] }
0x3f72   :  { %14759 = vmatmul.mubr.msk.f32.vlgmr.msra.gmra.mxu1 %vm219_vm2, %v11882_v12  ;;  %14797 = vmatprep.subr.mxu0 %v13432_v25 }
0x3f73   :  { %v15169_v29 = vpop.eup %15168  ;;  %14767 = vmatpush3.msra.mxu1 %v12050_v4  ;;  %14768 = vmatprep.mubr.msk.f32.mxu1 %vm15283_vm1, %v15282_v34 }
0x3f74   :  { %v12048_v11 = vmul.f32 %v15169_v29, %v15155_v52  ;;  %14776 = vmatprep.subr.mxu1 %v15282_v34  ;;  %v15171_v13 = vpop.eup %15170  ;;  %14798 = vmatpush3.msra.mxu0 %v13432_v25  ;;  %v13456_v25 = vld [vmem:[%s17561_s13 + $0xe0] sm:$0xff] }
0x3f75   :  { %v12214_v15 = vmul.f32 %v15171_v13, %v17357_v50 }
0x3f76   :  { %14769 = vmatmul.mubr.msk.f32.vlgmr.msra.gmra.mxu1 %vm219_vm2, %v12048_v11 }
0x3f77   :  { %14777 = vmatpush3.msra.mxu1 %v12216_v14  ;;  %14778 = vmatprep.mubr.msk.f32.mxu1 %vm15283_vm1, %v15282_v34 }
0x3f78   :  { %14786 = vmatprep.subr.mxu1 %v15282_v34 }
0x3f7a   :  { %14779 = vmatmul.mubr.msk.f32.vlgmr.msra.gmra.mxu1 %vm219_vm2, %v12214_v15 }
0x3f7b   :  { %v15173_v17 = vpop.eup %15172  ;;  %14787 = vmatpush3.msra.mxu1 %v12382_v16  ;;  %14788 = vmatprep.mubr.msk.f32.mxu1 %vm15283_vm1, %v15282_v34 }
0x3f7c   :  { %v12380_v37 = vmul.f32 %v15173_v17, %v17362_v7  ;;  %v13442_v17 = vld [vmem:[%s17559_s9 + $0x3] ss:$0 sm:$0xff] }
0x3f7e   :  { %14789 = vmatmul.mubr.msk.f32.vlgmr.msra.gmra.mxu1 %vm219_vm2, %v12380_v37 }
0x3ff5   :  { %v11277_v20 = vpop.f32.mrf.mxu1 }
0x3ff7   :  { %v14720_v21 = vpop.f32.mrf.mxu1 }
0x3ff9   :  { %v11443_v26 = vpop.f32.mrf.mxu1 }
0x3ffa   :  { %11780 = vrot.lane.b32.xlu0 %v11443_v26, %s17666_s21 }
0x3ffb   :  { %v14730_v5 = vpop.f32.mrf.mxu1 }
0x402a   :  { %v11609_v6 = vpop.f32.mrf.mxu1 }
0x402b   :  { %11784 = vrot.lane.b32.xlu1 %v11609_v6, %s17653_s8 }
0x402c   :  { %v14740_v34 = vpop.f32.mrf.mxu1 }
0x402d   :  { %v13459_v34 = vld [vmem:[%s17561_s13 + $0xf8] sm:$0xff] }
0x402e   :  { %v11775_v56 = vpop.f32.mrf.mxu1  ;;  %14813 = vmatprep.subr.mxu0 %v13459_v34 }
0x402f   :  { %11788 = vrot.lane.b32.xlu1 %v11775_v56, %s17667_s17  ;;  %v13458_v56 = vld [vmem:[%s17561_s13 + $0xf0] sm:$0xff] }
0x4030   :  { %v14750_v24 = vpop.f32.mrf.mxu1 }
0x4031   :  { %v13455_v24 = vld [vmem:[%s17561_s13 + $0xd8] sm:$0xff] }
0x4032   :  { %v11955_v35 = vpop.f32.mrf.mxu1 }
0x4034   :  { %v14760_v36 = vpop.f32.mrf.mxu1 }
0x4035   :  { %v13453_v36 = vld [vmem:[%s17561_s13 + $0xc8] sm:$0xff] }
0x4036   :  { %v12121_v40 = vpop.f32.mrf.mxu1 }
0x4037   :  { %12458 = vrot.lane.b32.xlu0 %v12121_v40, %s17666_s21  ;;  %v13452_v40 = vld [vmem:[%s17561_s13 + $0xc0] sm:$0xff] }
0x4038   :  { %v14770_v33 = vpop.f32.mrf.mxu1 }
0x4039   :  { %v13449_v33 = vld [vmem:[%s17562_s12 + $0x3] ss:$0 sm:$0xff] }
0x403a   :  { %v12287_v30 = vpop.f32.mrf.mxu1 }
0x403b   :  { %12462 = vrot.lane.b32.xlu0 %v12287_v30, %s17653_s8 }
0x403c   :  { %v14780_v41 = vpop.f32.mrf.mxu1 }
0x403e   :  { %v12453_v42 = vpop.f32.mrf.mxu1 }
0x403f   :  { %12466 = vrot.lane.b32.xlu1 %v12453_v42, %s17667_s17 }
0x4040   :  { %v14790_v22 = vpop.f32.mrf.mxu1 }
0x406c   :  { %v11781_v44 = vpop.permute.xlu0 %11780 }
0x406d   :  { %v11791_v46 = vsel %vm219_vm2, %v11277_v20, %v11781_v44  ;;  %v13443_v20 = vld [vmem:[%s17560_s10 + $0x3] ss:$0 sm:$0xff] }
0x409d   :  { %v11785_v45 = vpop.permute.xlu1 %11784 }
0x409e   :  { %v11792_v47 = vsel %vm903_vm3, %v11791_v46, %v11785_v45 }
0x40a1   :  { %v11789_v23 = vpop.permute.xlu1 %11788 }
0x40a2   :  { %v11793_v50 = vsel %vm905_vm4, %v11792_v47, %v11789_v23 }
0x40a3   :  { %14799 = vmatprep.mubr.msk.f32.mxu0 %vm80_vm0, %v11793_v50 }
0x40a9   :  { %v12459_v51 = vpop.permute.xlu0 %12458 }
0x40aa   :  { %v12469_v43 = vsel %vm219_vm2, %v11955_v35, %v12459_v51  ;;  %v13454_v35 = vld [vmem:[%s17561_s13 + $0xd0] sm:$0xff]  ;;  %s17690_s13 = sld [smem:[#allocation16_spill]] }
0x40ad   :  { %v12463_v52 = vpop.permute.xlu0 %12462 }
0x40ae   :  { %v12470_v7 = vsel %vm903_vm3, %v12469_v43, %v12463_v52 }
0x40b1   :  { %v12467_v49 = vpop.permute.xlu1 %12466 }
0x40b2   :  { %v12471_v48 = vsel %vm905_vm4, %v12470_v7, %v12467_v49 }
0x40b3   :  { %14800 = vmatmul.mubr.msk.f32.vlgmr.msra.gmra.mxu0 %vm80_vm0, %v12471_v48 }
0x40b4   :  { %14814 = vmatpush3.msra.mxu0 %v13459_v34 }
0x40b5   :  { %14815 = vmatprep.subr.mxu0 %v13458_v56 }
0x40b6   :  { %14816 = vmatpush3.msra.mxu0 %v13458_v56 }
0x40b7   :  { %14817 = vmatprep.subr.mxu0 %v13457_v32 }
0x40b8   :  { %14818 = vmatpush3.msra.mxu0 %v13457_v32  ;;  %v13467_v32 = vld [vmem:[%s17565_s16 + $0x3] ss:$0 sm:$0xff] }
0x40b9   :  { %14819 = vmatprep.subr.mxu0 %v13456_v25 }
0x40ba   :  { %14820 = vmatpush3.msra.mxu0 %v13456_v25 }
0x40bb   :  { %14821 = vmatprep.subr.mxu0 %v13455_v24 }
0x40bc   :  { %14822 = vmatpush3.msra.mxu0 %v13455_v24 }
0x40bd   :  { %14823 = vmatprep.subr.mxu0 %v13454_v35 }
0x40be   :  { %14824 = vmatpush3.msra.mxu0 %v13454_v35 }
0x40bf   :  { %14825 = vmatprep.subr.mxu0 %v13453_v36 }
0x40c0   :  { %14826 = vmatpush3.msra.mxu0 %v13453_v36  ;;  %v13468_v36 = vld [vmem:[%s17687_s26] ss:$0 sm:$0xff] }
0x40c1   :  { %14827 = vmatprep.subr.mxu0 %v13452_v40 }
0x40c2   :  { %14828 = vmatpush3.msra.mxu0 %v13452_v40 }
0x4173   :  { %v14801_v31 = vpop.f32.mrf.mxu0 }
0x4174   :  { %v12563_v9 = vadd.f32 %v14801_v31, %v13437_v57 }
0x4175   :  { %v12557_v58 = vpop.f32.mrf.mxu0 }
0x4176   :  { %v12567_v55 = vadd.f32 %v12563_v9, %v17236_v19  ;;  %v12558_v59 = vadd.f32 %v13437_v57, %v12557_v58 }
0x4178   :  { %v12566_v60 = vadd.f32 %v12558_v59, %v17234_v18  ;;  %v12575_v62 = vsel %vm80_vm0, %v12567_v55, 0.0  ;;  %v13447_v18 = vld [vmem:[%s17558_s11 + $0x78] sm:$0xff] }
0x4179   :  { %12576 = vadd.xlane.f32.xlu1 %v12575_v62  ;;  %14802 = vmatprep.subr.mxu1 %v13447_v18 }
0x417a   :  { %v12572_v8 = vsel %vm80_vm0, %v12566_v60, 0.0  ;;  %14803 = vmatpush3.msra.mxu1 %v13447_v18 }
0x417b   :  { %12573 = vadd.xlane.f32.xlu0 %v12572_v8  ;;  %14804 = vmatprep.subr.mxu1 %v13446_v53 }
0x417c   :  { %14805 = vmatpush3.msra.mxu1 %v13446_v53 }
0x417d   :  { %14806 = vmatprep.subr.mxu1 %v13445_v54 }
0x417e   :  { %14807 = vmatpush3.msra.mxu1 %v13445_v54 }
0x417f   :  { %14808 = vmatprep.subr.mxu1 %v13444_v10 }
0x4180   :  { %14809 = vmatpush3.msra.mxu1 %v13444_v10 }
0x4202   :  { %v12577_v39 = vpop.xlane.xlu1 %12576 }
0x4203   :  { %v12579_v63 = vmul.f32 0.03125, %v12577_v39 }
0x4204   :  { %v12574_v0 = vpop.xlane.xlu0 %12573 }
0x4205   :  { %v12578_v4 = vmul.f32 0.03125, %v12574_v0  ;;  %v12581_v3 = vsub.f32 %v12567_v55, %v12579_v63 }
0x4207   :  { %v12580_v2 = vsub.f32 %v12566_v60, %v12578_v4  ;;  %v12583_v61 = vmul.f32 %v12581_v3, %v12581_v3  ;;  %v13461_v60 = vld [vmem:[%s17678_s19 + $0x3] ss:$0 sm:$0xff] }
0x4209   :  { %v12582_v38 = vmul.f32 %v12580_v2, %v12580_v2  ;;  %v12587_v19 = vsel %vm80_vm0, %v12583_v61, 0.0 }
0x420b   :  { %v12584_v1 = vsel %vm80_vm0, %v12582_v38, 0.0 }
0x420c   :  { %12585 = vadd.xlane.f32.xlu0 %v12584_v1 }
0x4210   :  { %12588 = vadd.xlane.f32.xlu0 %v12587_v19 }
0x4295   :  { %v12586_v12 = vpop.xlane.xlu0 %12585 }
0x4296   :  { %v12590_v29 = vmul.f32 0.03125, %v12586_v12 }
0x4298   :  { %v12592_v11 = vadd.f32 1e-12, %v12590_v29 }
0x4299   :  { %v12589_v13 = vpop.xlane.xlu0 %12588 }
0x429a   :  { %15174 = vrsqrt.f32 %v12592_v11  ;;  %v12591_v14 = vmul.f32 0.03125, %v12589_v13  ;;  %v12875_v11 = vld [vmem:[%s17686_s3 + $0x18] sm:$0xff]  ;;  %v12874_v13 = vld [vmem:[%s17686_s3 + $0x10] sm:$0xff] }
0x429b   :  { %14832 = vmatprep.subr.mxu1 %v12875_v11 }
0x429c   :  { %v12593_v15 = vadd.f32 1e-12, %v12591_v14  ;;  %v12873_v14 = vld [vmem:[%s17686_s3 + $0x8] sm:$0xff] }
0x429e   :  { %15176 = vrsqrt.f32 %v12593_v15  ;;  %v12872_v15 = vld [vmem:[%s17686_s3] sm:$0xff]  ;;  %s17691_s3 = sld [smem:[#allocation17_spill]] }
0x42a7   :  { %v15175_v16 = vpop.eup %15174 }
0x42a8   :  { %v12596_v37 = vmul.f32 %v15175_v16, %v12580_v2 }
0x42aa   :  { %v12604_v21 = vmul.f32 %v13442_v17, %v12596_v37 }
0x42ab   :  { %v15177_v26 = vpop.eup %15176 }
0x42ac   :  { %v12597_v5 = vmul.f32 %v15177_v26, %v12581_v3  ;;  %v12612_v6 = vadd.f32 %v13443_v20, %v12604_v21 }
0x42ae   :  { %v12605_v27 = vmul.f32 %v13442_v17, %v12597_v5  ;;  %14810 = vmatprep.mubr.msk.f32.mxu1 %vm80_vm0, %v12612_v6 }
0x42b0   :  { %v12613_v28 = vadd.f32 %v13443_v20, %v12605_v27 }
0x42b2   :  { %14811 = vmatmul.mubr.msk.f32.vlgmr.msra.gmra.mxu1 %vm80_vm0, %v12613_v28 }
0x42b3   :  { %14833 = vmatpush3.msra.mxu1 %v12875_v11 }
0x42b4   :  { %14834 = vmatprep.subr.mxu1 %v12874_v13 }
0x42b5   :  { %14835 = vmatpush3.msra.mxu1 %v12874_v13 }
0x42b6   :  { %14836 = vmatprep.subr.mxu1 %v12873_v14 }
0x42b7   :  { %14837 = vmatpush3.msra.mxu1 %v12873_v14  ;;  %v13471_v14 = vld [vmem:[%s17689_s23] ss:$0 sm:$0xff] }
0x42b8   :  { %14838 = vmatprep.subr.mxu1 %v12872_v15 }
0x42b9   :  { %14839 = vmatpush3.msra.mxu1 %v12872_v15 }
0x4372   :  { %v14812_v30 = vpop.f32.mrf.mxu1 }
0x4373   :  { %v12705_v41 = vadd.f32 %v14812_v30, %v13449_v33 }
0x4374   :  { %v12699_v42 = vpop.f32.mrf.mxu1 }
0x4375   :  { %v12709_v22 = vmul.f32 %v12705_v41, %v12705_v41  ;;  %v12700_v44 = vadd.f32 %v13449_v33, %v12699_v42 }
0x4377   :  { %v12711_v45 = vmul.f32 %v12709_v22, %v12705_v41  ;;  %v12708_v46 = vmul.f32 %v12700_v44, %v12700_v44 }
0x4379   :  { %v12713_v47 = vmul.f32 0.044715, %v12711_v45  ;;  %v12710_v23 = vmul.f32 %v12708_v46, %v12700_v44 }
0x437b   :  { %v12715_v50 = vadd.f32 %v12713_v47, %v12705_v41  ;;  %v12712_v51 = vmul.f32 0.044715, %v12710_v23 }
0x437d   :  { %v12717_v52 = vmul.f32 0.7978846, %v12715_v50  ;;  %v12714_v43 = vadd.f32 %v12712_v51, %v12700_v44 }
0x437f   :  { %15178 = vtanh.f32 %v12717_v52  ;;  %v12716_v7 = vmul.f32 0.7978846, %v12714_v43 }
0x4381   :  { %15180 = vtanh.f32 %v12716_v7 }
0x438c   :  { %v15179_v49 = vpop.eup %15178 }
0x438d   :  { %v12721_v48 = vadd.f32 1.0, %v15179_v49 }
0x438e   :  { %v15181_v57 = vpop.eup %15180 }
0x438f   :  { %v12720_v31 = vadd.f32 1.0, %v15181_v57  ;;  %v12723_v9 = vmul.f32 0.5, %v12721_v48 }
0x4391   :  { %v12722_v58 = vmul.f32 0.5, %v12720_v31  ;;  %v12725_v59 = vmul.f32 %v12723_v9, %v12705_v41 }
0x4393   :  { %v12724_v55 = vmul.f32 %v12722_v58, %v12700_v44 }
0x4395   :  { %14829 = vmatprep.mubr.msk.f32.mxu0 %vm1858_vm5, %v12724_v55 }
0x4396   :  { %14830 = vmatmul.mubr.msk.f32.vlgmr.msra.gmra.mxu0 %vm1858_vm5, %v12725_v59 }
0x4456   :  { %v14831_v62 = vpop.f32.mrf.mxu0 }
0x4457   :  { %v12821_v8 = vadd.f32 %v14831_v62, %v13461_v60 }
0x4458   :  { %v12815_v39 = vpop.f32.mrf.mxu0 }
0x4459   :  { %v12825_v63 = vadd.f32 %v12821_v8, %v12613_v28  ;;  %v12816_v0 = vadd.f32 %v13461_v60, %v12815_v39 }
0x445b   :  { %v12824_v4 = vadd.f32 %v12816_v0, %v12612_v6  ;;  %v12833_v3 = vsel %vm80_vm0, %v12825_v63, 0.0  ;;  %v13466_v6 = vld [vmem:[%s17564_s15 + $0x3] ss:$0 sm:$0xff] }
0x445c   :  { %12834 = vadd.xlane.f32.xlu1 %v12833_v3 }
0x445d   :  { %v12830_v2 = vsel %vm80_vm0, %v12824_v4, 0.0 }
0x445e   :  { %12831 = vadd.xlane.f32.xlu0 %v12830_v2 }
0x44e5   :  { %v12835_v38 = vpop.xlane.xlu1 %12834 }
0x44e6   :  { %v12837_v1 = vmul.f32 0.03125, %v12835_v38 }
0x44e7   :  { %v12832_v61 = vpop.xlane.xlu0 %12831 }
0x44e8   :  { %v12839_v19 = vsub.f32 %v12825_v63, %v12837_v1  ;;  %v12836_v18 = vmul.f32 0.03125, %v12832_v61  ;;  %v13029_v1 = vld [vmem:[%s17688_s24 + $0x18] sm:$0xff]  ;;  %v13028_v61 = vld [vmem:[%s17688_s24 + $0x10] sm:$0xff] }
0x44e9   :  { %14843 = vmatprep.subr.mxu1 %v13029_v1 }
0x44ea   :  { %v12838_v53 = vsub.f32 %v12824_v4, %v12836_v18  ;;  %v12841_v54 = vmul.f32 %v12839_v19, %v12839_v19  ;;  %v13026_v18 = vld [vmem:[%s17688_s24] sm:$0xff] }
0x44ec   :  { %v12845_v10 = vsel %vm80_vm0, %v12841_v54, 0.0  ;;  %v12840_v12 = vmul.f32 %v12838_v53, %v12838_v53 }
0x44ed   :  { %12846 = vadd.xlane.f32.xlu1 %v12845_v10 }
0x44ee   :  { %v12842_v29 = vsel %vm80_vm0, %v12840_v12, 0.0 }
0x44ef   :  { %12843 = vadd.xlane.f32.xlu0 %v12842_v29 }
0x4576   :  { %v12847_v16 = vpop.xlane.xlu1 %12846 }
0x4577   :  { %v12849_v17 = vmul.f32 0.03125, %v12847_v16 }
0x4578   :  { %v12844_v37 = vpop.xlane.xlu0 %12843 }
0x4579   :  { %v12851_v20 = vadd.f32 1e-12, %v12849_v17  ;;  %v12848_v21 = vmul.f32 0.03125, %v12844_v37 }
0x457b   :  { %15182 = vrsqrt.f32 %v12851_v20  ;;  %v12850_v26 = vadd.f32 1e-12, %v12848_v21  ;;  %v13472_v20 = vld [vmem:[%s17690_s13] ss:$0 sm:$0xff] }
0x457d   :  { %15184 = vrsqrt.f32 %v12850_v26 }
0x4588   :  { %v15183_v5 = vpop.eup %15182 }
0x4589   :  { %v12855_v27 = vmul.f32 %v15183_v5, %v12839_v19  ;;  %v13027_v19 = vld [vmem:[%s17688_s24 + $0x8] sm:$0xff] }
0x458a   :  { %v15185_v28 = vpop.eup %15184 }
0x458b   :  { %v12854_v34 = vmul.f32 %v15185_v28, %v12838_v53  ;;  %v12863_v56 = vmul.f32 %v13466_v6, %v12855_v27 }
0x458d   :  { %v12862_v25 = vmul.f32 %v13466_v6, %v12854_v34  ;;  %v12871_v35 = vadd.f32 %v13467_v32, %v12863_v56  ;;  %v13473_v6 = vld [vmem:[%s17691_s3] ss:$0 sm:$0xff] }
0x458f   :  { %v12870_v24 = vadd.f32 %v13467_v32, %v12862_v25 }
0x4591   :  { %14840 = vmatprep.mubr.msk.f32.mxu1 %vm80_vm0, %v12870_v24 }
0x4592   :  { %14841 = vmatmul.mubr.msk.f32.vlgmr.msra.gmra.mxu1 %vm80_vm0, %v12871_v35 }
0x4593   :  { %14844 = vmatpush3.msra.mxu1 %v13029_v1 }
0x4594   :  { %14845 = vmatprep.subr.mxu1 %v13028_v61 }
0x4595   :  { %14846 = vmatpush3.msra.mxu1 %v13028_v61 }
0x4596   :  { %14847 = vmatprep.subr.mxu1 %v13027_v19 }
0x4597   :  { %14848 = vmatpush3.msra.mxu1 %v13027_v19 }
0x4598   :  { %14849 = vmatprep.subr.mxu1 %v13026_v18 }
0x4599   :  { %14850 = vmatpush3.msra.mxu1 %v13026_v18 }
0x4652   :  { %v14842_v40 = vpop.f32.mrf.mxu1 }
0x4653   :  { %v12961_v33 = vadd.f32 %v14842_v40, %v13468_v36 }
0x4654   :  { %v12955_v30 = vpop.f32.mrf.mxu1 }
0x4655   :  { %v12965_v41 = vmul.f32 %v12961_v33, %v12961_v33  ;;  %v12956_v42 = vadd.f32 %v13468_v36, %v12955_v30 }
0x4657   :  { %v12967_v22 = vmul.f32 %v12965_v41, %v12961_v33  ;;  %v12964_v44 = vmul.f32 %v12956_v42, %v12956_v42 }
0x4659   :  { %v12969_v45 = vmul.f32 0.044715, %v12967_v22  ;;  %v12966_v46 = vmul.f32 %v12964_v44, %v12956_v42 }
0x465b   :  { %v12971_v47 = vadd.f32 %v12969_v45, %v12961_v33  ;;  %v12968_v23 = vmul.f32 0.044715, %v12966_v46 }
0x465d   :  { %v12973_v50 = vmul.f32 0.7978846, %v12971_v47  ;;  %v12970_v51 = vadd.f32 %v12968_v23, %v12956_v42 }
0x465f   :  { %15186 = vtanh.f32 %v12973_v50  ;;  %v12972_v52 = vmul.f32 0.7978846, %v12970_v51 }
0x4661   :  { %15188 = vtanh.f32 %v12972_v52 }
0x466c   :  { %v15187_v43 = vpop.eup %15186 }
0x466d   :  { %v12977_v7 = vadd.f32 1.0, %v15187_v43 }
0x466e   :  { %v15189_v49 = vpop.eup %15188 }
0x466f   :  { %v12979_v48 = vmul.f32 0.5, %v12977_v7  ;;  %v12976_v57 = vadd.f32 1.0, %v15189_v49 }
0x4671   :  { %v12981_v31 = vmul.f32 %v12979_v48, %v12961_v33  ;;  %v12978_v9 = vmul.f32 0.5, %v12976_v57 }
0x4673   :  { %v12987_v58 = vsel %vm80_vm0, %v12981_v31, 0.0  ;;  %v12980_v55 = vmul.f32 %v12978_v9, %v12956_v42 }
0x4674   :  { %12988 = vadd.xlane.f32.xlu1 %v12987_v58 }
0x4675   :  { %v12984_v59 = vsel %vm80_vm0, %v12980_v55, 0.0 }
0x4676   :  { %12985 = vadd.xlane.f32.xlu0 %v12984_v59 }
0x46fd   :  { %v12989_v60 = vpop.xlane.xlu1 %12988 }
0x46fe   :  { %v12991_v62 = vmul.f32 0.03125, %v12989_v60 }
0x46ff   :  { %v12986_v8 = vpop.xlane.xlu0 %12985 }
0x4700   :  { %v12993_v39 = vsub.f32 %v12981_v31, %v12991_v62  ;;  %v12990_v63 = vmul.f32 0.03125, %v12986_v8 }
0x4702   :  { %v12992_v0 = vsub.f32 %v12980_v55, %v12990_v63  ;;  %v12995_v4 = vmul.f32 %v12993_v39, %v12993_v39 }
0x4704   :  { %v12999_v3 = vsel %vm80_vm0, %v12995_v4, 0.0  ;;  %v12994_v2 = vmul.f32 %v12992_v0, %v12992_v0 }
0x4705   :  { %13000 = vadd.xlane.f32.xlu1 %v12999_v3 }
0x4706   :  { %v12996_v38 = vsel %vm80_vm0, %v12994_v2, 0.0 }
0x4707   :  { %12997 = vadd.xlane.f32.xlu0 %v12996_v38 }
0x478e   :  { %v13001_v53 = vpop.xlane.xlu1 %13000 }
0x478f   :  { %v13003_v54 = vmul.f32 0.03125, %v13001_v53 }
0x4790   :  { %v12998_v10 = vpop.xlane.xlu0 %12997 }
0x4791   :  { %v13005_v12 = vadd.f32 1e-12, %v13003_v54  ;;  %v13002_v29 = vmul.f32 0.03125, %v12998_v10 }
0x4793   :  { %15190 = vrsqrt.f32 %v13005_v12  ;;  %v13004_v11 = vadd.f32 1e-12, %v13002_v29 }
0x4795   :  { %15192 = vrsqrt.f32 %v13004_v11 }
0x47a0   :  { %v15191_v13 = vpop.eup %15190 }
0x47a1   :  { %v13009_v15 = vmul.f32 %v15191_v13, %v12993_v39 }
0x47a2   :  { %v15193_v16 = vpop.eup %15192 }
0x47a3   :  { %v13008_v17 = vmul.f32 %v15193_v16, %v12992_v0  ;;  %v13017_v37 = vmul.f32 %v13471_v14, %v13009_v15 }
0x47a5   :  { %v13016_v21 = vmul.f32 %v13471_v14, %v13008_v17  ;;  %v13025_v5 = vadd.f32 %v13472_v20, %v13017_v37 }
0x47a7   :  { %v13024_v26 = vadd.f32 %v13472_v20, %v13016_v21 }
0x47a9   :  { %14851 = vmatprep.mubr.msk.f32.mxu1 %vm80_vm0, %v13024_v26 }
0x47aa   :  { %14852 = vmatmul.mubr.msk.f32.vlgmr.msra.gmra.mxu1 %vm80_vm0, %v13025_v5 }
0x486a   :  { %v14853_v27 = vpop.f32.mrf.mxu1 }
0x486b   :  { %v13115_v28 = vadd.f32 %v14853_v27, %v13473_v6 }
0x486c   :  { %v13109_v34 = vpop.f32.mrf.mxu1 }
0x486d   :  { %13119 = vst [vmem:[%s17692_s30 + $0x8] sm:$0xff] %v13115_v28  ;;  %v13110_v56 = vadd.f32 %v13473_v6, %v13109_v34 }
0x486f   :  { %13118 = vst [vmem:[%s17692_s30] sm:$0xff] %v13110_v56 }

</bundles_post_ra>
